<compile_context>
chip_gen: v7x
topology: tpu7x:2x2x1
jax: 0.10.0
libtpu: 0.0.40
codegen_flags: <defaults>
</compile_context>

<pallas_src>
import functools

import jax
import jax.numpy as jnp
from jax.experimental import pallas as pl
from jax.experimental.pallas import tpu as pltpu


def _round_up(x, m):
    return ((x + m - 1) // m) * m


def _choose_tiles(p_real):
    """Pixel tile (multiple of 128) and padded pixel count."""
    p128 = _round_up(p_real, 128)
    tp = 512 if p128 >= 512 else p128          # bigger tiles for real maps
    return tp, _round_up(p_real, tp)


# ----------------------------- fused Pallas kernel ---------------------------

def _fused_kernel(*refs, has_proj):
    if has_proj:
        patches_ref, wbT_ref, wpT_ref, bp_ref, feat_out_ref, pool_ref = refs
    else:
        patches_ref, wbT_ref, feat_out_ref, pool_ref = refs

    p = pl.program_id(1)

    # Base conv tile: (C_feat, Kp) @ (Kp, tp) on the MXU, f32 accumulation.
    # The conv bias is folded in (patches carry a ones-row at column K).
    feat = jnp.dot(wbT_ref[...], patches_ref[0],
                   preferred_element_type=jnp.float32)
    feat = jnp.maximum(feat, 0.0)                       # ReLU, (C_feat, tp) f32

    # Global-avg-pool numerator, accumulated in the revisited output block.
    # Padded pixel columns are exactly zero after conv+ReLU, so no mask needed.
    @pl.when(p == 0)
    def _():
        pool_ref[...] = jnp.zeros_like(pool_ref)
    pool_ref[...] += jnp.sum(feat, axis=1, keepdims=True)[None]

    # 1x1 student projection: (C_out, C_feat) @ (C_feat, tp) -> channel-major
    # tile, stored lane-dense with no transpose (already NCHW-major).
    if has_proj:
        tile = jnp.dot(wpT_ref[...], feat.astype(jnp.bfloat16),
                       preferred_element_type=jnp.float32) + bp_ref[...]
    else:
        tile = feat
    feat_out_ref[0] = tile.astype(feat_out_ref.dtype)


def fused_forward(patches, w_baseT, w_projT=None, b_proj=None, *,
                  tp, feat_dtype=jnp.bfloat16):
    """patches: (B, Kp, P_pad) bf16, pixels on lanes (P_pad % 128 == 0).

    Returns (feat_cm (B, C_out, P_pad) feat_dtype, pool_sum (B, C_feat) f32).
    """
    B, Kp, P_pad = patches.shape
    C_feat = w_baseT.shape[0]
    has_proj = w_projT is not None
    C_out = w_projT.shape[0] if has_proj else C_feat
    assert P_pad % tp == 0 and tp % 128 == 0
    n_p = P_pad // tp

    in_specs = [
        pl.BlockSpec((1, Kp, tp), lambda b, p: (b, 0, p)),       # patches tile
        pl.BlockSpec((C_feat, Kp), lambda b, p: (0, 0)),         # base w (+bias col)
    ]
    args = [patches, w_baseT]
    if has_proj:
        in_specs += [
            pl.BlockSpec((C_out, C_feat), lambda b, p: (0, 0)),  # proj w, resident
            pl.BlockSpec((C_out, 1), lambda b, p: (0, 0)),       # proj bias column
        ]
        args += [w_projT, b_proj.reshape(C_out, 1).astype(jnp.float32)]

    out_shape = (
        jax.ShapeDtypeStruct((B, C_out, P_pad), feat_dtype),     # NCHW-major feat
        jax.ShapeDtypeStruct((B, C_feat, 1), jnp.float32),       # pooled col sums
    )
    out_specs = (
        pl.BlockSpec((1, C_out, tp), lambda b, p: (b, 0, p)),
        pl.BlockSpec((1, C_feat, 1), lambda b, p: (b, 0, 0)),    # revisited accum
    )

    feat_cm, pool_sum = pl.pallas_call(
        functools.partial(_fused_kernel, has_proj=has_proj),
        out_shape=out_shape,
        grid_spec=pltpu.PrefetchScalarGridSpec(
            num_scalar_prefetch=0,
            grid=(B, n_p),
            in_specs=in_specs,
            out_specs=out_specs,
        ),
        compiler_params=pltpu.CompilerParams(
            # Batch axis can shard across v7x's 2 TensorCores; the pixel axis
            # is sequential because the pooled accumulator revisits its block.
            # TODO(synk): for v7x with B == 1, emit per-tile pool partials so
            # the pixel axis can be "parallel" as well.
            dimension_semantics=("parallel", "arbitrary"),
            # Explicit limit: v5e's default scoped VMEM is only 16 MiB.
            vmem_limit_bytes=48 * 1024 * 1024,
        ),
    )(*args)
    return feat_cm, pool_sum[:, :, 0]


# -------------------------------- glue (JAX) ---------------------------------

def im2col_3x3_s2_cm(x_nhwc, k_pad, p_pad):
    """3x3 / stride 2 / pad 1 im2col, channel-major output (B, k_pad, p_pad).

    Column layout along K: (kh*3 + kw)*C + cin for the 9 taps, then one
    ones-row (folded conv bias), then zero padding up to k_pad. Pixels beyond
    Ho*Wo are all-zero columns.
    # TODO(synk): for a real backbone, replace this im2col materialization
    # with in-kernel accumulation over the 9 taps (9 small matmuls per tile).
    """
    B, H, W, C = x_nhwc.shape
    Ho, Wo = (H + 1) // 2, (W + 1) // 2        # matches PyTorch k=3, s=2, p=1
    P = Ho * Wo
    xp = jnp.pad(x_nhwc, ((0, 0), (1, 1), (1, 1), (0, 0)))
    cols = [xp[:, kh:kh + 2 * Ho - 1:2, kw:kw + 2 * Wo - 1:2, :]
            for kh in range(3) for kw in range(3)]
    patches = jnp.concatenate(cols, axis=-1).reshape(B, P, 9 * C)
    ones = jnp.ones((B, P, 1), patches.dtype)                  # folded bias row
    patches = jnp.concatenate([patches, ones], axis=-1)        # (B, P, 9C+1)
    patches = jnp.pad(patches, ((0, 0), (0, p_pad - P), (0, k_pad - 9 * C - 1)))
    return jnp.transpose(patches, (0, 2, 1)), Ho, Wo           # (B, k_pad, p_pad)


def init_params(key, cin=4, c_feat=512, c_proj=2048, num_classes=10):
    k1, k2, k3, k4, k5, k6 = jax.random.split(key, 6)

    def scale(fan_in):
        return 1.0 / jnp.sqrt(jnp.float32(fan_in))

    k = 9 * cin
    k_pad = _round_up(k + 1, 16)               # +1 bias column, bf16 sublane pack
    w_base = jax.random.normal(k1, (c_feat, k), jnp.float32) * scale(k)
    b_base = jax.random.normal(k2, (c_feat,), jnp.float32) * 0.01
    w_baseT = jnp.concatenate([w_base, b_base[:, None]], axis=1)
    w_baseT = jnp.pad(w_baseT, ((0, 0), (0, k_pad - (k + 1))))

    return {
        # synthetic backbone conv, channel-major (C_feat, Kp) with bias folded,
        # stored in bf16 once (no per-forward casts).
        "w_baseT": w_baseT.astype(jnp.bfloat16),
        # fc: PyTorch Linear(512, num_classes).weight stored transposed (f32).
        "w_fc": jax.random.normal(k3, (c_feat, num_classes), jnp.float32) * scale(c_feat),
        "b_fc": jax.random.normal(k4, (num_classes,), jnp.float32) * 0.01,
        # proj: PyTorch Conv2d(512, 2048, 1).weight as (C_out, C_feat), bf16.
        "w_projT": (jax.random.normal(k5, (c_proj, c_feat), jnp.float32)
                    * scale(c_feat)).astype(jnp.bfloat16),
        "b_proj": jax.random.normal(k6, (c_proj,), jnp.float32) * 0.01,
    }


def model_with_feat_forward(x_nchw, params, is_student=True,
                            feat_dtype=jnp.bfloat16):
    B, _, H, W = x_nchw.shape
    # NCHW -> NHWC; bf16 activations halve DMA and feed the bf16 MXU.
    x = jnp.transpose(x_nchw, (0, 2, 3, 1)).astype(jnp.bfloat16)

    # ---- base(x): synthetic truncated backbone (3x3 s2 conv + ReLU) ---------
    # TODO(synk): the real `base_model` backbone (children()[:-2]) is external
    # to this module; replaced with one representative conv+ReLU stage -> 512ch.
    Ho, Wo = (H + 1) // 2, (W + 1) // 2
    P_real = Ho * Wo
    tp, p_pad = _choose_tiles(P_real)
    patches, Ho, Wo = im2col_3x3_s2_cm(x, params["w_baseT"].shape[1], p_pad)

    w_projT = params["w_projT"] if is_student else None
    b_proj = params["b_proj"] if is_student else None

    feat_cm, pool_sum = fused_forward(
        patches, params["w_baseT"], w_projT, b_proj,
        tp=tp, feat_dtype=feat_dtype)

    # Tiny 512 -> num_classes fc, hoisted out of the kernel (negligible FLOPs).
    pooled = pool_sum * (1.0 / P_real)                        # global avg pool
    out = pooled @ params["w_fc"] + params["b_fc"]

    c_out = feat_cm.shape[1]
    feat = feat_cm if p_pad == P_real else feat_cm[:, :, :P_real]
    feat_nchw = feat.reshape(B, c_out, Ho, Wo)                # already NCHW-major
    return out, feat_nchw


# ----------------------------- pure-JAX reference ----------------------------

def _reference_forward(x_nchw, params, is_student=True):
    """Independent f32 reference (uses lax conv, not the im2col path)."""
    c_feat = params["w_baseT"].shape[0]
    cin = x_nchw.shape[1]
    k = 9 * cin
    w_baseT = params["w_baseT"].astype(jnp.float32)
    w_conv = w_baseT[:, :k].reshape(c_feat, 3, 3, cin)        # (O, kh, kw, I)
    b_base = w_baseT[:, k]

    x = x_nchw.astype(jnp.bfloat16).astype(jnp.float32)       # match kernel input cast
    feat = jax.lax.conv_general_dilated(
        x, jnp.transpose(w_conv, (0, 3, 1, 2)),               # OIHW
        window_strides=(2, 2), padding=((1, 1), (1, 1)),
        dimension_numbers=("NCHW", "OIHW", "NCHW"))
    feat = jnp.maximum(feat + b_base[None, :, None, None], 0.0)
    pooled = feat.mean(axis=(2, 3))
    out = pooled @ params["w_fc"] + params["b_fc"]
    if is_student:
        w_p = params["w_projT"].astype(jnp.float32)
        feat = (jnp.einsum("oc,bchw->bohw", w_p, feat)
                + params["b_proj"][None, :, None, None])
    return out, feat


# ----------------------------------- main ------------------------------------

if __name__ == "__main__":
    key = jax.random.PRNGKey(0)
    kparam, kx = jax.random.split(key)

    params = init_params(kparam, cin=4, c_feat=512, c_proj=2048, num_classes=10)
    x = jax.random.normal(kx, (2, 4, 16, 16), jnp.float32)    # NCHW like PyTorch

    fwd = jax.jit(model_with_feat_forward,
                  static_argnames=("is_student", "feat_dtype"))
    out, feat = fwd(x, params, is_student=True)
    out, feat = jax.block_until_ready((out, feat))

    assert out.shape == (2, 10), out.shape
    assert feat.shape == (2, 2048, 8, 8), feat.shape
    assert bool(jnp.all(jnp.isfinite(out)))
    assert bool(jnp.all(jnp.isfinite(feat.astype(jnp.float32))))

    out_ref, feat_ref = _reference_forward(x, params, is_student=True)
    assert jnp.allclose(out, out_ref, atol=2e-2, rtol=2e-2), "pool/fc mismatch"
    assert jnp.allclose(feat.astype(jnp.float32), feat_ref,
                        atol=5e-2, rtol=5e-2), "feat mismatch"
    print("KERNEL_OK")
</pallas_src>

<mosaic_0001>
module attributes {stable_mosaic.version = 11 : i64} {
  func.func @_fused_kernel(%arg0: i32, %arg1: i32, %arg2: memref<1x48x128xbf16, #tpu.memory_space<vmem>>, %arg3: memref<512x48xbf16, #tpu.memory_space<vmem>>, %arg4: memref<2048x512xbf16, #tpu.memory_space<vmem>>, %arg5: memref<2048x1xf32, #tpu.memory_space<vmem>>, %arg6: memref<1x2048x128xbf16, #tpu.memory_space<vmem>>, %arg7: memref<1x512x1xf32, #tpu.memory_space<vmem>>) attributes {dimension_semantics = [#tpu.dimension_semantics<parallel>, #tpu.dimension_semantics<arbitrary>], iteration_bounds = array<i64: 2, 1>, scalar_prefetch = 0 : i64, scratch_operands = 0 : i64, tpu.core_type = #tpu.core_type<tc>, window_params = [{transform_indices = @transform_0, window_bounds = array<i64: 1, 48, 128>}, {pipeline_mode = #tpu.pipeline_mode<synchronous>, transform_indices = @transform_1, window_bounds = array<i64: 512, 48>}, {pipeline_mode = #tpu.pipeline_mode<synchronous>, transform_indices = @transform_2, window_bounds = array<i64: 2048, 512>}, {pipeline_mode = #tpu.pipeline_mode<synchronous>, transform_indices = @transform_3, window_bounds = array<i64: 2048, 1>}, {transform_indices = @transform_4, window_bounds = array<i64: 1, 2048, 128>}, {transform_indices = @transform_5, window_bounds = array<i64: 1, 512, 1>}]} {
    %c0 = arith.constant 0 : index
    %c0_0 = arith.constant 0 : index
    %0 = vector.load %arg3[%c0, %c0_0] : memref<512x48xbf16, #tpu.memory_space<vmem>>, vector<512x48xbf16>
    %c0_1 = arith.constant 0 : index
    %c0_2 = arith.constant 0 : index
    %c0_3 = arith.constant 0 : index
    %1 = vector.load %arg2[%c0_1, %c0_2, %c0_3] : memref<1x48x128xbf16, #tpu.memory_space<vmem>>, vector<1x48x128xbf16>
    %2 = vector.shape_cast %1 : vector<1x48x128xbf16> to vector<48x128xbf16>
    %cst = arith.constant dense<0.000000e+00> : vector<512x128xf32>
    %3 = tpu.matmul %0, %2, %cst {dimension_numbers = #tpu.dot_dimension_numbers<[1], [0], [0], [1], [0, 0, 1, 1], [], []>} : vector<512x48xbf16>, vector<48x128xbf16>, vector<512x128xf32> -> vector<512x128xf32>
    %cst_4 = arith.constant 0.000000e+00 : f32
    %4 = vector.broadcast %cst_4 : f32 to vector<512x128xf32>
    %5 = arith.maximumf %3, %4 : vector<512x128xf32>
    %c0_i32 = arith.constant 0 : i32
    %6 = arith.cmpi eq, %arg1, %c0_i32 : i32
    %7 = arith.extui %6 : i1 to i32
    %c0_i32_5 = arith.constant 0 : i32
    %8 = arith.cmpi ne, %7, %c0_i32_5 : i32
    scf.if %8 {
      %cst_21 = arith.constant 0.000000e+00 : f32
      %25 = vector.broadcast %cst_21 : f32 to vector<1x512x1xf32>
      %c0_22 = arith.constant 0 : index
      %c0_23 = arith.constant 0 : index
      %c0_24 = arith.constant 0 : index
      %26 = vector.load %arg7[%c0_22, %c0_23, %c0_24] : memref<1x512x1xf32, #tpu.memory_space<vmem>>, vector<1x512x1xf32>
      tpu.vector_store %arg7[%c0_22, %c0_23, %c0_24], %25 {strides = array<i32>} : memref<1x512x1xf32, #tpu.memory_space<vmem>>, vector<1x512x1xf32>,
    } else {
    }
    %c0_6 = arith.constant 0 : index
    %c0_7 = arith.constant 0 : index
    %c0_8 = arith.constant 0 : index
    %9 = vector.load %arg7[%c0_6, %c0_7, %c0_8] : memref<1x512x1xf32, #tpu.memory_space<vmem>>, vector<1x512x1xf32>
    %cst_9 = arith.constant dense<0.000000e+00> : vector<512xf32>
    %10 = vector.multi_reduction <add>, %5, %cst_9 [1] : vector<512x128xf32> to vector<512xf32>
    %11 = vector.shape_cast %10 : vector<512xf32> to vector<512x1xf32>
    %12 = vector.shape_cast %11 : vector<512x1xf32> to vector<1x512x1xf32>
    %13 = arith.addf %9, %12 : vector<1x512x1xf32>
    %c0_10 = arith.constant 0 : index
    %c0_11 = arith.constant 0 : index
    %c0_12 = arith.constant 0 : index
    %14 = vector.load %arg7[%c0_10, %c0_11, %c0_12] : memref<1x512x1xf32, #tpu.memory_space<vmem>>, vector<1x512x1xf32>
    tpu.vector_store %arg7[%c0_10, %c0_11, %c0_12], %13 {strides = array<i32>} : memref<1x512x1xf32, #tpu.memory_space<vmem>>, vector<1x512x1xf32>,
    %c0_13 = arith.constant 0 : index
    %c0_14 = arith.constant 0 : index
    %15 = vector.load %arg4[%c0_13, %c0_14] : memref<2048x512xbf16, #tpu.memory_space<vmem>>, vector<2048x512xbf16>
    %16 = arith.truncf %5 : vector<512x128xf32> to vector<512x128xbf16>
    %cst_15 = arith.constant dense<0.000000e+00> : vector<2048x128xf32>
    %17 = tpu.matmul %15, %16, %cst_15 {dimension_numbers = #tpu.dot_dimension_numbers<[1], [0], [0], [1], [0, 0, 1, 1], [], []>} : vector<2048x512xbf16>, vector<512x128xbf16>, vector<2048x128xf32> -> vector<2048x128xf32>
    %c0_16 = arith.constant 0 : index
    %c0_17 = arith.constant 0 : index
    %18 = vector.load %arg5[%c0_16, %c0_17] : memref<2048x1xf32, #tpu.memory_space<vmem>>, vector<2048x1xf32>
    %19 = vector.broadcast %18 : vector<2048x1xf32> to vector<2048x128xf32>
    %20 = arith.addf %17, %19 : vector<2048x128xf32>
    %21 = arith.truncf %20 : vector<2048x128xf32> to vector<2048x128xbf16>
    %c0_18 = arith.constant 0 : index
    %c0_19 = arith.constant 0 : index
    %c0_20 = arith.constant 0 : index
    %22 = vector.load %arg6[%c0_18, %c0_19, %c0_20] : memref<1x2048x128xbf16, #tpu.memory_space<vmem>>, vector<1x2048x128xbf16>
    %23 = vector.shape_cast %22 : vector<1x2048x128xbf16> to vector<2048x128xbf16>
    %24 = vector.shape_cast %21 : vector<2048x128xbf16> to vector<1x2048x128xbf16>
    tpu.vector_store %arg6[%c0_18, %c0_19, %c0_20], %24 {strides = array<i32>} : memref<1x2048x128xbf16, #tpu.memory_space<vmem>>, vector<1x2048x128xbf16>,
    return
  }
  func.func @transform_0(%arg0: i32, %arg1: i32) -> (i32, i32, i32) {
    %c0_i32 = arith.constant 0 : i32
    %c0_i32_0 = arith.constant 0 : i32
    return %arg0, %c0_i32, %arg1 : i32, i32, i32
  }
  func.func @transform_1(%arg0: i32, %arg1: i32) -> (i32, i32) {
    %c0_i32 = arith.constant 0 : i32
    %c0_i32_0 = arith.constant 0 : i32
    %c0_i32_1 = arith.constant 0 : i32
    return %c0_i32, %c0_i32_0 : i32, i32
  }
  func.func @transform_2(%arg0: i32, %arg1: i32) -> (i32, i32) {
    %c0_i32 = arith.constant 0 : i32
    %c0_i32_0 = arith.constant 0 : i32
    %c0_i32_1 = arith.constant 0 : i32
    return %c0_i32, %c0_i32_0 : i32, i32
  }
  func.func @transform_3(%arg0: i32, %arg1: i32) -> (i32, i32) {
    %c0_i32 = arith.constant 0 : i32
    %c0_i32_0 = arith.constant 0 : i32
    %c0_i32_1 = arith.constant 0 : i32
    return %c0_i32, %c0_i32_0 : i32, i32
  }
  func.func @transform_4(%arg0: i32, %arg1: i32) -> (i32, i32, i32) {
    %c0_i32 = arith.constant 0 : i32
    %c0_i32_0 = arith.constant 0 : i32
    return %arg0, %c0_i32, %arg1 : i32, i32, i32
  }
  func.func @transform_5(%arg0: i32, %arg1: i32) -> (i32, i32, i32) {
    %c0_i32 = arith.constant 0 : i32
    %c0_i32_0 = arith.constant 0 : i32
    %c0_i32_1 = arith.constant 0 : i32
    return %arg0, %c0_i32, %c0_i32_0 : i32, i32, i32
  }
}

</mosaic_0001>

<bundles_post_ra>
// kernel: model_with_feat_forward.1
= control target key start
LH: loop header
LB: loop body
LE: loop exit
PB: predicated region body
PF: predicated region fallthrough
CT: control target
= control target key end

     0   :  { %s12924_s18 = smov 0   ;;  %s12926_s19 = smov 0   ;;  %s17314_s0 = inlined_call_operand.vmem [shape: bf16[2,48,128], index: 0, kind: input, shape index: {}]   ;;  %s17315_s1 = inlined_call_operand.vmem [shape: bf16[512,48], index: 1, kind: input, shape index: {}]   ;;  %s17316_s2 = inlined_call_operand.vmem [shape: bf16[2048,512], index: 2, kind: input, shape index: {}]   ;;  %s17317_s3 = inlined_call_operand.vmem [shape: f32[2048,1], index: 3, kind: input, shape index: {}]   ;;  %s17318_s4 = inlined_call_operand.vmem [shape: bf16[2,2048,128], index: 4, kind: output, shape index: {0}]   ;;  %s17319_s5 = inlined_call_operand.vmem [shape: f32[2,512,1], index: 5, kind: output, shape index: {1}]  }
   0x1   :  { %s12928_s20 = smov 0  }
   0x2 LB: > { %s28_s21 = sadd.s32 1, %s12886_s19  ;;  %p9512_p0 = scmp.ge.s32.totalorder %s12890_s20, 1  ;;  %s12890_s20 = sphi %s12928_s20, %s16_s20   ;;  %s12886_s19 = sphi %s12926_s19, %s17544_s19   ;;  %s12882_s18 = sphi %s12924_s18, %s17543_s18  }
   0x3   : > { %p30_p1 = scmp.ge.s32.totalorder %s28_s21, 2  ;;  %p209_p2 = scmp.lt.s32.totalorder %s12890_s20, 3 }
   0x5   : > { %s17546_s21 = smov (%p30_p1, %s28_s21), 0  ;;  %p210_p3 = pnand %p9512_p0, %p209_p2 }
   0x7   : > { %213 = sbr.rel (%p210_p3) target bundleno = 1617 (0x651), region = 36 }
   0xe   : > { %v1903_v0 = vld [vmem:[%s17317_s3 + $0x8] sm:$0xff]  ;;  %p248_p4 = scmp.lt.s32.totalorder %s12882_s18, 1  ;;  %v17320_v1 = vmov 0   ;;  %v1902_v2 = vld [vmem:[%s17317_s3] sm:$0xff]  ;;  %vm518_vm0 = vcmask 392192   ;;  %v1904_v4 = vld [vmem:[%s17317_s3 + $0x10] sm:$0xff] }
   0xf   : > { %12067 = vset.pattern.permute.xlu1 %v17320_v1  ;;  %12066 = vset.pattern.permute.xlu0 %v17320_v1  ;;  %v12071_v3 = vld [vmem:[%s17315_s1] sm:$0xff]   ;;  %v1911_v5 = vld [vmem:[%s17317_s3 + $0x48] sm:$0xff]  ;;  %v1905_v6 = vld [vmem:[%s17317_s3 + $0x18] sm:$0xff]  ;;  %vm972_vm1 = vcmask 7168  }
  0x10   : > { %2165 = vperm.xlu1 %12067, %v1903_v0   ;;  %s17548_s18 = smov (!%p248_p4, %s12882_s18), 1  ;;  %2160 = vperm.xlu0 %12066, %v1902_v2   ;;  %v1913_v7 = vld [vmem:[%s17317_s3 + $0x58] sm:$0xff]  ;;  %v1906_v10 = vld [vmem:[%s17317_s3 + $0x20] sm:$0xff]  ;;  %v1915_v12 = vld [vmem:[%s17317_s3 + $0x68] sm:$0xff] }
  0x11   : > { %5998 = vmatprep.subr.bf16.mxu1 %v17320_v1  ;;  %s12039_s7 = smul.u32 24, %s17548_s18  ;;  %11421 = vmatprep.mubr.msk.bf16.mxu0 %vm518_vm0, %v12071_v3  ;;  %v1907_v13 = vld [vmem:[%s17317_s3 + $0x28] sm:$0xff]  ;;  %v1917_v14 = vld [vmem:[%s17317_s3 + $0x78] sm:$0xff]  ;;  %v12073_v16 = vld [vmem:[%s17315_s1 + $0x10] sm:$0xff]   ;;  %s10356_s27 = sshll.u32 %s17548_s18, 9 }
  0x12   : > { %v12072_v15 = vld [vmem:[%s17315_s1 + $0x8] sm:$0xff]   ;;  %v1908_v17 = vld [vmem:[%s17317_s3 + $0x30] sm:$0xff]  ;;  %v1909_v19 = vld [vmem:[%s17317_s3 + $0x38] sm:$0xff]  ;;  %s13527_s30 = scalar_lea.vmem %s17319_s5, %s10356_s27  ;;  %s10355_s29 = sshll.u32 %s17548_s18, 10 }
  0x13   : > { %s255_s12 = scalar_lea.vmem %s17314_s0, %s12039_s7  ;;  %v1919_v18 = vld [vmem:[%s17317_s3 + $0x88] sm:$0xff]  ;;  %v1921_v20 = vld [vmem:[%s17317_s3 + $0x98] sm:$0xff]  ;;  %v12075_v22 = vld [vmem:[%s17315_s1 + $0x20] sm:$0xff]   ;;  %s14945_s22 = scalar_lea.vmem %s17318_s4, %s10355_s29 }
  0x14   : > { %2170 = vperm.xlu1 %12067, %v1904_v4   ;;  %2205 = vperm.xlu0 %12066, %v1911_v5   ;;  %v12068_v8 = vld [vmem:[%s255_s12] sm:$0xff]   ;;  %v12069_v9 = vld [vmem:[%s255_s12 + $0x8] sm:$0xff]   ;;  %v12070_v11 = vld [vmem:[%s255_s12 + $0x10] sm:$0xff]  }
  0x15   : > { %11415 = vmatprep.subr.bf16.mxu0 %v12068_v8  ;;  %v12074_v21 = vld [vmem:[%s17315_s1 + $0x18] sm:$0xff]   ;;  %v1910_v23 = vld [vmem:[%s17317_s3 + $0x40] sm:$0xff]  ;;  %v1923_v24 = vld [vmem:[%s17317_s3 + $0xa8] sm:$0xff] }
  0x16   : > { %11416 = vmatpush3.bf16.msra.mxu0 %v12068_v8  ;;  %v1912_v25 = vld [vmem:[%s17317_s3 + $0x50] sm:$0xff]  ;;  %v1925_v26 = vld [vmem:[%s17317_s3 + $0xb8] sm:$0xff]  ;;  %v12076_v27 = vld [vmem:[%s17315_s1 + $0x28] sm:$0xff]  }
  0x17   : > { %11417 = vmatprep.subr.bf16.mxu0 %v12069_v9  ;;  %v12077_v28 = vld [vmem:[%s17315_s1 + $0x30] sm:$0xff]   ;;  %v1914_v29 = vld [vmem:[%s17317_s3 + $0x60] sm:$0xff]  ;;  %v1927_v30 = vld [vmem:[%s17317_s3 + $0xc8] sm:$0xff] }
  0x18   : > { %2175 = vperm.xlu1 %12067, %v1905_v6   ;;  %2215 = vperm.xlu0 %12066, %v1913_v7   ;;  %v1916_v31 = vld [vmem:[%s17317_s3 + $0x70] sm:$0xff]  ;;  %v1929_v32 = vld [vmem:[%s17317_s3 + $0xd8] sm:$0xff]  ;;  %v12079_v34 = vld [vmem:[%s17315_s1 + $0x40] sm:$0xff]  }
  0x19   : > { %v12078_v33 = vld [vmem:[%s17315_s1 + $0x38] sm:$0xff]   ;;  %v1918_v35 = vld [vmem:[%s17317_s3 + $0x80] sm:$0xff]  ;;  %v1931_v36 = vld [vmem:[%s17317_s3 + $0xe8] sm:$0xff] }
  0x1a   : > { %11418 = vmatpush3.bf16.msra.mxu0 %v12069_v9  ;;  %v1920_v37 = vld [vmem:[%s17317_s3 + $0x90] sm:$0xff]  ;;  %v1933_v38 = vld [vmem:[%s17317_s3 + $0xf8] sm:$0xff]  ;;  %v12080_v39 = vld [vmem:[%s17315_s1 + $0x48] sm:$0xff]  }
  0x1b   : > { %11419 = vmatprep.subr.bf16.mxu0 %v12070_v11  ;;  %v12081_v40 = vld [vmem:[%s17315_s1 + $0x50] sm:$0xff]   ;;  %v1922_v41 = vld [vmem:[%s17317_s3 + $0xa0] sm:$0xff]  ;;  %v1935_v42 = vld [vmem:[%s17317_s3 + $0x108] sm:$0xff] }
  0x1c   : > { %2180 = vperm.xlu1 %12067, %v1906_v10   ;;  %2225 = vperm.xlu0 %12066, %v1915_v12   ;;  %v1924_v43 = vld [vmem:[%s17317_s3 + $0xb0] sm:$0xff]  ;;  %v1937_v44 = vld [vmem:[%s17317_s3 + $0x118] sm:$0xff]  ;;  %v12083_v46 = vld [vmem:[%s17315_s1 + $0x60] sm:$0xff]  }
  0x1d   : > { %v12082_v45 = vld [vmem:[%s17315_s1 + $0x58] sm:$0xff]   ;;  %v1926_v47 = vld [vmem:[%s17317_s3 + $0xc0] sm:$0xff]  ;;  %v1939_v48 = vld [vmem:[%s17317_s3 + $0x128] sm:$0xff] }
  0x1e   : > { %11420 = vmatpush3.bf16.msra.mxu0 %v12070_v11  ;;  %v1928_v49 = vld [vmem:[%s17317_s3 + $0xd0] sm:$0xff]  ;;  %v1941_v50 = vld [vmem:[%s17317_s3 + $0x138] sm:$0xff]  ;;  %v12084_v51 = vld [vmem:[%s17315_s1 + $0x68] sm:$0xff]  }
  0x1f   : > { %7055 = vmatprep.subr.bf16.mxu0 %v17320_v1  ;;  %v1930_v52 = vld [vmem:[%s17317_s3 + $0xe0] sm:$0xff]  ;;  %v12085_v53 = vld [vmem:[%s17315_s1 + $0x70] sm:$0xff]   ;;  %v1943_v54 = vld [vmem:[%s17317_s3 + $0x148] sm:$0xff] }
  0x20   : > { %2185 = vperm.xlu1 %12067, %v1907_v13   ;;  %2235 = vperm.xlu0 %12066, %v1917_v14   ;;  %v1932_v55 = vld [vmem:[%s17317_s3 + $0xf0] sm:$0xff]  ;;  %v12086_v56 = vld [vmem:[%s17315_s1 + $0x78] sm:$0xff]   ;;  %v1934_v58 = vld [vmem:[%s17317_s3 + $0x100] sm:$0xff] }
  0x21   : > { %11422 = vmatmul.mubr.msk.bf16.vlgmr.msra.gmra.mrb[0].mxu0 %vm518_vm0, %v12072_v15  ;;  %v1945_v57 = vld [vmem:[%s17317_s3 + $0x158] sm:$0xff]  ;;  %v12087_v59 = vld [vmem:[%s17315_s1 + $0x80] sm:$0xff]   ;;  %v1947_v60 = vld [vmem:[%s17317_s3 + $0x168] sm:$0xff] }
  0x22   : > { %11425 = vmatprep.mubr.msk.bf16.mxu0 %vm518_vm0, %v12073_v16  ;;  %v1936_v61 = vld [vmem:[%s17317_s3 + $0x110] sm:$0xff]  ;;  %v1949_v62 = vld [vmem:[%s17317_s3 + $0x178] sm:$0xff]  ;;  %v12088_v63 = vld [vmem:[%s17315_s1 + $0x88] sm:$0xff]  }
  0x23   : > { %v12089_v0 = vld [vmem:[%s17315_s1 + $0x90] sm:$0xff]   ;;  %v1938_v2 = vld [vmem:[%s17317_s3 + $0x120] sm:$0xff]  ;;  %v1951_v3 = vld [vmem:[%s17317_s3 + $0x188] sm:$0xff] }
  0x24   : > { %2190 = vperm.xlu1 %12067, %v1908_v17   ;;  %2245 = vperm.xlu0 %12066, %v1919_v18   ;;  %v1940_v4 = vld [vmem:[%s17317_s3 + $0x130] sm:$0xff]  ;;  %v1953_v5 = vld [vmem:[%s17317_s3 + $0x198] sm:$0xff]  ;;  %v12091_v7 = vld [vmem:[%s17315_s1 + $0xa0] sm:$0xff]  }
  0x25   : > { %v12090_v6 = vld [vmem:[%s17315_s1 + $0x98] sm:$0xff]   ;;  %v1942_v8 = vld [vmem:[%s17317_s3 + $0x140] sm:$0xff]  ;;  %v1955_v9 = vld [vmem:[%s17317_s3 + $0x1a8] sm:$0xff] }
  0x26   : > { %v1944_v10 = vld [vmem:[%s17317_s3 + $0x150] sm:$0xff]  ;;  %v1957_v11 = vld [vmem:[%s17317_s3 + $0x1b8] sm:$0xff]  ;;  %v12092_v12 = vld [vmem:[%s17315_s1 + $0xa8] sm:$0xff]  }
  0x27   : > { %v12093_v13 = vld [vmem:[%s17315_s1 + $0xb0] sm:$0xff]   ;;  %v1946_v14 = vld [vmem:[%s17317_s3 + $0x160] sm:$0xff]  ;;  %v1959_v15 = vld [vmem:[%s17317_s3 + $0x1c8] sm:$0xff] }
  0x28   : > { %2195 = vperm.xlu1 %12067, %v1909_v19   ;;  %2255 = vperm.xlu0 %12066, %v1921_v20   ;;  %v1948_v16 = vld [vmem:[%s17317_s3 + $0x170] sm:$0xff]  ;;  %v1961_v17 = vld [vmem:[%s17317_s3 + $0x1d8] sm:$0xff]  ;;  %v12095_v19 = vld [vmem:[%s17315_s1 + $0xc0] sm:$0xff]  }
  0x29   : > { %11426 = vmatmul.mubr.msk.bf16.gmra.mrb[4].mxu0 %vm518_vm0, %v12074_v21  ;;  %v12094_v18 = vld [vmem:[%s17315_s1 + $0xb8] sm:$0xff]   ;;  %v1950_v20 = vld [vmem:[%s17317_s3 + $0x180] sm:$0xff]  ;;  %v1963_v21 = vld [vmem:[%s17317_s3 + $0x1e8] sm:$0xff] }
  0x2a   : > { %11429 = vmatprep.mubr.msk.bf16.mxu0 %vm518_vm0, %v12075_v22  ;;  %v1952_v22 = vld [vmem:[%s17317_s3 + $0x190] sm:$0xff] }
  0x2c   : > { %2200 = vperm.xlu1 %12067, %v1910_v23   ;;  %2265 = vperm.xlu0 %12066, %v1923_v24   ;;  %v1965_v23 = vld [vmem:[%s17317_s3 + $0x1f8] sm:$0xff]  ;;  %v12096_v24 = vld [vmem:[%s17315_s1 + $0xc8] sm:$0xff]  }
  0x30   : > { %2210 = vperm.xlu1 %12067, %v1912_v25   ;;  %2275 = vperm.xlu0 %12066, %v1925_v26   ;;  %v12097_v25 = vld [vmem:[%s17315_s1 + $0xd0] sm:$0xff]   ;;  %v1954_v26 = vld [vmem:[%s17317_s3 + $0x1a0] sm:$0xff] }
  0x31   : > { %11430 = vmatmul.mubr.msk.bf16.gmra.mrb[8].mxu0 %vm518_vm0, %v12076_v27  ;;  %v1967_v27 = vld [vmem:[%s17317_s3 + $0x208] sm:$0xff] }
  0x32   : > { %11433 = vmatprep.mubr.msk.bf16.mxu0 %vm518_vm0, %v12077_v28  ;;  %v1956_v28 = vld [vmem:[%s17317_s3 + $0x1b0] sm:$0xff] }
  0x34   : > { %2220 = vperm.xlu1 %12067, %v1914_v29   ;;  %2285 = vperm.xlu0 %12066, %v1927_v30   ;;  %v1969_v29 = vld [vmem:[%s17317_s3 + $0x218] sm:$0xff] }
  0x35   : > { %v12098_v30 = vld [vmem:[%s17315_s1 + $0xd8] sm:$0xff]  }
  0x38   : > { %2230 = vperm.xlu1 %12067, %v1916_v31   ;;  %2295 = vperm.xlu0 %12066, %v1929_v32   ;;  %v12099_v31 = vld [vmem:[%s17315_s1 + $0xe0] sm:$0xff]  }
  0x39   : > { %11434 = vmatmul.mubr.msk.bf16.gmra.mrb[12].mxu0 %vm518_vm0, %v12078_v33  ;;  %v1958_v32 = vld [vmem:[%s17317_s3 + $0x1c0] sm:$0xff]  ;;  %v1971_v33 = vld [vmem:[%s17317_s3 + $0x228] sm:$0xff] }
  0x3a   : > { %11437 = vmatprep.mubr.msk.bf16.mxu0 %vm518_vm0, %v12079_v34  ;;  %v1960_v34 = vld [vmem:[%s17317_s3 + $0x1d0] sm:$0xff] }
  0x3c   : > { %2240 = vperm.xlu1 %12067, %v1918_v35   ;;  %2305 = vperm.xlu0 %12066, %v1931_v36   ;;  %v1973_v35 = vld [vmem:[%s17317_s3 + $0x238] sm:$0xff]  ;;  %v12100_v36 = vld [vmem:[%s17315_s1 + $0xe8] sm:$0xff]  }
  0x40   : > { %2250 = vperm.xlu1 %12067, %v1920_v37   ;;  %2315 = vperm.xlu0 %12066, %v1933_v38   ;;  %v12101_v37 = vld [vmem:[%s17315_s1 + $0xf0] sm:$0xff]   ;;  %v1962_v38 = vld [vmem:[%s17317_s3 + $0x1e0] sm:$0xff] }
  0x41   : > { %11438 = vmatmul.mubr.msk.bf16.gmra.mrb[16].mxu0 %vm518_vm0, %v12080_v39 }
  0x42   : > { %11441 = vmatprep.mubr.msk.bf16.mxu0 %vm518_vm0, %v12081_v40 }
  0x44   : > { %2260 = vperm.xlu1 %12067, %v1922_v41   ;;  %2325 = vperm.xlu0 %12066, %v1935_v42   ;;  %v1975_v41 = vld [vmem:[%s17317_s3 + $0x248] sm:$0xff]  ;;  %v1964_v42 = vld [vmem:[%s17317_s3 + $0x1f0] sm:$0xff] }
  0x48   : > { %2270 = vperm.xlu1 %12067, %v1924_v43   ;;  %2335 = vperm.xlu0 %12066, %v1937_v44  }
  0x49   : > { %11442 = vmatmul.mubr.msk.bf16.gmra.mrb[20].mxu0 %vm518_vm0, %v12082_v45  ;;  %v1977_v45 = vld [vmem:[%s17317_s3 + $0x258] sm:$0xff] }
  0x4a   : > { %11445 = vmatprep.mubr.msk.bf16.mxu0 %vm518_vm0, %v12083_v46  ;;  %v12102_v46 = vld [vmem:[%s17315_s1 + $0xf8] sm:$0xff]  }
  0x4c   : > { %2280 = vperm.xlu1 %12067, %v1926_v47   ;;  %2345 = vperm.xlu0 %12066, %v1939_v48   ;;  %v1966_v47 = vld [vmem:[%s17317_s3 + $0x200] sm:$0xff] }
  0x50   : > { %2290 = vperm.xlu1 %12067, %v1928_v49   ;;  %2355 = vperm.xlu0 %12066, %v1941_v50   ;;  %v1979_v49 = vld [vmem:[%s17317_s3 + $0x268] sm:$0xff] }
  0x51   : > { %11446 = vmatmul.mubr.msk.bf16.gmra.mrb[24].mxu0 %vm518_vm0, %v12084_v51  ;;  %v1968_v51 = vld [vmem:[%s17317_s3 + $0x210] sm:$0xff] }
  0x52   : > { %11449 = vmatprep.mubr.msk.bf16.mxu0 %vm518_vm0, %v12085_v53  ;;  %v1981_v53 = vld [vmem:[%s17317_s3 + $0x278] sm:$0xff] }
  0x54   : > { %2300 = vperm.xlu1 %12067, %v1930_v52   ;;  %2365 = vperm.xlu0 %12066, %v1943_v54  }
  0x58   : > { %2310 = vperm.xlu1 %12067, %v1932_v55   ;;  %2375 = vperm.xlu0 %12066, %v1945_v57   ;;  %v1970_v55 = vld [vmem:[%s17317_s3 + $0x220] sm:$0xff]  ;;  %v1983_v57 = vld [vmem:[%s17317_s3 + $0x288] sm:$0xff] }
  0x59   : > { %11450 = vmatmul.mubr.msk.bf16.gmra.mrb[28].mxu0 %vm518_vm0, %v12086_v56 }
  0x5a   : > { %11453 = vmatprep.mubr.msk.bf16.mxu0 %vm518_vm0, %v12087_v59  ;;  %v1972_v59 = vld [vmem:[%s17317_s3 + $0x230] sm:$0xff] }
  0x5c   : > { %2320 = vperm.xlu1 %12067, %v1934_v58   ;;  %2385 = vperm.xlu0 %12066, %v1947_v60  }
  0x60   : > { %2330 = vperm.xlu1 %12067, %v1936_v61   ;;  %2395 = vperm.xlu0 %12066, %v1949_v62   ;;  %v1985_v61 = vld [vmem:[%s17317_s3 + $0x298] sm:$0xff] }
  0x61   : > { %11454 = vmatmul.mubr.msk.bf16.gmra.mrb[32].mxu0 %vm518_vm0, %v12088_v63  ;;  %v1974_v63 = vld [vmem:[%s17317_s3 + $0x240] sm:$0xff] }
  0x62   : > { %11457 = vmatprep.mubr.msk.bf16.mxu0 %vm518_vm0, %v12089_v0 }
  0x64   : > { %2340 = vperm.xlu1 %12067, %v1938_v2   ;;  %2405 = vperm.xlu0 %12066, %v1951_v3   ;;  %v1987_v2 = vld [vmem:[%s17317_s3 + $0x2a8] sm:$0xff] }
  0x68   : > { %2350 = vperm.xlu1 %12067, %v1940_v4   ;;  %2415 = vperm.xlu0 %12066, %v1953_v5   ;;  %v1976_v4 = vld [vmem:[%s17317_s3 + $0x250] sm:$0xff] }
  0x69   : > { %11458 = vmatmul.mubr.msk.bf16.gmra.mrb[36].mxu0 %vm518_vm0, %v12090_v6  ;;  %v1989_v6 = vld [vmem:[%s17317_s3 + $0x2b8] sm:$0xff] }
  0x6a   : > { %11461 = vmatprep.mubr.msk.bf16.mxu0 %vm518_vm0, %v12091_v7 }
  0x6c   : > { %2360 = vperm.xlu1 %12067, %v1942_v8   ;;  %2425 = vperm.xlu0 %12066, %v1955_v9   ;;  %v1978_v8 = vld [vmem:[%s17317_s3 + $0x260] sm:$0xff] }
  0x70   : > { %2370 = vperm.xlu1 %12067, %v1944_v10   ;;  %2435 = vperm.xlu0 %12066, %v1957_v11   ;;  %v1991_v10 = vld [vmem:[%s17317_s3 + $0x2c8] sm:$0xff] }
  0x71   : > { %11462 = vmatmul.mubr.msk.bf16.gmra.mrb[40].mxu0 %vm518_vm0, %v12092_v12  ;;  %v1980_v12 = vld [vmem:[%s17317_s3 + $0x270] sm:$0xff] }
  0x72   : > { %11465 = vmatprep.mubr.msk.bf16.mxu0 %vm518_vm0, %v12093_v13 }
  0x74   : > { %2380 = vperm.xlu1 %12067, %v1946_v14   ;;  %2445 = vperm.xlu0 %12066, %v1959_v15   ;;  %v1993_v14 = vld [vmem:[%s17317_s3 + $0x2d8] sm:$0xff] }
  0x78   : > { %2390 = vperm.xlu1 %12067, %v1948_v16   ;;  %2455 = vperm.xlu0 %12066, %v1961_v17   ;;  %v1982_v16 = vld [vmem:[%s17317_s3 + $0x280] sm:$0xff] }
  0x79   : > { %11466 = vmatmul.mubr.msk.bf16.gmra.mrb[44].mxu0 %vm518_vm0, %v12094_v18  ;;  %v1995_v18 = vld [vmem:[%s17317_s3 + $0x2e8] sm:$0xff] }
  0x7a   : > { %11469 = vmatprep.mubr.msk.bf16.mxu0 %vm518_vm0, %v12095_v19 }
  0x7c   : > { %2400 = vperm.xlu1 %12067, %v1950_v20   ;;  %2465 = vperm.xlu0 %12066, %v1963_v21   ;;  %v12105_v20 = vld [vmem:[%s17316_s2 + $0x4] ss:$16 sps:$4 sm:$0xff]  }
  0x7d   : > { %v1984_v21 = vld [vmem:[%s17317_s3 + $0x290] sm:$0xff]  ;;  %6030 = vmatprep.mubr.bf16.mxu1 %v12105_v20 }
  0x80   : > { %2410 = vperm.xlu1 %12067, %v1952_v22   ;;  %2475 = vperm.xlu0 %12066, %v1965_v23   ;;  %v1997_v23 = vld [vmem:[%s17317_s3 + $0x2f8] sm:$0xff] }
  0x81   : > { %11470 = vmatmul.mubr.msk.bf16.gmra.mrb[48].mxu0 %vm518_vm0, %v12096_v24 }
  0x82   : > { %11473 = vmatprep.mubr.msk.bf16.mxu0 %vm518_vm0, %v12097_v25  ;;  %v1986_v25 = vld [vmem:[%s17317_s3 + $0x2a0] sm:$0xff] }
  0x84   : > { %2420 = vperm.xlu1 %12067, %v1954_v26   ;;  %2485 = vperm.xlu0 %12066, %v1967_v27  }
  0x88   : > { %2430 = vperm.xlu1 %12067, %v1956_v28   ;;  %2495 = vperm.xlu0 %12066, %v1969_v29   ;;  %v1999_v28 = vld [vmem:[%s17317_s3 + $0x308] sm:$0xff]  ;;  %v1988_v29 = vld [vmem:[%s17317_s3 + $0x2b0] sm:$0xff] }
  0x89   : > { %11474 = vmatmul.mubr.msk.bf16.gmra.mrb[52].mxu0 %vm518_vm0, %v12098_v30 }
  0x8a   : > { %11477 = vmatprep.mubr.msk.bf16.mxu0 %vm518_vm0, %v12099_v31  ;;  %v2001_v31 = vld [vmem:[%s17317_s3 + $0x318] sm:$0xff] }
  0x8c   : > { %2440 = vperm.xlu1 %12067, %v1958_v32   ;;  %2505 = vperm.xlu0 %12066, %v1971_v33   ;;  %v1990_v33 = vld [vmem:[%s17317_s3 + $0x2c0] sm:$0xff] }
  0x8f   : > { %v13275_v39 = vpop.permute.xlu1 %2165  ;;  %v13277_v40 = vpop.permute.xlu0 %2160 }
  0x90   : > { %2450 = vperm.xlu1 %12067, %v1960_v34   ;;  %2515 = vperm.xlu0 %12066, %v1973_v35  }
  0x91   : > { %11478 = vmatmul.mubr.msk.bf16.gmra.mrb[56].mxu0 %vm518_vm0, %v12100_v36  ;;  %v2003_v36 = vld [vmem:[%s17317_s3 + $0x328] sm:$0xff] }
  0x92   : > { %11481 = vmatprep.mubr.msk.bf16.mxu0 %vm518_vm0, %v12101_v37  ;;  %v1992_v37 = vld [vmem:[%s17317_s3 + $0x2d0] sm:$0xff] }
  0x93   : > { %v13286_v43 = vpop.permute.xlu1 %2170  ;;  %v13288_v44 = vpop.permute.xlu0 %2205 }
  0x94   : > { %2460 = vperm.xlu1 %12067, %v1962_v38   ;;  %2525 = vperm.xlu0 %12066, %v1975_v41  }
  0x97   : > { %v13300_v48 = vpop.permute.xlu1 %2175  ;;  %v13305_v50 = vpop.permute.xlu0 %2215 }
  0x98   : > { %2470 = vperm.xlu1 %12067, %v1964_v42   ;;  %2535 = vperm.xlu0 %12066, %v1977_v45   ;;  %v1994_v42 = vld [vmem:[%s17317_s3 + $0x2e0] sm:$0xff] }
  0x99   : > { %11482 = vmatmul.mubr.msk.bf16.gmra.mrb[60].mxu0 %vm518_vm0, %v12102_v46 }
  0x9b   : > { %v13311_v52 = vpop.permute.xlu1 %2180  ;;  %v13316_v54 = vpop.permute.xlu0 %2225 }
  0x9c   : > { %2480 = vperm.xlu1 %12067, %v1966_v47   ;;  %2545 = vperm.xlu0 %12066, %v1979_v49   ;;  %v1996_v47 = vld [vmem:[%s17317_s3 + $0x2f0] sm:$0xff] }
  0x9f   : > { %v13321_v56 = vpop.permute.xlu1 %2185  ;;  %v13326_v58 = vpop.permute.xlu0 %2235 }
  0xa0   : > { %2490 = vperm.xlu1 %12067, %v1968_v51   ;;  %2555 = vperm.xlu0 %12066, %v1981_v53   ;;  %v1998_v53 = vld [vmem:[%s17317_s3 + $0x300] sm:$0xff] }
  0xa3   : > { %v13331_v60 = vpop.permute.xlu1 %2190  ;;  %v13336_v62 = vpop.permute.xlu0 %2245 }
  0xa4   : > { %2500 = vperm.xlu1 %12067, %v1970_v55   ;;  %2565 = vperm.xlu0 %12066, %v1983_v57  }
  0xa7   : > { %v13341_v0 = vpop.permute.xlu1 %2195  ;;  %v13346_v3 = vpop.permute.xlu0 %2255 }
  0xa8   : > { %2510 = vperm.xlu1 %12067, %v1972_v59   ;;  %2575 = vperm.xlu0 %12066, %v1985_v61   ;;  %v2000_v59 = vld [vmem:[%s17317_s3 + $0x310] sm:$0xff] }
  0xab   : > { %v13351_v5 = vpop.permute.xlu1 %2200  ;;  %v13356_v7 = vpop.permute.xlu0 %2265 }
  0xac   : > { %2520 = vperm.xlu1 %12067, %v1974_v63   ;;  %2585 = vperm.xlu0 %12066, %v1987_v2   ;;  %v2002_v2 = vld [vmem:[%s17317_s3 + $0x320] sm:$0xff] }
  0xaf   : > { %v13361_v9 = vpop.permute.xlu1 %2210  ;;  %v13366_v11 = vpop.permute.xlu0 %2275 }
  0xb0   : > { %2530 = vperm.xlu1 %12067, %v1976_v4   ;;  %2595 = vperm.xlu0 %12066, %v1989_v6  }
  0xb3   : > { %v13371_v13 = vpop.permute.xlu1 %2220  ;;  %v13376_v15 = vpop.permute.xlu0 %2285 }
  0xb4   : > { %2540 = vperm.xlu1 %12067, %v1978_v8   ;;  %2605 = vperm.xlu0 %12066, %v1991_v10   ;;  %v2004_v8 = vld [vmem:[%s17317_s3 + $0x330] sm:$0xff] }
  0xb7   : > { %v13381_v17 = vpop.permute.xlu1 %2230  ;;  %v13386_v19 = vpop.permute.xlu0 %2295 }
  0xb8   : > { %2550 = vperm.xlu1 %12067, %v1980_v12   ;;  %2615 = vperm.xlu0 %12066, %v1993_v14  }
  0xbb   : > { %v13394_v22 = vpop.permute.xlu1 %2240  ;;  %v13399_v24 = vpop.permute.xlu0 %2305 }
  0xbc   : > { %2560 = vperm.xlu1 %12067, %v1982_v16   ;;  %2625 = vperm.xlu0 %12066, %v1995_v18  }
  0xbf   : > { %v13404_v26 = vpop.permute.xlu1 %2250  ;;  %v13406_v27 = vpop.permute.xlu0 %2315 }
  0xc0   : > { %2570 = vperm.xlu1 %12067, %v1984_v21   ;;  %2635 = vperm.xlu0 %12066, %v1997_v23  }
  0xc3   : > { %v13414_v30 = vpop.permute.xlu1 %2260  ;;  %v13419_v32 = vpop.permute.xlu0 %2325 }
  0xc4   : > { %2580 = vperm.xlu1 %12067, %v1986_v25   ;;  %2645 = vperm.xlu0 %12066, %v1999_v28  }
  0xc7   : > { %v13424_v34 = vpop.permute.xlu1 %2270  ;;  %v13426_v35 = vpop.permute.xlu0 %2335 }
  0xc8   : > { %2590 = vperm.xlu1 %12067, %v1988_v29   ;;  %17337 = vst [vmem:[#allocation2_spill] sm:$0xff] %v13426_v35  ;;  %2655 = vperm.xlu0 %12066, %v2001_v31  }
  0xcb   : > { %v13434_v38 = vpop.permute.xlu1 %2280  ;;  %v13436_v41 = vpop.permute.xlu0 %2345 }
  0xcc   : > { %2600 = vperm.xlu1 %12067, %v1990_v33   ;;  %17338 = vst [vmem:[#allocation3_spill] sm:$0xff] %v13436_v41  ;;  %2665 = vperm.xlu0 %12066, %v2003_v36  }
  0xcf   : > { %v13441_v45 = vpop.permute.xlu1 %2290  ;;  %v13443_v46 = vpop.permute.xlu0 %2355 }
  0xd0   : > { %2610 = vperm.xlu1 %12067, %v1992_v37   ;;  %17339 = vst [vmem:[#allocation4_spill] sm:$0xff] %v13443_v46  ;;  %v2097_v46 = vld [vmem:[%s17317_s3 + $0x618] sm:$0xff] }
  0xd3   : > { %v13448_v49 = vpop.permute.xlu1 %2300  ;;  %v13450_v51 = vpop.permute.xlu0 %2365 }
  0xd4   : > { %2620 = vperm.xlu1 %12067, %v1994_v42   ;;  %17340 = vst [vmem:[#allocation5_spill] sm:$0xff] %v13450_v51 }
  0xd7   : > { %v13455_v55 = vpop.permute.xlu1 %2310  ;;  %v13457_v57 = vpop.permute.xlu0 %2375 }
  0xd8   : > { %2630 = vperm.xlu1 %12067, %v1996_v47   ;;  %17341 = vst [vmem:[#allocation6_spill] sm:$0xff] %v13457_v57 }
  0xdb   : > { %v13462_v61 = vpop.permute.xlu1 %2320  ;;  %v13464_v63 = vpop.permute.xlu0 %2385 }
  0xdc   : > { %2640 = vperm.xlu1 %12067, %v1998_v53   ;;  %17342 = vst [vmem:[#allocation7_spill] sm:$0xff] %v13464_v63 }
  0xdf   : > { %v13469_v4 = vpop.permute.xlu1 %2330  ;;  %v13471_v6 = vpop.permute.xlu0 %2395 }
  0xe0   : > { %2650 = vperm.xlu1 %12067, %v2000_v59   ;;  %17343 = vst [vmem:[#allocation8_spill] sm:$0xff] %v13471_v6 }
  0xe3   : > { %v13476_v10 = vpop.permute.xlu1 %2340  ;;  %v13478_v12 = vpop.permute.xlu0 %2405 }
  0xe4   : > { %17344 = vst [vmem:[#allocation9_spill] sm:$0xff] %v13476_v10  ;;  %2660 = vperm.xlu1 %12067, %v2002_v2   ;;  %17345 = vst [vmem:[#allocation10_spill] sm:$0xff] %v13478_v12  ;;  %v2105_v10 = vld [vmem:[%s17317_s3 + $0x658] sm:$0xff] }
  0xe7   : > { %v13480_v14 = vpop.permute.xlu1 %2350  ;;  %v13482_v16 = vpop.permute.xlu0 %2415 }
  0xe8   : > { %17346 = vst [vmem:[#allocation11_spill] sm:$0xff] %v13480_v14  ;;  %2670 = vperm.xlu1 %12067, %v2004_v8   ;;  %17347 = vst [vmem:[#allocation12_spill] sm:$0xff] %v13482_v16  ;;  %v12131_v8 = vld [vmem:[%s17316_s2 + $0xc] ss:$16 sps:$4 sm:$0xff]  }
  0xe9   : > { %7087 = vmatprep.mubr.bf16.mxu0 %v12131_v8 }
  0xeb   : > { %v13484_v18 = vpop.permute.xlu1 %2360  ;;  %v13488_v21 = vpop.permute.xlu0 %2425 }
  0xec   : > { %17348 = vst [vmem:[#allocation13_spill] sm:$0xff] %v13484_v18  ;;  %17350 = vst [vmem:[#allocation15_spill] sm:$0xff] %v13488_v21 }
  0xef   : > { %v13486_v20 = vpop.permute.xlu1 %2370  ;;  %v13494_v28 = vpop.permute.xlu0 %2435 }
  0xf0   : > { %17349 = vst [vmem:[#allocation14_spill] sm:$0xff] %v13486_v20  ;;  %17352 = vst [vmem:[#allocation17_spill] sm:$0xff] %v13494_v28 }
  0xf3   : > { %v13490_v23 = vpop.permute.xlu1 %2380  ;;  %v13513_v1 = vpop.permute.xlu0 %2445 }
  0xf4   : > { %17351 = vst [vmem:[#allocation16_spill] sm:$0xff] %v13490_v23  ;;  %v13492_v25 = vpop.f32.mrb[0].mxu0  ;;  %17355 = vst [vmem:[#allocation20_spill] sm:$0xff] %v13513_v1 }
  0xf5   : > { %v649_v29 = vpop.f32.mrb[1].mxu0  ;;  %v17323_v37 = vmax.f32 %v13492_v25, 0.0 }
  0xf6   : > { %v13498_v33 = vpop.f32.mrb[2].mxu0  ;;  %v904_v36 = vmax.f32 %v649_v29, 0.0 }
  0xf7   : > { %v13496_v31 = vpop.permute.xlu1 %2390  ;;  %v17322_v42 = vmax.f32 %v13498_v33, 0.0  ;;  %v652_v47 = vpop.f32.mrb[3].mxu0 }
  0xf8   : > { %17353 = vst [vmem:[#allocation18_spill] sm:$0xff] %v13496_v31  ;;  %v905_v53 = vmax.f32 %v652_v47, 0.0  ;;  %1101 = vadd.xlane.f32.xlu0 %v904_v36 }
  0xf9   : > { %v13506_v59 = vpack.c.bf16 %v17322_v42, %v17323_v37  ;;  %v17356_v42 = vmov 0  }
  0xfa   : > { %v1870_v29 = vpack.c.bf16 %v905_v53, %v904_v36 }
  0xfb   : > { %v13508_v2 = vpop.permute.xlu1 %2400 }
  0xfc   : > { %17354 = vst [vmem:[#allocation19_spill] sm:$0xff] %v13508_v2  ;;  %1103 = vadd.xlane.f32.xlu0 %v905_v53  ;;  %v13515_v28 = vpop.f32.mrb[4].mxu0  ;;  %5999 = vmatpush1.bf16.msra.mxu1 %v1870_v29  ;;  %v12893_v53 = vmov 0.0  }
  0xfd   : > { %v13519_v21 = vpop.f32.mrb[5].mxu0  ;;  %6000 = vmatprep.subr.bf16.mxu1 %v17356_v42  ;;  %973 = vst.msk [vmem:[%s13527_s30] sm:$0xff] %vm972_vm1, %v12893_v53  ;;  %974 = vst.msk [vmem:[%s13527_s30 + $0x8] sm:$0xff] %vm972_vm1, %v12893_v53  ;;  %v17358_v16 = vmax.f32 %v13515_v28, 0.0 }
  0xfe   : > { %v13529_v36 = vpop.f32.mrb[6].mxu0  ;;  %975 = vst.msk [vmem:[%s13527_s30 + $0x10] sm:$0xff] %vm972_vm1, %v12893_v53  ;;  %976 = vst.msk [vmem:[%s13527_s30 + $0x18] sm:$0xff] %vm972_vm1, %v12893_v53  ;;  %v908_v47 = vmax.f32 %v13519_v21, 0.0 }
  0xff   : > { %v13522_v37 = vpop.permute.xlu1 %2410  ;;  %977 = vst.msk [vmem:[%s13527_s30 + $0x20] sm:$0xff] %vm972_vm1, %v12893_v53  ;;  %978 = vst.msk [vmem:[%s13527_s30 + $0x28] sm:$0xff] %vm972_vm1, %v12893_v53  ;;  %v911_v8 = vmax.f32 %v13529_v36, 0.0  ;;  %v668_v29 = vpop.f32.mrb[7].mxu0  ;;  %v17360_v12 = vmov %v17358_v16 }
 0x100   : > { %17357 = vst [vmem:[#allocation21_spill] sm:$0xff] %v13522_v37  ;;  %979 = vst.msk [vmem:[%s13527_s30 + $0x30] sm:$0xff] %vm972_vm1, %v12893_v53  ;;  %v909_v1 = vmax.f32 %v668_v29, 0.0  ;;  %6001 = vmatpush1.bf16.msra.mxu1 %v13506_v59  ;;  %1113 = vadd.xlane.f32.xlu0 %v17358_v16  ;;  %v13728_v37 = vpop.permute.xlu0 %2455 }
 0x101   : > { %980 = vst.msk [vmem:[%s13527_s30 + $0x38] sm:$0xff] %vm972_vm1, %v12893_v53  ;;  %981 = vst.msk [vmem:[%s13527_s30 + $0x40] sm:$0xff] %vm972_vm1, %v12893_v53  ;;  %6002 = vmatprep.subr.bf16.mxu1 %v17356_v42  ;;  %v1873_v2 = vpack.c.bf16 %v911_v8, %v17360_v12 }
 0x102   : > { %982 = vst.msk [vmem:[%s13527_s30 + $0x48] sm:$0xff] %vm972_vm1, %v12893_v53  ;;  %983 = vst.msk [vmem:[%s13527_s30 + $0x50] sm:$0xff] %vm972_vm1, %v12893_v53 }
 0x103   : > { %984 = vst.msk [vmem:[%s13527_s30 + $0x58] sm:$0xff] %vm972_vm1, %v12893_v53  ;;  %985 = vst.msk [vmem:[%s13527_s30 + $0x60] sm:$0xff] %vm972_vm1, %v12893_v53  ;;  %v13733_v6 = vpop.permute.xlu1 %2420 }
 0x104   : > { %986 = vst.msk [vmem:[%s13527_s30 + $0x68] sm:$0xff] %vm972_vm1, %v12893_v53  ;;  %987 = vst.msk [vmem:[%s13527_s30 + $0x70] sm:$0xff] %vm972_vm1, %v12893_v53  ;;  %1109 = vadd.xlane.f32.xlu0 %v908_v47  ;;  %v11431_v36 = vpop.f32.mrb[8].mxu0  ;;  %v13738_v31 = vpop.permute.xlu0 %2465 }
 0x105   : > { %988 = vst.msk [vmem:[%s13527_s30 + $0x78] sm:$0xff] %vm972_vm1, %v12893_v53  ;;  %989 = vst.msk [vmem:[%s13527_s30 + $0x80] sm:$0xff] %vm972_vm1, %v12893_v53  ;;  %v914_v21 = vmax.f32 %v11431_v36, 0.0  ;;  %v681_v29 = vpop.f32.mrb[9].mxu0 }
 0x106   : > { %990 = vst.msk [vmem:[%s13527_s30 + $0x88] sm:$0xff] %vm972_vm1, %v12893_v53  ;;  %991 = vst.msk [vmem:[%s13527_s30 + $0x90] sm:$0xff] %vm972_vm1, %v12893_v53  ;;  %v11432_v16 = vpop.f32.mrb[10].mxu0  ;;  %v912_v23 = vmax.f32 %v681_v29, 0.0 }
 0x107   : > { %992 = vst.msk [vmem:[%s13527_s30 + $0x98] sm:$0xff] %vm972_vm1, %v12893_v53  ;;  %993 = vst.msk [vmem:[%s13527_s30 + $0xa0] sm:$0xff] %vm972_vm1, %v12893_v53  ;;  %v13736_v59 = vpop.permute.xlu1 %2430  ;;  %v684_v63 = vpop.f32.mrb[11].mxu0 }
 0x108   : > { %994 = vst.msk [vmem:[%s13527_s30 + $0xa8] sm:$0xff] %vm972_vm1, %v12893_v53  ;;  %995 = vst.msk [vmem:[%s13527_s30 + $0xb0] sm:$0xff] %vm972_vm1, %v12893_v53  ;;  %v913_v28 = vmax.f32 %v684_v63, 0.0  ;;  %1121 = vadd.xlane.f32.xlu0 %v914_v21 }
 0x109   : > { %996 = vst.msk [vmem:[%s13527_s30 + $0xb8] sm:$0xff] %vm972_vm1, %v12893_v53  ;;  %997 = vst.msk [vmem:[%s13527_s30 + $0xc0] sm:$0xff] %vm972_vm1, %v12893_v53 }
 0x10a   : > { %998 = vst.msk [vmem:[%s13527_s30 + $0xc8] sm:$0xff] %vm972_vm1, %v12893_v53  ;;  %999 = vst.msk [vmem:[%s13527_s30 + $0xd0] sm:$0xff] %vm972_vm1, %v12893_v53  ;;  %v1874_v36 = vpack.c.bf16 %v913_v28, %v912_v23 }
 0x10b   : > { %1000 = vst.msk [vmem:[%s13527_s30 + $0xd8] sm:$0xff] %vm972_vm1, %v12893_v53  ;;  %1001 = vst.msk [vmem:[%s13527_s30 + $0xe0] sm:$0xff] %vm972_vm1, %v12893_v53 }
 0x10c   : > { %1002 = vst.msk [vmem:[%s13527_s30 + $0xe8] sm:$0xff] %vm972_vm1, %v12893_v53  ;;  %1003 = vst.msk [vmem:[%s13527_s30 + $0xf0] sm:$0xff] %vm972_vm1, %v12893_v53  ;;  %1117 = vadd.xlane.f32.xlu0 %v912_v23 }
 0x10d   : > { %1004 = vst.msk [vmem:[%s13527_s30 + $0xf8] sm:$0xff] %vm972_vm1, %v12893_v53  ;;  %1005 = vst.msk [vmem:[%s13527_s30 + $0x100] sm:$0xff] %vm972_vm1, %v12893_v53 }
 0x10e   : > { %1006 = vst.msk [vmem:[%s13527_s30 + $0x108] sm:$0xff] %vm972_vm1, %v12893_v53  ;;  %1007 = vst.msk [vmem:[%s13527_s30 + $0x110] sm:$0xff] %vm972_vm1, %v12893_v53 }
 0x10f   : > { %1008 = vst.msk [vmem:[%s13527_s30 + $0x118] sm:$0xff] %vm972_vm1, %v12893_v53  ;;  %1009 = vst.msk [vmem:[%s13527_s30 + $0x120] sm:$0xff] %vm972_vm1, %v12893_v53 }
 0x110   : > { %1010 = vst.msk [vmem:[%s13527_s30 + $0x128] sm:$0xff] %vm972_vm1, %v12893_v53  ;;  %1011 = vst.msk [vmem:[%s13527_s30 + $0x130] sm:$0xff] %vm972_vm1, %v12893_v53 }
 0x111   : > { %1012 = vst.msk [vmem:[%s13527_s30 + $0x138] sm:$0xff] %vm972_vm1, %v12893_v53  ;;  %1013 = vst.msk [vmem:[%s13527_s30 + $0x140] sm:$0xff] %vm972_vm1, %v12893_v53 }
 0x112   : > { %1014 = vst.msk [vmem:[%s13527_s30 + $0x148] sm:$0xff] %vm972_vm1, %v12893_v53  ;;  %1015 = vst.msk [vmem:[%s13527_s30 + $0x150] sm:$0xff] %vm972_vm1, %v12893_v53 }
 0x113   : > { %1016 = vst.msk [vmem:[%s13527_s30 + $0x158] sm:$0xff] %vm972_vm1, %v12893_v53  ;;  %1017 = vst.msk [vmem:[%s13527_s30 + $0x160] sm:$0xff] %vm972_vm1, %v12893_v53 }
 0x114   : > { %1018 = vst.msk [vmem:[%s13527_s30 + $0x168] sm:$0xff] %vm972_vm1, %v12893_v53  ;;  %1019 = vst.msk [vmem:[%s13527_s30 + $0x170] sm:$0xff] %vm972_vm1, %v12893_v53 }
 0x115   : > { %1020 = vst.msk [vmem:[%s13527_s30 + $0x178] sm:$0xff] %vm972_vm1, %v12893_v53  ;;  %1021 = vst.msk [vmem:[%s13527_s30 + $0x180] sm:$0xff] %vm972_vm1, %v12893_v53 }
 0x116   : > { %1022 = vst.msk [vmem:[%s13527_s30 + $0x188] sm:$0xff] %vm972_vm1, %v12893_v53  ;;  %1023 = vst.msk [vmem:[%s13527_s30 + $0x190] sm:$0xff] %vm972_vm1, %v12893_v53 }
 0x117   : > { %1024 = vst.msk [vmem:[%s13527_s30 + $0x198] sm:$0xff] %vm972_vm1, %v12893_v53  ;;  %1025 = vst.msk [vmem:[%s13527_s30 + $0x1a0] sm:$0xff] %vm972_vm1, %v12893_v53 }
 0x118   : > { %1026 = vst.msk [vmem:[%s13527_s30 + $0x1a8] sm:$0xff] %vm972_vm1, %v12893_v53  ;;  %1027 = vst.msk [vmem:[%s13527_s30 + $0x1b0] sm:$0xff] %vm972_vm1, %v12893_v53 }
 0x119   : > { %1028 = vst.msk [vmem:[%s13527_s30 + $0x1b8] sm:$0xff] %vm972_vm1, %v12893_v53  ;;  %1029 = vst.msk [vmem:[%s13527_s30 + $0x1c0] sm:$0xff] %vm972_vm1, %v12893_v53 }
 0x11a   : > { %1030 = vst.msk [vmem:[%s13527_s30 + $0x1c8] sm:$0xff] %vm972_vm1, %v12893_v53  ;;  %1031 = vst.msk [vmem:[%s13527_s30 + $0x1d0] sm:$0xff] %vm972_vm1, %v12893_v53 }
 0x11b   : > { %1032 = vst.msk [vmem:[%s13527_s30 + $0x1d8] sm:$0xff] %vm972_vm1, %v12893_v53  ;;  %1033 = vst.msk [vmem:[%s13527_s30 + $0x1e0] sm:$0xff] %vm972_vm1, %v12893_v53 }
 0x11c   : > { %1034 = vst.msk [vmem:[%s13527_s30 + $0x1e8] sm:$0xff] %vm972_vm1, %v12893_v53  ;;  %1035 = vst.msk [vmem:[%s13527_s30 + $0x1f0] sm:$0xff] %vm972_vm1, %v12893_v53 }
 0x11d   : > { %1036 = vst.msk [vmem:[%s13527_s30 + $0x1f8] sm:$0xff] %vm972_vm1, %v12893_v53  ;;  %17359 = vst [vmem:[#allocation22_spill] sm:$0xff] %v13728_v37  ;;  %v1872_v53 = vpack.c.bf16 %v909_v1, %v908_v47  ;;  %v915_v37 = vmax.f32 %v11432_v16, 0.0  ;;  %v13741_v47 = vpop.permute.xlu1 %2440 }
 0x11e   : > { %17361 = vst [vmem:[#allocation23_spill] sm:$0xff] %v13733_v6  ;;  %17362 = vst [vmem:[#allocation24_spill] sm:$0xff] %v13736_v59  ;;  %v11435_v59 = vpop.f32.mrb[12].mxu0  ;;  %v13745_v6 = vpop.permute.xlu0 %2475 }
 0x11f   : > { %6003 = vmatpush1.bf16.msra.mxu1 %v1872_v53  ;;  %17363 = vst [vmem:[#allocation25_spill] sm:$0xff] %v13738_v31  ;;  %v1875_v12 = vpack.c.bf16 %v915_v37, %v914_v21  ;;  %17364 = vst [vmem:[#allocation26_spill] sm:$0xff] %v13741_v47  ;;  %v17365_v53 = vmax.f32 %v13492_v25, 0.0  ;;  %v918_v16 = vmax.f32 %v11435_v59, 0.0  ;;  %v697_v31 = vpop.f32.mrb[13].mxu0 }
 0x120   : > { %6004 = vmatprep.subr.bf16.mxu1 %v17356_v42  ;;  %17366 = vst [vmem:[#allocation27_spill] sm:$0xff] %v13745_v6  ;;  %v11436_v21 = vpop.f32.mrb[14].mxu0  ;;  %v916_v25 = vmax.f32 %v697_v31, 0.0 }
 0x121   : > { %1105 = vadd.xlane.f32.xlu1 %v17365_v53  ;;  %v13748_v63 = vpop.permute.xlu1 %2450  ;;  %v919_v29 = vmax.f32 %v11436_v21, 0.0  ;;  %v700_v47 = vpop.f32.mrb[15].mxu0  ;;  %1129 = vadd.xlane.f32.xlu0 %v918_v16 }
 0x122   : > { %17367 = vst [vmem:[#allocation28_spill] sm:$0xff] %v13748_v63  ;;  %v917_v53 = vmax.f32 %v700_v47, 0.0  ;;  %v11439_v63 = vpop.f32.mrb[16].mxu0 }
 0x123   : > { %6005 = vmatpush1.bf16.msra.mxu1 %v1873_v2  ;;  %v17368_v2 = vmax.f32 %v13498_v33, 0.0  ;;  %v1877_v23 = vpack.c.bf16 %v919_v29, %v918_v16  ;;  %v922_v33 = vmax.f32 %v11439_v63, 0.0 }
 0x124   : > { %6006 = vmatprep.subr.bf16.mxu1 %v17356_v42  ;;  %v1876_v59 = vpack.c.bf16 %v917_v53, %v916_v25 }
 0x125   : > { %1107 = vadd.xlane.f32.xlu1 %v17368_v2  ;;  %v13755_v6 = vpop.permute.xlu1 %2460  ;;  %1125 = vadd.xlane.f32.xlu0 %v916_v25  ;;  %v713_v2 = vpop.f32.mrb[17].mxu0 }
 0x126   : > { %17370 = vst [vmem:[#allocation30_spill] sm:$0xff] %v13755_v6  ;;  %v11440_v31 = vpop.f32.mrb[18].mxu0  ;;  %v920_v21 = vmax.f32 %v713_v2, 0.0 }
 0x127   : > { %6007 = vmatpush1.bf16.msra.mxu1 %v1874_v36  ;;  %v13753_v36 = vpop.permute.xlu0 %2485  ;;  %v716_v47 = vpop.f32.mrb[19].mxu0 }
 0x128   : > { %6008 = vmatprep.subr.bf16.mxu1 %v17356_v42  ;;  %17369 = vst [vmem:[#allocation29_spill] sm:$0xff] %v13753_v36  ;;  %v921_v57 = vmax.f32 %v716_v47, 0.0 }
 0x129   : > { %1115 = vadd.xlane.f32.xlu1 %v911_v8  ;;  %1137 = vadd.xlane.f32.xlu0 %v922_v33  ;;  %v13761_v25 = vpop.permute.xlu1 %2470 }
 0x12a   : > { %17372 = vst [vmem:[#allocation32_spill] sm:$0xff] %v13761_v25  ;;  %v1878_v63 = vpack.c.bf16 %v921_v57, %v920_v21 }
 0x12b   : > { %6009 = vmatpush1.bf16.msra.mxu1 %v1875_v12  ;;  %v923_v12 = vmax.f32 %v11440_v31, 0.0  ;;  %v13758_v8 = vpop.permute.xlu0 %2495 }
 0x12c   : > { %6010 = vmatprep.subr.bf16.mxu1 %v17356_v42  ;;  %17371 = vst [vmem:[#allocation31_spill] sm:$0xff] %v13758_v8 }
 0x12d   : > { %1111 = vadd.xlane.f32.xlu1 %v909_v1  ;;  %v1879_v16 = vpack.c.bf16 %v923_v12, %v922_v33  ;;  %1133 = vadd.xlane.f32.xlu0 %v920_v21  ;;  %v13766_v8 = vpop.permute.xlu1 %2480 }
 0x12e   : > { %17374 = vst [vmem:[#allocation34_spill] sm:$0xff] %v13766_v8 }
 0x12f   : > { %6011 = vmatpush1.bf16.msra.mxu1 %v1876_v59  ;;  %v11443_v59 = vpop.f32.mrb[20].mxu0 }
 0x130   : > { %6012 = vmatprep.subr.bf16.mxu1 %v17356_v42  ;;  %v926_v1 = vmax.f32 %v11443_v59, 0.0  ;;  %v729_v36 = vpop.f32.mrb[21].mxu0 }
 0x131   : > { %1123 = vadd.xlane.f32.xlu1 %v915_v37  ;;  %v11444_v2 = vpop.f32.mrb[22].mxu0  ;;  %v924_v33 = vmax.f32 %v729_v36, 0.0 }
 0x132   : > { %v927_v31 = vmax.f32 %v11444_v2, 0.0  ;;  %v732_v47 = vpop.f32.mrb[23].mxu0  ;;  %1145 = vadd.xlane.f32.xlu0 %v926_v1  ;;  %v13772_v2 = vpop.permute.xlu1 %2490 }
 0x133   : > { %6013 = vmatpush1.bf16.msra.mxu1 %v1877_v23  ;;  %v13764_v23 = vpop.permute.xlu0 %2505  ;;  %v925_v6 = vmax.f32 %v732_v47, 0.0  ;;  %17376 = vst [vmem:[#allocation36_spill] sm:$0xff] %v13772_v2 }
 0x134   : > { %6014 = vmatprep.subr.bf16.mxu1 %v17356_v42  ;;  %17373 = vst [vmem:[#allocation33_spill] sm:$0xff] %v13764_v23  ;;  %v1881_v37 = vpack.c.bf16 %v927_v31, %v926_v1 }
 0x135   : > { %1119 = vadd.xlane.f32.xlu1 %v913_v28  ;;  %v1880_v21 = vpack.c.bf16 %v925_v6, %v924_v33 }
 0x136   : > { %1141 = vadd.xlane.f32.xlu0 %v924_v33 }
 0x137   : > { %6015 = vmatpush1.bf16.msra.mxu1 %v1878_v63  ;;  %v11447_v63 = vpop.f32.mrb[24].mxu0  ;;  %v13769_v28 = vpop.permute.xlu0 %2515 }
 0x138   : > { %6016 = vmatprep.subr.bf16.mxu1 %v17356_v42  ;;  %17375 = vst [vmem:[#allocation35_spill] sm:$0xff] %v13769_v28  ;;  %v930_v59 = vmax.f32 %v11447_v63, 0.0  ;;  %v745_v23 = vpop.f32.mrb[25].mxu0  ;;  %v13780_v63 = vpop.permute.xlu1 %2500 }
 0x139   : > { %1131 = vadd.xlane.f32.xlu1 %v919_v29  ;;  %v11448_v36 = vpop.f32.mrb[26].mxu0  ;;  %v928_v8 = vmax.f32 %v745_v23, 0.0  ;;  %17378 = vst [vmem:[#allocation38_spill] sm:$0xff] %v13780_v63 }
 0x13a   : > { %v13774_v47 = vpop.f32.mrb[27].mxu0  ;;  %1153 = vadd.xlane.f32.xlu0 %v930_v59 }
 0x13b   : > { %6017 = vmatpush1.bf16.msra.mxu1 %v1879_v16  ;;  %v931_v16 = vmax.f32 %v11448_v36, 0.0  ;;  %v929_v29 = vmax.f32 %v13774_v47, 0.0 }
 0x13c   : > { %6018 = vmatprep.subr.bf16.mxu1 %v17356_v42 }
 0x13d   : > { %1127 = vadd.xlane.f32.xlu1 %v917_v53  ;;  %v1883_v1 = vpack.c.bf16 %v931_v16, %v930_v59  ;;  %v1882_v33 = vpack.c.bf16 %v929_v29, %v928_v8  ;;  %v11451_v53 = vpop.f32.mrb[28].mxu0 }
 0x13e   : > { %1149 = vadd.xlane.f32.xlu0 %v928_v8  ;;  %v934_v36 = vmax.f32 %v11451_v53, 0.0  ;;  %v761_v28 = vpop.f32.mrb[29].mxu0 }
 0x13f   : > { %6019 = vmatpush1.bf16.msra.mxu1 %v1880_v21  ;;  %v13778_v21 = vpop.permute.xlu0 %2525  ;;  %v11452_v23 = vpop.f32.mrb[30].mxu0  ;;  %v932_v2 = vmax.f32 %v761_v28, 0.0 }
 0x140   : > { %6020 = vmatprep.subr.bf16.mxu1 %v17356_v42  ;;  %17377 = vst [vmem:[#allocation37_spill] sm:$0xff] %v13778_v21  ;;  %v13783_v47 = vpop.f32.mrb[31].mxu0 }
 0x141   : > { %1139 = vadd.xlane.f32.xlu1 %v923_v12  ;;  %v17324_v12 = vmax.f32 %v13783_v47, 0.0  ;;  %v11455_v53 = vpop.f32.mrb[32].mxu0 }
 0x142   : > { %1161 = vadd.xlane.f32.xlu0 %v934_v36  ;;  %v777_v28 = vpop.f32.mrb[33].mxu0 }
 0x143   : > { %6021 = vmatpush1.bf16.msra.mxu1 %v1881_v37  ;;  %v935_v37 = vmax.f32 %v11452_v23, 0.0  ;;  %v13786_v59 = vpop.permute.xlu0 %2535  ;;  %v938_v23 = vmax.f32 %v11455_v53, 0.0  ;;  %v13794_v21 = vpop.f32.mrb[34].mxu0 }
 0x144   : > { %6022 = vmatprep.subr.bf16.mxu1 %v17356_v42  ;;  %17379 = vst [vmem:[#allocation39_spill] sm:$0xff] %v13786_v59 }
 0x145   : > { %1135 = vadd.xlane.f32.xlu1 %v921_v57  ;;  %v1885_v8 = vpack.c.bf16 %v935_v37, %v934_v36  ;;  %v1884_v57 = vpack.c.bf16 %v17324_v12, %v932_v2  ;;  %v17326_v36 = vmax.f32 %v13794_v21, 0.0 }
 0x146   : > { %1157 = vadd.xlane.f32.xlu0 %v932_v2 }
 0x147   : > { %6023 = vmatpush1.bf16.msra.mxu1 %v1882_v33  ;;  %v13789_v33 = vpop.permute.xlu1 %2510  ;;  %v13796_v59 = vpop.permute.xlu0 %2545 }
 0x148   : > { %6024 = vmatprep.subr.bf16.mxu1 %v17356_v42  ;;  %17380 = vst [vmem:[#allocation40_spill] sm:$0xff] %v13789_v33  ;;  %17381 = vst [vmem:[#allocation41_spill] sm:$0xff] %v13796_v59  ;;  %v13799_v33 = vpop.f32.mrb[35].mxu0 }
 0x149   : > { %1147 = vadd.xlane.f32.xlu1 %v927_v31  ;;  %v12103_v31 = vld [vmem:[%s17316_s2] ss:$16 sps:$4 sm:$0xff]   ;;  %v11459_v12 = vpop.f32.mrb[36].mxu0 }
 0x14a   : > { %1169 = vadd.xlane.f32.xlu0 %v938_v23 }
 0x14b   : > { %6025 = vmatpush1.bf16.msra.mxu1 %v1883_v1  ;;  %v936_v1 = vmax.f32 %v777_v28, 0.0  ;;  %v13804_v2 = vpop.permute.xlu1 %2520  ;;  %v12106_v28 = vld [vmem:[%s17316_s2 + $0x24] ss:$16 sps:$4 sm:$0xff]   ;;  %v13815_v59 = vpop.permute.xlu0 %2555 }
 0x14c   : > { %6026 = vmatprep.subr.bf16.mxu1 %v17356_v42  ;;  %17382 = vst [vmem:[#allocation42_spill] sm:$0xff] %v13804_v2  ;;  %17383 = vst [vmem:[#allocation43_spill] sm:$0xff] %v13815_v59  ;;  %v793_v2 = vpop.f32.mrb[37].mxu0 }
 0x14d   : > { %1143 = vadd.xlane.f32.xlu1 %v925_v6  ;;  %v1887_v6 = vpack.c.bf16 %v17326_v36, %v938_v23  ;;  %v12109_v36 = vld [vmem:[%s17316_s2 + $0x44] ss:$16 sps:$4 sm:$0xff]  }
 0x14e   : > { %1165 = vadd.xlane.f32.xlu0 %v936_v1 }
 0x14f   : > { %6027 = vmatpush1.bf16.msra.mxu1 %v1884_v57  ;;  %v17325_v57 = vmax.f32 %v13799_v33, 0.0  ;;  %v13818_v23 = vpop.permute.xlu1 %2530 }
 0x150   : > { %6028 = vmatprep.subr.bf16.mxu1 %v17356_v42  ;;  %17384 = vst [vmem:[#allocation44_spill] sm:$0xff] %v13818_v23 }
 0x151   : > { %v1886_v53 = vpack.c.bf16 %v17325_v57, %v936_v1  ;;  %1155 = vadd.xlane.f32.xlu1 %v931_v16  ;;  %v940_v57 = vmax.f32 %v793_v2, 0.0  ;;  %v13820_v16 = vpop.f32.mrb[38].mxu0 }
 0x152   : > { %v13824_v1 = vpop.f32.mrb[39].mxu0 }
 0x153   : > { %6029 = vmatpush1.bf16.msra.mxu1 %v1885_v8  ;;  %7056 = vmatpush1.bf16.msra.mxu0 %v1886_v53  ;;  %v942_v8 = vmax.f32 %v11459_v12, 0.0  ;;  %v12108_v12 = vld [vmem:[%s17316_s2 + $0x20] ss:$16 sps:$4 sm:$0xff]   ;;  %v13841_v59 = vpop.permute.xlu1 %2540  ;;  %v11463_v23 = vpop.f32.mrb[40].mxu0 }
 0x154   : > { %11485 = vmatprep.subr.bf16.mxu1 %v17356_v42  ;;  %7057 = vmatprep.subr.bf16.mxu0 %v17356_v42  ;;  %17386 = vst [vmem:[#allocation46_spill] sm:$0xff] %v13841_v59  ;;  %v17390_v59 = vmax.f32 %v13794_v21, 0.0 }
 0x155   : > { %1151 = vadd.xlane.f32.xlu1 %v929_v29  ;;  %1177 = vadd.xlane.f32.xlu0 %v942_v8 }
 0x156   : > { %6031 = vmatmul.mubr.bf16.vlgmr.msra.gmra.mrb[0].mxu1 %v12103_v31  ;;  %v17328_v31 = vmax.f32 %v13820_v16, 0.0 }
 0x157   : > { %11501 = vmatpush1.bf16.msra.mxu1 %v1886_v53  ;;  %6038 = vmatprep.mubr.bf16.mxu1 %v12106_v28  ;;  %v17327_v53 = vmax.f32 %v13824_v1, 0.0  ;;  %v13836_v28 = vpop.permute.xlu0 %2565 }
 0x158   : > { %11486 = vmatprep.subr.bf16.mxu1 %v17356_v42  ;;  %7058 = vmatpush1.bf16.msra.mxu0 %v1887_v6  ;;  %v1889_v29 = vpack.c.bf16 %v17328_v31, %v942_v8  ;;  %17385 = vst [vmem:[#allocation45_spill] sm:$0xff] %v13836_v28  ;;  %v809_v8 = vpop.f32.mrb[41].mxu0 }
 0x159   : > { %7059 = vmatprep.subr.bf16.mxu0 %v17356_v42  ;;  %v1888_v2 = vpack.c.bf16 %v17327_v53, %v940_v57  ;;  %1163 = vadd.xlane.f32.xlu1 %v935_v37  ;;  %v17387_v37 = vmax.f32 %v13783_v47, 0.0  ;;  %v944_v53 = vmax.f32 %v809_v8, 0.0  ;;  %v13846_v31 = vpop.f32.mrb[42].mxu0  ;;  %v12112_v47 = vld [vmem:[%s17316_s2 + $0x64] ss:$16 sps:$4 sm:$0xff]  }
 0x15a   : > { %1173 = vadd.xlane.f32.xlu0 %v940_v57  ;;  %v13850_v28 = vpop.f32.mrb[43].mxu0  ;;  %v12111_v57 = vld [vmem:[%s17316_s2 + $0x40] ss:$16 sps:$4 sm:$0xff]  }
 0x15b   : > { %11502 = vmatpush1.bf16.msra.mxu1 %v1887_v6  ;;  %v946_v6 = vmax.f32 %v11463_v23, 0.0  ;;  %v17330_v23 = vmax.f32 %v13850_v28, 0.0  ;;  %v11467_v63 = vpop.f32.mrb[44].mxu0 }
 0x15c   : > { %11487 = vmatprep.subr.bf16.mxu1 %v17356_v42  ;;  %7060 = vmatpush1.bf16.msra.mxu0 %v1888_v2  ;;  %v825_v25 = vpop.f32.mrb[45].mxu0 }
 0x15d   : > { %7061 = vmatprep.subr.bf16.mxu0 %v17356_v42  ;;  %1159 = vadd.xlane.f32.xlu1 %v17387_v37  ;;  %v1890_v37 = vpack.c.bf16 %v17330_v23, %v944_v53 }
 0x15e   : > { %6039 = vmatmul.mubr.bf16.gmra.mrb[4].mxu1 %v12108_v12  ;;  %v17329_v12 = vmax.f32 %v13846_v31, 0.0  ;;  %1185 = vadd.xlane.f32.xlu0 %v946_v6 }
 0x15f   : > { %11503 = vmatpush1.bf16.msra.mxu1 %v1888_v2  ;;  %6046 = vmatprep.mubr.bf16.mxu1 %v12109_v36  ;;  %v13859_v2 = vpop.permute.xlu0 %2575  ;;  %v13864_v36 = vpop.permute.xlu1 %2550 }
 0x160   : > { %11488 = vmatprep.subr.bf16.mxu1 %v17356_v42  ;;  %7062 = vmatpush1.bf16.msra.mxu0 %v1889_v29  ;;  %17388 = vst [vmem:[#allocation47_spill] sm:$0xff] %v13859_v2  ;;  %v1891_v8 = vpack.c.bf16 %v17329_v12, %v946_v6  ;;  %17389 = vst [vmem:[#allocation48_spill] sm:$0xff] %v13864_v36  ;;  %v950_v2 = vmax.f32 %v11467_v63, 0.0  ;;  %v948_v6 = vmax.f32 %v825_v25, 0.0  ;;  %v13874_v12 = vpop.f32.mrb[46].mxu0 }
 0x161   : > { %7063 = vmatprep.subr.bf16.mxu0 %v17356_v42  ;;  %1171 = vadd.xlane.f32.xlu1 %v17390_v59  ;;  %v17331_v59 = vmax.f32 %v13874_v12, 0.0  ;;  %v12114_v63 = vld [vmem:[%s17316_s2 + $0x60] ss:$16 sps:$4 sm:$0xff]   ;;  %v12115_v25 = vld [vmem:[%s17316_s2 + $0x84] ss:$16 sps:$4 sm:$0xff]  }
 0x162   : > { %1181 = vadd.xlane.f32.xlu0 %v944_v53 }
 0x163   : > { %11504 = vmatpush1.bf16.msra.mxu1 %v1889_v29  ;;  %v17391_v29 = vmax.f32 %v13799_v33, 0.0  ;;  %v13876_v21 = vpop.permute.xlu0 %2585  ;;  %v1893_v53 = vpack.c.bf16 %v17331_v59, %v950_v2 }
 0x164   : > { %11489 = vmatprep.subr.bf16.mxu1 %v17356_v42  ;;  %7064 = vmatpush1.bf16.msra.mxu0 %v1890_v37  ;;  %17392 = vst [vmem:[#allocation49_spill] sm:$0xff] %v13876_v21 }
 0x165   : > { %7065 = vmatprep.subr.bf16.mxu0 %v17356_v42  ;;  %1167 = vadd.xlane.f32.xlu1 %v17391_v29  ;;  %v17394_v29 = vmax.f32 %v13820_v16, 0.0 }
 0x166   : > { %6047 = vmatmul.mubr.bf16.gmra.mrb[8].mxu1 %v12111_v57  ;;  %v13879_v57 = vpop.f32.mrb[47].mxu0  ;;  %1193 = vadd.xlane.f32.xlu0 %v950_v2 }
 0x167   : > { %6054 = vmatprep.mubr.bf16.mxu1 %v12112_v47  ;;  %11505 = vmatpush1.bf16.msra.mxu1 %v1890_v37  ;;  %v13885_v47 = vpop.permute.xlu1 %2560  ;;  %v17332_v33 = vmax.f32 %v13879_v57, 0.0  ;;  %v11471_v23 = vpop.f32.mrb[48].mxu0 }
 0x168   : > { %11490 = vmatprep.subr.bf16.mxu1 %v17356_v42  ;;  %17393 = vst [vmem:[#allocation50_spill] sm:$0xff] %v13885_v47  ;;  %7066 = vmatpush1.bf16.msra.mxu0 %v1891_v8  ;;  %v13899_v21 = vpop.permute.xlu0 %2595  ;;  %v954_v47 = vmax.f32 %v11471_v23, 0.0  ;;  %v841_v59 = vpop.f32.mrb[49].mxu0  ;;  %v12117_v23 = vld [vmem:[%s17316_s2 + $0x80] ss:$16 sps:$4 sm:$0xff]  }
 0x169   : > { %7067 = vmatprep.subr.bf16.mxu0 %v17356_v42  ;;  %v1892_v37 = vpack.c.bf16 %v17332_v33, %v948_v6  ;;  %1179 = vadd.xlane.f32.xlu1 %v17394_v29  ;;  %17395 = vst [vmem:[#allocation51_spill] sm:$0xff] %v13899_v21  ;;  %v17397_v33 = vmax.f32 %v13824_v1, 0.0  ;;  %v952_v16 = vmax.f32 %v841_v59, 0.0  ;;  %v13906_v2 = vpop.f32.mrb[50].mxu0  ;;  %v12118_v1 = vld [vmem:[%s17316_s2 + $0xa4] ss:$16 sps:$4 sm:$0xff]  }
 0x16a   : > { %1189 = vadd.xlane.f32.xlu0 %v948_v6  ;;  %v13909_v29 = vpop.f32.mrb[51].mxu0 }
 0x16b   : > { %11506 = vmatpush1.bf16.msra.mxu1 %v1891_v8  ;;  %v13902_v8 = vpop.permute.xlu1 %2570 }
 0x16c   : > { %11491 = vmatprep.subr.bf16.mxu1 %v17356_v42  ;;  %7068 = vmatpush1.bf16.msra.mxu0 %v1892_v37  ;;  %17396 = vst [vmem:[#allocation52_spill] sm:$0xff] %v13902_v8  ;;  %v11475_v8 = vpop.f32.mrb[52].mxu0 }
 0x16d   : > { %7069 = vmatprep.subr.bf16.mxu0 %v17356_v42  ;;  %1175 = vadd.xlane.f32.xlu1 %v17397_v33  ;;  %v17398_v33 = vmax.f32 %v13846_v31, 0.0  ;;  %v857_v36 = vpop.f32.mrb[53].mxu0 }
 0x16e   : > { %6055 = vmatmul.mubr.bf16.gmra.mrb[12].mxu1 %v12114_v63  ;;  %v17333_v63 = vmax.f32 %v13906_v2, 0.0  ;;  %1201 = vadd.xlane.f32.xlu0 %v954_v47  ;;  %v956_v31 = vmax.f32 %v857_v36, 0.0 }
 0x16f   : > { %6062 = vmatprep.mubr.bf16.mxu1 %v12115_v25  ;;  %11507 = vmatpush1.bf16.msra.mxu1 %v1892_v37  ;;  %v17334_v25 = vmax.f32 %v13909_v29, 0.0  ;;  %v13926_v37 = vpop.permute.xlu0 %2605  ;;  %v13928_v21 = vpop.permute.xlu1 %2580 }
 0x170   : > { %11492 = vmatprep.subr.bf16.mxu1 %v17356_v42  ;;  %7070 = vmatpush1.bf16.msra.mxu0 %v1893_v53  ;;  %v1895_v6 = vpack.c.bf16 %v17333_v63, %v954_v47  ;;  %17399 = vst [vmem:[#allocation53_spill] sm:$0xff] %v13926_v37  ;;  %17400 = vst [vmem:[#allocation54_spill] sm:$0xff] %v13928_v21  ;;  %v958_v63 = vmax.f32 %v11475_v8, 0.0 }
 0x171   : > { %7071 = vmatprep.subr.bf16.mxu0 %v17356_v42  ;;  %v1894_v59 = vpack.c.bf16 %v17334_v25, %v952_v16  ;;  %1187 = vadd.xlane.f32.xlu1 %v17398_v33  ;;  %v13934_v33 = vpop.f32.mrb[54].mxu0  ;;  %v17404_v25 = vmax.f32 %v13874_v12, 0.0 }
 0x172   : > { %1197 = vadd.xlane.f32.xlu0 %v952_v16  ;;  %v17335_v47 = vmax.f32 %v13934_v33, 0.0 }
 0x173   : > { %11508 = vmatpush1.bf16.msra.mxu1 %v1893_v53  ;;  %v17401_v53 = vmax.f32 %v13850_v28, 0.0  ;;  %v12121_v28 = vld [vmem:[%s17316_s2 + $0xc4] ss:$16 sps:$4 sm:$0xff]   ;;  %v13947_v36 = vpop.permute.xlu0 %2615 }
 0x174   : > { %11493 = vmatprep.subr.bf16.mxu1 %v17356_v42  ;;  %7072 = vmatpush1.bf16.msra.mxu0 %v1894_v59  ;;  %17402 = vst [vmem:[#allocation55_spill] sm:$0xff] %v13947_v36  ;;  %v1897_v16 = vpack.c.bf16 %v17335_v47, %v958_v63 }
 0x175   : > { %7073 = vmatprep.subr.bf16.mxu0 %v17356_v42  ;;  %1183 = vadd.xlane.f32.xlu1 %v17401_v53 }
 0x176   : > { %6063 = vmatmul.mubr.bf16.gmra.mrb[16].mxu1 %v12117_v23  ;;  %v13937_v23 = vpop.f32.mrb[55].mxu0  ;;  %1209 = vadd.xlane.f32.xlu0 %v958_v63 }
 0x177   : > { %6070 = vmatprep.mubr.bf16.mxu1 %v12118_v1  ;;  %11509 = vmatpush1.bf16.msra.mxu1 %v1894_v59  ;;  %v12120_v1 = vld [vmem:[%s17316_s2 + $0xa0] ss:$16 sps:$4 sm:$0xff]   ;;  %v17336_v8 = vmax.f32 %v13937_v23, 0.0  ;;  %v13952_v59 = vpop.permute.xlu1 %2590  ;;  %v11479_v37 = vpop.f32.mrb[56].mxu0 }
 0x178   : > { %11494 = vmatprep.subr.bf16.mxu1 %v17356_v42  ;;  %7074 = vmatpush1.bf16.msra.mxu0 %v1895_v6  ;;  %17403 = vst [vmem:[#allocation56_spill] sm:$0xff] %v13952_v59  ;;  %v962_v36 = vmax.f32 %v11479_v37, 0.0  ;;  %v873_v47 = vpop.f32.mrb[57].mxu0  ;;  %v13964_v12 = vpop.permute.xlu0 %2625  ;;  %v12123_v37 = vld [vmem:[%s17316_s2 + $0xc0] ss:$16 sps:$4 sm:$0xff]  }
 0x179   : > { %7075 = vmatprep.subr.bf16.mxu0 %v17356_v42  ;;  %v1896_v53 = vpack.c.bf16 %v17336_v8, %v956_v31  ;;  %1195 = vadd.xlane.f32.xlu1 %v17404_v25  ;;  %v960_v59 = vmax.f32 %v873_v47, 0.0  ;;  %v17405_v8 = vmax.f32 %v13879_v57, 0.0  ;;  %17406 = vst [vmem:[#allocation57_spill] sm:$0xff] %v13964_v12  ;;  %v12124_v57 = vld [vmem:[%s17316_s2 + $0xe4] ss:$16 sps:$4 sm:$0xff]  }
 0x17a   : > { %1205 = vadd.xlane.f32.xlu0 %v956_v31 }
 0x17b   : > { %11510 = vmatpush1.bf16.msra.mxu1 %v1895_v6  ;;  %v13960_v6 = vpop.f32.mrb[58].mxu0 }
 0x17c   : > { %11495 = vmatprep.subr.bf16.mxu1 %v17356_v42  ;;  %7076 = vmatpush1.bf16.msra.mxu0 %v1896_v53  ;;  %v963_v63 = vmax.f32 %v13960_v6, 0.0  ;;  %v13967_v25 = vpop.f32.mrb[59].mxu0  ;;  %v13983_v6 = vpop.permute.xlu0 %2635 }
 0x17d   : > { %7077 = vmatprep.subr.bf16.mxu0 %v17356_v42  ;;  %1191 = vadd.xlane.f32.xlu1 %v17405_v8  ;;  %v961_v47 = vmax.f32 %v13967_v25, 0.0  ;;  %17409 = vst [vmem:[#allocation59_spill] sm:$0xff] %v13983_v6 }
 0x17e   : > { %6071 = vmatmul.mubr.bf16.gmra.mrb[20].mxu1 %v12120_v1  ;;  %v13972_v1 = vpop.permute.xlu1 %2600  ;;  %v1899_v31 = vpack.c.bf16 %v963_v63, %v962_v36  ;;  %1217 = vadd.xlane.f32.xlu0 %v962_v36 }
 0x17f   : > { %6078 = vmatprep.mubr.bf16.mxu1 %v12121_v28  ;;  %11511 = vmatpush1.bf16.msra.mxu1 %v1896_v53  ;;  %17407 = vst [vmem:[#allocation58_spill] sm:$0xff] %v13972_v1  ;;  %v1898_v8 = vpack.c.bf16 %v961_v47, %v960_v59  ;;  %v17408_v28 = vmax.f32 %v13906_v2, 0.0  ;;  %v11483_v53 = vpop.f32.mrb[60].mxu0  ;;  %v17411_v2 = vmax.f32 %v13909_v29, 0.0 }
 0x180   : > { %11496 = vmatprep.subr.bf16.mxu1 %v17356_v42  ;;  %7078 = vmatpush1.bf16.msra.mxu0 %v1897_v16  ;;  %v966_v25 = vmax.f32 %v11483_v53, 0.0  ;;  %v889_v12 = vpop.f32.mrb[61].mxu0 }
 0x181   : > { %7079 = vmatprep.subr.bf16.mxu0 %v17356_v42  ;;  %1203 = vadd.xlane.f32.xlu1 %v17408_v28  ;;  %v11484_v21 = vpop.f32.mrb[62].mxu0 }
 0x182   : > { %v13986_v1 = vpop.permute.xlu1 %2610  ;;  %1213 = vadd.xlane.f32.xlu0 %v960_v59  ;;  %v967_v36 = vmax.f32 %v11484_v21, 0.0  ;;  %v17412_v21 = vmax.f32 %v13934_v33, 0.0  ;;  %v14000_v59 = vpop.permute.xlu0 %2645  ;;  %v12129_v33 = vld [vmem:[%s17316_s2 + $0x8] ss:$16 sps:$4 sm:$0xff]  }
 0x183   : > { %11512 = vmatpush1.bf16.msra.mxu1 %v1897_v16  ;;  %17410 = vst [vmem:[#allocation60_spill] sm:$0xff] %v13986_v1  ;;  %v964_v16 = vmax.f32 %v889_v12, 0.0  ;;  %17413 = vst [vmem:[#allocation61_spill] sm:$0xff] %v14000_v59 }
 0x184   : > { %11497 = vmatprep.subr.bf16.mxu1 %v17356_v42  ;;  %7080 = vmatpush1.bf16.msra.mxu0 %v1898_v8  ;;  %v1901_v12 = vpack.c.bf16 %v967_v36, %v966_v25 }
 0x185   : > { %7081 = vmatprep.subr.bf16.mxu0 %v17356_v42  ;;  %1199 = vadd.xlane.f32.xlu1 %v17411_v2  ;;  %v17415_v2 = vmax.f32 %v13937_v23, 0.0  ;;  %v12135_v23 = vld [vmem:[%s17316_s2 + $0x2c] ss:$16 sps:$4 sm:$0xff]  }
 0x186   : > { %6079 = vmatmul.mubr.bf16.gmra.mrb[24].mxu1 %v12123_v37  ;;  %v892_v37 = vpop.f32.mrb[63].mxu0  ;;  %1225 = vadd.xlane.f32.xlu0 %v966_v25  ;;  %v14002_v53 = vpop.permute.xlu1 %2620  ;;  %v12133_v25 = vld [vmem:[%s17316_s2 + $0x124] ss:$16 sps:$4 sm:$0xff]  }
 0x187   : > { %6086 = vmatprep.mubr.bf16.mxu1 %v12124_v57  ;;  %11513 = vmatpush1.bf16.msra.mxu1 %v1898_v8  ;;  %v12126_v57 = vld [vmem:[%s17316_s2 + $0xe0] ss:$16 sps:$4 sm:$0xff]   ;;  %v965_v28 = vmax.f32 %v892_v37, 0.0  ;;  %v12127_v8 = vld [vmem:[%s17316_s2 + $0x104] ss:$16 sps:$4 sm:$0xff]   ;;  %17414 = vst [vmem:[#allocation62_spill] sm:$0xff] %v14002_v53 }
 0x188   : > { %11498 = vmatprep.subr.bf16.mxu1 %v17356_v42  ;;  %7082 = vmatpush1.bf16.msra.mxu0 %v1899_v31  ;;  %v2084_v53 = vld [vmem:[%s17317_s3 + $0x5b0] sm:$0xff] }
 0x189   : > { %7083 = vmatprep.subr.bf16.mxu0 %v17356_v42  ;;  %v1900_v29 = vpack.c.bf16 %v965_v28, %v964_v16  ;;  %1211 = vadd.xlane.f32.xlu1 %v17412_v21 }
 0x18a   : > { %1221 = vadd.xlane.f32.xlu0 %v964_v16  ;;  %v14021_v16 = vpop.permute.xlu0 %2655  ;;  %v14023_v37 = vpop.permute.xlu1 %2630 }
 0x18b   : > { %11514 = vmatpush1.bf16.msra.mxu1 %v1899_v31  ;;  %v12132_v31 = vld [vmem:[%s17316_s2 + $0x100] ss:$16 sps:$4 sm:$0xff]   ;;  %17416 = vst [vmem:[#allocation63_spill] sm:$0xff] %v14021_v16  ;;  %17417 = vst [vmem:[#allocation64_spill] sm:$0xff] %v14023_v37 }
 0x18c   : > { %11499 = vmatprep.subr.bf16.mxu1 %v17356_v42  ;;  %7084 = vmatpush1.bf16.msra.mxu0 %v1900_v29  ;;  %v1051_v16 = vld [vmem:[%s13527_s30 + $0x70] sm:$0xff] }
 0x18d   : > { %7085 = vmatprep.subr.bf16.mxu0 %v17356_v42  ;;  %1207 = vadd.xlane.f32.xlu1 %v17415_v2 }
 0x18e   : > { %6087 = vmatmul.mubr.bf16.gmra.mrb[28].mxu1 %v12126_v57  ;;  %v12137_v57 = vld [vmem:[%s17316_s2 + $0x120] ss:$16 sps:$4 sm:$0xff]  }
 0x18f   : > { %6094 = vmatprep.mubr.bf16.mxu1 %v12127_v8  ;;  %11515 = vmatpush1.bf16.msra.mxu1 %v1900_v29  ;;  %v12138_v8 = vld [vmem:[%s17316_s2 + $0x28] ss:$16 sps:$4 sm:$0xff]   ;;  %v14033_v29 = vpop.permute.xlu1 %2640 }
 0x190   : > { %11500 = vmatprep.subr.bf16.mxu1 %v17356_v42  ;;  %7086 = vmatpush1.bf16.msra.mxu0 %v1901_v12  ;;  %v14025_v42 = vpop.permute.xlu0 %2665  ;;  %17419 = vst [vmem:[#allocation66_spill] sm:$0xff] %v14033_v29  ;;  %v2081_v29 = vld [vmem:[%s17317_s3 + $0x598] sm:$0xff] }
 0x191   : > { %1219 = vadd.xlane.f32.xlu1 %v963_v63  ;;  %17418 = vst [vmem:[#allocation65_spill] sm:$0xff] %v14025_v42  ;;  %v12139_v63 = vld [vmem:[%s17316_s2 + $0x144] ss:$16 sps:$4 sm:$0xff]  }
 0x192   : > { %v2006_v42 = vld [vmem:[%s17317_s3 + $0x340] sm:$0xff] }
 0x193   : > { %11516 = vmatpush1.bf16.msra.mxu1 %v1901_v12  ;;  %7088 = vmatmul.mubr.bf16.vlgmr.msra.gmra.mrb[64].mxu0 %v12129_v33  ;;  %v1037_v12 = vld [vmem:[%s13527_s30] sm:$0xff]  ;;  %v14042_v2 = vpop.permute.xlu1 %2650 }
 0x194   : > { %7095 = vmatprep.mubr.bf16.mxu0 %v12135_v23  ;;  %v1102_v21 = vpop.xlane.xlu0 %1101  ;;  %17420 = vst [vmem:[#allocation67_spill] sm:$0xff] %v14042_v2  ;;  %v12145_v23 = vld [vmem:[%s17316_s2 + $0x164] ss:$16 sps:$4 sm:$0xff]  }
 0x195   : > { %1215 = vadd.xlane.f32.xlu1 %v961_v47  ;;  %v12141_v47 = vld [vmem:[%s17316_s2 + $0x4c] ss:$16 sps:$4 sm:$0xff]   ;;  %v1229_v33 = vadd.f32 %v1102_v21, %v1037_v12  ;;  %v1055_v2 = vld [vmem:[%s13527_s30 + $0x90] sm:$0xff] }
 0x196   : > { %6095 = vmatmul.mubr.bf16.gmra.mrb[32].mxu1 %v12132_v31  ;;  %v1038_v31 = vld [vmem:[%s13527_s30 + $0x8] sm:$0xff] }
 0x197   : > { %6102 = vmatprep.mubr.bf16.mxu1 %v12133_v25  ;;  %v12143_v25 = vld [vmem:[%s17316_s2 + $0x140] ss:$16 sps:$4 sm:$0xff]   ;;  %1294 = vst.msk [vmem:[%s13527_s30] sm:$0xff] %vm972_vm1, %v1229_v33  ;;  %v14063_v12 = vpop.permute.xlu1 %2660 }
 0x198   : > { %17421 = vst [vmem:[#allocation68_spill] sm:$0xff] %v14063_v12  ;;  %v1040_v12 = vld [vmem:[%s13527_s30 + $0x18] sm:$0xff] }
 0x199   : > { %1227 = vadd.xlane.f32.xlu1 %v967_v36  ;;  %v12144_v36 = vld [vmem:[%s17316_s2 + $0x48] ss:$16 sps:$4 sm:$0xff]  }
 0x19b   : > { %7096 = vmatmul.mubr.bf16.gmra.mrb[68].mxu0 %v12138_v8 }
 0x19c   : > { %7103 = vmatprep.mubr.bf16.mxu0 %v12141_v47  ;;  %v1043_v47 = vld [vmem:[%s13527_s30 + $0x30] sm:$0xff] }
 0x19d   : > { %1223 = vadd.xlane.f32.xlu1 %v965_v28  ;;  %v12147_v28 = vld [vmem:[%s17316_s2 + $0x6c] ss:$16 sps:$4 sm:$0xff]  }
 0x19e   : > { %6103 = vmatmul.mubr.bf16.gmra.mrb[36].mxu1 %v12137_v57  ;;  %v1104_v57 = vpop.xlane.xlu0 %1103 }
 0x19f   : > { %6110 = vmatprep.mubr.bf16.mxu1 %v12139_v63  ;;  %v1230_v8 = vadd.f32 %v1104_v57, %v1038_v31  ;;  %v2005_v63 = vld [vmem:[%s17317_s3 + $0x338] sm:$0xff]  ;;  %v2007_v31 = vld [vmem:[%s17317_s3 + $0x348] sm:$0xff]  ;;  %v1041_v57 = vld [vmem:[%s13527_s30 + $0x20] sm:$0xff] }
 0x1a0   : > { %2675 = vperm.xlu0 %12066, %v2005_v63   ;;  %v14085_v63 = vpop.permute.xlu1 %2670 }
 0x1a1   : > { %1295 = vst.msk [vmem:[%s13527_s30 + $0x8] sm:$0xff] %vm972_vm1, %v1230_v8  ;;  %17422 = vst [vmem:[#allocation69_spill] sm:$0xff] %v14085_v63  ;;  %v1039_v63 = vld [vmem:[%s13527_s30 + $0x10] sm:$0xff] }
 0x1a2   : > { %v1114_v21 = vpop.xlane.xlu0 %1113 }
 0x1a3   : > { %7104 = vmatmul.mubr.bf16.gmra.mrb[72].mxu0 %v12144_v36  ;;  %v1235_v33 = vadd.f32 %v1114_v21, %v1043_v47  ;;  %v12150_v36 = vld [vmem:[%s17316_s2 + $0x68] ss:$16 sps:$4 sm:$0xff]  }
 0x1a4   : > { %7111 = vmatprep.mubr.bf16.mxu0 %v12147_v28  ;;  %v12153_v28 = vld [vmem:[%s17316_s2 + $0x8c] ss:$16 sps:$4 sm:$0xff]   ;;  %2685 = vperm.xlu0 %12066, %v2007_v31  }
 0x1a5   : > { %1300 = vst.msk [vmem:[%s13527_s30 + $0x30] sm:$0xff] %vm972_vm1, %v1235_v33  ;;  %v2009_v21 = vld [vmem:[%s17317_s3 + $0x358] sm:$0xff]  ;;  %v1047_v33 = vld [vmem:[%s13527_s30 + $0x50] sm:$0xff] }
 0x1a6   : > { %6111 = vmatmul.mubr.bf16.gmra.mrb[40].mxu1 %v12143_v25  ;;  %v12149_v25 = vld [vmem:[%s17316_s2 + $0x160] ss:$16 sps:$4 sm:$0xff]   ;;  %v1110_v8 = vpop.xlane.xlu0 %1109 }
 0x1a7   : > { %6118 = vmatprep.mubr.bf16.mxu1 %v12145_v23  ;;  %v12151_v23 = vld [vmem:[%s17316_s2 + $0x184] ss:$16 sps:$4 sm:$0xff]   ;;  %v1233_v47 = vadd.f32 %v1110_v8, %v1041_v57 }
 0x1a8   : > { %2695 = vperm.xlu0 %12066, %v2009_v21   ;;  %v1045_v8 = vld [vmem:[%s13527_s30 + $0x40] sm:$0xff] }
 0x1a9   : > { %1298 = vst.msk [vmem:[%s13527_s30 + $0x20] sm:$0xff] %vm972_vm1, %v1233_v47  ;;  %v12157_v21 = vld [vmem:[%s17316_s2 + $0x1a4] ss:$16 sps:$4 sm:$0xff]  }
 0x1aa   : > { %v1122_v31 = vpop.xlane.xlu0 %1121 }
 0x1ab   : > { %7112 = vmatmul.mubr.bf16.gmra.mrb[76].mxu0 %v12150_v36  ;;  %v1239_v57 = vadd.f32 %v1122_v31, %v1047_v33  ;;  %v12159_v33 = vld [vmem:[%s17316_s2 + $0xac] ss:$16 sps:$4 sm:$0xff]  }
 0x1ac   : > { %7119 = vmatprep.mubr.bf16.mxu0 %v12153_v28  ;;  %v12156_v28 = vld [vmem:[%s17316_s2 + $0x88] ss:$16 sps:$4 sm:$0xff]  }
 0x1ad   : > { %1304 = vst.msk [vmem:[%s13527_s30 + $0x50] sm:$0xff] %vm972_vm1, %v1239_v57  ;;  %v2013_v57 = vld [vmem:[%s17317_s3 + $0x378] sm:$0xff] }
 0x1ae   : > { %6119 = vmatmul.mubr.bf16.gmra.mrb[44].mxu1 %v12149_v25  ;;  %v2011_v25 = vld [vmem:[%s17317_s3 + $0x368] sm:$0xff]  ;;  %v1106_v36 = vpop.xlane.xlu1 %1105  ;;  %2680 = vperm.xlu1 %12067, %v2006_v42   ;;  %v1118_v31 = vpop.xlane.xlu0 %1117 }
 0x1af   : > { %6126 = vmatprep.mubr.bf16.mxu1 %v12151_v23  ;;  %v12155_v23 = vld [vmem:[%s17316_s2 + $0x180] ss:$16 sps:$4 sm:$0xff]   ;;  %v1231_v47 = vadd.f32 %v1106_v36, %v1039_v63  ;;  %2705 = vperm.xlu0 %12066, %v2011_v25   ;;  %v1237_v42 = vadd.f32 %v1118_v31, %v1045_v8 }
 0x1b0   : > { %v2008_v63 = vld [vmem:[%s17317_s3 + $0x350] sm:$0xff] }
 0x1b1   : > { %1296 = vst.msk [vmem:[%s13527_s30 + $0x10] sm:$0xff] %vm972_vm1, %v1231_v47  ;;  %1302 = vst.msk [vmem:[%s13527_s30 + $0x40] sm:$0xff] %vm972_vm1, %v1237_v42  ;;  %v1044_v47 = vld [vmem:[%s13527_s30 + $0x38] sm:$0xff] }
 0x1b2   : > { %v1108_v36 = vpop.xlane.xlu1 %1107  ;;  %v1130_v8 = vpop.xlane.xlu0 %1129  ;;  %2690 = vperm.xlu1 %12067, %v2008_v63   ;;  %v12162_v42 = vld [vmem:[%s17316_s2 + $0xa8] ss:$16 sps:$4 sm:$0xff]   ;;  %v12163_v63 = vld [vmem:[%s17316_s2 + $0x1c4] ss:$16 sps:$4 sm:$0xff]  }
 0x1b3   : > { %7120 = vmatmul.mubr.bf16.gmra.mrb[80].mxu0 %v12156_v28  ;;  %v1232_v25 = vadd.f32 %v1108_v36, %v1040_v12  ;;  %2715 = vperm.xlu0 %12066, %v2013_v57   ;;  %v1243_v31 = vadd.f32 %v1130_v8, %v1051_v16  ;;  %v2015_v28 = vld [vmem:[%s17317_s3 + $0x388] sm:$0xff] }
 0x1b4   : > { %7127 = vmatprep.mubr.bf16.mxu0 %v12159_v33  ;;  %v12161_v33 = vld [vmem:[%s17316_s2 + $0x1a0] ss:$16 sps:$4 sm:$0xff]   ;;  %v12165_v57 = vld [vmem:[%s17316_s2 + $0xcc] ss:$16 sps:$4 sm:$0xff]  }
 0x1b5   : > { %1297 = vst.msk [vmem:[%s13527_s30 + $0x18] sm:$0xff] %vm972_vm1, %v1232_v25  ;;  %1308 = vst.msk [vmem:[%s13527_s30 + $0x70] sm:$0xff] %vm972_vm1, %v1243_v31  ;;  %v1042_v25 = vld [vmem:[%s13527_s30 + $0x28] sm:$0xff]  ;;  %v2017_v31 = vld [vmem:[%s17317_s3 + $0x398] sm:$0xff] }
 0x1b6   : > { %6127 = vmatmul.mubr.bf16.gmra.mrb[48].mxu1 %v12155_v23  ;;  %v2010_v23 = vld [vmem:[%s17317_s3 + $0x360] sm:$0xff]  ;;  %v1116_v12 = vpop.xlane.xlu1 %1115  ;;  %v1126_v36 = vpop.xlane.xlu0 %1125 }
 0x1b7   : > { %6134 = vmatprep.mubr.bf16.mxu1 %v12157_v21  ;;  %v1049_v21 = vld [vmem:[%s13527_s30 + $0x60] sm:$0xff]  ;;  %v1236_v16 = vadd.f32 %v1116_v12, %v1044_v47  ;;  %2700 = vperm.xlu1 %12067, %v2010_v23   ;;  %v2012_v47 = vld [vmem:[%s17317_s3 + $0x370] sm:$0xff] }
 0x1b8   : > { %2725 = vperm.xlu0 %12066, %v2015_v28   ;;  %v1241_v8 = vadd.f32 %v1126_v36, %v1049_v21  ;;  %v1048_v21 = vld [vmem:[%s13527_s30 + $0x58] sm:$0xff] }
 0x1b9   : > { %1301 = vst.msk [vmem:[%s13527_s30 + $0x38] sm:$0xff] %vm972_vm1, %v1236_v16 }
 0x1ba   : > { %v1112_v12 = vpop.xlane.xlu1 %1111  ;;  %1306 = vst.msk [vmem:[%s13527_s30 + $0x60] sm:$0xff] %vm972_vm1, %v1241_v8  ;;  %v1138_v28 = vpop.xlane.xlu0 %1137  ;;  %v12169_v8 = vld [vmem:[%s17316_s2 + $0x1e4] ss:$16 sps:$4 sm:$0xff]  }
 0x1bb   : > { %7128 = vmatmul.mubr.bf16.gmra.mrb[84].mxu0 %v12162_v42  ;;  %v1234_v23 = vadd.f32 %v1112_v12, %v1042_v25  ;;  %2710 = vperm.xlu1 %12067, %v2012_v47   ;;  %v1247_v16 = vadd.f32 %v1138_v28, %v1055_v2  ;;  %v2019_v42 = vld [vmem:[%s17317_s3 + $0x3a8] sm:$0xff]  ;;  %v2016_v28 = vld [vmem:[%s17317_s3 + $0x390] sm:$0xff] }
 0x1bc   : > { %7135 = vmatprep.mubr.bf16.mxu0 %v12165_v57  ;;  %2735 = vperm.xlu0 %12066, %v2017_v31   ;;  %v12167_v57 = vld [vmem:[%s17316_s2 + $0x1c0] ss:$16 sps:$4 sm:$0xff]   ;;  %v12168_v25 = vld [vmem:[%s17316_s2 + $0xc8] ss:$16 sps:$4 sm:$0xff]   ;;  %v12171_v47 = vld [vmem:[%s17316_s2 + $0xec] ss:$16 sps:$4 sm:$0xff]  }
 0x1bd   : > { %1299 = vst.msk [vmem:[%s13527_s30 + $0x28] sm:$0xff] %vm972_vm1, %v1234_v23  ;;  %1312 = vst.msk [vmem:[%s13527_s30 + $0x90] sm:$0xff] %vm972_vm1, %v1247_v16  ;;  %v1046_v12 = vld [vmem:[%s13527_s30 + $0x48] sm:$0xff] }
 0x1be   : > { %6135 = vmatmul.mubr.bf16.gmra.mrb[52].mxu1 %v12161_v33  ;;  %v2014_v33 = vld [vmem:[%s17317_s3 + $0x380] sm:$0xff]  ;;  %v1124_v36 = vpop.xlane.xlu1 %1123  ;;  %v1134_v31 = vpop.xlane.xlu0 %1133 }
 0x1bf   : > { %6142 = vmatprep.mubr.bf16.mxu1 %v12163_v63  ;;  %v1053_v63 = vld [vmem:[%s13527_s30 + $0x80] sm:$0xff]  ;;  %v1240_v2 = vadd.f32 %v1124_v36, %v1048_v21  ;;  %2720 = vperm.xlu1 %12067, %v2014_v33   ;;  %v2021_v21 = vld [vmem:[%s17317_s3 + $0x3b8] sm:$0xff]  ;;  %v1059_v36 = vld [vmem:[%s13527_s30 + $0xb0] sm:$0xff] }
 0x1c0   : > { %2745 = vperm.xlu0 %12066, %v2019_v42   ;;  %v1245_v23 = vadd.f32 %v1134_v31, %v1053_v63  ;;  %v1052_v63 = vld [vmem:[%s13527_s30 + $0x78] sm:$0xff] }
 0x1c1   : > { %1305 = vst.msk [vmem:[%s13527_s30 + $0x58] sm:$0xff] %vm972_vm1, %v1240_v2 }
 0x1c2   : > { %v1120_v16 = vpop.xlane.xlu1 %1119  ;;  %1310 = vst.msk [vmem:[%s13527_s30 + $0x80] sm:$0xff] %vm972_vm1, %v1245_v23  ;;  %v1146_v42 = vpop.xlane.xlu0 %1145 }
 0x1c3   : > { %7136 = vmatmul.mubr.bf16.gmra.mrb[88].mxu0 %v12168_v25  ;;  %v1238_v33 = vadd.f32 %v1120_v16, %v1046_v12  ;;  %2730 = vperm.xlu1 %12067, %v2016_v28   ;;  %v1251_v2 = vadd.f32 %v1146_v42, %v1059_v36  ;;  %v2023_v25 = vld [vmem:[%s17317_s3 + $0x3c8] sm:$0xff]  ;;  %v12175_v28 = vld [vmem:[%s17316_s2 + $0x204] ss:$16 sps:$4 sm:$0xff]  }
 0x1c4   : > { %7143 = vmatprep.mubr.bf16.mxu0 %v12171_v47  ;;  %2755 = vperm.xlu0 %12066, %v2021_v21   ;;  %v12173_v47 = vld [vmem:[%s17316_s2 + $0x1e0] ss:$16 sps:$4 sm:$0xff]   ;;  %v12174_v12 = vld [vmem:[%s17316_s2 + $0xe8] ss:$16 sps:$4 sm:$0xff]   ;;  %v12177_v21 = vld [vmem:[%s17316_s2 + $0x10c] ss:$16 sps:$4 sm:$0xff]  }
 0x1c5   : > { %1303 = vst.msk [vmem:[%s13527_s30 + $0x48] sm:$0xff] %vm972_vm1, %v1238_v33  ;;  %1316 = vst.msk [vmem:[%s13527_s30 + $0xb0] sm:$0xff] %vm972_vm1, %v1251_v2  ;;  %v1050_v36 = vld [vmem:[%s13527_s30 + $0x68] sm:$0xff]  ;;  %v2020_v42 = vld [vmem:[%s17317_s3 + $0x3b0] sm:$0xff] }
 0x1c6   : > { %6143 = vmatmul.mubr.bf16.gmra.mrb[56].mxu1 %v12167_v57  ;;  %v2018_v57 = vld [vmem:[%s17317_s3 + $0x3a0] sm:$0xff]  ;;  %v1132_v31 = vpop.xlane.xlu1 %1131  ;;  %v1142_v16 = vpop.xlane.xlu0 %1141 }
 0x1c7   : > { %6150 = vmatprep.mubr.bf16.mxu1 %v12169_v8  ;;  %v1057_v8 = vld [vmem:[%s13527_s30 + $0xa0] sm:$0xff]  ;;  %v1244_v23 = vadd.f32 %v1132_v31, %v1052_v63  ;;  %2740 = vperm.xlu1 %12067, %v2018_v57   ;;  %v2025_v63 = vld [vmem:[%s17317_s3 + $0x3d8] sm:$0xff]  ;;  %v1063_v31 = vld [vmem:[%s13527_s30 + $0xd0] sm:$0xff] }
 0x1c8   : > { %2765 = vperm.xlu0 %12066, %v2023_v25   ;;  %v1249_v33 = vadd.f32 %v1142_v16, %v1057_v8  ;;  %v1056_v8 = vld [vmem:[%s13527_s30 + $0x98] sm:$0xff] }
 0x1c9   : > { %1309 = vst.msk [vmem:[%s13527_s30 + $0x78] sm:$0xff] %vm972_vm1, %v1244_v23 }
 0x1ca   : > { %v1128_v2 = vpop.xlane.xlu1 %1127  ;;  %1314 = vst.msk [vmem:[%s13527_s30 + $0xa0] sm:$0xff] %vm972_vm1, %v1249_v33  ;;  %v1154_v25 = vpop.xlane.xlu0 %1153 }
 0x1cb   : > { %7144 = vmatmul.mubr.bf16.gmra.mrb[92].mxu0 %v12174_v12  ;;  %v1242_v57 = vadd.f32 %v1128_v2, %v1050_v36  ;;  %2750 = vperm.xlu1 %12067, %v2020_v42   ;;  %v1255_v23 = vadd.f32 %v1154_v25, %v1063_v31  ;;  %v2027_v12 = vld [vmem:[%s17317_s3 + $0x3e8] sm:$0xff]  ;;  %v12181_v42 = vld [vmem:[%s17316_s2 + $0x224] ss:$16 sps:$4 sm:$0xff]  }
 0x1cc   : > { %7151 = vmatprep.mubr.bf16.mxu0 %v12177_v21  ;;  %2775 = vperm.xlu0 %12066, %v2025_v63   ;;  %v12179_v21 = vld [vmem:[%s17316_s2 + $0x200] ss:$16 sps:$4 sm:$0xff]   ;;  %v12180_v36 = vld [vmem:[%s17316_s2 + $0x108] ss:$16 sps:$4 sm:$0xff]   ;;  %v12183_v63 = vld [vmem:[%s17316_s2 + $0x12c] ss:$16 sps:$4 sm:$0xff]  }
 0x1cd   : > { %1307 = vst.msk [vmem:[%s13527_s30 + $0x68] sm:$0xff] %vm972_vm1, %v1242_v57  ;;  %1320 = vst.msk [vmem:[%s13527_s30 + $0xd0] sm:$0xff] %vm972_vm1, %v1255_v23  ;;  %v1054_v31 = vld [vmem:[%s13527_s30 + $0x88] sm:$0xff]  ;;  %v2024_v25 = vld [vmem:[%s17317_s3 + $0x3d0] sm:$0xff] }
 0x1ce   : > { %6151 = vmatmul.mubr.bf16.gmra.mrb[60].mxu1 %v12173_v47  ;;  %v2022_v47 = vld [vmem:[%s17317_s3 + $0x3c0] sm:$0xff]  ;;  %v1140_v16 = vpop.xlane.xlu1 %1139  ;;  %v1150_v2 = vpop.xlane.xlu0 %1149 }
 0x1cf   : > { %6158 = vmatprep.mubr.bf16.mxu1 %v12175_v28  ;;  %v1061_v28 = vld [vmem:[%s13527_s30 + $0xc0] sm:$0xff]  ;;  %v1248_v33 = vadd.f32 %v1140_v16, %v1056_v8  ;;  %2760 = vperm.xlu1 %12067, %v2022_v47   ;;  %v2029_v8 = vld [vmem:[%s17317_s3 + $0x3f8] sm:$0xff]  ;;  %v1067_v16 = vld [vmem:[%s13527_s30 + $0xf0] sm:$0xff] }
 0x1d0   : > { %2785 = vperm.xlu0 %12066, %v2027_v12   ;;  %v1253_v57 = vadd.f32 %v1150_v2, %v1061_v28  ;;  %v1060_v28 = vld [vmem:[%s13527_s30 + $0xb8] sm:$0xff] }
 0x1d1   : > { %1313 = vst.msk [vmem:[%s13527_s30 + $0x98] sm:$0xff] %vm972_vm1, %v1248_v33 }
 0x1d2   : > { %v1136_v23 = vpop.xlane.xlu1 %1135  ;;  %1318 = vst.msk [vmem:[%s13527_s30 + $0xc0] sm:$0xff] %vm972_vm1, %v1253_v57  ;;  %v1162_v12 = vpop.xlane.xlu0 %1161 }
 0x1d3   : > { %7152 = vmatmul.mubr.bf16.gmra.mrb[96].mxu0 %v12180_v36  ;;  %v1246_v47 = vadd.f32 %v1136_v23, %v1054_v31  ;;  %2770 = vperm.xlu1 %12067, %v2024_v25   ;;  %v1259_v33 = vadd.f32 %v1162_v12, %v1067_v16  ;;  %v2031_v36 = vld [vmem:[%s17317_s3 + $0x408] sm:$0xff]  ;;  %v12187_v25 = vld [vmem:[%s17316_s2 + $0x244] ss:$16 sps:$4 sm:$0xff]  }
 0x1d4   : > { %7159 = vmatprep.mubr.bf16.mxu0 %v12183_v63  ;;  %2795 = vperm.xlu0 %12066, %v2029_v8   ;;  %v12185_v63 = vld [vmem:[%s17316_s2 + $0x220] ss:$16 sps:$4 sm:$0xff]   ;;  %v12186_v31 = vld [vmem:[%s17316_s2 + $0x128] ss:$16 sps:$4 sm:$0xff]   ;;  %v12189_v8 = vld [vmem:[%s17316_s2 + $0x14c] ss:$16 sps:$4 sm:$0xff]  }
 0x1d5   : > { %1311 = vst.msk [vmem:[%s13527_s30 + $0x88] sm:$0xff] %vm972_vm1, %v1246_v47  ;;  %1324 = vst.msk [vmem:[%s13527_s30 + $0xf0] sm:$0xff] %vm972_vm1, %v1259_v33  ;;  %v1058_v16 = vld [vmem:[%s13527_s30 + $0xa8] sm:$0xff]  ;;  %v2028_v12 = vld [vmem:[%s17317_s3 + $0x3f0] sm:$0xff] }
 0x1d6   : > { %6159 = vmatmul.mubr.bf16.gmra.mrb[64].mxu1 %v12179_v21  ;;  %v2026_v21 = vld [vmem:[%s17317_s3 + $0x3e0] sm:$0xff]  ;;  %v1148_v2 = vpop.xlane.xlu1 %1147  ;;  %v1158_v23 = vpop.xlane.xlu0 %1157 }
 0x1d7   : > { %6166 = vmatprep.mubr.bf16.mxu1 %v12181_v42  ;;  %v1065_v42 = vld [vmem:[%s13527_s30 + $0xe0] sm:$0xff]  ;;  %v1252_v57 = vadd.f32 %v1148_v2, %v1060_v28  ;;  %2780 = vperm.xlu1 %12067, %v2026_v21   ;;  %v2033_v28 = vld [vmem:[%s17317_s3 + $0x418] sm:$0xff]  ;;  %v1071_v2 = vld [vmem:[%s13527_s30 + $0x110] sm:$0xff] }
 0x1d8   : > { %2805 = vperm.xlu0 %12066, %v2031_v36   ;;  %v1257_v47 = vadd.f32 %v1158_v23, %v1065_v42  ;;  %v1064_v42 = vld [vmem:[%s13527_s30 + $0xd8] sm:$0xff] }
 0x1d9   : > { %1317 = vst.msk [vmem:[%s13527_s30 + $0xb8] sm:$0xff] %vm972_vm1, %v1252_v57 }
 0x1da   : > { %v1144_v33 = vpop.xlane.xlu1 %1143  ;;  %1322 = vst.msk [vmem:[%s13527_s30 + $0xe0] sm:$0xff] %vm972_vm1, %v1257_v47  ;;  %v1170_v36 = vpop.xlane.xlu0 %1169 }
 0x1db   : > { %7160 = vmatmul.mubr.bf16.gmra.mrb[100].mxu0 %v12186_v31  ;;  %v1250_v21 = vadd.f32 %v1144_v33, %v1058_v16  ;;  %2790 = vperm.xlu1 %12067, %v2028_v12   ;;  %v1263_v57 = vadd.f32 %v1170_v36, %v1071_v2  ;;  %v2035_v31 = vld [vmem:[%s17317_s3 + $0x428] sm:$0xff]  ;;  %v12193_v12 = vld [vmem:[%s17316_s2 + $0x264] ss:$16 sps:$4 sm:$0xff]  }
 0x1dc   : > { %7167 = vmatprep.mubr.bf16.mxu0 %v12189_v8  ;;  %2815 = vperm.xlu0 %12066, %v2033_v28   ;;  %v12191_v8 = vld [vmem:[%s17316_s2 + $0x240] ss:$16 sps:$4 sm:$0xff]   ;;  %v12192_v16 = vld [vmem:[%s17316_s2 + $0x148] ss:$16 sps:$4 sm:$0xff]   ;;  %v12195_v28 = vld [vmem:[%s17316_s2 + $0x16c] ss:$16 sps:$4 sm:$0xff]  }
 0x1dd   : > { %1315 = vst.msk [vmem:[%s13527_s30 + $0xa8] sm:$0xff] %vm972_vm1, %v1250_v21  ;;  %1328 = vst.msk [vmem:[%s13527_s30 + $0x110] sm:$0xff] %vm972_vm1, %v1263_v57  ;;  %v1062_v2 = vld [vmem:[%s13527_s30 + $0xc8] sm:$0xff]  ;;  %v2032_v36 = vld [vmem:[%s17317_s3 + $0x410] sm:$0xff] }
 0x1de   : > { %6167 = vmatmul.mubr.bf16.gmra.mrb[68].mxu1 %v12185_v63  ;;  %v2030_v63 = vld [vmem:[%s17317_s3 + $0x400] sm:$0xff]  ;;  %v1156_v23 = vpop.xlane.xlu1 %1155  ;;  %v1166_v33 = vpop.xlane.xlu0 %1165 }
 0x1df   : > { %6174 = vmatprep.mubr.bf16.mxu1 %v12187_v25  ;;  %v1069_v25 = vld [vmem:[%s13527_s30 + $0x100] sm:$0xff]  ;;  %v1256_v47 = vadd.f32 %v1156_v23, %v1064_v42  ;;  %2800 = vperm.xlu1 %12067, %v2030_v63   ;;  %v2037_v42 = vld [vmem:[%s17317_s3 + $0x438] sm:$0xff]  ;;  %v1075_v23 = vld [vmem:[%s13527_s30 + $0x130] sm:$0xff] }
 0x1e0   : > { %2825 = vperm.xlu0 %12066, %v2035_v31   ;;  %v1261_v21 = vadd.f32 %v1166_v33, %v1069_v25  ;;  %v1068_v31 = vld [vmem:[%s13527_s30 + $0xf8] sm:$0xff] }
 0x1e1   : > { %1321 = vst.msk [vmem:[%s13527_s30 + $0xd8] sm:$0xff] %vm972_vm1, %v1256_v47 }
 0x1e2   : > { %v1152_v57 = vpop.xlane.xlu1 %1151  ;;  %1326 = vst.msk [vmem:[%s13527_s30 + $0x100] sm:$0xff] %vm972_vm1, %v1261_v21  ;;  %v1178_v25 = vpop.xlane.xlu0 %1177 }
 0x1e3   : > { %7168 = vmatmul.mubr.bf16.gmra.mrb[104].mxu0 %v12192_v16  ;;  %v1254_v63 = vadd.f32 %v1152_v57, %v1062_v2  ;;  %2810 = vperm.xlu1 %12067, %v2032_v36   ;;  %v1267_v47 = vadd.f32 %v1178_v25, %v1075_v23  ;;  %v2039_v16 = vld [vmem:[%s17317_s3 + $0x448] sm:$0xff]  ;;  %v1073_v2 = vld [vmem:[%s13527_s30 + $0x120] sm:$0xff]  ;;  %v2041_v25 = vld [vmem:[%s17317_s3 + $0x458] sm:$0xff] }
 0x1e4   : > { %7175 = vmatprep.mubr.bf16.mxu0 %v12195_v28  ;;  %2835 = vperm.xlu0 %12066, %v2037_v42   ;;  %v12198_v28 = vld [vmem:[%s17316_s2 + $0x168] ss:$16 sps:$4 sm:$0xff]   ;;  %v12199_v36 = vld [vmem:[%s17316_s2 + $0x284] ss:$16 sps:$4 sm:$0xff]   ;;  %v12201_v42 = vld [vmem:[%s17316_s2 + $0x18c] ss:$16 sps:$4 sm:$0xff]  }
 0x1e5   : > { %1319 = vst.msk [vmem:[%s13527_s30 + $0xc8] sm:$0xff] %vm972_vm1, %v1254_v63  ;;  %1332 = vst.msk [vmem:[%s13527_s30 + $0x130] sm:$0xff] %vm972_vm1, %v1267_v47  ;;  %v1066_v57 = vld [vmem:[%s13527_s30 + $0xe8] sm:$0xff] }
 0x1e6   : > { %6175 = vmatmul.mubr.bf16.gmra.mrb[72].mxu1 %v12191_v8  ;;  %v2034_v8 = vld [vmem:[%s17317_s3 + $0x420] sm:$0xff]  ;;  %v1164_v33 = vpop.xlane.xlu1 %1163 }
 0x1e7   : > { %6182 = vmatprep.mubr.bf16.mxu1 %v12193_v12  ;;  %v12197_v12 = vld [vmem:[%s17316_s2 + $0x260] ss:$16 sps:$4 sm:$0xff]   ;;  %v1260_v21 = vadd.f32 %v1164_v33, %v1068_v31  ;;  %v1174_v23 = vpop.xlane.xlu0 %1173  ;;  %2820 = vperm.xlu1 %12067, %v2034_v8  }
 0x1e8   : > { %2845 = vperm.xlu0 %12066, %v2039_v16   ;;  %v1265_v63 = vadd.f32 %v1174_v23, %v1073_v2  ;;  %v2036_v31 = vld [vmem:[%s17317_s3 + $0x430] sm:$0xff]  ;;  %v1438_v8 = vld [vmem:[%s17316_s2 + $0x280] sm:$0xff]  ;;  %v1072_v2 = vld [vmem:[%s13527_s30 + $0x118] sm:$0xff] }
 0x1e9   : > { %1325 = vst.msk [vmem:[%s13527_s30 + $0xf8] sm:$0xff] %vm972_vm1, %v1260_v21  ;;  %v1079_v33 = vld [vmem:[%s13527_s30 + $0x150] sm:$0xff]  ;;  %v2038_v21 = vld [vmem:[%s17317_s3 + $0x440] sm:$0xff]  ;;  %v12203_v23 = vld [vmem:[%s17316_s2 + $0x188] ss:$16 sps:$4 sm:$0xff]  }
 0x1ea   : > { %v1160_v47 = vpop.xlane.xlu1 %1159  ;;  %1330 = vst.msk [vmem:[%s13527_s30 + $0x120] sm:$0xff] %vm972_vm1, %v1265_v63  ;;  %v1440_v16 = vld [vmem:[%s17316_s2 + $0x290] sm:$0xff] }
 0x1eb   : > { %7176 = vmatmul.mubr.bf16.gmra.mrb[108].mxu0 %v12198_v28  ;;  %v1258_v59 = vadd.f32 %v1160_v47, %v1066_v57  ;;  %2830 = vperm.xlu1 %12067, %v2036_v31   ;;  %v2043_v57 = vld [vmem:[%s17317_s3 + $0x468] sm:$0xff]  ;;  %v1077_v47 = vld [vmem:[%s13527_s30 + $0x140] sm:$0xff] }
 0x1ec   : > { %7183 = vmatprep.mubr.bf16.mxu0 %v12201_v42  ;;  %2855 = vperm.xlu0 %12066, %v2041_v25   ;;  %v9665_v42 = vcombine.low %v1438_v8, %v1440_v16  ;;  %v12206_v31 = vld [vmem:[%s17316_s2 + $0x1ac] ss:$16 sps:$4 sm:$0xff]  }
 0x1ed   : > { %1323 = vst.msk [vmem:[%s13527_s30 + $0xe8] sm:$0xff] %vm972_vm1, %v1258_v59  ;;  %v12204_v59 = vld [vmem:[%s17316_s2 + $0x2a4] ss:$16 sps:$4 sm:$0xff]   ;;  %v1070_v25 = vld [vmem:[%s13527_s30 + $0x108] sm:$0xff]  ;;  %v2045_v8 = vld [vmem:[%s17317_s3 + $0x478] sm:$0xff] }
 0x1ee   : > { %6183 = vmatmul.mubr.bf16.gmra.mrb[76].mxu1 %v12197_v12  ;;  %v1186_v12 = vpop.xlane.xlu0 %1185 }
 0x1ef   : > { %6190 = vmatprep.mubr.bf16.mxu1 %v12199_v36  ;;  %v1271_v28 = vadd.f32 %v1186_v12, %v1079_v33  ;;  %v1172_v36 = vpop.xlane.xlu1 %1171  ;;  %2840 = vperm.xlu1 %12067, %v2038_v21   ;;  %v2040_v33 = vld [vmem:[%s17317_s3 + $0x450] sm:$0xff] }
 0x1f0   : > { %v1264_v63 = vadd.f32 %v1172_v36, %v1072_v2  ;;  %2865 = vperm.xlu0 %12066, %v2043_v57   ;;  %v1444_v21 = vld [vmem:[%s17316_s2 + $0x2b0] sm:$0xff]  ;;  %v1076_v36 = vld [vmem:[%s13527_s30 + $0x138] sm:$0xff] }
 0x1f1   : > { %1336 = vst.msk [vmem:[%s13527_s30 + $0x150] sm:$0xff] %vm972_vm1, %v1271_v28  ;;  %v1442_v28 = vld [vmem:[%s17316_s2 + $0x2a0] sm:$0xff] }
 0x1f2   : > { %1329 = vst.msk [vmem:[%s13527_s30 + $0x118] sm:$0xff] %vm972_vm1, %v1264_v63  ;;  %v1182_v2 = vpop.xlane.xlu0 %1181  ;;  %v1083_v63 = vld [vmem:[%s13527_s30 + $0x170] sm:$0xff] }
 0x1f3   : > { %v1168_v16 = vpop.xlane.xlu1 %1167  ;;  %7184 = vmatmul.mubr.bf16.gmra.mrb[112].mxu0 %v12203_v23  ;;  %v1269_v57 = vadd.f32 %v1182_v2, %v1077_v47  ;;  %2850 = vperm.xlu1 %12067, %v2040_v33   ;;  %v2047_v23 = vld [vmem:[%s17317_s3 + $0x488] sm:$0xff] }
 0x1f4   : > { %v1262_v12 = vadd.f32 %v1168_v16, %v1070_v25  ;;  %7191 = vmatprep.mubr.bf16.mxu0 %v12206_v31  ;;  %2875 = vperm.xlu0 %12066, %v2045_v8   ;;  %v9669_v31 = vcombine.low %v1442_v28, %v1444_v21  ;;  %v12208_v25 = vld [vmem:[%s17316_s2 + $0x1a8] ss:$16 sps:$4 sm:$0xff]   ;;  %v12209_v8 = vld [vmem:[%s17316_s2 + $0x2c4] ss:$16 sps:$4 sm:$0xff]   ;;  %v12211_v16 = vld [vmem:[%s17316_s2 + $0x1cc] ss:$16 sps:$4 sm:$0xff]  }
 0x1f5   : > { %1334 = vst.msk [vmem:[%s13527_s30 + $0x140] sm:$0xff] %vm972_vm1, %v1269_v57  ;;  %v1081_v57 = vld [vmem:[%s13527_s30 + $0x160] sm:$0xff]  ;;  %v2044_v28 = vld [vmem:[%s17317_s3 + $0x470] sm:$0xff]  ;;  %v2049_v21 = vld [vmem:[%s17317_s3 + $0x498] sm:$0xff] }
 0x1f6   : > { %6191 = vmatmul.mubr.bf16.gmra.mrb[80].mxu1 %v9665_v42  ;;  %1327 = vst.msk [vmem:[%s13527_s30 + $0x108] sm:$0xff] %vm972_vm1, %v1262_v12  ;;  %v2042_v42 = vld [vmem:[%s17317_s3 + $0x460] sm:$0xff]  ;;  %v1194_v47 = vpop.xlane.xlu0 %1193  ;;  %v1074_v12 = vld [vmem:[%s13527_s30 + $0x128] sm:$0xff] }
 0x1f7   : > { %6198 = vmatprep.mubr.bf16.mxu1 %v12204_v59  ;;  %v1180_v59 = vpop.xlane.xlu1 %1179  ;;  %v1275_v2 = vadd.f32 %v1194_v47, %v1083_v63  ;;  %2860 = vperm.xlu1 %12067, %v2042_v42  }
 0x1f8   : > { %v1268_v33 = vadd.f32 %v1180_v59, %v1076_v36  ;;  %2885 = vperm.xlu0 %12066, %v2047_v23   ;;  %v1446_v23 = vld [vmem:[%s17316_s2 + $0x2c0] sm:$0xff]  ;;  %v1448_v59 = vld [vmem:[%s17316_s2 + $0x2d0] sm:$0xff] }
 0x1f9   : > { %1340 = vst.msk [vmem:[%s13527_s30 + $0x170] sm:$0xff] %vm972_vm1, %v1275_v2  ;;  %v1087_v2 = vld [vmem:[%s13527_s30 + $0x190] sm:$0xff] }
 0x1fa   : > { %1333 = vst.msk [vmem:[%s13527_s30 + $0x138] sm:$0xff] %vm972_vm1, %v1268_v33  ;;  %v1190_v63 = vpop.xlane.xlu0 %1189  ;;  %v1080_v33 = vld [vmem:[%s13527_s30 + $0x158] sm:$0xff] }
 0x1fb   : > { %v1176_v36 = vpop.xlane.xlu1 %1175  ;;  %7192 = vmatmul.mubr.bf16.gmra.mrb[116].mxu0 %v12208_v25  ;;  %v1273_v47 = vadd.f32 %v1190_v63, %v1081_v57  ;;  %2870 = vperm.xlu1 %12067, %v2044_v28   ;;  %v2051_v25 = vld [vmem:[%s17317_s3 + $0x4a8] sm:$0xff] }
 0x1fc   : > { %v1266_v42 = vadd.f32 %v1176_v36, %v1074_v12  ;;  %7199 = vmatprep.mubr.bf16.mxu0 %v12211_v16  ;;  %2895 = vperm.xlu0 %12066, %v2049_v21   ;;  %v9673_v16 = vcombine.low %v1446_v23, %v1448_v59  ;;  %v12213_v12 = vld [vmem:[%s17316_s2 + $0x1c8] ss:$16 sps:$4 sm:$0xff]   ;;  %v12214_v21 = vld [vmem:[%s17316_s2 + $0x2e4] ss:$16 sps:$4 sm:$0xff]   ;;  %v12216_v36 = vld [vmem:[%s17316_s2 + $0x1ec] ss:$16 sps:$4 sm:$0xff]  }
 0x1fd   : > { %1338 = vst.msk [vmem:[%s13527_s30 + $0x160] sm:$0xff] %vm972_vm1, %v1273_v47  ;;  %v1085_v47 = vld [vmem:[%s13527_s30 + $0x180] sm:$0xff]  ;;  %v2048_v23 = vld [vmem:[%s17317_s3 + $0x490] sm:$0xff]  ;;  %v2053_v59 = vld [vmem:[%s17317_s3 + $0x4b8] sm:$0xff] }
 0x1fe   : > { %6199 = vmatmul.mubr.bf16.gmra.mrb[84].mxu1 %v9669_v31  ;;  %1331 = vst.msk [vmem:[%s13527_s30 + $0x128] sm:$0xff] %vm972_vm1, %v1266_v42  ;;  %v2046_v31 = vld [vmem:[%s17317_s3 + $0x480] sm:$0xff]  ;;  %v1202_v57 = vpop.xlane.xlu0 %1201  ;;  %v1078_v42 = vld [vmem:[%s13527_s30 + $0x148] sm:$0xff] }
 0x1ff   : > { %6206 = vmatprep.mubr.bf16.mxu1 %v12209_v8  ;;  %v1188_v8 = vpop.xlane.xlu1 %1187  ;;  %v1279_v63 = vadd.f32 %v1202_v57, %v1087_v2  ;;  %2880 = vperm.xlu1 %12067, %v2046_v31   ;;  %v1091_v57 = vld [vmem:[%s13527_s30 + $0x1b0] sm:$0xff] }
 0x200   : > { %v1272_v28 = vadd.f32 %v1188_v8, %v1080_v33  ;;  %2905 = vperm.xlu0 %12066, %v2051_v25   ;;  %v1084_v8 = vld [vmem:[%s13527_s30 + $0x178] sm:$0xff] }
 0x201   : > { %1344 = vst.msk [vmem:[%s13527_s30 + $0x190] sm:$0xff] %vm972_vm1, %v1279_v63 }
 0x202   : > { %1337 = vst.msk [vmem:[%s13527_s30 + $0x158] sm:$0xff] %vm972_vm1, %v1272_v28  ;;  %v1198_v2 = vpop.xlane.xlu0 %1197 }
 0x203   : > { %v1184_v33 = vpop.xlane.xlu1 %1183  ;;  %7200 = vmatmul.mubr.bf16.gmra.mrb[120].mxu0 %v12213_v12  ;;  %v1277_v25 = vadd.f32 %v1198_v2, %v1085_v47  ;;  %2890 = vperm.xlu1 %12067, %v2048_v23   ;;  %v2055_v12 = vld [vmem:[%s17317_s3 + $0x4c8] sm:$0xff]  ;;  %v12220_v47 = vld [vmem:[%s17316_s2 + $0x304] ss:$16 sps:$4 sm:$0xff]  }
 0x204   : > { %v1270_v31 = vadd.f32 %v1184_v33, %v1078_v42  ;;  %7207 = vmatprep.mubr.bf16.mxu0 %v12216_v36  ;;  %2915 = vperm.xlu0 %12066, %v2053_v59   ;;  %v12219_v36 = vld [vmem:[%s17316_s2 + $0x1e8] ss:$16 sps:$4 sm:$0xff]   ;;  %v12222_v23 = vld [vmem:[%s17316_s2 + $0x20c] ss:$16 sps:$4 sm:$0xff]   ;;  %v1089_v2 = vld [vmem:[%s13527_s30 + $0x1a0] sm:$0xff] }
 0x205   : > { %1342 = vst.msk [vmem:[%s13527_s30 + $0x180] sm:$0xff] %vm972_vm1, %v1277_v25  ;;  %v1082_v33 = vld [vmem:[%s13527_s30 + $0x168] sm:$0xff]  ;;  %v2057_v25 = vld [vmem:[%s17317_s3 + $0x4d8] sm:$0xff] }
 0x206   : > { %6207 = vmatmul.mubr.bf16.gmra.mrb[88].mxu1 %v9673_v16  ;;  %1335 = vst.msk [vmem:[%s13527_s30 + $0x148] sm:$0xff] %vm972_vm1, %v1270_v31  ;;  %v2050_v16 = vld [vmem:[%s17317_s3 + $0x4a0] sm:$0xff]  ;;  %v1210_v63 = vpop.xlane.xlu0 %1209  ;;  %v2052_v31 = vld [vmem:[%s17317_s3 + $0x4b0] sm:$0xff] }
 0x207   : > { %6214 = vmatprep.mubr.bf16.mxu1 %v12214_v21  ;;  %v1196_v28 = vpop.xlane.xlu1 %1195  ;;  %v12218_v21 = vld [vmem:[%s17316_s2 + $0x2e0] ss:$16 sps:$4 sm:$0xff]   ;;  %v1283_v59 = vadd.f32 %v1210_v63, %v1091_v57  ;;  %2900 = vperm.xlu1 %12067, %v2050_v16  }
 0x208   : > { %v1276_v42 = vadd.f32 %v1196_v28, %v1084_v8  ;;  %2925 = vperm.xlu0 %12066, %v2055_v12   ;;  %v1088_v28 = vld [vmem:[%s13527_s30 + $0x198] sm:$0xff]  ;;  %v1095_v63 = vld [vmem:[%s13527_s30 + $0x1d0] sm:$0xff] }
 0x209   : > { %1348 = vst.msk [vmem:[%s13527_s30 + $0x1b0] sm:$0xff] %vm972_vm1, %v1283_v59 }
 0x20a   : > { %1341 = vst.msk [vmem:[%s13527_s30 + $0x178] sm:$0xff] %vm972_vm1, %v1276_v42  ;;  %v1206_v57 = vpop.xlane.xlu0 %1205  ;;  %v12224_v42 = vld [vmem:[%s17316_s2 + $0x300] ss:$16 sps:$4 sm:$0xff]  }
 0x20b   : > { %7208 = vmatmul.mubr.bf16.gmra.mrb[124].mxu0 %v12219_v36  ;;  %v1192_v8 = vpop.xlane.xlu1 %1191  ;;  %v1281_v12 = vadd.f32 %v1206_v57, %v1089_v2  ;;  %2910 = vperm.xlu1 %12067, %v2052_v31   ;;  %v2059_v36 = vld [vmem:[%s17317_s3 + $0x4e8] sm:$0xff]  ;;  %v12226_v2 = vld [vmem:[%s17316_s2 + $0x324] ss:$16 sps:$4 sm:$0xff]  }
 0x20c   : > { %v1274_v16 = vadd.f32 %v1192_v8, %v1082_v33  ;;  %7215 = vmatprep.mubr.bf16.mxu0 %v12222_v23  ;;  %2935 = vperm.xlu0 %12066, %v2057_v25   ;;  %v12228_v31 = vld [vmem:[%s17316_s2 + $0x22c] ss:$16 sps:$4 sm:$0xff]   ;;  %v1093_v57 = vld [vmem:[%s13527_s30 + $0x1c0] sm:$0xff] }
 0x20d   : > { %1346 = vst.msk [vmem:[%s13527_s30 + $0x1a0] sm:$0xff] %vm972_vm1, %v1281_v12  ;;  %v1086_v8 = vld [vmem:[%s13527_s30 + $0x188] sm:$0xff]  ;;  %v2061_v12 = vld [vmem:[%s17317_s3 + $0x4f8] sm:$0xff] }
 0x20e   : > { %6215 = vmatmul.mubr.bf16.gmra.mrb[92].mxu1 %v12218_v21  ;;  %1339 = vst.msk [vmem:[%s13527_s30 + $0x168] sm:$0xff] %vm972_vm1, %v1274_v16  ;;  %v2054_v21 = vld [vmem:[%s17317_s3 + $0x4c0] sm:$0xff]  ;;  %v1218_v59 = vpop.xlane.xlu0 %1217  ;;  %v2056_v16 = vld [vmem:[%s17317_s3 + $0x4d0] sm:$0xff] }
 0x20f   : > { %6222 = vmatprep.mubr.bf16.mxu1 %v12220_v47  ;;  %v12225_v47 = vld [vmem:[%s17316_s2 + $0x208] ss:$16 sps:$4 sm:$0xff]   ;;  %v1204_v23 = vpop.xlane.xlu1 %1203  ;;  %v1287_v25 = vadd.f32 %v1218_v59, %v1095_v63  ;;  %2920 = vperm.xlu1 %12067, %v2054_v21   ;;  %v1099_v59 = vld [vmem:[%s13527_s30 + $0x1f0] sm:$0xff] }
 0x210   : > { %v1280_v33 = vadd.f32 %v1204_v23, %v1088_v28  ;;  %2945 = vperm.xlu0 %12066, %v2059_v36   ;;  %v1092_v23 = vld [vmem:[%s13527_s30 + $0x1b8] sm:$0xff] }
 0x211   : > { %1352 = vst.msk [vmem:[%s13527_s30 + $0x1d0] sm:$0xff] %vm972_vm1, %v1287_v25 }
 0x212   : > { %1345 = vst.msk [vmem:[%s13527_s30 + $0x198] sm:$0xff] %vm972_vm1, %v1280_v33  ;;  %v1214_v63 = vpop.xlane.xlu0 %1213  ;;  %v12230_v33 = vld [vmem:[%s17316_s2 + $0x320] ss:$16 sps:$4 sm:$0xff]  }
 0x213   : > { %7216 = vmatmul.mubr.bf16.gmra.mrb[128].mxu0 %v12225_v47  ;;  %v1200_v28 = vpop.xlane.xlu1 %1199  ;;  %v1285_v36 = vadd.f32 %v1214_v63, %v1093_v57  ;;  %2930 = vperm.xlu1 %12067, %v2056_v16   ;;  %v2063_v47 = vld [vmem:[%s17317_s3 + $0x508] sm:$0xff]  ;;  %v1097_v63 = vld [vmem:[%s13527_s30 + $0x1e0] sm:$0xff] }
 0x214   : > { %7223 = vmatprep.mubr.bf16.mxu0 %v12228_v31  ;;  %v1278_v21 = vadd.f32 %v1200_v28, %v1086_v8  ;;  %2955 = vperm.xlu0 %12066, %v2061_v12   ;;  %v12232_v8 = vld [vmem:[%s17316_s2 + $0x344] ss:$16 sps:$4 sm:$0xff]   ;;  %v12234_v57 = vld [vmem:[%s17316_s2 + $0x24c] ss:$16 sps:$4 sm:$0xff]  }
 0x215   : > { %1350 = vst.msk [vmem:[%s13527_s30 + $0x1c0] sm:$0xff] %vm972_vm1, %v1285_v36  ;;  %v1090_v28 = vld [vmem:[%s13527_s30 + $0x1a8] sm:$0xff]  ;;  %v2065_v36 = vld [vmem:[%s17317_s3 + $0x518] sm:$0xff] }
 0x216   : > { %6223 = vmatmul.mubr.bf16.gmra.mrb[96].mxu1 %v12224_v42  ;;  %1343 = vst.msk [vmem:[%s13527_s30 + $0x188] sm:$0xff] %vm972_vm1, %v1278_v21  ;;  %v2058_v42 = vld [vmem:[%s17317_s3 + $0x4e0] sm:$0xff]  ;;  %v1226_v25 = vpop.xlane.xlu0 %1225  ;;  %v2060_v21 = vld [vmem:[%s17317_s3 + $0x4f0] sm:$0xff] }
 0x217   : > { %6230 = vmatprep.mubr.bf16.mxu1 %v12226_v2  ;;  %v12231_v2 = vld [vmem:[%s17316_s2 + $0x228] ss:$16 sps:$4 sm:$0xff]   ;;  %v1212_v31 = vpop.xlane.xlu1 %1211  ;;  %v1291_v12 = vadd.f32 %v1226_v25, %v1099_v59  ;;  %2940 = vperm.xlu1 %12067, %v2058_v42   ;;  %v12236_v25 = vld [vmem:[%s17316_s2 + $0x340] ss:$16 sps:$4 sm:$0xff]  }
 0x218   : > { %v1284_v16 = vadd.f32 %v1212_v31, %v1092_v23  ;;  %2965 = vperm.xlu0 %12066, %v2063_v47   ;;  %v1096_v31 = vld [vmem:[%s13527_s30 + $0x1d8] sm:$0xff] }
 0x219   : > { %1356 = vst.msk [vmem:[%s13527_s30 + $0x1f0] sm:$0xff] %vm972_vm1, %v1291_v12  ;;  %v12240_v12 = vld [vmem:[%s17316_s2 + $0x26c] ss:$16 sps:$4 sm:$0xff]  }
 0x21a   : > { %1349 = vst.msk [vmem:[%s13527_s30 + $0x1b8] sm:$0xff] %vm972_vm1, %v1284_v16  ;;  %v1222_v59 = vpop.xlane.xlu0 %1221  ;;  %v12238_v16 = vld [vmem:[%s17316_s2 + $0x364] ss:$16 sps:$4 sm:$0xff]  }
 0x21b   : > { %7224 = vmatmul.mubr.bf16.gmra.mrb[132].mxu0 %v12231_v2  ;;  %v1208_v23 = vpop.xlane.xlu1 %1207  ;;  %v1289_v47 = vadd.f32 %v1222_v59, %v1097_v63  ;;  %2950 = vperm.xlu1 %12067, %v2060_v21   ;;  %v2067_v2 = vld [vmem:[%s17317_s3 + $0x528] sm:$0xff]  ;;  %v2064_v21 = vld [vmem:[%s17317_s3 + $0x510] sm:$0xff] }
 0x21c   : > { %7231 = vmatprep.mubr.bf16.mxu0 %v12234_v57  ;;  %v1282_v42 = vadd.f32 %v1208_v23, %v1090_v28  ;;  %2975 = vperm.xlu0 %12066, %v2065_v36   ;;  %v1094_v63 = vld [vmem:[%s13527_s30 + $0x1c8] sm:$0xff]  ;;  %v2069_v36 = vld [vmem:[%s17317_s3 + $0x538] sm:$0xff] }
 0x21d   : > { %1354 = vst.msk [vmem:[%s13527_s30 + $0x1e0] sm:$0xff] %vm972_vm1, %v1289_v47  ;;  %v1100_v47 = vld [vmem:[%s13527_s30 + $0x1f8] sm:$0xff] }
 0x21e   : > { %6231 = vmatmul.mubr.bf16.gmra.mrb[100].mxu1 %v12230_v33  ;;  %1347 = vst.msk [vmem:[%s13527_s30 + $0x1a8] sm:$0xff] %vm972_vm1, %v1282_v42  ;;  %v2062_v33 = vld [vmem:[%s17317_s3 + $0x500] sm:$0xff] }
 0x21f   : > { %6238 = vmatprep.mubr.bf16.mxu1 %v12232_v8  ;;  %v12237_v8 = vld [vmem:[%s17316_s2 + $0x248] ss:$16 sps:$4 sm:$0xff]   ;;  %v1220_v57 = vpop.xlane.xlu1 %1219  ;;  %2960 = vperm.xlu1 %12067, %v2062_v33   ;;  %v14633_v42 = vpop.permute.xlu0 %2675  ;;  %v2066_v33 = vld [vmem:[%s17317_s3 + $0x520] sm:$0xff] }
 0x220   : > { %v1288_v28 = vadd.f32 %v1220_v57, %v1096_v31  ;;  %2985 = vperm.xlu0 %12066, %v2067_v2   ;;  %17423 = vst [vmem:[#allocation70_spill] sm:$0xff] %v14633_v42  ;;  %v2071_v2 = vld [vmem:[%s17317_s3 + $0x548] sm:$0xff]  ;;  %v2073_v42 = vld [vmem:[%s17317_s3 + $0x558] sm:$0xff] }
 0x222   : > { %1353 = vst.msk [vmem:[%s13527_s30 + $0x1d8] sm:$0xff] %vm972_vm1, %v1288_v28  ;;  %v12246_v28 = vld [vmem:[%s17316_s2 + $0x28c] ss:$16 sps:$4 sm:$0xff]  }
 0x223   : > { %7232 = vmatmul.mubr.bf16.gmra.mrb[136].mxu0 %v12237_v8  ;;  %v1216_v23 = vpop.xlane.xlu1 %1215  ;;  %2970 = vperm.xlu1 %12067, %v2064_v21   ;;  %v12243_v8 = vld [vmem:[%s17316_s2 + $0x268] ss:$16 sps:$4 sm:$0xff]  }
 0x224   : > { %7239 = vmatprep.mubr.bf16.mxu0 %v12240_v12  ;;  %v1286_v59 = vadd.f32 %v1216_v23, %v1094_v63  ;;  %2995 = vperm.xlu0 %12066, %v2069_v36   ;;  %v12244_v12 = vld [vmem:[%s17316_s2 + $0x384] ss:$16 sps:$4 sm:$0xff]   ;;  %v14660_v36 = vpop.permute.xlu0 %2685  ;;  %v1098_v23 = vld [vmem:[%s13527_s30 + $0x1e8] sm:$0xff] }
 0x225   : > { %17424 = vst [vmem:[#allocation71_spill] sm:$0xff] %v14660_v36 }
 0x226   : > { %6239 = vmatmul.mubr.bf16.gmra.mrb[104].mxu1 %v12236_v25  ;;  %1351 = vst.msk [vmem:[%s13527_s30 + $0x1c8] sm:$0xff] %vm972_vm1, %v1286_v59  ;;  %v12242_v25 = vld [vmem:[%s17316_s2 + $0x360] ss:$16 sps:$4 sm:$0xff]  }
 0x227   : > { %6246 = vmatprep.mubr.bf16.mxu1 %v12238_v16  ;;  %v1228_v57 = vpop.xlane.xlu1 %1227  ;;  %2980 = vperm.xlu1 %12067, %v2066_v33  }
 0x228   : > { %v1292_v63 = vadd.f32 %v1228_v57, %v1100_v47  ;;  %3005 = vperm.xlu0 %12066, %v2071_v2   ;;  %v14671_v36 = vpop.permute.xlu0 %2695  ;;  %v2070_v2 = vld [vmem:[%s17317_s3 + $0x540] sm:$0xff] }
 0x229   : > { %v14638_v31 = vpop.f32.mrb[0].mxu1  ;;  %17425 = vst [vmem:[#allocation72_spill] sm:$0xff] %v14671_v36 }
 0x22a   : > { %v6034_v16 = vpop.f32.mrb[1].mxu1  ;;  %1357 = vst.msk [vmem:[%s13527_s30 + $0x1f8] sm:$0xff] %vm972_vm1, %v1292_v63  ;;  %v12250_v63 = vld [vmem:[%s17316_s2 + $0x3a4] ss:$16 sps:$4 sm:$0xff]   ;;  %v6033_v14 = vadd.f32 %v14638_v31, %v13277_v40 }
 0x22b   : > { %v14658_v21 = vpop.f32.mrb[2].mxu1  ;;  %v2068_v16 = vld [vmem:[%s17317_s3 + $0x530] sm:$0xff]  ;;  %7240 = vmatmul.mubr.bf16.gmra.mrb[140].mxu0 %v12243_v8  ;;  %v1224_v47 = vpop.xlane.xlu1 %1223 }
 0x22c   : > { %v6037_v59 = vpop.f32.mrb[3].mxu1  ;;  %7247 = vmatprep.mubr.bf16.mxu0 %v12246_v28  ;;  %v1290_v57 = vadd.f32 %v1224_v47, %v1098_v23  ;;  %2990 = vperm.xlu1 %12067, %v2068_v16   ;;  %v12248_v8 = vld [vmem:[%s17316_s2 + $0x380] ss:$16 sps:$4 sm:$0xff]   ;;  %v12252_v23 = vld [vmem:[%s17316_s2 + $0x2ac] ss:$16 sps:$4 sm:$0xff]   ;;  %v6036_v40 = vadd.f32 %v14658_v21, %v13275_v39 }
 0x22d   : > { %3015 = vperm.xlu0 %12066, %v2073_v42   ;;  %v12249_v42 = vld [vmem:[%s17316_s2 + $0x288] ss:$16 sps:$4 sm:$0xff]   ;;  %v12294_v39 = vld [vmem:[%s17316_s2 + $0x38c] ss:$16 sps:$4 sm:$0xff]  }
 0x22e   : > { %6247 = vmatmul.mubr.bf16.gmra.mrb[108].mxu1 %v12242_v25  ;;  %1355 = vst.msk [vmem:[%s13527_s30 + $0x1e8] sm:$0xff] %vm972_vm1, %v1290_v57  ;;  %v2075_v25 = vld [vmem:[%s17317_s3 + $0x568] sm:$0xff]  ;;  %v14699_v16 = vpop.permute.xlu0 %2705  ;;  %v2072_v57 = vld [vmem:[%s17317_s3 + $0x550] sm:$0xff] }
 0x22f   : > { %6254 = vmatprep.mubr.bf16.mxu1 %v12244_v12  ;;  %v14689_v28 = vpop.permute.xlu1 %2680  ;;  %17427 = vst [vmem:[#allocation74_spill] sm:$0xff] %v14699_v16 }
 0x230   : > { %17426 = vst [vmem:[#allocation73_spill] sm:$0xff] %v14689_v28  ;;  %3000 = vperm.xlu1 %12067, %v2070_v2  }
 0x231   : > { %v14675_v33 = vpop.f32.mrb[4].mxu1  ;;  %3025 = vperm.xlu0 %12066, %v2075_v25   ;;  %v2074_v25 = vld [vmem:[%s17317_s3 + $0x560] sm:$0xff] }
 0x232   : > { %v6042_v12 = vpop.f32.mrb[5].mxu1  ;;  %v14709_v28 = vpop.permute.xlu0 %2715 }
 0x233   : > { %v14697_v59 = vpop.f32.mrb[6].mxu1  ;;  %v2077_v12 = vld [vmem:[%s17317_s3 + $0x578] sm:$0xff]  ;;  %7248 = vmatmul.mubr.bf16.gmra.mrb[144].mxu0 %v12249_v42  ;;  %v14707_v36 = vpop.permute.xlu1 %2690  ;;  %17429 = vst [vmem:[#allocation76_spill] sm:$0xff] %v14709_v28 }
 0x234   : > { %v6045_v47 = vpop.f32.mrb[7].mxu1  ;;  %7255 = vmatprep.mubr.bf16.mxu0 %v12252_v23  ;;  %17428 = vst [vmem:[#allocation75_spill] sm:$0xff] %v14707_v36  ;;  %3010 = vperm.xlu1 %12067, %v2072_v57   ;;  %v12255_v42 = vld [vmem:[%s17316_s2 + $0x2a8] ss:$16 sps:$4 sm:$0xff]   ;;  %v12256_v23 = vld [vmem:[%s17316_s2 + $0x3c4] ss:$16 sps:$4 sm:$0xff]  }
 0x235   : > { %3035 = vperm.xlu0 %12066, %v2077_v12   ;;  %v2079_v47 = vld [vmem:[%s17317_s3 + $0x588] sm:$0xff] }
 0x236   : > { %6255 = vmatmul.mubr.bf16.gmra.mrb[112].mxu1 %v12248_v8  ;;  %v12254_v8 = vld [vmem:[%s17316_s2 + $0x3a0] ss:$16 sps:$4 sm:$0xff]   ;;  %v12258_v57 = vld [vmem:[%s17316_s2 + $0x2cc] ss:$16 sps:$4 sm:$0xff]  }
 0x237   : > { %6262 = vmatprep.mubr.bf16.mxu1 %v12250_v63  ;;  %v14733_v28 = vpop.permute.xlu1 %2700  ;;  %v14735_v36 = vpop.permute.xlu0 %2725 }
 0x238   : > { %17430 = vst [vmem:[#allocation77_spill] sm:$0xff] %v14733_v28  ;;  %3020 = vperm.xlu1 %12067, %v2074_v25   ;;  %17431 = vst [vmem:[#allocation78_spill] sm:$0xff] %v14735_v36  ;;  %v2078_v25 = vld [vmem:[%s17317_s3 + $0x580] sm:$0xff] }
 0x239   : > { %v14711_v2 = vpop.f32.mrb[8].mxu1  ;;  %3045 = vperm.xlu0 %12066, %v2079_v47   ;;  %v2083_v47 = vld [vmem:[%s17317_s3 + $0x5a8] sm:$0xff] }
 0x23a   : > { %v6050_v63 = vpop.f32.mrb[9].mxu1 }
 0x23b   : > { %v14731_v12 = vpop.f32.mrb[10].mxu1  ;;  %v2076_v63 = vld [vmem:[%s17317_s3 + $0x570] sm:$0xff]  ;;  %7256 = vmatmul.mubr.bf16.gmra.mrb[148].mxu0 %v12255_v42  ;;  %v14743_v6 = vpop.permute.xlu1 %2710  ;;  %v12261_v42 = vld [vmem:[%s17316_s2 + $0x2c8] ss:$16 sps:$4 sm:$0xff]  }
 0x23c   : > { %v6053_v16 = vpop.f32.mrb[11].mxu1  ;;  %7263 = vmatprep.mubr.bf16.mxu0 %v12258_v57  ;;  %17432 = vst [vmem:[#allocation79_spill] sm:$0xff] %v14743_v6  ;;  %3030 = vperm.xlu1 %12067, %v2076_v63   ;;  %v12262_v57 = vld [vmem:[%s17316_s2 + $0x3e4] ss:$16 sps:$4 sm:$0xff]   ;;  %v12264_v63 = vld [vmem:[%s17316_s2 + $0x2ec] ss:$16 sps:$4 sm:$0xff]  }
 0x23d   : > { %3055 = vperm.xlu0 %12066, %v2081_v29   ;;  %v14759_v29 = vpop.permute.xlu0 %2735 }
 0x23e   : > { %6263 = vmatmul.mubr.bf16.gmra.mrb[116].mxu1 %v12254_v8  ;;  %v12260_v8 = vld [vmem:[%s17316_s2 + $0x3c0] ss:$16 sps:$4 sm:$0xff]   ;;  %17433 = vst [vmem:[#allocation80_spill] sm:$0xff] %v14759_v29  ;;  %v2085_v29 = vld [vmem:[%s17317_s3 + $0x5b8] sm:$0xff] }
 0x23f   : > { %6270 = vmatprep.mubr.bf16.mxu1 %v12256_v23  ;;  %v14769_v6 = vpop.permute.xlu1 %2720 }
 0x240   : > { %17434 = vst [vmem:[#allocation81_spill] sm:$0xff] %v14769_v6  ;;  %3040 = vperm.xlu1 %12067, %v2078_v25  }
 0x241   : > { %v14745_v16 = vpop.f32.mrb[12].mxu1  ;;  %3065 = vperm.xlu0 %12066, %v2083_v47   ;;  %v14784_v25 = vpop.permute.xlu0 %2745  ;;  %v2087_v47 = vld [vmem:[%s17317_s3 + $0x5c8] sm:$0xff] }
 0x242   : > { %v6058_v23 = vpop.f32.mrb[13].mxu1  ;;  %17436 = vst [vmem:[#allocation83_spill] sm:$0xff] %v14784_v25 }
 0x243   : > { %v14767_v36 = vpop.f32.mrb[14].mxu1  ;;  %v2080_v23 = vld [vmem:[%s17317_s3 + $0x590] sm:$0xff]  ;;  %7264 = vmatmul.mubr.bf16.gmra.mrb[152].mxu0 %v12261_v42  ;;  %v14777_v37 = vpop.permute.xlu1 %2730  ;;  %v12267_v42 = vld [vmem:[%s17316_s2 + $0x2e8] ss:$16 sps:$4 sm:$0xff]  }
 0x244   : > { %v6061_v28 = vpop.f32.mrb[15].mxu1  ;;  %7271 = vmatprep.mubr.bf16.mxu0 %v12264_v63  ;;  %17435 = vst [vmem:[#allocation82_spill] sm:$0xff] %v14777_v37  ;;  %3050 = vperm.xlu1 %12067, %v2080_v23   ;;  %v12270_v63 = vld [vmem:[%s17316_s2 + $0x30c] ss:$16 sps:$4 sm:$0xff]  }
 0x245   : > { %3075 = vperm.xlu0 %12066, %v2085_v29   ;;  %v2082_v28 = vld [vmem:[%s17317_s3 + $0x5a0] sm:$0xff]  ;;  %v14811_v1 = vpop.permute.xlu0 %2755 }
 0x246   : > { %6271 = vmatmul.mubr.bf16.gmra.mrb[120].mxu1 %v12260_v8  ;;  %v12266_v8 = vld [vmem:[%s17316_s2 + $0x3e0] ss:$16 sps:$4 sm:$0xff]   ;;  %17438 = vst [vmem:[#allocation85_spill] sm:$0xff] %v14811_v1 }
 0x247   : > { %6278 = vmatprep.mubr.bf16.mxu1 %v12262_v57  ;;  %v12268_v57 = vld [vmem:[%s17316_s2 + $0x404] ss:$16 sps:$4 sm:$0xff]   ;;  %v14803_v25 = vpop.permute.xlu1 %2740 }
 0x248   : > { %17437 = vst [vmem:[#allocation84_spill] sm:$0xff] %v14803_v25  ;;  %3060 = vperm.xlu1 %12067, %v2082_v28   ;;  %v2086_v28 = vld [vmem:[%s17317_s3 + $0x5c0] sm:$0xff] }
 0x249   : > { %v14779_v6 = vpop.f32.mrb[16].mxu1  ;;  %3085 = vperm.xlu0 %12066, %v2087_v47   ;;  %v2091_v47 = vld [vmem:[%s17317_s3 + $0x5e8] sm:$0xff]  ;;  %v14840_v25 = vpop.permute.xlu0 %2765 }
 0x24a   : > { %v6066_v29 = vpop.f32.mrb[17].mxu1  ;;  %17440 = vst [vmem:[#allocation87_spill] sm:$0xff] %v14840_v25 }
 0x24b   : > { %v14801_v23 = vpop.f32.mrb[18].mxu1  ;;  %v2089_v29 = vld [vmem:[%s17317_s3 + $0x5d8] sm:$0xff]  ;;  %7272 = vmatmul.mubr.bf16.gmra.mrb[156].mxu0 %v12267_v42  ;;  %v14813_v20 = vpop.permute.xlu1 %2750 }
 0x24c   : > { %v6069_v37 = vpop.f32.mrb[19].mxu1  ;;  %7279 = vmatprep.mubr.bf16.mxu0 %v12270_v63  ;;  %17439 = vst [vmem:[#allocation86_spill] sm:$0xff] %v14813_v20  ;;  %3070 = vperm.xlu1 %12067, %v2084_v53   ;;  %v12273_v42 = vld [vmem:[%s17316_s2 + $0x308] ss:$16 sps:$4 sm:$0xff]   ;;  %v12276_v63 = vld [vmem:[%s17316_s2 + $0x32c] ss:$16 sps:$4 sm:$0xff]  }
 0x24d   : > { %3095 = vperm.xlu0 %12066, %v2089_v29   ;;  %v2088_v20 = vld [vmem:[%s17317_s3 + $0x5d0] sm:$0xff]  ;;  %v14869_v25 = vpop.permute.xlu0 %2775 }
 0x24e   : > { %6279 = vmatmul.mubr.bf16.gmra.mrb[124].mxu1 %v12266_v8  ;;  %v12272_v8 = vld [vmem:[%s17316_s2 + $0x400] ss:$16 sps:$4 sm:$0xff]   ;;  %17442 = vst [vmem:[#allocation89_spill] sm:$0xff] %v14869_v25 }
 0x24f   : > { %6286 = vmatprep.mubr.bf16.mxu1 %v12268_v57  ;;  %v12274_v57 = vld [vmem:[%s17316_s2 + $0x424] ss:$16 sps:$4 sm:$0xff]   ;;  %v14845_v51 = vpop.permute.xlu1 %2760 }
 0x250   : > { %3080 = vperm.xlu1 %12067, %v2086_v28   ;;  %17441 = vst [vmem:[#allocation88_spill] sm:$0xff] %v14845_v51  ;;  %v2090_v28 = vld [vmem:[%s17317_s3 + $0x5e0] sm:$0xff] }
 0x251   : > { %v14815_v37 = vpop.f32.mrb[20].mxu1  ;;  %3105 = vperm.xlu0 %12066, %v2091_v47   ;;  %v2095_v47 = vld [vmem:[%s17317_s3 + $0x608] sm:$0xff] }
 0x252   : > { %v6074_v53 = vpop.f32.mrb[21].mxu1 }
 0x253   : > { %v14835_v29 = vpop.f32.mrb[22].mxu1  ;;  %v2093_v53 = vld [vmem:[%s17317_s3 + $0x5f8] sm:$0xff]  ;;  %7280 = vmatmul.mubr.bf16.gmra.mrb[160].mxu0 %v12273_v42  ;;  %v14871_v18 = vpop.permute.xlu1 %2770 }
 0x254   : > { %v6077_v1 = vpop.f32.mrb[23].mxu1  ;;  %7287 = vmatprep.mubr.bf16.mxu0 %v12276_v63  ;;  %3090 = vperm.xlu1 %12067, %v2088_v20   ;;  %v12279_v42 = vld [vmem:[%s17316_s2 + $0x328] ss:$16 sps:$4 sm:$0xff]   ;;  %v12282_v63 = vld [vmem:[%s17316_s2 + $0x34c] ss:$16 sps:$4 sm:$0xff]   ;;  %17443 = vst [vmem:[#allocation90_spill] sm:$0xff] %v14871_v18 }
 0x255   : > { %3115 = vperm.xlu0 %12066, %v2093_v53  }
 0x256   : > { %6287 = vmatmul.mubr.bf16.gmra.mrb[128].mxu1 %v12272_v8  ;;  %v12278_v8 = vld [vmem:[%s17316_s2 + $0x420] ss:$16 sps:$4 sm:$0xff]  }
 0x257   : > { %6294 = vmatprep.mubr.bf16.mxu1 %v12274_v57  ;;  %v12280_v57 = vld [vmem:[%s17316_s2 + $0x444] ss:$16 sps:$4 sm:$0xff]  }
 0x258   : > { %3100 = vperm.xlu1 %12067, %v2090_v28   ;;  %v14884_v28 = vpop.permute.xlu0 %2785 }
 0x259   : > { %v14847_v1 = vpop.f32.mrb[24].mxu1  ;;  %3125 = vperm.xlu0 %12066, %v2095_v47   ;;  %17444 = vst [vmem:[#allocation91_spill] sm:$0xff] %v14884_v28  ;;  %v2099_v47 = vld [vmem:[%s17317_s3 + $0x628] sm:$0xff] }
 0x25a   : > { %v6082_v20 = vpop.f32.mrb[25].mxu1 }
 0x25b   : > { %v14867_v53 = vpop.f32.mrb[26].mxu1  ;;  %v2092_v20 = vld [vmem:[%s17317_s3 + $0x5f0] sm:$0xff]  ;;  %7288 = vmatmul.mubr.bf16.gmra.mrb[164].mxu0 %v12279_v42 }
 0x25c   : > { %v6085_v51 = vpop.f32.mrb[27].mxu1  ;;  %7295 = vmatprep.mubr.bf16.mxu0 %v12282_v63  ;;  %3110 = vperm.xlu1 %12067, %v2092_v20   ;;  %v12286_v63 = vld [vmem:[%s17316_s2 + $0x464] ss:$16 sps:$4 sm:$0xff]   ;;  %v12288_v20 = vld [vmem:[%s17316_s2 + $0x36c] ss:$16 sps:$4 sm:$0xff]  }
 0x25d   : > { %3135 = vperm.xlu0 %12066, %v2097_v46   ;;  %v2094_v51 = vld [vmem:[%s17317_s3 + $0x600] sm:$0xff]  ;;  %v12285_v46 = vld [vmem:[%s17316_s2 + $0x348] ss:$16 sps:$4 sm:$0xff]  }
 0x25e   : > { %6295 = vmatmul.mubr.bf16.gmra.mrb[132].mxu1 %v12278_v8  ;;  %v12284_v8 = vld [vmem:[%s17316_s2 + $0x440] ss:$16 sps:$4 sm:$0xff]  }
 0x25f   : > { %6302 = vmatprep.mubr.bf16.mxu1 %v12280_v57  ;;  %v14895_v57 = vpop.permute.xlu1 %2780 }
 0x260   : > { %17445 = vst [vmem:[#allocation92_spill] sm:$0xff] %v14895_v57  ;;  %3120 = vperm.xlu1 %12067, %v2094_v51   ;;  %v2101_v57 = vld [vmem:[%s17317_s3 + $0x638] sm:$0xff] }
 0x261   : > { %v14879_v25 = vpop.f32.mrb[28].mxu1  ;;  %3145 = vperm.xlu0 %12066, %v2099_v47  }
 0x262   : > { %v6090_v42 = vpop.f32.mrb[29].mxu1 }
 0x263   : > { %v14903_v28 = vpop.f32.mrb[30].mxu1  ;;  %v2096_v42 = vld [vmem:[%s17317_s3 + $0x610] sm:$0xff]  ;;  %7296 = vmatmul.mubr.bf16.gmra.mrb[168].mxu0 %v12285_v46  ;;  %v14913_v41 = vpop.permute.xlu1 %2790  ;;  %v2103_v46 = vld [vmem:[%s17317_s3 + $0x648] sm:$0xff] }
 0x264   : > { %v6093_v18 = vpop.f32.mrb[31].mxu1  ;;  %7303 = vmatprep.mubr.bf16.mxu0 %v12288_v20  ;;  %17446 = vst [vmem:[#allocation93_spill] sm:$0xff] %v14913_v41  ;;  %3130 = vperm.xlu1 %12067, %v2096_v42   ;;  %v12291_v20 = vld [vmem:[%s17316_s2 + $0x368] ss:$16 sps:$4 sm:$0xff]   ;;  %v12292_v41 = vld [vmem:[%s17316_s2 + $0x484] ss:$16 sps:$4 sm:$0xff]  }
 0x265   : > { %v14915_v18 = vpop.permute.xlu0 %2795  ;;  %3155 = vperm.xlu0 %12066, %v2101_v57   ;;  %v12290_v57 = vld [vmem:[%s17316_s2 + $0x460] ss:$16 sps:$4 sm:$0xff]  }
 0x266   : > { %6303 = vmatmul.mubr.bf16.gmra.mrb[136].mxu1 %v12284_v8  ;;  %17447 = vst [vmem:[#allocation94_spill] sm:$0xff] %v14915_v18  ;;  %v7089_v51 = vpop.f32.mrb[64].mxu0  ;;  %v2098_v8 = vld [vmem:[%s17317_s3 + $0x620] sm:$0xff] }
 0x267   : > { %6310 = vmatprep.mubr.bf16.mxu1 %v12286_v63  ;;  %v7090_v31 = vadd.f32 %v7089_v51, %v6033_v14  ;;  %v7091_v63 = vpop.f32.mrb[65].mxu0 }
 0x268   : > { %v7092_v18 = vpop.f32.mrb[66].mxu0  ;;  %3140 = vperm.xlu1 %12067, %v2098_v8   ;;  %v14956_v8 = vpop.permute.xlu1 %2800 }
 0x269   : > { %v14918_v47 = vpop.f32.mrb[32].mxu1  ;;  %v7093_v21 = vadd.f32 %v7092_v18, %v6036_v40  ;;  %v7094_v51 = vpop.f32.mrb[67].mxu0  ;;  %3165 = vperm.xlu0 %12066, %v2103_v46   ;;  %v6041_v18 = vadd.f32 %v14675_v33, %v13286_v43  ;;  %v6044_v43 = vadd.f32 %v14697_v59, %v13300_v48  ;;  %v12300_v48 = vld [vmem:[%s17316_s2 + $0x3ac] ss:$16 sps:$4 sm:$0xff]  }
 0x26a   : > { %v6098_v42 = vpop.f32.mrb[33].mxu1  ;;  %v14958_v46 = vpop.permute.xlu0 %2805 }
 0x26b   : > { %v14940_v14 = vpop.f32.mrb[34].mxu1  ;;  %v2100_v42 = vld [vmem:[%s17317_s3 + $0x630] sm:$0xff]  ;;  %v10616_v35 = vpack.c.bf16 %v7093_v21, %v7090_v31  ;;  %7304 = vmatmul.mubr.bf16.gmra.mrb[172].mxu0 %v12291_v20  ;;  %v2102_v31 = vld [vmem:[%s17317_s3 + $0x640] sm:$0xff] }
 0x26c   : > { %v6101_v63 = vpop.f32.mrb[35].mxu1  ;;  %7311 = vmatprep.mubr.bf16.mxu0 %v12294_v39  ;;  %3150 = vperm.xlu1 %12067, %v2100_v42   ;;  %v12298_v21 = vld [vmem:[%s17316_s2 + $0x4a4] ss:$16 sps:$4 sm:$0xff]  }
 0x26d   : > { %10617 = vst [vmem:[%s14945_s22] sm:$0xff] %v10616_v35   ;;  %3175 = vperm.xlu0 %12066, %v2105_v10   ;;  %v12296_v10 = vld [vmem:[%s17316_s2 + $0x480] ss:$16 sps:$4 sm:$0xff]  }
 0x26e   : > { %6311 = vmatmul.mubr.bf16.gmra.mrb[140].mxu1 %v12290_v57  ;;  %v7097_v40 = vpop.f32.mrb[68].mxu0  ;;  %v12297_v57 = vld [vmem:[%s17316_s2 + $0x388] ss:$16 sps:$4 sm:$0xff]  }
 0x26f   : > { %6318 = vmatprep.mubr.bf16.mxu1 %v12292_v41  ;;  %v2107_v41 = vld [vmem:[%s17317_s3 + $0x668] sm:$0xff]  ;;  %v7098_v35 = vadd.f32 %v7097_v40, %v6041_v18  ;;  %v7099_v33 = vpop.f32.mrb[69].mxu0  ;;  %v2104_v40 = vld [vmem:[%s17317_s3 + $0x650] sm:$0xff] }
 0x270   : > { %v7100_v39 = vpop.f32.mrb[70].mxu0  ;;  %3160 = vperm.xlu1 %12067, %v2102_v31   ;;  %v2109_v33 = vld [vmem:[%s17317_s3 + $0x678] sm:$0xff]  ;;  %v14995_v31 = vpop.permute.xlu0 %2815 }
 0x271   : > { %v14960_v51 = vpop.f32.mrb[36].mxu1  ;;  %v7101_v63 = vadd.f32 %v7100_v39, %v6044_v43  ;;  %v7102_v42 = vpop.f32.mrb[71].mxu0  ;;  %3185 = vperm.xlu0 %12066, %v2107_v41   ;;  %v6049_v43 = vadd.f32 %v14711_v2, %v13311_v52  ;;  %v6052_v52 = vadd.f32 %v14731_v12, %v13321_v56  ;;  %v12306_v56 = vld [vmem:[%s17316_s2 + $0x3cc] ss:$16 sps:$4 sm:$0xff]  }
 0x272   : > { %v6106_v20 = vpop.f32.mrb[37].mxu1  ;;  %v14993_v39 = vpop.permute.xlu1 %2810 }
 0x273   : > { %v14982_v59 = vpop.f32.mrb[38].mxu1  ;;  %v10621_v20 = vpack.c.bf16 %v7101_v63, %v7098_v35  ;;  %7312 = vmatmul.mubr.bf16.gmra.mrb[176].mxu0 %v12297_v57  ;;  %v2106_v35 = vld [vmem:[%s17317_s3 + $0x660] sm:$0xff] }
 0x274   : > { %v6109_v18 = vpop.f32.mrb[39].mxu1  ;;  %7319 = vmatprep.mubr.bf16.mxu0 %v12300_v48  ;;  %3170 = vperm.xlu1 %12067, %v2104_v40   ;;  %v12303_v48 = vld [vmem:[%s17316_s2 + $0x3a8] ss:$16 sps:$4 sm:$0xff]   ;;  %v12304_v40 = vld [vmem:[%s17316_s2 + $0x4c4] ss:$16 sps:$4 sm:$0xff]  }
 0x275   : > { %11253 = vst [vmem:[%s14945_s22 + $0x8] sm:$0xff] %v10621_v20   ;;  %3195 = vperm.xlu0 %12066, %v2109_v33  }
 0x276   : > { %6319 = vmatmul.mubr.bf16.gmra.mrb[144].mxu1 %v12296_v10  ;;  %v7105_v41 = vpop.f32.mrb[72].mxu0  ;;  %v2111_v10 = vld [vmem:[%s17317_s3 + $0x688] sm:$0xff] }
 0x277   : > { %6326 = vmatprep.mubr.bf16.mxu1 %v12298_v21  ;;  %v7106_v2 = vadd.f32 %v7105_v41, %v6049_v43  ;;  %v7107_v57 = vpop.f32.mrb[73].mxu0  ;;  %v12302_v21 = vld [vmem:[%s17316_s2 + $0x4a0] ss:$16 sps:$4 sm:$0xff]  }
 0x278   : > { %v7108_v18 = vpop.f32.mrb[74].mxu0  ;;  %3180 = vperm.xlu1 %12067, %v2106_v35   ;;  %v2108_v41 = vld [vmem:[%s17317_s3 + $0x670] sm:$0xff]  ;;  %v2113_v57 = vld [vmem:[%s17317_s3 + $0x698] sm:$0xff]  ;;  %v15032_v35 = vpop.permute.xlu0 %2825 }
 0x279   : > { %v14997_v42 = vpop.f32.mrb[40].mxu1  ;;  %v7109_v33 = vadd.f32 %v7108_v18, %v6052_v52  ;;  %v7110_v20 = vpop.f32.mrb[75].mxu0  ;;  %3205 = vperm.xlu0 %12066, %v2111_v10   ;;  %v6057_v52 = vadd.f32 %v14745_v16, %v13331_v60  ;;  %v6060_v60 = vadd.f32 %v14767_v36, %v13341_v0  ;;  %v12312_v0 = vld [vmem:[%s17316_s2 + $0x3ec] ss:$16 sps:$4 sm:$0xff]  }
 0x27a   : > { %v6114_v63 = vpop.f32.mrb[41].mxu1  ;;  %v15030_v18 = vpop.permute.xlu1 %2820 }
 0x27b   : > { %v15019_v12 = vpop.f32.mrb[42].mxu1  ;;  %v10626_v63 = vpack.c.bf16 %v7109_v33, %v7106_v2  ;;  %7320 = vmatmul.mubr.bf16.gmra.mrb[180].mxu0 %v12303_v48  ;;  %v2110_v2 = vld [vmem:[%s17317_s3 + $0x680] sm:$0xff] }
 0x27c   : > { %v6117_v43 = vpop.f32.mrb[43].mxu1  ;;  %7327 = vmatprep.mubr.bf16.mxu0 %v12306_v56  ;;  %3190 = vperm.xlu1 %12067, %v2108_v41   ;;  %v12309_v56 = vld [vmem:[%s17316_s2 + $0x3c8] ss:$16 sps:$4 sm:$0xff]   ;;  %v12310_v41 = vld [vmem:[%s17316_s2 + $0x4e4] ss:$16 sps:$4 sm:$0xff]  }
 0x27d   : > { %11254 = vst [vmem:[%s14945_s22 + $0x10] sm:$0xff] %v10626_v63   ;;  %3215 = vperm.xlu0 %12066, %v2113_v57  }
 0x27e   : > { %6327 = vmatmul.mubr.bf16.gmra.mrb[148].mxu1 %v12302_v21  ;;  %v7113_v10 = vpop.f32.mrb[76].mxu0  ;;  %v2115_v21 = vld [vmem:[%s17317_s3 + $0x6a8] sm:$0xff] }
 0x27f   : > { %6334 = vmatprep.mubr.bf16.mxu1 %v12304_v40  ;;  %v7114_v16 = vadd.f32 %v7113_v10, %v6057_v52  ;;  %v7115_v48 = vpop.f32.mrb[77].mxu0  ;;  %v12308_v40 = vld [vmem:[%s17316_s2 + $0x4c0] ss:$16 sps:$4 sm:$0xff]  }
 0x280   : > { %v7116_v43 = vpop.f32.mrb[78].mxu0  ;;  %3200 = vperm.xlu1 %12067, %v2110_v2   ;;  %v2112_v10 = vld [vmem:[%s17317_s3 + $0x690] sm:$0xff]  ;;  %v2117_v48 = vld [vmem:[%s17317_s3 + $0x6b8] sm:$0xff]  ;;  %v15069_v2 = vpop.permute.xlu0 %2835 }
 0x281   : > { %v15034_v20 = vpop.f32.mrb[44].mxu1  ;;  %v7117_v57 = vadd.f32 %v7116_v43, %v6060_v60  ;;  %v7118_v63 = vpop.f32.mrb[79].mxu0  ;;  %3225 = vperm.xlu0 %12066, %v2115_v21   ;;  %v6065_v60 = vadd.f32 %v14779_v6, %v13351_v5  ;;  %v6068_v5 = vadd.f32 %v14801_v23, %v13288_v44  ;;  %v12318_v44 = vld [vmem:[%s17316_s2 + $0x40c] ss:$16 sps:$4 sm:$0xff]  }
 0x282   : > { %v6122_v33 = vpop.f32.mrb[45].mxu1  ;;  %v15067_v43 = vpop.permute.xlu1 %2830 }
 0x283   : > { %v15056_v36 = vpop.f32.mrb[46].mxu1  ;;  %v10631_v33 = vpack.c.bf16 %v7117_v57, %v7114_v16  ;;  %7328 = vmatmul.mubr.bf16.gmra.mrb[184].mxu0 %v12309_v56  ;;  %v2114_v16 = vld [vmem:[%s17317_s3 + $0x6a0] sm:$0xff] }
 0x284   : > { %v6125_v52 = vpop.f32.mrb[47].mxu1  ;;  %7335 = vmatprep.mubr.bf16.mxu0 %v12312_v0  ;;  %3210 = vperm.xlu1 %12067, %v2112_v10   ;;  %v12315_v0 = vld [vmem:[%s17316_s2 + $0x3e8] ss:$16 sps:$4 sm:$0xff]   ;;  %v12316_v10 = vld [vmem:[%s17316_s2 + $0x504] ss:$16 sps:$4 sm:$0xff]  }
 0x285   : > { %11255 = vst [vmem:[%s14945_s22 + $0x18] sm:$0xff] %v10631_v33   ;;  %3235 = vperm.xlu0 %12066, %v2117_v48  }
 0x286   : > { %6335 = vmatmul.mubr.bf16.gmra.mrb[152].mxu1 %v12308_v40  ;;  %v7121_v21 = vpop.f32.mrb[80].mxu0  ;;  %v2119_v40 = vld [vmem:[%s17317_s3 + $0x6c8] sm:$0xff] }
 0x287   : > { %6342 = vmatprep.mubr.bf16.mxu1 %v12310_v41  ;;  %v7122_v6 = vadd.f32 %v7121_v21, %v6065_v60  ;;  %v7123_v56 = vpop.f32.mrb[81].mxu0  ;;  %v12314_v41 = vld [vmem:[%s17316_s2 + $0x4e0] ss:$16 sps:$4 sm:$0xff]  }
 0x288   : > { %v7124_v52 = vpop.f32.mrb[82].mxu0  ;;  %3220 = vperm.xlu1 %12067, %v2114_v16   ;;  %v2116_v21 = vld [vmem:[%s17317_s3 + $0x6b0] sm:$0xff]  ;;  %v2121_v56 = vld [vmem:[%s17317_s3 + $0x6d8] sm:$0xff]  ;;  %v15106_v16 = vpop.permute.xlu0 %2845 }
 0x289   : > { %v15071_v63 = vpop.f32.mrb[48].mxu1  ;;  %v7125_v48 = vadd.f32 %v7124_v52, %v6068_v5  ;;  %v7126_v33 = vpop.f32.mrb[83].mxu0  ;;  %3245 = vperm.xlu0 %12066, %v2119_v40   ;;  %v6073_v5 = vadd.f32 %v14815_v37, %v13361_v9  ;;  %v6076_v9 = vadd.f32 %v14835_v29, %v13305_v50  ;;  %v12324_v50 = vld [vmem:[%s17316_s2 + $0x42c] ss:$16 sps:$4 sm:$0xff]  }
 0x28a   : > { %v6130_v57 = vpop.f32.mrb[49].mxu1  ;;  %v15104_v52 = vpop.permute.xlu1 %2840 }
 0x28b   : > { %v15093_v23 = vpop.f32.mrb[50].mxu1  ;;  %v10636_v57 = vpack.c.bf16 %v7125_v48, %v7122_v6  ;;  %7336 = vmatmul.mubr.bf16.gmra.mrb[188].mxu0 %v12315_v0  ;;  %v2118_v6 = vld [vmem:[%s17317_s3 + $0x6c0] sm:$0xff] }
 0x28c   : > { %v6133_v60 = vpop.f32.mrb[51].mxu1  ;;  %7343 = vmatprep.mubr.bf16.mxu0 %v12318_v44  ;;  %3230 = vperm.xlu1 %12067, %v2116_v21   ;;  %v12321_v44 = vld [vmem:[%s17316_s2 + $0x408] ss:$16 sps:$4 sm:$0xff]   ;;  %v12322_v21 = vld [vmem:[%s17316_s2 + $0x524] ss:$16 sps:$4 sm:$0xff]  }
 0x28d   : > { %11256 = vst [vmem:[%s14945_s22 + $0x20] sm:$0xff] %v10636_v57   ;;  %3255 = vperm.xlu0 %12066, %v2121_v56  }
 0x28e   : > { %6343 = vmatmul.mubr.bf16.gmra.mrb[156].mxu1 %v12314_v41  ;;  %v7129_v40 = vpop.f32.mrb[84].mxu0  ;;  %v2123_v41 = vld [vmem:[%s17317_s3 + $0x6e8] sm:$0xff] }
 0x28f   : > { %6350 = vmatprep.mubr.bf16.mxu1 %v12316_v10  ;;  %v7130_v37 = vadd.f32 %v7129_v40, %v6073_v5  ;;  %v7131_v0 = vpop.f32.mrb[85].mxu0  ;;  %v12320_v10 = vld [vmem:[%s17316_s2 + $0x500] ss:$16 sps:$4 sm:$0xff]  }
 0x290   : > { %v7132_v60 = vpop.f32.mrb[86].mxu0  ;;  %3240 = vperm.xlu1 %12067, %v2118_v6   ;;  %v2120_v40 = vld [vmem:[%s17317_s3 + $0x6d0] sm:$0xff]  ;;  %v2125_v0 = vld [vmem:[%s17317_s3 + $0x6f8] sm:$0xff]  ;;  %v15143_v6 = vpop.permute.xlu0 %2855 }
 0x291   : > { %v15108_v33 = vpop.f32.mrb[52].mxu1  ;;  %v7133_v56 = vadd.f32 %v7132_v60, %v6076_v9  ;;  %v7134_v57 = vpop.f32.mrb[87].mxu0  ;;  %3265 = vperm.xlu0 %12066, %v2123_v41   ;;  %v6081_v9 = vadd.f32 %v14847_v1, %v13371_v13  ;;  %v6084_v13 = vadd.f32 %v14867_v53, %v13316_v54  ;;  %v12330_v54 = vld [vmem:[%s17316_s2 + $0x44c] ss:$16 sps:$4 sm:$0xff]  }
 0x292   : > { %v6138_v48 = vpop.f32.mrb[53].mxu1  ;;  %v15141_v60 = vpop.permute.xlu1 %2850 }
 0x293   : > { %v15130_v29 = vpop.f32.mrb[54].mxu1  ;;  %v10641_v48 = vpack.c.bf16 %v7133_v56, %v7130_v37  ;;  %7344 = vmatmul.mubr.bf16.gmra.mrb[192].mxu0 %v12321_v44  ;;  %v2122_v37 = vld [vmem:[%s17317_s3 + $0x6e0] sm:$0xff] }
 0x294   : > { %v6141_v5 = vpop.f32.mrb[55].mxu1  ;;  %7351 = vmatprep.mubr.bf16.mxu0 %v12324_v50  ;;  %3250 = vperm.xlu1 %12067, %v2120_v40   ;;  %v12327_v50 = vld [vmem:[%s17316_s2 + $0x428] ss:$16 sps:$4 sm:$0xff]   ;;  %v12328_v40 = vld [vmem:[%s17316_s2 + $0x544] ss:$16 sps:$4 sm:$0xff]  }
 0x295   : > { %11257 = vst [vmem:[%s14945_s22 + $0x28] sm:$0xff] %v10641_v48   ;;  %3275 = vperm.xlu0 %12066, %v2125_v0  }
 0x296   : > { %6351 = vmatmul.mubr.bf16.gmra.mrb[160].mxu1 %v12320_v10  ;;  %v7137_v41 = vpop.f32.mrb[88].mxu0  ;;  %v2127_v10 = vld [vmem:[%s17317_s3 + $0x708] sm:$0xff] }
 0x297   : > { %6358 = vmatprep.mubr.bf16.mxu1 %v12322_v21  ;;  %v7138_v1 = vadd.f32 %v7137_v41, %v6081_v9  ;;  %v7139_v44 = vpop.f32.mrb[89].mxu0  ;;  %v12326_v21 = vld [vmem:[%s17316_s2 + $0x520] ss:$16 sps:$4 sm:$0xff]  }
 0x298   : > { %v7140_v5 = vpop.f32.mrb[90].mxu0  ;;  %3260 = vperm.xlu1 %12067, %v2122_v37   ;;  %v2124_v41 = vld [vmem:[%s17317_s3 + $0x6f0] sm:$0xff]  ;;  %v2129_v44 = vld [vmem:[%s17317_s3 + $0x718] sm:$0xff]  ;;  %v15180_v37 = vpop.permute.xlu0 %2865 }
 0x299   : > { %v15145_v57 = vpop.f32.mrb[56].mxu1  ;;  %v7141_v0 = vadd.f32 %v7140_v5, %v6084_v13  ;;  %v7142_v48 = vpop.f32.mrb[91].mxu0  ;;  %3285 = vperm.xlu0 %12066, %v2127_v10   ;;  %v6089_v13 = vadd.f32 %v14879_v25, %v13381_v17  ;;  %v6092_v17 = vadd.f32 %v14903_v28, %v13326_v58  ;;  %v12336_v58 = vld [vmem:[%s17316_s2 + $0x46c] ss:$16 sps:$4 sm:$0xff]  }
 0x29a   : > { %v6146_v56 = vpop.f32.mrb[57].mxu1  ;;  %v15178_v5 = vpop.permute.xlu1 %2860 }
 0x29b   : > { %v15167_v53 = vpop.f32.mrb[58].mxu1  ;;  %v10646_v56 = vpack.c.bf16 %v7141_v0, %v7138_v1  ;;  %7352 = vmatmul.mubr.bf16.gmra.mrb[196].mxu0 %v12327_v50  ;;  %v2126_v1 = vld [vmem:[%s17317_s3 + $0x700] sm:$0xff] }
 0x29c   : > { %v6149_v9 = vpop.f32.mrb[59].mxu1  ;;  %7359 = vmatprep.mubr.bf16.mxu0 %v12330_v54  ;;  %3270 = vperm.xlu1 %12067, %v2124_v41   ;;  %v12333_v54 = vld [vmem:[%s17316_s2 + $0x448] ss:$16 sps:$4 sm:$0xff]   ;;  %v12334_v41 = vld [vmem:[%s17316_s2 + $0x564] ss:$16 sps:$4 sm:$0xff]  }
 0x29d   : > { %11258 = vst [vmem:[%s14945_s22 + $0x30] sm:$0xff] %v10646_v56   ;;  %3295 = vperm.xlu0 %12066, %v2129_v44  }
 0x29e   : > { %6359 = vmatmul.mubr.bf16.gmra.mrb[164].mxu1 %v12326_v21  ;;  %v7145_v10 = vpop.f32.mrb[92].mxu0  ;;  %v2131_v21 = vld [vmem:[%s17317_s3 + $0x728] sm:$0xff] }
 0x29f   : > { %6366 = vmatprep.mubr.bf16.mxu1 %v12328_v40  ;;  %v7146_v25 = vadd.f32 %v7145_v10, %v6089_v13  ;;  %v7147_v50 = vpop.f32.mrb[93].mxu0  ;;  %v12332_v40 = vld [vmem:[%s17316_s2 + $0x540] ss:$16 sps:$4 sm:$0xff]  }
 0x2a0   : > { %v7148_v9 = vpop.f32.mrb[94].mxu0  ;;  %3280 = vperm.xlu1 %12067, %v2126_v1   ;;  %v2128_v10 = vld [vmem:[%s17317_s3 + $0x710] sm:$0xff]  ;;  %v2133_v50 = vld [vmem:[%s17317_s3 + $0x738] sm:$0xff]  ;;  %v15217_v1 = vpop.permute.xlu0 %2875 }
 0x2a1   : > { %v15182_v48 = vpop.f32.mrb[60].mxu1  ;;  %v7149_v44 = vadd.f32 %v7148_v9, %v6092_v17  ;;  %v7150_v56 = vpop.f32.mrb[95].mxu0  ;;  %3305 = vperm.xlu0 %12066, %v2131_v21   ;;  %v6097_v17 = vadd.f32 %v14918_v47, %v13394_v22  ;;  %v6100_v22 = vadd.f32 %v14940_v14, %v13336_v62  ;;  %v12342_v62 = vld [vmem:[%s17316_s2 + $0x48c] ss:$16 sps:$4 sm:$0xff]  }
 0x2a2   : > { %v6154_v0 = vpop.f32.mrb[61].mxu1  ;;  %v15215_v9 = vpop.permute.xlu1 %2870 }
 0x2a3   : > { %v15204_v28 = vpop.f32.mrb[62].mxu1  ;;  %v10651_v0 = vpack.c.bf16 %v7149_v44, %v7146_v25  ;;  %7360 = vmatmul.mubr.bf16.gmra.mrb[200].mxu0 %v12333_v54  ;;  %v2130_v25 = vld [vmem:[%s17317_s3 + $0x720] sm:$0xff] }
 0x2a4   : > { %v6157_v13 = vpop.f32.mrb[63].mxu1  ;;  %7367 = vmatprep.mubr.bf16.mxu0 %v12336_v58  ;;  %3290 = vperm.xlu1 %12067, %v2128_v10   ;;  %v12339_v58 = vld [vmem:[%s17316_s2 + $0x468] ss:$16 sps:$4 sm:$0xff]   ;;  %v12340_v10 = vld [vmem:[%s17316_s2 + $0x584] ss:$16 sps:$4 sm:$0xff]  }
 0x2a5   : > { %11259 = vst [vmem:[%s14945_s22 + $0x38] sm:$0xff] %v10651_v0   ;;  %3315 = vperm.xlu0 %12066, %v2133_v50  }
 0x2a6   : > { %6367 = vmatmul.mubr.bf16.gmra.mrb[168].mxu1 %v12332_v40  ;;  %v7153_v21 = vpop.f32.mrb[96].mxu0  ;;  %v2135_v40 = vld [vmem:[%s17317_s3 + $0x748] sm:$0xff] }
 0x2a7   : > { %6374 = vmatprep.mubr.bf16.mxu1 %v12334_v41  ;;  %v7154_v47 = vadd.f32 %v7153_v21, %v6097_v17  ;;  %v7155_v54 = vpop.f32.mrb[97].mxu0  ;;  %v12338_v41 = vld [vmem:[%s17316_s2 + $0x560] ss:$16 sps:$4 sm:$0xff]  }
 0x2a8   : > { %v7156_v13 = vpop.f32.mrb[98].mxu0  ;;  %3300 = vperm.xlu1 %12067, %v2130_v25   ;;  %v2132_v21 = vld [vmem:[%s17317_s3 + $0x730] sm:$0xff]  ;;  %v2137_v54 = vld [vmem:[%s17317_s3 + $0x758] sm:$0xff]  ;;  %v15254_v25 = vpop.permute.xlu0 %2885 }
 0x2a9   : > { %v15219_v56 = vpop.f32.mrb[64].mxu1  ;;  %v7157_v50 = vadd.f32 %v7156_v13, %v6100_v22  ;;  %v7158_v0 = vpop.f32.mrb[99].mxu0  ;;  %3325 = vperm.xlu0 %12066, %v2135_v40   ;;  %v6105_v22 = vadd.f32 %v14960_v51, %v13404_v26  ;;  %v6108_v26 = vadd.f32 %v14982_v59, %v13346_v3  ;;  %v12348_v3 = vld [vmem:[%s17316_s2 + $0x4ac] ss:$16 sps:$4 sm:$0xff]  }
 0x2aa   : > { %v6162_v44 = vpop.f32.mrb[65].mxu1  ;;  %v15252_v13 = vpop.permute.xlu1 %2880 }
 0x2ab   : > { %v15241_v14 = vpop.f32.mrb[66].mxu1  ;;  %v10656_v44 = vpack.c.bf16 %v7157_v50, %v7154_v47  ;;  %7368 = vmatmul.mubr.bf16.gmra.mrb[204].mxu0 %v12339_v58  ;;  %v2134_v47 = vld [vmem:[%s17317_s3 + $0x740] sm:$0xff] }
 0x2ac   : > { %v6165_v17 = vpop.f32.mrb[67].mxu1  ;;  %7375 = vmatprep.mubr.bf16.mxu0 %v12342_v62  ;;  %3310 = vperm.xlu1 %12067, %v2132_v21   ;;  %v12345_v62 = vld [vmem:[%s17316_s2 + $0x488] ss:$16 sps:$4 sm:$0xff]   ;;  %v12346_v21 = vld [vmem:[%s17316_s2 + $0x5a4] ss:$16 sps:$4 sm:$0xff]  }
 0x2ad   : > { %11260 = vst [vmem:[%s14945_s22 + $0x40] sm:$0xff] %v10656_v44   ;;  %3335 = vperm.xlu0 %12066, %v2137_v54  }
 0x2ae   : > { %6375 = vmatmul.mubr.bf16.gmra.mrb[172].mxu1 %v12338_v41  ;;  %v7161_v40 = vpop.f32.mrb[100].mxu0  ;;  %v2139_v41 = vld [vmem:[%s17317_s3 + $0x768] sm:$0xff] }
 0x2af   : > { %6382 = vmatprep.mubr.bf16.mxu1 %v12340_v10  ;;  %v7162_v51 = vadd.f32 %v7161_v40, %v6105_v22  ;;  %v7163_v58 = vpop.f32.mrb[101].mxu0  ;;  %v12344_v10 = vld [vmem:[%s17316_s2 + $0x580] ss:$16 sps:$4 sm:$0xff]  }
 0x2b0   : > { %v7164_v17 = vpop.f32.mrb[102].mxu0  ;;  %3320 = vperm.xlu1 %12067, %v2134_v47   ;;  %v2136_v40 = vld [vmem:[%s17317_s3 + $0x750] sm:$0xff]  ;;  %v2141_v58 = vld [vmem:[%s17317_s3 + $0x778] sm:$0xff]  ;;  %v15291_v47 = vpop.permute.xlu0 %2895 }
 0x2b1   : > { %v15256_v0 = vpop.f32.mrb[68].mxu1  ;;  %v7165_v54 = vadd.f32 %v7164_v17, %v6108_v26  ;;  %v7166_v44 = vpop.f32.mrb[103].mxu0  ;;  %3345 = vperm.xlu0 %12066, %v2139_v41   ;;  %v6113_v26 = vadd.f32 %v14997_v42, %v13414_v30  ;;  %v6116_v30 = vadd.f32 %v15019_v12, %v13356_v7  ;;  %v12354_v7 = vld [vmem:[%s17316_s2 + $0x4cc] ss:$16 sps:$4 sm:$0xff]  }
 0x2b2   : > { %v6170_v50 = vpop.f32.mrb[69].mxu1  ;;  %v15289_v17 = vpop.permute.xlu1 %2890 }
 0x2b3   : > { %v15278_v59 = vpop.f32.mrb[70].mxu1  ;;  %v10661_v50 = vpack.c.bf16 %v7165_v54, %v7162_v51  ;;  %7376 = vmatmul.mubr.bf16.gmra.mrb[208].mxu0 %v12345_v62  ;;  %v2138_v51 = vld [vmem:[%s17317_s3 + $0x760] sm:$0xff] }
 0x2b4   : > { %v6173_v22 = vpop.f32.mrb[71].mxu1  ;;  %7383 = vmatprep.mubr.bf16.mxu0 %v12348_v3  ;;  %3330 = vperm.xlu1 %12067, %v2136_v40   ;;  %v12351_v3 = vld [vmem:[%s17316_s2 + $0x4a8] ss:$16 sps:$4 sm:$0xff]   ;;  %v12352_v40 = vld [vmem:[%s17316_s2 + $0x5c4] ss:$16 sps:$4 sm:$0xff]  }
 0x2b5   : > { %11261 = vst [vmem:[%s14945_s22 + $0x48] sm:$0xff] %v10661_v50   ;;  %3355 = vperm.xlu0 %12066, %v2141_v58  }
 0x2b6   : > { %6383 = vmatmul.mubr.bf16.gmra.mrb[176].mxu1 %v12344_v10  ;;  %v7169_v41 = vpop.f32.mrb[104].mxu0  ;;  %v2143_v10 = vld [vmem:[%s17317_s3 + $0x788] sm:$0xff] }
 0x2b7   : > { %6390 = vmatprep.mubr.bf16.mxu1 %v12346_v21  ;;  %v7170_v42 = vadd.f32 %v7169_v41, %v6113_v26  ;;  %v7171_v62 = vpop.f32.mrb[105].mxu0  ;;  %v12350_v21 = vld [vmem:[%s17316_s2 + $0x5a0] ss:$16 sps:$4 sm:$0xff]  }
 0x2b8   : > { %v7172_v22 = vpop.f32.mrb[106].mxu0  ;;  %3340 = vperm.xlu1 %12067, %v2138_v51   ;;  %v2140_v41 = vld [vmem:[%s17317_s3 + $0x770] sm:$0xff]  ;;  %v2145_v62 = vld [vmem:[%s17317_s3 + $0x798] sm:$0xff]  ;;  %v15328_v51 = vpop.permute.xlu0 %2905 }
 0x2b9   : > { %v15293_v44 = vpop.f32.mrb[72].mxu1  ;;  %v7173_v58 = vadd.f32 %v7172_v22, %v6116_v30  ;;  %v7174_v50 = vpop.f32.mrb[107].mxu0  ;;  %3365 = vperm.xlu0 %12066, %v2143_v10   ;;  %v6121_v30 = vadd.f32 %v15034_v20, %v13424_v34  ;;  %v6124_v34 = vadd.f32 %v15056_v36, %v13366_v11  ;;  %v12360_v11 = vld [vmem:[%s17316_s2 + $0x4ec] ss:$16 sps:$4 sm:$0xff]  }
 0x2ba   : > { %v6178_v54 = vpop.f32.mrb[73].mxu1  ;;  %v15326_v22 = vpop.permute.xlu1 %2900 }
 0x2bb   : > { %v15315_v12 = vpop.f32.mrb[74].mxu1  ;;  %v10666_v54 = vpack.c.bf16 %v7173_v58, %v7170_v42  ;;  %7384 = vmatmul.mubr.bf16.gmra.mrb[212].mxu0 %v12351_v3  ;;  %v2142_v42 = vld [vmem:[%s17317_s3 + $0x780] sm:$0xff] }
 0x2bc   : > { %v6181_v26 = vpop.f32.mrb[75].mxu1  ;;  %7391 = vmatprep.mubr.bf16.mxu0 %v12354_v7  ;;  %3350 = vperm.xlu1 %12067, %v2140_v41   ;;  %v12357_v7 = vld [vmem:[%s17316_s2 + $0x4c8] ss:$16 sps:$4 sm:$0xff]   ;;  %v12358_v41 = vld [vmem:[%s17316_s2 + $0x5e4] ss:$16 sps:$4 sm:$0xff]  }
 0x2bd   : > { %11262 = vst [vmem:[%s14945_s22 + $0x50] sm:$0xff] %v10666_v54   ;;  %3375 = vperm.xlu0 %12066, %v2145_v62  }
 0x2be   : > { %6391 = vmatmul.mubr.bf16.gmra.mrb[180].mxu1 %v12350_v21  ;;  %v7177_v10 = vpop.f32.mrb[108].mxu0  ;;  %v2147_v21 = vld [vmem:[%s17317_s3 + $0x7a8] sm:$0xff] }
 0x2bf   : > { %6398 = vmatprep.mubr.bf16.mxu1 %v12352_v40  ;;  %v7178_v20 = vadd.f32 %v7177_v10, %v6121_v30  ;;  %v7179_v3 = vpop.f32.mrb[109].mxu0  ;;  %v12356_v40 = vld [vmem:[%s17316_s2 + $0x5c0] ss:$16 sps:$4 sm:$0xff]  }
 0x2c0   : > { %v7180_v26 = vpop.f32.mrb[110].mxu0  ;;  %3360 = vperm.xlu1 %12067, %v2142_v42   ;;  %v2144_v10 = vld [vmem:[%s17317_s3 + $0x790] sm:$0xff]  ;;  %v15365_v42 = vpop.permute.xlu0 %2915 }
 0x2c1   : > { %v15330_v50 = vpop.f32.mrb[76].mxu1  ;;  %v7181_v62 = vadd.f32 %v7180_v26, %v6124_v34  ;;  %v7182_v54 = vpop.f32.mrb[111].mxu0  ;;  %3385 = vperm.xlu0 %12066, %v2147_v21   ;;  %v6129_v34 = vadd.f32 %v15071_v63, %v13434_v38  ;;  %v12362_v38 = vld [vmem:[%s17316_s2 + $0x5e0] ss:$16 sps:$4 sm:$0xff]   ;;  %v12363_v63 = vld [vmem:[%s17316_s2 + $0x4e8] ss:$16 sps:$4 sm:$0xff]  }
 0x2c2   : > { %v6186_v58 = vpop.f32.mrb[77].mxu1  ;;  %v15363_v26 = vpop.permute.xlu1 %2910 }
 0x2c3   : > { %v15352_v36 = vpop.f32.mrb[78].mxu1  ;;  %v10671_v3 = vpack.c.bf16 %v7181_v62, %v7178_v20  ;;  %7392 = vmatmul.mubr.bf16.gmra.mrb[216].mxu0 %v12357_v7  ;;  %v2149_v58 = vld [vmem:[%s17317_s3 + $0x7b8] sm:$0xff]  ;;  %v6132_v7 = vadd.f32 %v15093_v23, %v13376_v15 }
 0x2c4   : > { %v6189_v30 = vpop.f32.mrb[79].mxu1  ;;  %7399 = vmatprep.mubr.bf16.mxu0 %v12360_v11  ;;  %3370 = vperm.xlu1 %12067, %v2144_v10   ;;  %v12366_v15 = vld [vmem:[%s17316_s2 + $0x50c] ss:$16 sps:$4 sm:$0xff]  }
 0x2c5   : > { %11263 = vst [vmem:[%s14945_s22 + $0x58] sm:$0xff] %v10671_v3   ;;  %3395 = vperm.xlu0 %12066, %v2149_v58   ;;  %v12364_v30 = vld [vmem:[%s17316_s2 + $0x604] ss:$16 sps:$4 sm:$0xff]  }
 0x2c6   : > { %6399 = vmatmul.mubr.bf16.gmra.mrb[184].mxu1 %v12356_v40  ;;  %v7185_v21 = vpop.f32.mrb[112].mxu0  ;;  %v2146_v40 = vld [vmem:[%s17317_s3 + $0x7a0] sm:$0xff] }
 0x2c7   : > { %6406 = vmatprep.mubr.bf16.mxu1 %v12358_v41  ;;  %v7186_v41 = vadd.f32 %v7185_v21, %v6129_v34  ;;  %v7187_v11 = vpop.f32.mrb[113].mxu0  ;;  %v2148_v34 = vld [vmem:[%s17317_s3 + $0x7b0] sm:$0xff] }
 0x2c8   : > { %v7188_v54 = vpop.f32.mrb[114].mxu0  ;;  %3380 = vperm.xlu1 %12067, %v2146_v40   ;;  %v2151_v11 = vld [vmem:[%s17317_s3 + $0x7c8] sm:$0xff]  ;;  %v15399_v40 = vpop.permute.xlu0 %2925 }
 0x2c9   : > { %v15367_v20 = vpop.f32.mrb[80].mxu1  ;;  %v7189_v10 = vadd.f32 %v7188_v54, %v6132_v7  ;;  %v7190_v3 = vpop.f32.mrb[115].mxu0  ;;  %3405 = vperm.xlu0 %12066, %v2151_v11  }
 0x2ca   : > { %v6194_v62 = vpop.f32.mrb[81].mxu1  ;;  %v15397_v7 = vpop.permute.xlu1 %2920 }
 0x2cb   : > { %v15386_v23 = vpop.f32.mrb[82].mxu1  ;;  %v10676_v21 = vpack.c.bf16 %v7189_v10, %v7186_v41  ;;  %7400 = vmatmul.mubr.bf16.gmra.mrb[220].mxu0 %v12363_v63  ;;  %v6137_v62 = vadd.f32 %v15108_v33, %v13441_v45  ;;  %v6140_v63 = vadd.f32 %v15130_v29, %v13386_v19  ;;  %v12368_v45 = vld [vmem:[%s17316_s2 + $0x600] ss:$16 sps:$4 sm:$0xff]   ;;  %v12369_v33 = vld [vmem:[%s17316_s2 + $0x508] ss:$16 sps:$4 sm:$0xff]  }
 0x2cc   : > { %v6197_v58 = vpop.f32.mrb[83].mxu1  ;;  %7407 = vmatprep.mubr.bf16.mxu0 %v12366_v15  ;;  %3390 = vperm.xlu1 %12067, %v2148_v34   ;;  %v12372_v19 = vld [vmem:[%s17316_s2 + $0x52c] ss:$16 sps:$4 sm:$0xff]  }
 0x2cd   : > { %11264 = vst [vmem:[%s14945_s22 + $0x60] sm:$0xff] %v10676_v21   ;;  %v12370_v58 = vld [vmem:[%s17316_s2 + $0x624] ss:$16 sps:$4 sm:$0xff]  }
 0x2ce   : > { %6407 = vmatmul.mubr.bf16.gmra.mrb[188].mxu1 %v12362_v38  ;;  %v7193_v54 = vpop.f32.mrb[116].mxu0  ;;  %v2150_v38 = vld [vmem:[%s17317_s3 + $0x7c0] sm:$0xff] }
 0x2cf   : > { %6414 = vmatprep.mubr.bf16.mxu1 %v12364_v30  ;;  %v7194_v30 = vadd.f32 %v7193_v54, %v6137_v62  ;;  %v7195_v15 = vpop.f32.mrb[117].mxu0  ;;  %v2152_v62 = vld [vmem:[%s17317_s3 + $0x7d0] sm:$0xff]  ;;  %v2153_v54 = vld [vmem:[%s17317_s3 + $0x7d8] sm:$0xff] }
 0x2d0   : > { %v7196_v3 = vpop.f32.mrb[118].mxu0  ;;  %3400 = vperm.xlu1 %12067, %v2150_v38   ;;  %v15433_v38 = vpop.permute.xlu0 %2935  ;;  %3415 = vperm.xlu0 %12066, %v2153_v54  }
 0x2d1   : > { %v15401_v41 = vpop.f32.mrb[84].mxu1  ;;  %v7197_v34 = vadd.f32 %v7196_v3, %v6140_v63  ;;  %v7198_v21 = vpop.f32.mrb[119].mxu0 }
 0x2d2   : > { %v6202_v10 = vpop.f32.mrb[85].mxu1  ;;  %v15431_v63 = vpop.permute.xlu1 %2930 }
 0x2d3   : > { %v15420_v29 = vpop.f32.mrb[86].mxu1  ;;  %v10681_v15 = vpack.c.bf16 %v7197_v34, %v7194_v30  ;;  %7408 = vmatmul.mubr.bf16.gmra.mrb[224].mxu0 %v12369_v33  ;;  %v6145_v10 = vadd.f32 %v15145_v57, %v13448_v49  ;;  %v2154_v30 = vld [vmem:[%s17317_s3 + $0x7e0] sm:$0xff]  ;;  %v6148_v49 = vadd.f32 %v15167_v53, %v13399_v24  ;;  %v12378_v24 = vld [vmem:[%s17316_s2 + $0x54c] ss:$16 sps:$4 sm:$0xff]  }
 0x2d4   : > { %v6205_v11 = vpop.f32.mrb[87].mxu1  ;;  %7415 = vmatprep.mubr.bf16.mxu0 %v12372_v19  ;;  %3410 = vperm.xlu1 %12067, %v2152_v62   ;;  %v12375_v19 = vld [vmem:[%s17316_s2 + $0x528] ss:$16 sps:$4 sm:$0xff]   ;;  %v12376_v62 = vld [vmem:[%s17316_s2 + $0x644] ss:$16 sps:$4 sm:$0xff]  }
 0x2d5   : > { %11265 = vst [vmem:[%s14945_s22 + $0x68] sm:$0xff] %v10681_v15  }
 0x2d6   : > { %6415 = vmatmul.mubr.bf16.gmra.mrb[192].mxu1 %v12368_v45  ;;  %v7201_v3 = vpop.f32.mrb[120].mxu0  ;;  %v2155_v45 = vld [vmem:[%s17317_s3 + $0x7e8] sm:$0xff] }
 0x2d7   : > { %6422 = vmatprep.mubr.bf16.mxu1 %v12370_v58  ;;  %v7202_v57 = vadd.f32 %v7201_v3, %v6145_v10  ;;  %v7203_v33 = vpop.f32.mrb[121].mxu0  ;;  %v12374_v58 = vld [vmem:[%s17316_s2 + $0x620] ss:$16 sps:$4 sm:$0xff]   ;;  %3425 = vperm.xlu0 %12066, %v2155_v45  }
 0x2d8   : > { %v7204_v11 = vpop.f32.mrb[122].mxu0  ;;  %3420 = vperm.xlu1 %12067, %v2154_v30   ;;  %v2156_v3 = vld [vmem:[%s17317_s3 + $0x7f0] sm:$0xff]  ;;  %v2157_v33 = vld [vmem:[%s17317_s3 + $0x7f8] sm:$0xff]  ;;  %v15470_v30 = vpop.permute.xlu0 %2945 }
 0x2d9   : > { %v15435_v21 = vpop.f32.mrb[88].mxu1  ;;  %v7205_v54 = vadd.f32 %v7204_v11, %v6148_v49  ;;  %v7206_v15 = vpop.f32.mrb[123].mxu0  ;;  %v6153_v49 = vadd.f32 %v15182_v48, %v13455_v55  ;;  %17448 = vst [vmem:[#allocation95_spill] sm:$0xff] %v15470_v30  ;;  %v12381_v55 = vld [vmem:[%s17316_s2 + $0x548] ss:$16 sps:$4 sm:$0xff]  }
 0x2da   : > { %v6210_v34 = vpop.f32.mrb[89].mxu1  ;;  %v15468_v11 = vpop.permute.xlu1 %2940  ;;  %v6156_v15 = vadd.f32 %v15204_v28, %v13406_v27  ;;  %v12384_v27 = vld [vmem:[%s17316_s2 + $0x56c] ss:$16 sps:$4 sm:$0xff]  }
 0x2db   : > { %v15457_v53 = vpop.f32.mrb[90].mxu1  ;;  %v10686_v34 = vpack.c.bf16 %v7205_v54, %v7202_v57  ;;  %7416 = vmatmul.mubr.bf16.gmra.mrb[228].mxu0 %v12375_v19  ;;  %3435 = vperm.xlu0 %12066, %v2157_v33  }
 0x2dc   : > { %v6213_v10 = vpop.f32.mrb[91].mxu1  ;;  %7423 = vmatprep.mubr.bf16.mxu0 %v12378_v24  ;;  %3430 = vperm.xlu1 %12067, %v2156_v3  }
 0x2dd   : > { %11266 = vst [vmem:[%s14945_s22 + $0x70] sm:$0xff] %v10686_v34  }
 0x2de   : > { %6423 = vmatmul.mubr.bf16.gmra.mrb[196].mxu1 %v12374_v58  ;;  %v7209_v45 = vpop.f32.mrb[124].mxu0  ;;  %v12380_v58 = vld [vmem:[%s17316_s2 + $0x640] ss:$16 sps:$4 sm:$0xff]  }
 0x2df   : > { %6430 = vmatprep.mubr.bf16.mxu1 %v12376_v62  ;;  %v7210_v10 = vadd.f32 %v7209_v45, %v6153_v49  ;;  %v7211_v57 = vpop.f32.mrb[125].mxu0  ;;  %v12382_v62 = vld [vmem:[%s17316_s2 + $0x664] ss:$16 sps:$4 sm:$0xff]   ;;  %v6161_v49 = vadd.f32 %v15219_v56, %v13462_v61 }
 0x2e0   : > { %v7212_v19 = vpop.f32.mrb[126].mxu0  ;;  %v6164_v57 = vadd.f32 %v15241_v14, %v13419_v32  ;;  %v12388_v61 = vld [vmem:[%s17316_s2 + $0x684] ss:$16 sps:$4 sm:$0xff]   ;;  %v12390_v32 = vld [vmem:[%s17316_s2 + $0x58c] ss:$16 sps:$4 sm:$0xff]  }
 0x2e1   : > { %v15480_v48 = vpop.f32.mrb[92].mxu1  ;;  %v7213_v24 = vadd.f32 %v7212_v19, %v6156_v15  ;;  %v7214_v54 = vpop.f32.mrb[127].mxu0  ;;  %v12386_v15 = vld [vmem:[%s17316_s2 + $0x660] ss:$16 sps:$4 sm:$0xff]  }
 0x2e2   : > { %v6218_v28 = vpop.f32.mrb[93].mxu1  ;;  %v6169_v54 = vadd.f32 %v15256_v0, %v13469_v4  ;;  %v12394_v4 = vld [vmem:[%s17316_s2 + $0x6a4] ss:$16 sps:$4 sm:$0xff]   ;;  %v12396_v0 = vld [vmem:[%s17316_s2 + $0x5ac] ss:$16 sps:$4 sm:$0xff]  }
 0x2e3   : > { %v15488_v3 = vpop.f32.mrb[94].mxu1  ;;  %v10691_v34 = vpack.c.bf16 %v7213_v24, %v7210_v10  ;;  %7424 = vmatmul.mubr.bf16.gmra.mrb[232].mxu0 %v12381_v55  ;;  %v12387_v10 = vld [vmem:[%s17316_s2 + $0x568] ss:$16 sps:$4 sm:$0xff]  }
 0x2e4   : > { %v6221_v33 = vpop.f32.mrb[95].mxu1  ;;  %7431 = vmatprep.mubr.bf16.mxu0 %v12384_v27 }
 0x2e5   : > { %11267 = vst [vmem:[%s14945_s22 + $0x78] sm:$0xff] %v10691_v34   ;;  %v17449_v34 = vld [vmem:[#allocation2_spill] sm:$0xff] }
 0x2e6   : > { %6431 = vmatmul.mubr.bf16.gmra.mrb[200].mxu1 %v12380_v58  ;;  %v7217_v45 = vpop.f32.mrb[128].mxu0 }
 0x2e7   : > { %6438 = vmatprep.mubr.bf16.mxu1 %v12382_v62  ;;  %v7218_v30 = vadd.f32 %v7217_v45, %v6161_v49  ;;  %v7219_v28 = vpop.f32.mrb[129].mxu0  ;;  %v6172_v49 = vadd.f32 %v15278_v59, %v17449_v34 }
 0x2e8   : > { %v7220_v55 = vpop.f32.mrb[130].mxu0 }
 0x2e9   : > { %v15501_v58 = vpop.f32.mrb[96].mxu1  ;;  %v7221_v14 = vadd.f32 %v7220_v55, %v6164_v57  ;;  %v7222_v19 = vpop.f32.mrb[131].mxu0  ;;  %v12392_v57 = vld [vmem:[%s17316_s2 + $0x680] ss:$16 sps:$4 sm:$0xff]  }
 0x2ea   : > { %v6226_v56 = vpop.f32.mrb[97].mxu1  ;;  %v17450_v19 = vld [vmem:[#allocation9_spill] sm:$0xff] }
 0x2eb   : > { %v15509_v62 = vpop.f32.mrb[98].mxu1  ;;  %v10696_v24 = vpack.c.bf16 %v7221_v14, %v7218_v30  ;;  %7432 = vmatmul.mubr.bf16.gmra.mrb[236].mxu0 %v12387_v10  ;;  %v12393_v30 = vld [vmem:[%s17316_s2 + $0x588] ss:$16 sps:$4 sm:$0xff]  }
 0x2ec   : > { %v6229_v27 = vpop.f32.mrb[99].mxu1  ;;  %7439 = vmatprep.mubr.bf16.mxu0 %v12390_v32 }
 0x2ed   : > { %11268 = vst [vmem:[%s14945_s22 + $0x80] sm:$0xff] %v10696_v24   ;;  %v6177_v27 = vadd.f32 %v15293_v44, %v17450_v19  ;;  %v12400_v44 = vld [vmem:[%s17316_s2 + $0x6c4] ss:$16 sps:$4 sm:$0xff]  }
 0x2ee   : > { %6439 = vmatmul.mubr.bf16.gmra.mrb[204].mxu1 %v12386_v15  ;;  %v7225_v33 = vpop.f32.mrb[132].mxu0 }
 0x2ef   : > { %6446 = vmatprep.mubr.bf16.mxu1 %v12388_v61  ;;  %v7226_v45 = vadd.f32 %v7225_v33, %v6169_v54  ;;  %v7227_v28 = vpop.f32.mrb[133].mxu0  ;;  %v17451_v54 = vld [vmem:[#allocation3_spill] sm:$0xff] }
 0x2f0   : > { %v7228_v10 = vpop.f32.mrb[134].mxu0  ;;  %v6180_v33 = vadd.f32 %v15315_v12, %v17451_v54  ;;  %v12402_v12 = vld [vmem:[%s17316_s2 + $0x5cc] ss:$16 sps:$4 sm:$0xff]  }
 0x2f1   : > { %v15522_v15 = vpop.f32.mrb[100].mxu1  ;;  %v7229_v55 = vadd.f32 %v7228_v10, %v6172_v49  ;;  %v7230_v61 = vpop.f32.mrb[135].mxu0  ;;  %v12398_v49 = vld [vmem:[%s17316_s2 + $0x6a0] ss:$16 sps:$4 sm:$0xff]  }
 0x2f2   : > { %v6234_v59 = vpop.f32.mrb[101].mxu1 }
 0x2f3   : > { %v15530_v32 = vpop.f32.mrb[102].mxu1  ;;  %v10701_v14 = vpack.c.bf16 %v7229_v55, %v7226_v45  ;;  %7440 = vmatmul.mubr.bf16.gmra.mrb[240].mxu0 %v12393_v30  ;;  %v12399_v45 = vld [vmem:[%s17316_s2 + $0x5a8] ss:$16 sps:$4 sm:$0xff]  }
 0x2f4   : > { %v6237_v56 = vpop.f32.mrb[103].mxu1  ;;  %7447 = vmatprep.mubr.bf16.mxu0 %v12396_v0 }
 0x2f5   : > { %11269 = vst [vmem:[%s14945_s22 + $0x88] sm:$0xff] %v10701_v14   ;;  %v17452_v56 = vld [vmem:[#allocation11_spill] sm:$0xff] }
 0x2f6   : > { %6447 = vmatmul.mubr.bf16.gmra.mrb[208].mxu1 %v12392_v57  ;;  %v7233_v24 = vpop.f32.mrb[136].mxu0  ;;  %v6185_v14 = vadd.f32 %v15330_v50, %v17452_v56 }
 0x2f7   : > { %6454 = vmatprep.mubr.bf16.mxu1 %v12394_v4  ;;  %v7234_v34 = vadd.f32 %v7233_v24, %v6177_v27  ;;  %v7235_v28 = vpop.f32.mrb[137].mxu0  ;;  %v17453_v24 = vld [vmem:[#allocation4_spill] sm:$0xff] }
 0x2f8   : > { %v7236_v30 = vpop.f32.mrb[138].mxu0  ;;  %v6188_v54 = vadd.f32 %v15352_v36, %v17453_v24  ;;  %v12408_v36 = vld [vmem:[%s17316_s2 + $0x5ec] ss:$16 sps:$4 sm:$0xff]  }
 0x2f9   : > { %v15543_v57 = vpop.f32.mrb[104].mxu1  ;;  %v7237_v4 = vadd.f32 %v7236_v30, %v6180_v33  ;;  %v7238_v0 = vpop.f32.mrb[139].mxu0  ;;  %v12406_v30 = vld [vmem:[%s17316_s2 + $0x6e4] ss:$16 sps:$4 sm:$0xff]  }
 0x2fa   : > { %v6242_v10 = vpop.f32.mrb[105].mxu1 }
 0x2fb   : > { %v15551_v59 = vpop.f32.mrb[106].mxu1  ;;  %v10706_v61 = vpack.c.bf16 %v7237_v4, %v7234_v34  ;;  %7448 = vmatmul.mubr.bf16.gmra.mrb[244].mxu0 %v12399_v45  ;;  %v12404_v34 = vld [vmem:[%s17316_s2 + $0x6c0] ss:$16 sps:$4 sm:$0xff]  }
 0x2fc   : > { %v6245_v55 = vpop.f32.mrb[107].mxu1  ;;  %7455 = vmatprep.mubr.bf16.mxu0 %v12402_v12 }
 0x2fd   : > { %11270 = vst [vmem:[%s14945_s22 + $0x90] sm:$0xff] %v10706_v61   ;;  %v17454_v55 = vld [vmem:[#allocation13_spill] sm:$0xff] }
 0x2fe   : > { %6455 = vmatmul.mubr.bf16.gmra.mrb[212].mxu1 %v12398_v49  ;;  %v7241_v19 = vpop.f32.mrb[140].mxu0  ;;  %v12405_v49 = vld [vmem:[%s17316_s2 + $0x5c8] ss:$16 sps:$4 sm:$0xff]   ;;  %v6193_v61 = vadd.f32 %v15367_v20, %v17454_v55 }
 0x2ff   : > { %6462 = vmatprep.mubr.bf16.mxu1 %v12400_v44  ;;  %v7242_v33 = vadd.f32 %v7241_v19, %v6185_v14  ;;  %v7243_v28 = vpop.f32.mrb[141].mxu0  ;;  %v17455_v19 = vld [vmem:[#allocation5_spill] sm:$0xff] }
 0x300   : > { %v7244_v50 = vpop.f32.mrb[142].mxu0  ;;  %v6196_v24 = vadd.f32 %v15386_v23, %v17455_v19  ;;  %v12416_v23 = vld [vmem:[%s17316_s2 + $0x60c] ss:$16 sps:$4 sm:$0xff]  }
 0x301   : > { %v15556_v27 = vpop.f32.mrb[108].mxu1  ;;  %v7245_v12 = vadd.f32 %v7244_v50, %v6188_v54  ;;  %v7246_v10 = vpop.f32.mrb[143].mxu0  ;;  %v12410_v54 = vld [vmem:[%s17316_s2 + $0x6e0] ss:$16 sps:$4 sm:$0xff]  }
 0x302   : > { %v6250_v45 = vpop.f32.mrb[109].mxu1 }
 0x303   : > { %v15572_v44 = vpop.f32.mrb[110].mxu1  ;;  %v10711_v0 = vpack.c.bf16 %v7245_v12, %v7242_v33  ;;  %7456 = vmatmul.mubr.bf16.gmra.mrb[248].mxu0 %v12405_v49  ;;  %v12411_v33 = vld [vmem:[%s17316_s2 + $0x5e8] ss:$16 sps:$4 sm:$0xff]   ;;  %v12412_v49 = vld [vmem:[%s17316_s2 + $0x704] ss:$16 sps:$4 sm:$0xff]  }
 0x304   : > { %v6253_v4 = vpop.f32.mrb[111].mxu1  ;;  %7463 = vmatprep.mubr.bf16.mxu0 %v12408_v36 }
 0x305   : > { %11271 = vst [vmem:[%s14945_s22 + $0x98] sm:$0xff] %v10711_v0   ;;  %v17456_v4 = vld [vmem:[#allocation14_spill] sm:$0xff] }
 0x306   : > { %6463 = vmatmul.mubr.bf16.gmra.mrb[216].mxu1 %v12404_v34  ;;  %v7249_v56 = vpop.f32.mrb[144].mxu0  ;;  %v6201_v0 = vadd.f32 %v15401_v41, %v17456_v4 }
 0x307   : > { %6470 = vmatprep.mubr.bf16.mxu1 %v12406_v30  ;;  %v7250_v28 = vadd.f32 %v7249_v56, %v6193_v61  ;;  %v7251_v45 = vpop.f32.mrb[145].mxu0  ;;  %v17457_v56 = vld [vmem:[#allocation6_spill] sm:$0xff] }
 0x308   : > { %v7252_v20 = vpop.f32.mrb[146].mxu0  ;;  %v6204_v19 = vadd.f32 %v15420_v29, %v17457_v56  ;;  %v12422_v29 = vld [vmem:[%s17316_s2 + $0x62c] ss:$16 sps:$4 sm:$0xff]  }
 0x309   : > { %v15577_v14 = vpop.f32.mrb[112].mxu1  ;;  %v7253_v30 = vadd.f32 %v7252_v20, %v6196_v24  ;;  %v7254_v36 = vpop.f32.mrb[147].mxu0  ;;  %v12414_v24 = vld [vmem:[%s17316_s2 + $0x608] ss:$16 sps:$4 sm:$0xff]  }
 0x30a   : > { %v6258_v34 = vpop.f32.mrb[113].mxu1 }
 0x30b   : > { %v15593_v50 = vpop.f32.mrb[114].mxu1  ;;  %v10716_v10 = vpack.c.bf16 %v7253_v30, %v7250_v28  ;;  %7464 = vmatmul.mubr.bf16.gmra.mrb[252].mxu0 %v12411_v33  ;;  %v12417_v28 = vld [vmem:[%s17316_s2 + $0x700] ss:$16 sps:$4 sm:$0xff]   ;;  %v12418_v33 = vld [vmem:[%s17316_s2 + $0x724] ss:$16 sps:$4 sm:$0xff]  }
 0x30c   : > { %v6261_v12 = vpop.f32.mrb[115].mxu1  ;;  %7471 = vmatprep.mubr.bf16.mxu0 %v12416_v23 }
 0x30d   : > { %11272 = vst [vmem:[%s14945_s22 + $0xa0] sm:$0xff] %v10716_v10   ;;  %v17458_v12 = vld [vmem:[#allocation16_spill] sm:$0xff] }
 0x30e   : > { %6471 = vmatmul.mubr.bf16.gmra.mrb[220].mxu1 %v12410_v54  ;;  %v7257_v55 = vpop.f32.mrb[148].mxu0  ;;  %v6209_v10 = vadd.f32 %v15435_v21, %v17458_v12 }
 0x30f   : > { %6478 = vmatprep.mubr.bf16.mxu1 %v12412_v49  ;;  %v7258_v45 = vadd.f32 %v7257_v55, %v6201_v0  ;;  %v7259_v34 = vpop.f32.mrb[149].mxu0  ;;  %v17459_v55 = vld [vmem:[#allocation7_spill] sm:$0xff] }
 0x310   : > { %v7260_v41 = vpop.f32.mrb[150].mxu0  ;;  %v6212_v56 = vadd.f32 %v15457_v53, %v17459_v55  ;;  %v12428_v53 = vld [vmem:[%s17316_s2 + $0x64c] ss:$16 sps:$4 sm:$0xff]  }
 0x311   : > { %v15598_v61 = vpop.f32.mrb[116].mxu1  ;;  %v7261_v49 = vadd.f32 %v7260_v41, %v6204_v19  ;;  %v7262_v23 = vpop.f32.mrb[151].mxu0  ;;  %v12420_v19 = vld [vmem:[%s17316_s2 + $0x628] ss:$16 sps:$4 sm:$0xff]  }
 0x312   : > { %v6266_v54 = vpop.f32.mrb[117].mxu1 }
 0x313   : > { %v15614_v20 = vpop.f32.mrb[118].mxu1  ;;  %v10721_v36 = vpack.c.bf16 %v7261_v49, %v7258_v45  ;;  %7472 = vmatmul.mubr.bf16.gmra.mrb[0].mxu0 %v12414_v24  ;;  %v12423_v45 = vld [vmem:[%s17316_s2 + $0x720] ss:$16 sps:$4 sm:$0xff]  }
 0x314   : > { %v6269_v30 = vpop.f32.mrb[119].mxu1  ;;  %7479 = vmatprep.mubr.bf16.mxu0 %v12422_v29 }
 0x315   : > { %11273 = vst [vmem:[%s14945_s22 + $0xa8] sm:$0xff] %v10721_v36   ;;  %v17460_v30 = vld [vmem:[#allocation18_spill] sm:$0xff] }
 0x316   : > { %6479 = vmatmul.mubr.bf16.gmra.mrb[224].mxu1 %v12417_v28  ;;  %v7265_v4 = vpop.f32.mrb[152].mxu0  ;;  %v12424_v28 = vld [vmem:[%s17316_s2 + $0x744] ss:$16 sps:$4 sm:$0xff]   ;;  %v6217_v36 = vadd.f32 %v15480_v48, %v17460_v30 }
 0x317   : > { %6486 = vmatprep.mubr.bf16.mxu1 %v12418_v33  ;;  %v7266_v34 = vadd.f32 %v7265_v4, %v6209_v10  ;;  %v7267_v54 = vpop.f32.mrb[153].mxu0  ;;  %v17461_v4 = vld [vmem:[#allocation8_spill] sm:$0xff] }
 0x318   : > { %v7268_v21 = vpop.f32.mrb[154].mxu0  ;;  %v6220_v55 = vadd.f32 %v15488_v3, %v17461_v4  ;;  %v12434_v3 = vld [vmem:[%s17316_s2 + $0x66c] ss:$16 sps:$4 sm:$0xff]  }
 0x319   : > { %v15619_v0 = vpop.f32.mrb[120].mxu1  ;;  %v7269_v33 = vadd.f32 %v7268_v21, %v6212_v56  ;;  %v7270_v29 = vpop.f32.mrb[155].mxu0  ;;  %v12426_v56 = vld [vmem:[%s17316_s2 + $0x648] ss:$16 sps:$4 sm:$0xff]  }
 0x31a   : > { %v6274_v24 = vpop.f32.mrb[121].mxu1 }
 0x31b   : > { %v15635_v41 = vpop.f32.mrb[122].mxu1  ;;  %v10726_v23 = vpack.c.bf16 %v7269_v33, %v7266_v34  ;;  %7480 = vmatmul.mubr.bf16.gmra.mrb[4].mxu0 %v12420_v19  ;;  %v12429_v34 = vld [vmem:[%s17316_s2 + $0x740] ss:$16 sps:$4 sm:$0xff]  }
 0x31c   : > { %v6277_v49 = vpop.f32.mrb[123].mxu1  ;;  %7487 = vmatprep.mubr.bf16.mxu0 %v12428_v53 }
 0x31d   : > { %11274 = vst [vmem:[%s14945_s22 + $0xb0] sm:$0xff] %v10726_v23   ;;  %v17462_v49 = vld [vmem:[#allocation19_spill] sm:$0xff] }
 0x31e   : > { %6487 = vmatmul.mubr.bf16.gmra.mrb[228].mxu1 %v12423_v45  ;;  %v7273_v12 = vpop.f32.mrb[156].mxu0  ;;  %v12430_v45 = vld [vmem:[%s17316_s2 + $0x764] ss:$16 sps:$4 sm:$0xff]   ;;  %v6225_v23 = vadd.f32 %v15501_v58, %v17462_v49 }
 0x31f   : > { %6494 = vmatprep.mubr.bf16.mxu1 %v12424_v28  ;;  %v7274_v54 = vadd.f32 %v7273_v12, %v6217_v36  ;;  %v7275_v24 = vpop.f32.mrb[157].mxu0  ;;  %v17463_v12 = vld [vmem:[#allocation10_spill] sm:$0xff] }
 0x320   : > { %v7276_v48 = vpop.f32.mrb[158].mxu0  ;;  %v6228_v4 = vadd.f32 %v15509_v62, %v17463_v12  ;;  %v12440_v62 = vld [vmem:[%s17316_s2 + $0x68c] ss:$16 sps:$4 sm:$0xff]  }
 0x321   : > { %v15640_v10 = vpop.f32.mrb[124].mxu1  ;;  %v7277_v28 = vadd.f32 %v7276_v48, %v6220_v55  ;;  %v7278_v53 = vpop.f32.mrb[159].mxu0  ;;  %v12432_v55 = vld [vmem:[%s17316_s2 + $0x668] ss:$16 sps:$4 sm:$0xff]  }
 0x322   : > { %v6282_v19 = vpop.f32.mrb[125].mxu1 }
 0x323   : > { %v15656_v21 = vpop.f32.mrb[126].mxu1  ;;  %v10731_v29 = vpack.c.bf16 %v7277_v28, %v7274_v54  ;;  %7488 = vmatmul.mubr.bf16.gmra.mrb[8].mxu0 %v12426_v56  ;;  %v12435_v54 = vld [vmem:[%s17316_s2 + $0x760] ss:$16 sps:$4 sm:$0xff]  }
 0x324   : > { %v6285_v33 = vpop.f32.mrb[127].mxu1  ;;  %7495 = vmatprep.mubr.bf16.mxu0 %v12434_v3 }
 0x325   : > { %11275 = vst [vmem:[%s14945_s22 + $0xb8] sm:$0xff] %v10731_v29   ;;  %v17464_v33 = vld [vmem:[#allocation21_spill] sm:$0xff] }
 0x326   : > { %6495 = vmatmul.mubr.bf16.gmra.mrb[232].mxu1 %v12429_v34  ;;  %v7281_v30 = vpop.f32.mrb[160].mxu0  ;;  %v12436_v34 = vld [vmem:[%s17316_s2 + $0x784] ss:$16 sps:$4 sm:$0xff]   ;;  %v6233_v29 = vadd.f32 %v15522_v15, %v17464_v33 }
 0x327   : > { %6502 = vmatprep.mubr.bf16.mxu1 %v12430_v45  ;;  %v7282_v24 = vadd.f32 %v7281_v30, %v6225_v23  ;;  %v7283_v19 = vpop.f32.mrb[161].mxu0  ;;  %v17465_v30 = vld [vmem:[#allocation12_spill] sm:$0xff] }
 0x328   : > { %v7284_v58 = vpop.f32.mrb[162].mxu0  ;;  %v6236_v12 = vadd.f32 %v15530_v32, %v17465_v30  ;;  %v12446_v32 = vld [vmem:[%s17316_s2 + $0x6ac] ss:$16 sps:$4 sm:$0xff]  }
 0x329   : > { %v15661_v36 = vpop.f32.mrb[128].mxu1  ;;  %v7285_v45 = vadd.f32 %v7284_v58, %v6228_v4  ;;  %v7286_v3 = vpop.f32.mrb[163].mxu0  ;;  %v12438_v4 = vld [vmem:[%s17316_s2 + $0x688] ss:$16 sps:$4 sm:$0xff]  }
 0x32a   : > { %v6290_v56 = vpop.f32.mrb[129].mxu1 }
 0x32b   : > { %v15677_v48 = vpop.f32.mrb[130].mxu1  ;;  %v10736_v53 = vpack.c.bf16 %v7285_v45, %v7282_v24  ;;  %7496 = vmatmul.mubr.bf16.gmra.mrb[12].mxu0 %v12432_v55  ;;  %v12441_v24 = vld [vmem:[%s17316_s2 + $0x780] ss:$16 sps:$4 sm:$0xff]  }
 0x32c   : > { %v6293_v28 = vpop.f32.mrb[131].mxu1  ;;  %7503 = vmatprep.mubr.bf16.mxu0 %v12440_v62 }
 0x32d   : > { %11276 = vst [vmem:[%s14945_s22 + $0xc0] sm:$0xff] %v10736_v53   ;;  %v17466_v28 = vld [vmem:[#allocation23_spill] sm:$0xff] }
 0x32e   : > { %6503 = vmatmul.mubr.bf16.gmra.mrb[236].mxu1 %v12435_v54  ;;  %v7289_v49 = vpop.f32.mrb[164].mxu0  ;;  %v12442_v54 = vld [vmem:[%s17316_s2 + $0x7a4] ss:$16 sps:$4 sm:$0xff]   ;;  %v6241_v53 = vadd.f32 %v15543_v57, %v17466_v28 }
 0x32f   : > { %6510 = vmatprep.mubr.bf16.mxu1 %v12436_v34  ;;  %v7290_v19 = vadd.f32 %v7289_v49, %v6233_v29  ;;  %v7291_v56 = vpop.f32.mrb[165].mxu0  ;;  %v17467_v49 = vld [vmem:[#allocation15_spill] sm:$0xff] }
 0x330   : > { %v7292_v15 = vpop.f32.mrb[166].mxu0  ;;  %v6244_v30 = vadd.f32 %v15551_v59, %v17467_v49  ;;  %v12452_v59 = vld [vmem:[%s17316_s2 + $0x6cc] ss:$16 sps:$4 sm:$0xff]  }
 0x331   : > { %v15682_v23 = vpop.f32.mrb[132].mxu1  ;;  %v7293_v34 = vadd.f32 %v7292_v15, %v6236_v12  ;;  %v7294_v62 = vpop.f32.mrb[167].mxu0  ;;  %v12444_v12 = vld [vmem:[%s17316_s2 + $0x6a8] ss:$16 sps:$4 sm:$0xff]  }
 0x332   : > { %v6298_v55 = vpop.f32.mrb[133].mxu1 }
 0x333   : > { %v15698_v58 = vpop.f32.mrb[134].mxu1  ;;  %v10741_v3 = vpack.c.bf16 %v7293_v34, %v7290_v19  ;;  %7504 = vmatmul.mubr.bf16.gmra.mrb[16].mxu0 %v12438_v4  ;;  %v12447_v19 = vld [vmem:[%s17316_s2 + $0x7a0] ss:$16 sps:$4 sm:$0xff]  }
 0x334   : > { %v6301_v45 = vpop.f32.mrb[135].mxu1  ;;  %7511 = vmatprep.mubr.bf16.mxu0 %v12446_v32 }
 0x335   : > { %11277 = vst [vmem:[%s14945_s22 + $0xc8] sm:$0xff] %v10741_v3   ;;  %v17468_v45 = vld [vmem:[#allocation24_spill] sm:$0xff] }
 0x336   : > { %6511 = vmatmul.mubr.bf16.gmra.mrb[240].mxu1 %v12441_v24  ;;  %v7297_v33 = vpop.f32.mrb[168].mxu0  ;;  %v12448_v24 = vld [vmem:[%s17316_s2 + $0x7c4] ss:$16 sps:$4 sm:$0xff]   ;;  %v6249_v3 = vadd.f32 %v15556_v27, %v17468_v45 }
 0x337   : > { %6518 = vmatprep.mubr.bf16.mxu1 %v12442_v54  ;;  %v7298_v56 = vadd.f32 %v7297_v33, %v6241_v53  ;;  %v7299_v55 = vpop.f32.mrb[169].mxu0  ;;  %v17469_v33 = vld [vmem:[#allocation17_spill] sm:$0xff] }
 0x338   : > { %v7300_v57 = vpop.f32.mrb[170].mxu0  ;;  %v6252_v49 = vadd.f32 %v15572_v44, %v17469_v33  ;;  %v12458_v44 = vld [vmem:[%s17316_s2 + $0x6ec] ss:$16 sps:$4 sm:$0xff]  }
 0x339   : > { %v15703_v29 = vpop.f32.mrb[136].mxu1  ;;  %v7301_v54 = vadd.f32 %v7300_v57, %v6244_v30  ;;  %v7302_v32 = vpop.f32.mrb[171].mxu0  ;;  %v12450_v30 = vld [vmem:[%s17316_s2 + $0x6c8] ss:$16 sps:$4 sm:$0xff]   ;;  %v12454_v57 = vld [vmem:[%s17316_s2 + $0x7e4] ss:$16 sps:$4 sm:$0xff]  }
 0x33a   : > { %v6306_v4 = vpop.f32.mrb[137].mxu1 }
 0x33b   : > { %v15719_v15 = vpop.f32.mrb[138].mxu1  ;;  %v10746_v62 = vpack.c.bf16 %v7301_v54, %v7298_v56  ;;  %7512 = vmatmul.mubr.bf16.gmra.mrb[20].mxu0 %v12444_v12  ;;  %v12453_v56 = vld [vmem:[%s17316_s2 + $0x7c0] ss:$16 sps:$4 sm:$0xff]  }
 0x33c   : > { %v6309_v34 = vpop.f32.mrb[139].mxu1  ;;  %7519 = vmatprep.mubr.bf16.mxu0 %v12452_v59 }
 0x33d   : > { %11278 = vst [vmem:[%s14945_s22 + $0xd0] sm:$0xff] %v10746_v62   ;;  %v17470_v34 = vld [vmem:[#allocation26_spill] sm:$0xff] }
 0x33e   : > { %6519 = vmatmul.mubr.bf16.gmra.mrb[244].mxu1 %v12447_v19  ;;  %v7305_v28 = vpop.f32.mrb[172].mxu0  ;;  %v6257_v62 = vadd.f32 %v15577_v14, %v17470_v34 }
 0x33f   : > { %6526 = vmatprep.mubr.bf16.mxu1 %v12448_v24  ;;  %v7306_v55 = vadd.f32 %v7305_v28, %v6249_v3  ;;  %v7307_v4 = vpop.f32.mrb[173].mxu0  ;;  %v17471_v28 = vld [vmem:[#allocation20_spill] sm:$0xff] }
 0x340   : > { %v7308_v27 = vpop.f32.mrb[174].mxu0  ;;  %v6260_v33 = vadd.f32 %v15593_v50, %v17471_v28  ;;  %v12465_v50 = vld [vmem:[%s17316_s2 + $0x70c] ss:$16 sps:$4 sm:$0xff]  }
 0x341   : > { %v15724_v53 = vpop.f32.mrb[140].mxu1  ;;  %v7309_v24 = vadd.f32 %v7308_v27, %v6252_v49  ;;  %v7310_v59 = vpop.f32.mrb[175].mxu0  ;;  %v12456_v49 = vld [vmem:[%s17316_s2 + $0x6e8] ss:$16 sps:$4 sm:$0xff]   ;;  %v12462_v27 = vld [vmem:[%s17316_s2 + $0x804] ss:$16 sps:$4 sm:$0xff]  }
 0x342   : > { %v6314_v12 = vpop.f32.mrb[141].mxu1 }
 0x343   : > { %v15734_v19 = vpop.f32.mrb[142].mxu1  ;;  %v10751_v32 = vpack.c.bf16 %v7309_v24, %v7306_v55  ;;  %7520 = vmatmul.mubr.bf16.gmra.mrb[24].mxu0 %v12450_v30  ;;  %v12459_v55 = vld [vmem:[%s17316_s2 + $0x7e0] ss:$16 sps:$4 sm:$0xff]  }
 0x344   : > { %v6317_v54 = vpop.f32.mrb[143].mxu1  ;;  %7527 = vmatprep.mubr.bf16.mxu0 %v12458_v44 }
 0x345   : > { %11279 = vst [vmem:[%s14945_s22 + $0xd8] sm:$0xff] %v10751_v32   ;;  %v17472_v54 = vld [vmem:[#allocation28_spill] sm:$0xff] }
 0x346   : > { %6527 = vmatmul.mubr.bf16.gmra.mrb[248].mxu1 %v12453_v56  ;;  %v7313_v45 = vpop.f32.mrb[176].mxu0  ;;  %v6265_v32 = vadd.f32 %v15598_v61, %v17472_v54 }
 0x347   : > { %6534 = vmatprep.mubr.bf16.mxu1 %v12454_v57  ;;  %v7314_v4 = vadd.f32 %v7313_v45, %v6257_v62  ;;  %v7315_v12 = vpop.f32.mrb[177].mxu0  ;;  %v17473_v45 = vld [vmem:[#allocation22_spill] sm:$0xff] }
 0x348   : > { %v7316_v14 = vpop.f32.mrb[178].mxu0  ;;  %v6268_v28 = vadd.f32 %v15614_v20, %v17473_v45  ;;  %v12471_v20 = vld [vmem:[%s17316_s2 + $0x72c] ss:$16 sps:$4 sm:$0xff]  }
 0x349   : > { %v15745_v3 = vpop.f32.mrb[144].mxu1  ;;  %v7317_v57 = vadd.f32 %v7316_v14, %v6260_v33  ;;  %v7318_v44 = vpop.f32.mrb[179].mxu0  ;;  %v12468_v14 = vld [vmem:[%s17316_s2 + $0x824] ss:$16 sps:$4 sm:$0xff]  }
 0x34a   : > { %v6322_v30 = vpop.f32.mrb[145].mxu1 }
 0x34b   : > { %v15755_v56 = vpop.f32.mrb[146].mxu1  ;;  %v10756_v59 = vpack.c.bf16 %v7317_v57, %v7314_v4  ;;  %7528 = vmatmul.mubr.bf16.gmra.mrb[28].mxu0 %v12456_v49  ;;  %v12460_v4 = vld [vmem:[%s17316_s2 + $0x800] ss:$16 sps:$4 sm:$0xff]   ;;  %v12463_v49 = vld [vmem:[%s17316_s2 + $0x708] ss:$16 sps:$4 sm:$0xff]  }
 0x34c   : > { %v6325_v24 = vpop.f32.mrb[147].mxu1  ;;  %7535 = vmatprep.mubr.bf16.mxu0 %v12465_v50 }
 0x34d   : > { %11280 = vst [vmem:[%s14945_s22 + $0xe0] sm:$0xff] %v10756_v59   ;;  %v17474_v24 = vld [vmem:[#allocation30_spill] sm:$0xff] }
 0x34e   : > { %6535 = vmatmul.mubr.bf16.gmra.mrb[252].mxu1 %v12459_v55  ;;  %v7321_v34 = vpop.f32.mrb[180].mxu0  ;;  %v6273_v59 = vadd.f32 %v15619_v0, %v17474_v24 }
 0x34f   : > { %6542 = vmatprep.mubr.bf16.mxu1 %v12462_v27  ;;  %v7322_v12 = vadd.f32 %v7321_v34, %v6265_v32  ;;  %v7323_v30 = vpop.f32.mrb[181].mxu0  ;;  %v17475_v34 = vld [vmem:[#allocation25_spill] sm:$0xff] }
 0x350   : > { %v7324_v61 = vpop.f32.mrb[182].mxu0  ;;  %v6276_v45 = vadd.f32 %v15635_v41, %v17475_v34  ;;  %v12477_v41 = vld [vmem:[%s17316_s2 + $0x74c] ss:$16 sps:$4 sm:$0xff]  }
 0x351   : > { %v15766_v62 = vpop.f32.mrb[148].mxu1  ;;  %v7325_v27 = vadd.f32 %v7324_v61, %v6268_v28  ;;  %v7326_v57 = vpop.f32.mrb[183].mxu0  ;;  %v12474_v61 = vld [vmem:[%s17316_s2 + $0x844] ss:$16 sps:$4 sm:$0xff]  }
 0x352   : > { %v6330_v33 = vpop.f32.mrb[149].mxu1  ;;  %v17476_v57 = vld [vmem:[#allocation32_spill] sm:$0xff] }
 0x353   : > { %v15776_v55 = vpop.f32.mrb[150].mxu1  ;;  %v10761_v44 = vpack.c.bf16 %v7325_v27, %v7322_v12  ;;  %7536 = vmatmul.mubr.bf16.gmra.mrb[32].mxu0 %v12463_v49  ;;  %v12466_v12 = vld [vmem:[%s17316_s2 + $0x820] ss:$16 sps:$4 sm:$0xff]  }
 0x354   : > { %v6333_v50 = vpop.f32.mrb[151].mxu1  ;;  %7543 = vmatprep.mubr.bf16.mxu0 %v12471_v20 }
 0x355   : > { %11281 = vst [vmem:[%s14945_s22 + $0xe8] sm:$0xff] %v10761_v44   ;;  %v6281_v44 = vadd.f32 %v15640_v10, %v17476_v57 }
 0x356   : > { %6543 = vmatmul.mubr.bf16.gmra.mrb[148].mxu1 %v12460_v4  ;;  %v7329_v54 = vpop.f32.mrb[184].mxu0  ;;  %v12469_v4 = vld [vmem:[%s17316_s2 + $0x728] ss:$16 sps:$4 sm:$0xff]  }
 0x357   : > { %6550 = vmatprep.mubr.bf16.mxu1 %v12468_v14  ;;  %v7330_v30 = vadd.f32 %v7329_v54, %v6273_v59  ;;  %v7331_v33 = vpop.f32.mrb[185].mxu0  ;;  %v17477_v54 = vld [vmem:[#allocation27_spill] sm:$0xff] }
 0x358   : > { %v7332_v0 = vpop.f32.mrb[186].mxu0  ;;  %v6284_v34 = vadd.f32 %v15656_v21, %v17477_v54  ;;  %v12483_v21 = vld [vmem:[%s17316_s2 + $0x76c] ss:$16 sps:$4 sm:$0xff]  }
 0x359   : > { %v15787_v32 = vpop.f32.mrb[152].mxu1  ;;  %v7333_v14 = vadd.f32 %v7332_v0, %v6276_v45  ;;  %v7334_v27 = vpop.f32.mrb[187].mxu0  ;;  %v12480_v0 = vld [vmem:[%s17316_s2 + $0x864] ss:$16 sps:$4 sm:$0xff]  }
 0x35a   : > { %v6338_v28 = vpop.f32.mrb[153].mxu1  ;;  %v17478_v27 = vld [vmem:[#allocation34_spill] sm:$0xff] }
 0x35b   : > { %v15797_v49 = vpop.f32.mrb[154].mxu1  ;;  %v10766_v50 = vpack.c.bf16 %v7333_v14, %v7330_v30  ;;  %7544 = vmatmul.mubr.bf16.gmra.mrb[36].mxu0 %v12469_v4  ;;  %v12472_v30 = vld [vmem:[%s17316_s2 + $0x840] ss:$16 sps:$4 sm:$0xff]  }
 0x35c   : > { %v6341_v20 = vpop.f32.mrb[155].mxu1  ;;  %7551 = vmatprep.mubr.bf16.mxu0 %v12477_v41 }
 0x35d   : > { %11282 = vst [vmem:[%s14945_s22 + $0xf0] sm:$0xff] %v10766_v50   ;;  %v6289_v50 = vadd.f32 %v15661_v36, %v17478_v27 }
 0x35e   : > { %6551 = vmatmul.mubr.bf16.gmra.mrb[152].mxu1 %v12466_v12  ;;  %v7337_v24 = vpop.f32.mrb[188].mxu0  ;;  %v12475_v12 = vld [vmem:[%s17316_s2 + $0x748] ss:$16 sps:$4 sm:$0xff]  }
 0x35f   : > { %6558 = vmatprep.mubr.bf16.mxu1 %v12474_v61  ;;  %v7338_v33 = vadd.f32 %v7337_v24, %v6281_v44  ;;  %v7339_v28 = vpop.f32.mrb[189].mxu0  ;;  %v17479_v24 = vld [vmem:[#allocation29_spill] sm:$0xff] }
 0x360   : > { %v7340_v10 = vpop.f32.mrb[190].mxu0  ;;  %v6292_v54 = vadd.f32 %v15677_v48, %v17479_v24  ;;  %v12489_v48 = vld [vmem:[%s17316_s2 + $0x78c] ss:$16 sps:$4 sm:$0xff]  }
 0x361   : > { %v15808_v59 = vpop.f32.mrb[156].mxu1  ;;  %v7341_v61 = vadd.f32 %v7340_v10, %v6284_v34  ;;  %v7342_v14 = vpop.f32.mrb[191].mxu0  ;;  %v12486_v10 = vld [vmem:[%s17316_s2 + $0x884] ss:$16 sps:$4 sm:$0xff]  }
 0x362   : > { %v6346_v45 = vpop.f32.mrb[157].mxu1  ;;  %v17480_v14 = vld [vmem:[#allocation36_spill] sm:$0xff] }
 0x363   : > { %v15818_v4 = vpop.f32.mrb[158].mxu1  ;;  %v10771_v20 = vpack.c.bf16 %v7341_v61, %v7338_v33  ;;  %7552 = vmatmul.mubr.bf16.gmra.mrb[40].mxu0 %v12475_v12  ;;  %v12478_v33 = vld [vmem:[%s17316_s2 + $0x860] ss:$16 sps:$4 sm:$0xff]  }
 0x364   : > { %v6349_v41 = vpop.f32.mrb[159].mxu1  ;;  %7559 = vmatprep.mubr.bf16.mxu0 %v12483_v21 }
 0x365   : > { %11283 = vst [vmem:[%s14945_s22 + $0xf8] sm:$0xff] %v10771_v20   ;;  %v6297_v20 = vadd.f32 %v15682_v23, %v17480_v14 }
 0x366   : > { %6559 = vmatmul.mubr.bf16.gmra.mrb[156].mxu1 %v12472_v30  ;;  %v7345_v57 = vpop.f32.mrb[192].mxu0  ;;  %v12481_v30 = vld [vmem:[%s17316_s2 + $0x768] ss:$16 sps:$4 sm:$0xff]  }
 0x367   : > { %6566 = vmatprep.mubr.bf16.mxu1 %v12480_v0  ;;  %v7346_v28 = vadd.f32 %v7345_v57, %v6289_v50  ;;  %v7347_v45 = vpop.f32.mrb[193].mxu0  ;;  %v17481_v57 = vld [vmem:[#allocation31_spill] sm:$0xff] }
 0x368   : > { %v7348_v36 = vpop.f32.mrb[194].mxu0  ;;  %v6300_v24 = vadd.f32 %v15698_v58, %v17481_v57  ;;  %v12495_v58 = vld [vmem:[%s17316_s2 + $0x7ac] ss:$16 sps:$4 sm:$0xff]  }
 0x369   : > { %v15829_v44 = vpop.f32.mrb[160].mxu1  ;;  %v7349_v0 = vadd.f32 %v7348_v36, %v6292_v54  ;;  %v7350_v61 = vpop.f32.mrb[195].mxu0  ;;  %v12492_v36 = vld [vmem:[%s17316_s2 + $0x8a4] ss:$16 sps:$4 sm:$0xff]  }
 0x36a   : > { %v6354_v34 = vpop.f32.mrb[161].mxu1  ;;  %v17482_v61 = vld [vmem:[#allocation38_spill] sm:$0xff] }
 0x36b   : > { %v15839_v12 = vpop.f32.mrb[162].mxu1  ;;  %v10776_v41 = vpack.c.bf16 %v7349_v0, %v7346_v28  ;;  %7560 = vmatmul.mubr.bf16.gmra.mrb[44].mxu0 %v12481_v30  ;;  %v12484_v28 = vld [vmem:[%s17316_s2 + $0x880] ss:$16 sps:$4 sm:$0xff]  }
 0x36c   : > { %v6357_v21 = vpop.f32.mrb[163].mxu1  ;;  %7567 = vmatprep.mubr.bf16.mxu0 %v12489_v48 }
 0x36d   : > { %11284 = vst [vmem:[%s14945_s22 + $0x100] sm:$0xff] %v10776_v41   ;;  %v6305_v41 = vadd.f32 %v15703_v29, %v17482_v61 }
 0x36e   : > { %6567 = vmatmul.mubr.bf16.gmra.mrb[160].mxu1 %v12478_v33  ;;  %v7353_v27 = vpop.f32.mrb[196].mxu0  ;;  %v12487_v33 = vld [vmem:[%s17316_s2 + $0x788] ss:$16 sps:$4 sm:$0xff]  }
 0x36f   : > { %6574 = vmatprep.mubr.bf16.mxu1 %v12486_v10  ;;  %v7354_v45 = vadd.f32 %v7353_v27, %v6297_v20  ;;  %v7355_v34 = vpop.f32.mrb[197].mxu0  ;;  %v17483_v27 = vld [vmem:[#allocation33_spill] sm:$0xff] }
 0x370   : > { %v7356_v23 = vpop.f32.mrb[198].mxu0  ;;  %v6308_v57 = vadd.f32 %v15719_v15, %v17483_v27  ;;  %v12501_v15 = vld [vmem:[%s17316_s2 + $0x7cc] ss:$16 sps:$4 sm:$0xff]  }
 0x371   : > { %v15850_v50 = vpop.f32.mrb[164].mxu1  ;;  %v7357_v10 = vadd.f32 %v7356_v23, %v6300_v24  ;;  %v7358_v0 = vpop.f32.mrb[199].mxu0  ;;  %v12490_v24 = vld [vmem:[%s17316_s2 + $0x8a0] ss:$16 sps:$4 sm:$0xff]  }
 0x372   : > { %v6362_v54 = vpop.f32.mrb[165].mxu1  ;;  %v17484_v0 = vld [vmem:[#allocation40_spill] sm:$0xff] }
 0x373   : > { %v15860_v30 = vpop.f32.mrb[166].mxu1  ;;  %v10781_v21 = vpack.c.bf16 %v7357_v10, %v7354_v45  ;;  %7568 = vmatmul.mubr.bf16.gmra.mrb[48].mxu0 %v12487_v33  ;;  %v12493_v45 = vld [vmem:[%s17316_s2 + $0x7a8] ss:$16 sps:$4 sm:$0xff]   ;;  %v12498_v33 = vld [vmem:[%s17316_s2 + $0x8c4] ss:$16 sps:$4 sm:$0xff]  }
 0x374   : > { %v6365_v48 = vpop.f32.mrb[167].mxu1  ;;  %7575 = vmatprep.mubr.bf16.mxu0 %v12495_v58 }
 0x375   : > { %11285 = vst [vmem:[%s14945_s22 + $0x108] sm:$0xff] %v10781_v21   ;;  %v6313_v21 = vadd.f32 %v15724_v53, %v17484_v0 }
 0x376   : > { %6575 = vmatmul.mubr.bf16.gmra.mrb[164].mxu1 %v12484_v28  ;;  %v7361_v14 = vpop.f32.mrb[200].mxu0 }
 0x377   : > { %6582 = vmatprep.mubr.bf16.mxu1 %v12492_v36  ;;  %v7362_v34 = vadd.f32 %v7361_v14, %v6305_v41  ;;  %v7363_v54 = vpop.f32.mrb[201].mxu0  ;;  %v17485_v14 = vld [vmem:[#allocation35_spill] sm:$0xff] }
 0x378   : > { %v7364_v28 = vpop.f32.mrb[202].mxu0  ;;  %v6316_v27 = vadd.f32 %v15734_v19, %v17485_v14  ;;  %v12507_v19 = vld [vmem:[%s17316_s2 + $0x7ec] ss:$16 sps:$4 sm:$0xff]  }
 0x379   : > { %v15871_v20 = vpop.f32.mrb[168].mxu1  ;;  %v7365_v23 = vadd.f32 %v7364_v28, %v6308_v57  ;;  %v7366_v10 = vpop.f32.mrb[203].mxu0  ;;  %v12504_v28 = vld [vmem:[%s17316_s2 + $0x8e4] ss:$16 sps:$4 sm:$0xff]  }
 0x37a   : > { %v6370_v29 = vpop.f32.mrb[169].mxu1  ;;  %v17486_v10 = vld [vmem:[#allocation42_spill] sm:$0xff] }
 0x37b   : > { %v15887_v36 = vpop.f32.mrb[170].mxu1  ;;  %v10786_v48 = vpack.c.bf16 %v7365_v23, %v7362_v34  ;;  %7576 = vmatmul.mubr.bf16.gmra.mrb[52].mxu0 %v12493_v45  ;;  %v12496_v34 = vld [vmem:[%s17316_s2 + $0x8c0] ss:$16 sps:$4 sm:$0xff]  }
 0x37c   : > { %v6373_v58 = vpop.f32.mrb[171].mxu1  ;;  %7583 = vmatprep.mubr.bf16.mxu0 %v12501_v15 }
 0x37d   : > { %11286 = vst [vmem:[%s14945_s22 + $0x110] sm:$0xff] %v10786_v48   ;;  %v6321_v48 = vadd.f32 %v15745_v3, %v17486_v10 }
 0x37e   : > { %6583 = vmatmul.mubr.bf16.gmra.mrb[168].mxu1 %v12490_v24  ;;  %v7369_v61 = vpop.f32.mrb[204].mxu0  ;;  %v12499_v24 = vld [vmem:[%s17316_s2 + $0x7c8] ss:$16 sps:$4 sm:$0xff]  }
 0x37f   : > { %6590 = vmatprep.mubr.bf16.mxu1 %v12498_v33  ;;  %v7370_v57 = vadd.f32 %v7369_v61, %v6313_v21  ;;  %v7371_v54 = vpop.f32.mrb[205].mxu0  ;;  %v17487_v61 = vld [vmem:[#allocation37_spill] sm:$0xff] }
 0x380   : > { %v7372_v45 = vpop.f32.mrb[206].mxu0  ;;  %v6324_v14 = vadd.f32 %v15755_v56, %v17487_v61  ;;  %v12513_v56 = vld [vmem:[%s17316_s2 + $0x80c] ss:$16 sps:$4 sm:$0xff]  }
 0x381   : > { %v15892_v41 = vpop.f32.mrb[172].mxu1  ;;  %v7373_v29 = vadd.f32 %v7372_v45, %v6316_v27  ;;  %v7374_v23 = vpop.f32.mrb[207].mxu0  ;;  %v12510_v45 = vld [vmem:[%s17316_s2 + $0x904] ss:$16 sps:$4 sm:$0xff]  }
 0x382   : > { %v6378_v53 = vpop.f32.mrb[173].mxu1  ;;  %v17488_v23 = vld [vmem:[#allocation44_spill] sm:$0xff] }
 0x383   : > { %v15908_v33 = vpop.f32.mrb[174].mxu1  ;;  %v10791_v58 = vpack.c.bf16 %v7373_v29, %v7370_v57  ;;  %7584 = vmatmul.mubr.bf16.gmra.mrb[56].mxu0 %v12499_v24  ;;  %v12502_v57 = vld [vmem:[%s17316_s2 + $0x8e0] ss:$16 sps:$4 sm:$0xff]  }
 0x384   : > { %v6381_v15 = vpop.f32.mrb[175].mxu1  ;;  %7591 = vmatprep.mubr.bf16.mxu0 %v12507_v19 }
 0x385   : > { %11287 = vst [vmem:[%s14945_s22 + $0x118] sm:$0xff] %v10791_v58   ;;  %v6329_v58 = vadd.f32 %v15766_v62, %v17488_v23 }
 0x386   : > { %6591 = vmatmul.mubr.bf16.gmra.mrb[172].mxu1 %v12496_v34  ;;  %v7377_v0 = vpop.f32.mrb[208].mxu0  ;;  %v12505_v34 = vld [vmem:[%s17316_s2 + $0x7e8] ss:$16 sps:$4 sm:$0xff]  }
 0x387   : > { %6598 = vmatprep.mubr.bf16.mxu1 %v12504_v28  ;;  %v7378_v27 = vadd.f32 %v7377_v0, %v6321_v48  ;;  %v7379_v54 = vpop.f32.mrb[209].mxu0  ;;  %v17489_v0 = vld [vmem:[#allocation39_spill] sm:$0xff] }
 0x388   : > { %v7380_v24 = vpop.f32.mrb[210].mxu0  ;;  %v6332_v61 = vadd.f32 %v15776_v55, %v17489_v0  ;;  %v12519_v55 = vld [vmem:[%s17316_s2 + $0x82c] ss:$16 sps:$4 sm:$0xff]  }
 0x389   : > { %v15913_v21 = vpop.f32.mrb[176].mxu1  ;;  %v7381_v53 = vadd.f32 %v7380_v24, %v6324_v14  ;;  %v7382_v29 = vpop.f32.mrb[211].mxu0  ;;  %v12516_v24 = vld [vmem:[%s17316_s2 + $0x924] ss:$16 sps:$4 sm:$0xff]  }
 0x38a   : > { %v6386_v3 = vpop.f32.mrb[177].mxu1  ;;  %v17490_v29 = vld [vmem:[#allocation46_spill] sm:$0xff] }
 0x38b   : > { %v15929_v28 = vpop.f32.mrb[178].mxu1  ;;  %v10796_v15 = vpack.c.bf16 %v7381_v53, %v7378_v27  ;;  %7592 = vmatmul.mubr.bf16.gmra.mrb[60].mxu0 %v12505_v34  ;;  %v12508_v27 = vld [vmem:[%s17316_s2 + $0x900] ss:$16 sps:$4 sm:$0xff]  }
 0x38c   : > { %v6389_v19 = vpop.f32.mrb[179].mxu1  ;;  %7599 = vmatprep.mubr.bf16.mxu0 %v12513_v56 }
 0x38d   : > { %11288 = vst [vmem:[%s14945_s22 + $0x120] sm:$0xff] %v10796_v15   ;;  %v6337_v15 = vadd.f32 %v15787_v32, %v17490_v29 }
 0x38e   : > { %6599 = vmatmul.mubr.bf16.gmra.mrb[176].mxu1 %v12502_v57  ;;  %v7385_v10 = vpop.f32.mrb[212].mxu0  ;;  %v12511_v57 = vld [vmem:[%s17316_s2 + $0x808] ss:$16 sps:$4 sm:$0xff]  }
 0x38f   : > { %6606 = vmatprep.mubr.bf16.mxu1 %v12510_v45  ;;  %v7386_v14 = vadd.f32 %v7385_v10, %v6329_v58  ;;  %v7387_v54 = vpop.f32.mrb[213].mxu0  ;;  %v17491_v10 = vld [vmem:[#allocation41_spill] sm:$0xff] }
 0x390   : > { %v7388_v34 = vpop.f32.mrb[214].mxu0  ;;  %v6340_v0 = vadd.f32 %v15797_v49, %v17491_v10  ;;  %v12525_v49 = vld [vmem:[%s17316_s2 + $0x84c] ss:$16 sps:$4 sm:$0xff]  }
 0x391   : > { %v15934_v48 = vpop.f32.mrb[180].mxu1  ;;  %v7389_v3 = vadd.f32 %v7388_v34, %v6332_v61  ;;  %v7390_v53 = vpop.f32.mrb[215].mxu0  ;;  %v12522_v34 = vld [vmem:[%s17316_s2 + $0x944] ss:$16 sps:$4 sm:$0xff]  }
 0x392   : > { %v6394_v62 = vpop.f32.mrb[181].mxu1  ;;  %v17492_v53 = vld [vmem:[#allocation48_spill] sm:$0xff] }
 0x393   : > { %v15950_v45 = vpop.f32.mrb[182].mxu1  ;;  %v10801_v19 = vpack.c.bf16 %v7389_v3, %v7386_v14  ;;  %7600 = vmatmul.mubr.bf16.gmra.mrb[64].mxu0 %v12511_v57  ;;  %v12514_v14 = vld [vmem:[%s17316_s2 + $0x920] ss:$16 sps:$4 sm:$0xff]  }
 0x394   : > { %v6397_v56 = vpop.f32.mrb[183].mxu1  ;;  %7607 = vmatprep.mubr.bf16.mxu0 %v12519_v55 }
 0x395   : > { %11289 = vst [vmem:[%s14945_s22 + $0x128] sm:$0xff] %v10801_v19   ;;  %v6345_v19 = vadd.f32 %v15808_v59, %v17492_v53 }
 0x396   : > { %6607 = vmatmul.mubr.bf16.gmra.mrb[180].mxu1 %v12508_v27  ;;  %v7393_v23 = vpop.f32.mrb[216].mxu0  ;;  %v12517_v27 = vld [vmem:[%s17316_s2 + $0x828] ss:$16 sps:$4 sm:$0xff]  }
 0x397   : > { %6614 = vmatprep.mubr.bf16.mxu1 %v12516_v24  ;;  %v7394_v61 = vadd.f32 %v7393_v23, %v6337_v15  ;;  %v7395_v54 = vpop.f32.mrb[217].mxu0  ;;  %v17493_v23 = vld [vmem:[#allocation43_spill] sm:$0xff] }
 0x398   : > { %v7396_v57 = vpop.f32.mrb[218].mxu0  ;;  %v6348_v10 = vadd.f32 %v15818_v4, %v17493_v23  ;;  %v12531_v4 = vld [vmem:[%s17316_s2 + $0x86c] ss:$16 sps:$4 sm:$0xff]  }
 0x399   : > { %v15955_v58 = vpop.f32.mrb[184].mxu1  ;;  %v7397_v62 = vadd.f32 %v7396_v57, %v6340_v0  ;;  %v7398_v3 = vpop.f32.mrb[219].mxu0  ;;  %v12528_v57 = vld [vmem:[%s17316_s2 + $0x964] ss:$16 sps:$4 sm:$0xff]  }
 0x39a   : > { %v6402_v32 = vpop.f32.mrb[185].mxu1  ;;  %v17494_v3 = vld [vmem:[#allocation50_spill] sm:$0xff] }
 0x39b   : > { %v15971_v24 = vpop.f32.mrb[186].mxu1  ;;  %v10806_v56 = vpack.c.bf16 %v7397_v62, %v7394_v61  ;;  %7608 = vmatmul.mubr.bf16.gmra.mrb[68].mxu0 %v12517_v27  ;;  %v12520_v61 = vld [vmem:[%s17316_s2 + $0x940] ss:$16 sps:$4 sm:$0xff]  }
 0x39c   : > { %v6405_v55 = vpop.f32.mrb[187].mxu1  ;;  %7615 = vmatprep.mubr.bf16.mxu0 %v12525_v49 }
 0x39d   : > { %11290 = vst [vmem:[%s14945_s22 + $0x130] sm:$0xff] %v10806_v56   ;;  %v6353_v56 = vadd.f32 %v15829_v44, %v17494_v3 }
 0x39e   : > { %6615 = vmatmul.mubr.bf16.gmra.mrb[184].mxu1 %v12514_v14  ;;  %v7401_v29 = vpop.f32.mrb[220].mxu0  ;;  %v12523_v14 = vld [vmem:[%s17316_s2 + $0x848] ss:$16 sps:$4 sm:$0xff]  }
 0x39f   : > { %6622 = vmatprep.mubr.bf16.mxu1 %v12522_v34  ;;  %v7402_v0 = vadd.f32 %v7401_v29, %v6345_v19  ;;  %v7403_v54 = vpop.f32.mrb[221].mxu0  ;;  %v17495_v29 = vld [vmem:[#allocation45_spill] sm:$0xff] }
 0x3a0   : > { %v7404_v27 = vpop.f32.mrb[222].mxu0  ;;  %v6356_v23 = vadd.f32 %v15839_v12, %v17495_v29  ;;  %v12537_v12 = vld [vmem:[%s17316_s2 + $0x88c] ss:$16 sps:$4 sm:$0xff]  }
 0x3a1   : > { %v15976_v15 = vpop.f32.mrb[188].mxu1  ;;  %v7405_v32 = vadd.f32 %v7404_v27, %v6348_v10  ;;  %v7406_v62 = vpop.f32.mrb[223].mxu0  ;;  %v12534_v27 = vld [vmem:[%s17316_s2 + $0x984] ss:$16 sps:$4 sm:$0xff]  }
 0x3a2   : > { %v6410_v59 = vpop.f32.mrb[189].mxu1  ;;  %v17496_v62 = vld [vmem:[#allocation52_spill] sm:$0xff] }
 0x3a3   : > { %v15992_v34 = vpop.f32.mrb[190].mxu1  ;;  %v10811_v55 = vpack.c.bf16 %v7405_v32, %v7402_v0  ;;  %7616 = vmatmul.mubr.bf16.gmra.mrb[72].mxu0 %v12523_v14  ;;  %v12526_v0 = vld [vmem:[%s17316_s2 + $0x960] ss:$16 sps:$4 sm:$0xff]  }
 0x3a4   : > { %v6413_v49 = vpop.f32.mrb[191].mxu1  ;;  %7623 = vmatprep.mubr.bf16.mxu0 %v12531_v4 }
 0x3a5   : > { %11291 = vst [vmem:[%s14945_s22 + $0x138] sm:$0xff] %v10811_v55   ;;  %v6361_v55 = vadd.f32 %v15850_v50, %v17496_v62 }
 0x3a6   : > { %6623 = vmatmul.mubr.bf16.gmra.mrb[188].mxu1 %v12520_v61  ;;  %v7409_v53 = vpop.f32.mrb[224].mxu0  ;;  %v12529_v61 = vld [vmem:[%s17316_s2 + $0x868] ss:$16 sps:$4 sm:$0xff]  }
 0x3a7   : > { %6630 = vmatprep.mubr.bf16.mxu1 %v12528_v57  ;;  %v7410_v10 = vadd.f32 %v7409_v53, %v6353_v56  ;;  %v7411_v54 = vpop.f32.mrb[225].mxu0  ;;  %v17497_v53 = vld [vmem:[#allocation47_spill] sm:$0xff] }
 0x3a8   : > { %v7412_v14 = vpop.f32.mrb[226].mxu0  ;;  %v6364_v29 = vadd.f32 %v15860_v30, %v17497_v53  ;;  %v12543_v30 = vld [vmem:[%s17316_s2 + $0x8ac] ss:$16 sps:$4 sm:$0xff]  }
 0x3a9   : > { %v15997_v19 = vpop.f32.mrb[192].mxu1  ;;  %v7413_v59 = vadd.f32 %v7412_v14, %v6356_v23  ;;  %v7414_v32 = vpop.f32.mrb[227].mxu0  ;;  %v12540_v14 = vld [vmem:[%s17316_s2 + $0x9a4] ss:$16 sps:$4 sm:$0xff]  }
 0x3aa   : > { %v6418_v44 = vpop.f32.mrb[193].mxu1  ;;  %v17498_v32 = vld [vmem:[#allocation54_spill] sm:$0xff] }
 0x3ab   : > { %v16013_v57 = vpop.f32.mrb[194].mxu1  ;;  %v10816_v49 = vpack.c.bf16 %v7413_v59, %v7410_v10  ;;  %7624 = vmatmul.mubr.bf16.gmra.mrb[76].mxu0 %v12529_v61  ;;  %v12532_v10 = vld [vmem:[%s17316_s2 + $0x980] ss:$16 sps:$4 sm:$0xff]  }
 0x3ac   : > { %v6421_v4 = vpop.f32.mrb[195].mxu1  ;;  %7631 = vmatprep.mubr.bf16.mxu0 %v12537_v12 }
 0x3ad   : > { %11292 = vst [vmem:[%s14945_s22 + $0x140] sm:$0xff] %v10816_v49   ;;  %v6369_v49 = vadd.f32 %v15871_v20, %v17498_v32 }
 0x3ae   : > { %6631 = vmatmul.mubr.bf16.gmra.mrb[192].mxu1 %v12526_v0  ;;  %v7417_v3 = vpop.f32.mrb[228].mxu0  ;;  %v12535_v0 = vld [vmem:[%s17316_s2 + $0x888] ss:$16 sps:$4 sm:$0xff]  }
 0x3af   : > { %6638 = vmatprep.mubr.bf16.mxu1 %v12534_v27  ;;  %v7418_v23 = vadd.f32 %v7417_v3, %v6361_v55  ;;  %v7419_v54 = vpop.f32.mrb[229].mxu0  ;;  %v17499_v3 = vld [vmem:[#allocation49_spill] sm:$0xff] }
 0x3b0   : > { %v7420_v61 = vpop.f32.mrb[230].mxu0  ;;  %v6372_v53 = vadd.f32 %v15887_v36, %v17499_v3  ;;  %v12549_v36 = vld [vmem:[%s17316_s2 + $0x8cc] ss:$16 sps:$4 sm:$0xff]  }
 0x3b1   : > { %v16018_v56 = vpop.f32.mrb[196].mxu1  ;;  %v7421_v44 = vadd.f32 %v7420_v61, %v6364_v29  ;;  %v7422_v59 = vpop.f32.mrb[231].mxu0  ;;  %v12546_v61 = vld [vmem:[%s17316_s2 + $0x9c4] ss:$16 sps:$4 sm:$0xff]  }
 0x3b2   : > { %v6426_v50 = vpop.f32.mrb[197].mxu1  ;;  %v17500_v59 = vld [vmem:[#allocation56_spill] sm:$0xff] }
 0x3b3   : > { %v16034_v27 = vpop.f32.mrb[198].mxu1  ;;  %v10821_v4 = vpack.c.bf16 %v7421_v44, %v7418_v23  ;;  %7632 = vmatmul.mubr.bf16.gmra.mrb[80].mxu0 %v12535_v0  ;;  %v12538_v23 = vld [vmem:[%s17316_s2 + $0x9a0] ss:$16 sps:$4 sm:$0xff]  }
 0x3b4   : > { %v6429_v12 = vpop.f32.mrb[199].mxu1  ;;  %7639 = vmatprep.mubr.bf16.mxu0 %v12543_v30 }
 0x3b5   : > { %11293 = vst [vmem:[%s14945_s22 + $0x148] sm:$0xff] %v10821_v4   ;;  %v6377_v4 = vadd.f32 %v15892_v41, %v17500_v59 }
 0x3b6   : > { %6639 = vmatmul.mubr.bf16.gmra.mrb[196].mxu1 %v12532_v10  ;;  %v7425_v62 = vpop.f32.mrb[232].mxu0  ;;  %v12541_v10 = vld [vmem:[%s17316_s2 + $0x8a8] ss:$16 sps:$4 sm:$0xff]  }
 0x3b7   : > { %6646 = vmatprep.mubr.bf16.mxu1 %v12540_v14  ;;  %v7426_v29 = vadd.f32 %v7425_v62, %v6369_v49  ;;  %v7427_v54 = vpop.f32.mrb[233].mxu0  ;;  %v17501_v62 = vld [vmem:[#allocation51_spill] sm:$0xff] }
 0x3b8   : > { %v7428_v0 = vpop.f32.mrb[234].mxu0  ;;  %v6380_v3 = vadd.f32 %v15908_v33, %v17501_v62  ;;  %v12555_v33 = vld [vmem:[%s17316_s2 + $0x8ec] ss:$16 sps:$4 sm:$0xff]  }
 0x3b9   : > { %v16039_v55 = vpop.f32.mrb[200].mxu1  ;;  %v7429_v50 = vadd.f32 %v7428_v0, %v6372_v53  ;;  %v7430_v44 = vpop.f32.mrb[235].mxu0  ;;  %v12552_v0 = vld [vmem:[%s17316_s2 + $0x9e4] ss:$16 sps:$4 sm:$0xff]  }
 0x3ba   : > { %v6434_v20 = vpop.f32.mrb[201].mxu1  ;;  %v17502_v44 = vld [vmem:[#allocation58_spill] sm:$0xff] }
 0x3bb   : > { %v16055_v14 = vpop.f32.mrb[202].mxu1  ;;  %v10826_v12 = vpack.c.bf16 %v7429_v50, %v7426_v29  ;;  %7640 = vmatmul.mubr.bf16.gmra.mrb[84].mxu0 %v12541_v10  ;;  %v12544_v29 = vld [vmem:[%s17316_s2 + $0x9c0] ss:$16 sps:$4 sm:$0xff]  }
 0x3bc   : > { %v6437_v30 = vpop.f32.mrb[203].mxu1  ;;  %7647 = vmatprep.mubr.bf16.mxu0 %v12549_v36 }
 0x3bd   : > { %11294 = vst [vmem:[%s14945_s22 + $0x150] sm:$0xff] %v10826_v12   ;;  %v6385_v12 = vadd.f32 %v15913_v21, %v17502_v44 }
 0x3be   : > { %6647 = vmatmul.mubr.bf16.gmra.mrb[200].mxu1 %v12538_v23  ;;  %v7433_v32 = vpop.f32.mrb[236].mxu0  ;;  %v12547_v23 = vld [vmem:[%s17316_s2 + $0x8c8] ss:$16 sps:$4 sm:$0xff]  }
 0x3bf   : > { %6654 = vmatprep.mubr.bf16.mxu1 %v12546_v61  ;;  %v7434_v53 = vadd.f32 %v7433_v32, %v6377_v4  ;;  %v7435_v54 = vpop.f32.mrb[237].mxu0  ;;  %v17503_v32 = vld [vmem:[#allocation53_spill] sm:$0xff] }
 0x3c0   : > { %v7436_v10 = vpop.f32.mrb[238].mxu0  ;;  %v6388_v62 = vadd.f32 %v15929_v28, %v17503_v32  ;;  %v12561_v28 = vld [vmem:[%s17316_s2 + $0x90c] ss:$16 sps:$4 sm:$0xff]  }
 0x3c1   : > { %v16060_v49 = vpop.f32.mrb[204].mxu1  ;;  %v7437_v20 = vadd.f32 %v7436_v10, %v6380_v3  ;;  %v7438_v50 = vpop.f32.mrb[239].mxu0  ;;  %v12558_v10 = vld [vmem:[%s17316_s2 + $0xa04] ss:$16 sps:$4 sm:$0xff]  }
 0x3c2   : > { %v6442_v41 = vpop.f32.mrb[205].mxu1  ;;  %v17504_v50 = vld [vmem:[#allocation60_spill] sm:$0xff] }
 0x3c3   : > { %v16076_v61 = vpop.f32.mrb[206].mxu1  ;;  %v10831_v30 = vpack.c.bf16 %v7437_v20, %v7434_v53  ;;  %7648 = vmatmul.mubr.bf16.gmra.mrb[88].mxu0 %v12547_v23  ;;  %v12550_v53 = vld [vmem:[%s17316_s2 + $0x9e0] ss:$16 sps:$4 sm:$0xff]  }
 0x3c4   : > { %v6445_v36 = vpop.f32.mrb[207].mxu1  ;;  %7655 = vmatprep.mubr.bf16.mxu0 %v12555_v33 }
 0x3c5   : > { %11295 = vst [vmem:[%s14945_s22 + $0x158] sm:$0xff] %v10831_v30   ;;  %v6393_v30 = vadd.f32 %v15934_v48, %v17504_v50 }
 0x3c6   : > { %6655 = vmatmul.mubr.bf16.gmra.mrb[204].mxu1 %v12544_v29  ;;  %v7441_v4 = vpop.f32.mrb[240].mxu0  ;;  %v12553_v29 = vld [vmem:[%s17316_s2 + $0x8e8] ss:$16 sps:$4 sm:$0xff]  }
 0x3c7   : > { %6662 = vmatprep.mubr.bf16.mxu1 %v12552_v0  ;;  %v7442_v3 = vadd.f32 %v7441_v4, %v6385_v12  ;;  %v7443_v54 = vpop.f32.mrb[241].mxu0  ;;  %v17505_v4 = vld [vmem:[#allocation55_spill] sm:$0xff] }
 0x3c8   : > { %v7444_v23 = vpop.f32.mrb[242].mxu0  ;;  %v6396_v32 = vadd.f32 %v15950_v45, %v17505_v4  ;;  %v12567_v45 = vld [vmem:[%s17316_s2 + $0x92c] ss:$16 sps:$4 sm:$0xff]  }
 0x3c9   : > { %v16081_v59 = vpop.f32.mrb[208].mxu1  ;;  %v7445_v41 = vadd.f32 %v7444_v23, %v6388_v62  ;;  %v7446_v33 = vpop.f32.mrb[243].mxu0  ;;  %v12564_v23 = vld [vmem:[%s17316_s2 + $0xa24] ss:$16 sps:$4 sm:$0xff]  }
 0x3ca   : > { %v6450_v21 = vpop.f32.mrb[209].mxu1 }
 0x3cb   : > { %v16097_v0 = vpop.f32.mrb[210].mxu1  ;;  %v10836_v36 = vpack.c.bf16 %v7445_v41, %v7442_v3  ;;  %7656 = vmatmul.mubr.bf16.gmra.mrb[92].mxu0 %v12553_v29  ;;  %v12556_v3 = vld [vmem:[%s17316_s2 + $0xa00] ss:$16 sps:$4 sm:$0xff]  }
 0x3cc   : > { %v6453_v20 = vpop.f32.mrb[211].mxu1  ;;  %7663 = vmatprep.mubr.bf16.mxu0 %v12561_v28 }
 0x3cd   : > { %11296 = vst [vmem:[%s14945_s22 + $0x160] sm:$0xff] %v10836_v36   ;;  %v17506_v20 = vld [vmem:[#allocation62_spill] sm:$0xff] }
 0x3ce   : > { %6663 = vmatmul.mubr.bf16.gmra.mrb[208].mxu1 %v12550_v53  ;;  %v7449_v12 = vpop.f32.mrb[244].mxu0  ;;  %v12559_v53 = vld [vmem:[%s17316_s2 + $0x908] ss:$16 sps:$4 sm:$0xff]   ;;  %v6401_v36 = vadd.f32 %v15955_v58, %v17506_v20 }
 0x3cf   : > { %6670 = vmatprep.mubr.bf16.mxu1 %v12558_v10  ;;  %v7450_v62 = vadd.f32 %v7449_v12, %v6393_v30  ;;  %v7451_v54 = vpop.f32.mrb[245].mxu0  ;;  %v17507_v12 = vld [vmem:[#allocation57_spill] sm:$0xff] }
 0x3d0   : > { %v7452_v29 = vpop.f32.mrb[246].mxu0  ;;  %v6404_v4 = vadd.f32 %v15971_v24, %v17507_v12  ;;  %v12573_v24 = vld [vmem:[%s17316_s2 + $0x94c] ss:$16 sps:$4 sm:$0xff]  }
 0x3d1   : > { %v16102_v44 = vpop.f32.mrb[212].mxu1  ;;  %v7453_v21 = vadd.f32 %v7452_v29, %v6396_v32  ;;  %v7454_v28 = vpop.f32.mrb[247].mxu0  ;;  %v12570_v29 = vld [vmem:[%s17316_s2 + $0xa44] ss:$16 sps:$4 sm:$0xff]  }
 0x3d2   : > { %v6458_v48 = vpop.f32.mrb[213].mxu1 }
 0x3d3   : > { %v16118_v10 = vpop.f32.mrb[214].mxu1  ;;  %v10841_v33 = vpack.c.bf16 %v7453_v21, %v7450_v62  ;;  %7664 = vmatmul.mubr.bf16.gmra.mrb[96].mxu0 %v12559_v53  ;;  %v12562_v62 = vld [vmem:[%s17316_s2 + $0xa20] ss:$16 sps:$4 sm:$0xff]  }
 0x3d4   : > { %v6461_v41 = vpop.f32.mrb[215].mxu1  ;;  %7671 = vmatprep.mubr.bf16.mxu0 %v12567_v45 }
 0x3d5   : > { %11297 = vst [vmem:[%s14945_s22 + $0x168] sm:$0xff] %v10841_v33   ;;  %v17508_v41 = vld [vmem:[#allocation64_spill] sm:$0xff] }
 0x3d6   : > { %6671 = vmatmul.mubr.bf16.gmra.mrb[212].mxu1 %v12556_v3  ;;  %v7457_v30 = vpop.f32.mrb[248].mxu0  ;;  %v12565_v3 = vld [vmem:[%s17316_s2 + $0x928] ss:$16 sps:$4 sm:$0xff]   ;;  %v6409_v33 = vadd.f32 %v15976_v15, %v17508_v41 }
 0x3d7   : > { %6678 = vmatprep.mubr.bf16.mxu1 %v12564_v23  ;;  %v7458_v32 = vadd.f32 %v7457_v30, %v6401_v36  ;;  %v7459_v54 = vpop.f32.mrb[249].mxu0  ;;  %v17509_v30 = vld [vmem:[#allocation59_spill] sm:$0xff] }
 0x3d8   : > { %v7460_v53 = vpop.f32.mrb[250].mxu0  ;;  %v6412_v12 = vadd.f32 %v15992_v34, %v17509_v30  ;;  %v12579_v34 = vld [vmem:[%s17316_s2 + $0x96c] ss:$16 sps:$4 sm:$0xff]  }
 0x3d9   : > { %v16123_v50 = vpop.f32.mrb[216].mxu1  ;;  %v7461_v48 = vadd.f32 %v7460_v53, %v6404_v4  ;;  %v7462_v45 = vpop.f32.mrb[251].mxu0 }
 0x3da   : > { %v6466_v58 = vpop.f32.mrb[217].mxu1 }
 0x3db   : > { %v16139_v23 = vpop.f32.mrb[218].mxu1  ;;  %v10846_v28 = vpack.c.bf16 %v7461_v48, %v7458_v32  ;;  %7672 = vmatmul.mubr.bf16.gmra.mrb[100].mxu0 %v12565_v3  ;;  %v12568_v32 = vld [vmem:[%s17316_s2 + $0xa40] ss:$16 sps:$4 sm:$0xff]   ;;  %v12576_v58 = vld [vmem:[%s17316_s2 + $0xa64] ss:$16 sps:$4 sm:$0xff]  }
 0x3dc   : > { %v6469_v21 = vpop.f32.mrb[219].mxu1  ;;  %7679 = vmatprep.mubr.bf16.mxu0 %v12573_v24 }
 0x3dd   : > { %11298 = vst [vmem:[%s14945_s22 + $0x170] sm:$0xff] %v10846_v28   ;;  %v17510_v21 = vld [vmem:[#allocation66_spill] sm:$0xff] }
 0x3de   : > { %6679 = vmatmul.mubr.bf16.gmra.mrb[216].mxu1 %v12562_v62  ;;  %v7465_v36 = vpop.f32.mrb[252].mxu0  ;;  %v12571_v62 = vld [vmem:[%s17316_s2 + $0x948] ss:$16 sps:$4 sm:$0xff]   ;;  %v6417_v28 = vadd.f32 %v15997_v19, %v17510_v21 }
 0x3df   : > { %6686 = vmatprep.mubr.bf16.mxu1 %v12570_v29  ;;  %v7466_v4 = vadd.f32 %v7465_v36, %v6409_v33  ;;  %v7467_v53 = vpop.f32.mrb[253].mxu0  ;;  %v17511_v36 = vld [vmem:[#allocation61_spill] sm:$0xff] }
 0x3e0   : > { %v7468_v3 = vpop.f32.mrb[254].mxu0  ;;  %v6420_v30 = vadd.f32 %v16013_v57, %v17511_v36  ;;  %v12585_v57 = vld [vmem:[%s17316_s2 + $0x98c] ss:$16 sps:$4 sm:$0xff]  }
 0x3e1   : > { %v16144_v20 = vpop.f32.mrb[220].mxu1  ;;  %v7469_v29 = vadd.f32 %v7468_v3, %v6412_v12  ;;  %v7470_v48 = vpop.f32.mrb[255].mxu0  ;;  %v12582_v3 = vld [vmem:[%s17316_s2 + $0xa84] ss:$16 sps:$4 sm:$0xff]  }
 0x3e2   : > { %v6474_v54 = vpop.f32.mrb[221].mxu1  ;;  %v17512_v48 = vld [vmem:[#allocation67_spill] sm:$0xff] }
 0x3e3   : > { %v16154_v15 = vpop.f32.mrb[222].mxu1  ;;  %v10851_v45 = vpack.c.bf16 %v7469_v29, %v7466_v4  ;;  %7680 = vmatmul.mubr.bf16.gmra.mrb[104].mxu0 %v12571_v62  ;;  %v12574_v4 = vld [vmem:[%s17316_s2 + $0xa60] ss:$16 sps:$4 sm:$0xff]  }
 0x3e4   : > { %v6477_v24 = vpop.f32.mrb[223].mxu1  ;;  %7687 = vmatprep.mubr.bf16.mxu0 %v12579_v34 }
 0x3e5   : > { %11299 = vst [vmem:[%s14945_s22 + $0x178] sm:$0xff] %v10851_v45   ;;  %v6425_v45 = vadd.f32 %v16018_v56, %v17512_v48 }
 0x3e6   : > { %6687 = vmatmul.mubr.bf16.gmra.mrb[220].mxu1 %v12568_v32  ;;  %v7473_v33 = vpop.f32.mrb[0].mxu0  ;;  %v12577_v32 = vld [vmem:[%s17316_s2 + $0x968] ss:$16 sps:$4 sm:$0xff]  }
 0x3e7   : > { %6694 = vmatprep.mubr.bf16.mxu1 %v12576_v58  ;;  %v7474_v54 = vadd.f32 %v7473_v33, %v6417_v28  ;;  %v7475_v12 = vpop.f32.mrb[1].mxu0  ;;  %v17513_v33 = vld [vmem:[#allocation63_spill] sm:$0xff] }
 0x3e8   : > { %v7476_v62 = vpop.f32.mrb[2].mxu0  ;;  %v6428_v36 = vadd.f32 %v16034_v27, %v17513_v33  ;;  %v12591_v27 = vld [vmem:[%s17316_s2 + $0x9ac] ss:$16 sps:$4 sm:$0xff]  }
 0x3e9   : > { %v16165_v41 = vpop.f32.mrb[224].mxu1  ;;  %v7477_v58 = vadd.f32 %v7476_v62, %v6420_v30  ;;  %v7478_v29 = vpop.f32.mrb[3].mxu0  ;;  %v12588_v62 = vld [vmem:[%s17316_s2 + $0xaa4] ss:$16 sps:$4 sm:$0xff]  }
 0x3ea   : > { %v6482_v53 = vpop.f32.mrb[225].mxu1  ;;  %v17514_v29 = vld [vmem:[#allocation68_spill] sm:$0xff] }
 0x3eb   : > { %v16175_v19 = vpop.f32.mrb[226].mxu1  ;;  %v10856_v24 = vpack.c.bf16 %v7477_v58, %v7474_v54  ;;  %7688 = vmatmul.mubr.bf16.gmra.mrb[108].mxu0 %v12577_v32  ;;  %v12580_v54 = vld [vmem:[%s17316_s2 + $0xa80] ss:$16 sps:$4 sm:$0xff]  }
 0x3ec   : > { %v6485_v34 = vpop.f32.mrb[227].mxu1  ;;  %7695 = vmatprep.mubr.bf16.mxu0 %v12585_v57 }
 0x3ed   : > { %11300 = vst [vmem:[%s14945_s22 + $0x180] sm:$0xff] %v10856_v24   ;;  %v6433_v24 = vadd.f32 %v16039_v55, %v17514_v29 }
 0x3ee   : > { %6695 = vmatmul.mubr.bf16.gmra.mrb[224].mxu1 %v12574_v4  ;;  %v7481_v28 = vpop.f32.mrb[4].mxu0  ;;  %v12583_v4 = vld [vmem:[%s17316_s2 + $0x988] ss:$16 sps:$4 sm:$0xff]  }
 0x3ef   : > { %6702 = vmatprep.mubr.bf16.mxu1 %v12582_v3  ;;  %v7482_v53 = vadd.f32 %v7481_v28, %v6425_v45  ;;  %v7483_v30 = vpop.f32.mrb[5].mxu0  ;;  %v17515_v28 = vld [vmem:[#allocation65_spill] sm:$0xff] }
 0x3f0   : > { %v7484_v32 = vpop.f32.mrb[6].mxu0  ;;  %v6436_v33 = vadd.f32 %v16055_v14, %v17515_v28  ;;  %v12597_v14 = vld [vmem:[%s17316_s2 + $0x9cc] ss:$16 sps:$4 sm:$0xff]  }
 0x3f1   : > { %v16186_v21 = vpop.f32.mrb[228].mxu1  ;;  %v7485_v3 = vadd.f32 %v7484_v32, %v6428_v36  ;;  %v7486_v58 = vpop.f32.mrb[7].mxu0  ;;  %v12594_v32 = vld [vmem:[%s17316_s2 + $0xac4] ss:$16 sps:$4 sm:$0xff]  }
 0x3f2   : > { %v6490_v12 = vpop.f32.mrb[229].mxu1  ;;  %v17516_v58 = vld [vmem:[#allocation69_spill] sm:$0xff] }
 0x3f3   : > { %v16196_v56 = vpop.f32.mrb[230].mxu1  ;;  %v10861_v34 = vpack.c.bf16 %v7485_v3, %v7482_v53  ;;  %7696 = vmatmul.mubr.bf16.gmra.mrb[112].mxu0 %v12583_v4  ;;  %v12586_v53 = vld [vmem:[%s17316_s2 + $0xaa0] ss:$16 sps:$4 sm:$0xff]  }
 0x3f4   : > { %v6493_v57 = vpop.f32.mrb[231].mxu1  ;;  %7703 = vmatprep.mubr.bf16.mxu0 %v12591_v27 }
 0x3f5   : > { %11301 = vst [vmem:[%s14945_s22 + $0x188] sm:$0xff] %v10861_v34   ;;  %v6441_v34 = vadd.f32 %v16060_v49, %v17516_v58 }
 0x3f6   : > { %6703 = vmatmul.mubr.bf16.gmra.mrb[228].mxu1 %v12580_v54  ;;  %v7489_v45 = vpop.f32.mrb[8].mxu0  ;;  %v12589_v54 = vld [vmem:[%s17316_s2 + $0x9a8] ss:$16 sps:$4 sm:$0xff]  }
 0x3f7   : > { %6710 = vmatprep.mubr.bf16.mxu1 %v12588_v62  ;;  %v7490_v12 = vadd.f32 %v7489_v45, %v6433_v24  ;;  %v7491_v36 = vpop.f32.mrb[9].mxu0  ;;  %v17517_v45 = vld [vmem:[#allocation70_spill] sm:$0xff] }
 0x3f8   : > { %v7492_v4 = vpop.f32.mrb[10].mxu0  ;;  %v6444_v28 = vadd.f32 %v16076_v61, %v17517_v45  ;;  %v12603_v61 = vld [vmem:[%s17316_s2 + $0x9ec] ss:$16 sps:$4 sm:$0xff]  }
 0x3f9   : > { %v16207_v48 = vpop.f32.mrb[232].mxu1  ;;  %v7493_v62 = vadd.f32 %v7492_v4, %v6436_v33  ;;  %v7494_v3 = vpop.f32.mrb[11].mxu0  ;;  %v12600_v4 = vld [vmem:[%s17316_s2 + $0xae4] ss:$16 sps:$4 sm:$0xff]  }
 0x3fa   : > { %v6498_v30 = vpop.f32.mrb[233].mxu1  ;;  %v17518_v3 = vld [vmem:[#allocation73_spill] sm:$0xff] }
 0x3fb   : > { %v16217_v55 = vpop.f32.mrb[234].mxu1  ;;  %v10866_v57 = vpack.c.bf16 %v7493_v62, %v7490_v12  ;;  %7704 = vmatmul.mubr.bf16.gmra.mrb[116].mxu0 %v12589_v54  ;;  %v12592_v12 = vld [vmem:[%s17316_s2 + $0xac0] ss:$16 sps:$4 sm:$0xff]  }
 0x3fc   : > { %v6501_v27 = vpop.f32.mrb[235].mxu1  ;;  %7711 = vmatprep.mubr.bf16.mxu0 %v12597_v14 }
 0x3fd   : > { %11302 = vst [vmem:[%s14945_s22 + $0x190] sm:$0xff] %v10866_v57   ;;  %v6449_v57 = vadd.f32 %v16081_v59, %v17518_v3 }
 0x3fe   : > { %6711 = vmatmul.mubr.bf16.gmra.mrb[232].mxu1 %v12586_v53  ;;  %v7497_v24 = vpop.f32.mrb[12].mxu0  ;;  %v12595_v53 = vld [vmem:[%s17316_s2 + $0x9c8] ss:$16 sps:$4 sm:$0xff]  }
 0x3ff   : > { %6718 = vmatprep.mubr.bf16.mxu1 %v12594_v32  ;;  %v7498_v30 = vadd.f32 %v7497_v24, %v6441_v34  ;;  %v7499_v33 = vpop.f32.mrb[13].mxu0  ;;  %v17519_v24 = vld [vmem:[#allocation71_spill] sm:$0xff] }
 0x400   : > { %v7500_v54 = vpop.f32.mrb[14].mxu0  ;;  %v6452_v45 = vadd.f32 %v16097_v0, %v17519_v24  ;;  %v12609_v0 = vld [vmem:[%s17316_s2 + $0xa0c] ss:$16 sps:$4 sm:$0xff]  }
 0x401   : > { %v16228_v29 = vpop.f32.mrb[236].mxu1  ;;  %v7501_v32 = vadd.f32 %v7500_v54, %v6444_v28  ;;  %v7502_v62 = vpop.f32.mrb[15].mxu0  ;;  %v12606_v54 = vld [vmem:[%s17316_s2 + $0xb04] ss:$16 sps:$4 sm:$0xff]  }
 0x402   : > { %v6506_v36 = vpop.f32.mrb[237].mxu1  ;;  %v17520_v62 = vld [vmem:[#allocation75_spill] sm:$0xff] }
 0x403   : > { %v16238_v49 = vpop.f32.mrb[238].mxu1  ;;  %v10871_v27 = vpack.c.bf16 %v7501_v32, %v7498_v30  ;;  %7712 = vmatmul.mubr.bf16.gmra.mrb[120].mxu0 %v12595_v53  ;;  %v12598_v30 = vld [vmem:[%s17316_s2 + $0xae0] ss:$16 sps:$4 sm:$0xff]  }
 0x404   : > { %v6509_v14 = vpop.f32.mrb[239].mxu1  ;;  %7719 = vmatprep.mubr.bf16.mxu0 %v12603_v61 }
 0x405   : > { %11303 = vst [vmem:[%s14945_s22 + $0x198] sm:$0xff] %v10871_v27   ;;  %v6457_v27 = vadd.f32 %v16102_v44, %v17520_v62 }
 0x406   : > { %6719 = vmatmul.mubr.bf16.gmra.mrb[236].mxu1 %v12592_v12  ;;  %v7505_v34 = vpop.f32.mrb[16].mxu0  ;;  %v12601_v12 = vld [vmem:[%s17316_s2 + $0x9e8] ss:$16 sps:$4 sm:$0xff]  }
 0x407   : > { %6726 = vmatprep.mubr.bf16.mxu1 %v12600_v4  ;;  %v7506_v36 = vadd.f32 %v7505_v34, %v6449_v57  ;;  %v7507_v28 = vpop.f32.mrb[17].mxu0  ;;  %v17521_v34 = vld [vmem:[#allocation72_spill] sm:$0xff] }
 0x408   : > { %v7508_v53 = vpop.f32.mrb[18].mxu0  ;;  %v6460_v24 = vadd.f32 %v16118_v10, %v17521_v34  ;;  %v12615_v10 = vld [vmem:[%s17316_s2 + $0xa2c] ss:$16 sps:$4 sm:$0xff]  }
 0x409   : > { %v16249_v58 = vpop.f32.mrb[240].mxu1  ;;  %v7509_v4 = vadd.f32 %v7508_v53, %v6452_v45  ;;  %v7510_v32 = vpop.f32.mrb[19].mxu0  ;;  %v12612_v53 = vld [vmem:[%s17316_s2 + $0xb24] ss:$16 sps:$4 sm:$0xff]  }
 0x40a   : > { %v6514_v33 = vpop.f32.mrb[241].mxu1  ;;  %v17522_v32 = vld [vmem:[#allocation77_spill] sm:$0xff] }
 0x40b   : > { %v16259_v59 = vpop.f32.mrb[242].mxu1  ;;  %v10876_v14 = vpack.c.bf16 %v7509_v4, %v7506_v36  ;;  %7720 = vmatmul.mubr.bf16.gmra.mrb[124].mxu0 %v12601_v12  ;;  %v12604_v36 = vld [vmem:[%s17316_s2 + $0xb00] ss:$16 sps:$4 sm:$0xff]  }
 0x40c   : > { %v6517_v61 = vpop.f32.mrb[243].mxu1  ;;  %7727 = vmatprep.mubr.bf16.mxu0 %v12609_v0 }
 0x40d   : > { %11304 = vst [vmem:[%s14945_s22 + $0x1a0] sm:$0xff] %v10876_v14   ;;  %v6465_v14 = vadd.f32 %v16123_v50, %v17522_v32 }
 0x40e   : > { %6727 = vmatmul.mubr.bf16.gmra.mrb[240].mxu1 %v12598_v30  ;;  %v7513_v57 = vpop.f32.mrb[20].mxu0  ;;  %v12607_v30 = vld [vmem:[%s17316_s2 + $0xa08] ss:$16 sps:$4 sm:$0xff]  }
 0x40f   : > { %6734 = vmatprep.mubr.bf16.mxu1 %v12606_v54  ;;  %v7514_v33 = vadd.f32 %v7513_v57, %v6457_v27  ;;  %v7515_v45 = vpop.f32.mrb[21].mxu0  ;;  %v17523_v57 = vld [vmem:[#allocation74_spill] sm:$0xff] }
 0x410   : > { %v7516_v12 = vpop.f32.mrb[22].mxu0  ;;  %v6468_v34 = vadd.f32 %v16139_v23, %v17523_v57  ;;  %v12621_v23 = vld [vmem:[%s17316_s2 + $0xa4c] ss:$16 sps:$4 sm:$0xff]  }
 0x411   : > { %v16270_v3 = vpop.f32.mrb[244].mxu1  ;;  %v7517_v54 = vadd.f32 %v7516_v12, %v6460_v24  ;;  %v7518_v4 = vpop.f32.mrb[23].mxu0  ;;  %v12618_v12 = vld [vmem:[%s17316_s2 + $0xb44] ss:$16 sps:$4 sm:$0xff]  }
 0x412   : > { %v6522_v28 = vpop.f32.mrb[245].mxu1  ;;  %v17524_v4 = vld [vmem:[#allocation79_spill] sm:$0xff] }
 0x413   : > { %v16280_v44 = vpop.f32.mrb[246].mxu1  ;;  %v10881_v61 = vpack.c.bf16 %v7517_v54, %v7514_v33  ;;  %7728 = vmatmul.mubr.bf16.gmra.mrb[128].mxu0 %v12607_v30  ;;  %v12610_v33 = vld [vmem:[%s17316_s2 + $0xb20] ss:$16 sps:$4 sm:$0xff]  }
 0x414   : > { %v6525_v0 = vpop.f32.mrb[247].mxu1  ;;  %7735 = vmatprep.mubr.bf16.mxu0 %v12615_v10 }
 0x415   : > { %11305 = vst [vmem:[%s14945_s22 + $0x1a8] sm:$0xff] %v10881_v61   ;;  %v6473_v61 = vadd.f32 %v16144_v20, %v17524_v4 }
 0x416   : > { %6735 = vmatmul.mubr.bf16.gmra.mrb[244].mxu1 %v12604_v36  ;;  %v7521_v27 = vpop.f32.mrb[24].mxu0  ;;  %v12613_v36 = vld [vmem:[%s17316_s2 + $0xa28] ss:$16 sps:$4 sm:$0xff]  }
 0x417   : > { %6742 = vmatprep.mubr.bf16.mxu1 %v12612_v53  ;;  %v7522_v28 = vadd.f32 %v7521_v27, %v6465_v14  ;;  %v7523_v24 = vpop.f32.mrb[25].mxu0  ;;  %v17525_v27 = vld [vmem:[#allocation76_spill] sm:$0xff] }
 0x418   : > { %v7524_v30 = vpop.f32.mrb[26].mxu0  ;;  %v6476_v57 = vadd.f32 %v16154_v15, %v17525_v27  ;;  %v12627_v15 = vld [vmem:[%s17316_s2 + $0xa6c] ss:$16 sps:$4 sm:$0xff]  }
 0x419   : > { %v16291_v62 = vpop.f32.mrb[248].mxu1  ;;  %v7525_v53 = vadd.f32 %v7524_v30, %v6468_v34  ;;  %v7526_v54 = vpop.f32.mrb[27].mxu0  ;;  %v12624_v30 = vld [vmem:[%s17316_s2 + $0xb64] ss:$16 sps:$4 sm:$0xff]  }
 0x41a   : > { %v6530_v45 = vpop.f32.mrb[249].mxu1  ;;  %v17526_v54 = vld [vmem:[#allocation81_spill] sm:$0xff] }
 0x41b   : > { %v16301_v50 = vpop.f32.mrb[250].mxu1  ;;  %v10886_v0 = vpack.c.bf16 %v7525_v53, %v7522_v28  ;;  %7736 = vmatmul.mubr.bf16.gmra.mrb[132].mxu0 %v12613_v36  ;;  %v12616_v28 = vld [vmem:[%s17316_s2 + $0xb40] ss:$16 sps:$4 sm:$0xff]  }
 0x41c   : > { %v6533_v10 = vpop.f32.mrb[251].mxu1  ;;  %7743 = vmatprep.mubr.bf16.mxu0 %v12621_v23 }
 0x41d   : > { %11306 = vst [vmem:[%s14945_s22 + $0x1b0] sm:$0xff] %v10886_v0   ;;  %v6481_v0 = vadd.f32 %v16165_v41, %v17526_v54 }
 0x41e   : > { %6743 = vmatmul.mubr.bf16.gmra.mrb[248].mxu1 %v12610_v33  ;;  %v7529_v14 = vpop.f32.mrb[28].mxu0  ;;  %v12619_v33 = vld [vmem:[%s17316_s2 + $0xa48] ss:$16 sps:$4 sm:$0xff]  }
 0x41f   : > { %6750 = vmatprep.mubr.bf16.mxu1 %v12618_v12  ;;  %v7530_v45 = vadd.f32 %v7529_v14, %v6473_v61  ;;  %v7531_v34 = vpop.f32.mrb[29].mxu0  ;;  %v17527_v14 = vld [vmem:[#allocation78_spill] sm:$0xff] }
 0x420   : > { %v7532_v36 = vpop.f32.mrb[30].mxu0  ;;  %v6484_v27 = vadd.f32 %v16175_v19, %v17527_v14  ;;  %v12633_v19 = vld [vmem:[%s17316_s2 + $0xa8c] ss:$16 sps:$4 sm:$0xff]  }
 0x421   : > { %v16312_v32 = vpop.f32.mrb[252].mxu1  ;;  %v7533_v12 = vadd.f32 %v7532_v36, %v6476_v57  ;;  %v7534_v53 = vpop.f32.mrb[31].mxu0  ;;  %v12630_v36 = vld [vmem:[%s17316_s2 + $0xb84] ss:$16 sps:$4 sm:$0xff]  }
 0x422   : > { %v6538_v24 = vpop.f32.mrb[253].mxu1  ;;  %v17528_v53 = vld [vmem:[#allocation82_spill] sm:$0xff] }
 0x423   : > { %v16322_v20 = vpop.f32.mrb[254].mxu1  ;;  %v10891_v10 = vpack.c.bf16 %v7533_v12, %v7530_v45  ;;  %7744 = vmatmul.mubr.bf16.gmra.mrb[136].mxu0 %v12619_v33  ;;  %v12622_v45 = vld [vmem:[%s17316_s2 + $0xb60] ss:$16 sps:$4 sm:$0xff]  }
 0x424   : > { %v6541_v23 = vpop.f32.mrb[255].mxu1  ;;  %7751 = vmatprep.mubr.bf16.mxu0 %v12627_v15 }
 0x425   : > { %11307 = vst [vmem:[%s14945_s22 + $0x1b8] sm:$0xff] %v10891_v10   ;;  %v6489_v10 = vadd.f32 %v16186_v21, %v17528_v53 }
 0x426   : > { %6751 = vmatmul.mubr.bf16.gmra.mrb[252].mxu1 %v12616_v28  ;;  %v7537_v61 = vpop.f32.mrb[32].mxu0  ;;  %v12625_v28 = vld [vmem:[%s17316_s2 + $0xa68] ss:$16 sps:$4 sm:$0xff]  }
 0x427   : > { %6758 = vmatprep.mubr.bf16.mxu1 %v12624_v30  ;;  %v7538_v24 = vadd.f32 %v7537_v61, %v6481_v0  ;;  %v7539_v57 = vpop.f32.mrb[33].mxu0  ;;  %v17529_v61 = vld [vmem:[#allocation80_spill] sm:$0xff] }
 0x428   : > { %v7540_v33 = vpop.f32.mrb[34].mxu0  ;;  %v6492_v14 = vadd.f32 %v16196_v56, %v17529_v61  ;;  %v12639_v56 = vld [vmem:[%s17316_s2 + $0xaac] ss:$16 sps:$4 sm:$0xff]  }
 0x429   : > { %v16333_v4 = vpop.f32.mrb[148].mxu1  ;;  %v7541_v30 = vadd.f32 %v7540_v33, %v6484_v27  ;;  %v7542_v12 = vpop.f32.mrb[35].mxu0  ;;  %v12636_v33 = vld [vmem:[%s17316_s2 + $0xba4] ss:$16 sps:$4 sm:$0xff]  }
 0x42a   : > { %v6546_v34 = vpop.f32.mrb[149].mxu1  ;;  %v17530_v12 = vld [vmem:[#allocation84_spill] sm:$0xff] }
 0x42b   : > { %v16343_v41 = vpop.f32.mrb[150].mxu1  ;;  %v10896_v23 = vpack.c.bf16 %v7541_v30, %v7538_v24  ;;  %7752 = vmatmul.mubr.bf16.gmra.mrb[140].mxu0 %v12625_v28  ;;  %v12628_v24 = vld [vmem:[%s17316_s2 + $0xb80] ss:$16 sps:$4 sm:$0xff]  }
 0x42c   : > { %v6549_v15 = vpop.f32.mrb[151].mxu1  ;;  %7759 = vmatprep.mubr.bf16.mxu0 %v12633_v19 }
 0x42d   : > { %11308 = vst [vmem:[%s14945_s22 + $0x1c0] sm:$0xff] %v10896_v23   ;;  %v6497_v23 = vadd.f32 %v16207_v48, %v17530_v12 }
 0x42e   : > { %6759 = vmatmul.mubr.bf16.gmra.mrb[148].mxu1 %v12622_v45  ;;  %v7545_v0 = vpop.f32.mrb[36].mxu0  ;;  %v12631_v45 = vld [vmem:[%s17316_s2 + $0xa88] ss:$16 sps:$4 sm:$0xff]  }
 0x42f   : > { %6766 = vmatprep.mubr.bf16.mxu1 %v12630_v36  ;;  %v7546_v34 = vadd.f32 %v7545_v0, %v6489_v10  ;;  %v7547_v27 = vpop.f32.mrb[37].mxu0  ;;  %v17531_v0 = vld [vmem:[#allocation83_spill] sm:$0xff] }
 0x430   : > { %v7548_v28 = vpop.f32.mrb[38].mxu0  ;;  %v6500_v61 = vadd.f32 %v16217_v55, %v17531_v0  ;;  %v12645_v55 = vld [vmem:[%s17316_s2 + $0xacc] ss:$16 sps:$4 sm:$0xff]  }
 0x431   : > { %v16354_v54 = vpop.f32.mrb[152].mxu1  ;;  %v7549_v36 = vadd.f32 %v7548_v28, %v6492_v14  ;;  %v7550_v30 = vpop.f32.mrb[39].mxu0  ;;  %v12642_v28 = vld [vmem:[%s17316_s2 + $0xbc4] ss:$16 sps:$4 sm:$0xff]  }
 0x432   : > { %v6554_v57 = vpop.f32.mrb[153].mxu1  ;;  %v17532_v30 = vld [vmem:[#allocation86_spill] sm:$0xff] }
 0x433   : > { %v16364_v21 = vpop.f32.mrb[154].mxu1  ;;  %v10901_v15 = vpack.c.bf16 %v7549_v36, %v7546_v34  ;;  %7760 = vmatmul.mubr.bf16.gmra.mrb[144].mxu0 %v12631_v45  ;;  %v12634_v34 = vld [vmem:[%s17316_s2 + $0xba0] ss:$16 sps:$4 sm:$0xff]  }
 0x434   : > { %v6557_v19 = vpop.f32.mrb[155].mxu1  ;;  %7767 = vmatprep.mubr.bf16.mxu0 %v12639_v56 }
 0x435   : > { %11309 = vst [vmem:[%s14945_s22 + $0x1c8] sm:$0xff] %v10901_v15   ;;  %v6505_v15 = vadd.f32 %v16228_v29, %v17532_v30 }
 0x436   : > { %6767 = vmatmul.mubr.bf16.gmra.mrb[152].mxu1 %v12628_v24  ;;  %v7553_v10 = vpop.f32.mrb[40].mxu0  ;;  %v12637_v24 = vld [vmem:[%s17316_s2 + $0xaa8] ss:$16 sps:$4 sm:$0xff]  }
 0x437   : > { %6774 = vmatprep.mubr.bf16.mxu1 %v12636_v33  ;;  %v7554_v57 = vadd.f32 %v7553_v10, %v6497_v23  ;;  %v7555_v14 = vpop.f32.mrb[41].mxu0 }
 0x438   : > { %v7556_v45 = vpop.f32.mrb[42].mxu0  ;;  %v17533_v14 = vld [vmem:[#allocation85_spill] sm:$0xff] }
 0x439   : > { %v16375_v53 = vpop.f32.mrb[156].mxu1  ;;  %v7557_v33 = vadd.f32 %v7556_v45, %v6500_v61  ;;  %v7558_v36 = vpop.f32.mrb[43].mxu0  ;;  %v6508_v61 = vadd.f32 %v16238_v49, %v17533_v14  ;;  %v12648_v45 = vld [vmem:[%s17316_s2 + $0xbe4] ss:$16 sps:$4 sm:$0xff]   ;;  %v17535_v14 = vld [vmem:[#allocation87_spill] sm:$0xff] }
 0x43a   : > { %v6562_v27 = vpop.f32.mrb[157].mxu1  ;;  %v17534_v36 = vld [vmem:[#allocation88_spill] sm:$0xff] }
 0x43b   : > { %v16385_v48 = vpop.f32.mrb[158].mxu1  ;;  %v10906_v19 = vpack.c.bf16 %v7557_v33, %v7554_v57  ;;  %7768 = vmatmul.mubr.bf16.gmra.mrb[148].mxu0 %v12637_v24  ;;  %v12640_v57 = vld [vmem:[%s17316_s2 + $0xbc0] ss:$16 sps:$4 sm:$0xff]  }
 0x43c   : > { %v6565_v56 = vpop.f32.mrb[159].mxu1  ;;  %7775 = vmatprep.mubr.bf16.mxu0 %v12645_v55 }
 0x43d   : > { %11310 = vst [vmem:[%s14945_s22 + $0x1d0] sm:$0xff] %v10906_v19   ;;  %v6513_v19 = vadd.f32 %v16249_v58, %v17534_v36 }
 0x43e   : > { %6775 = vmatmul.mubr.bf16.gmra.mrb[156].mxu1 %v12634_v34  ;;  %v7561_v23 = vpop.f32.mrb[44].mxu0  ;;  %v12643_v34 = vld [vmem:[%s17316_s2 + $0xac8] ss:$16 sps:$4 sm:$0xff]  }
 0x43f   : > { %6782 = vmatprep.mubr.bf16.mxu1 %v12642_v28  ;;  %v7562_v10 = vadd.f32 %v7561_v23, %v6505_v15  ;;  %v7563_v27 = vpop.f32.mrb[45].mxu0  ;;  %v12651_v28 = vld [vmem:[%s17316_s2 + $0xaec] ss:$16 sps:$4 sm:$0xff]  }
 0x440   : > { %v7564_v29 = vpop.f32.mrb[46].mxu0 }
 0x441   : > { %v16396_v12 = vpop.f32.mrb[160].mxu1  ;;  %v7565_v49 = vadd.f32 %v7564_v29, %v6508_v61  ;;  %v7566_v33 = vpop.f32.mrb[47].mxu0  ;;  %v6516_v61 = vadd.f32 %v16259_v59, %v17535_v14  ;;  %v12654_v29 = vld [vmem:[%s17316_s2 + $0xc04] ss:$16 sps:$4 sm:$0xff]   ;;  %v17537_v14 = vld [vmem:[#allocation89_spill] sm:$0xff] }
 0x442   : > { %v6570_v0 = vpop.f32.mrb[161].mxu1  ;;  %v17536_v33 = vld [vmem:[#allocation90_spill] sm:$0xff] }
 0x443   : > { %v16406_v24 = vpop.f32.mrb[162].mxu1  ;;  %v10911_v56 = vpack.c.bf16 %v7565_v49, %v7562_v10  ;;  %7776 = vmatmul.mubr.bf16.gmra.mrb[152].mxu0 %v12643_v34  ;;  %v12646_v10 = vld [vmem:[%s17316_s2 + $0xbe0] ss:$16 sps:$4 sm:$0xff]  }
 0x444   : > { %v6573_v55 = vpop.f32.mrb[163].mxu1  ;;  %7783 = vmatprep.mubr.bf16.mxu0 %v12651_v28 }
 0x445   : > { %11311 = vst [vmem:[%s14945_s22 + $0x1d8] sm:$0xff] %v10911_v56   ;;  %v6521_v56 = vadd.f32 %v16270_v3, %v17536_v33 }
 0x446   : > { %6783 = vmatmul.mubr.bf16.gmra.mrb[160].mxu1 %v12640_v57  ;;  %v7569_v15 = vpop.f32.mrb[48].mxu0  ;;  %v12649_v57 = vld [vmem:[%s17316_s2 + $0xae8] ss:$16 sps:$4 sm:$0xff]  }
 0x447   : > { %6790 = vmatprep.mubr.bf16.mxu1 %v12648_v45  ;;  %v7570_v23 = vadd.f32 %v7569_v15, %v6513_v19  ;;  %v7571_v27 = vpop.f32.mrb[49].mxu0  ;;  %v12657_v45 = vld [vmem:[%s17316_s2 + $0xb0c] ss:$16 sps:$4 sm:$0xff]  }
 0x448   : > { %v7572_v58 = vpop.f32.mrb[50].mxu0 }
 0x449   : > { %v16417_v30 = vpop.f32.mrb[164].mxu1  ;;  %v7573_v59 = vadd.f32 %v7572_v58, %v6516_v61  ;;  %v7574_v49 = vpop.f32.mrb[51].mxu0  ;;  %v6524_v61 = vadd.f32 %v16280_v44, %v17537_v14  ;;  %v12660_v58 = vld [vmem:[%s17316_s2 + $0xc24] ss:$16 sps:$4 sm:$0xff]   ;;  %v17539_v14 = vld [vmem:[#allocation91_spill] sm:$0xff] }
 0x44a   : > { %v6578_v0 = vpop.f32.mrb[165].mxu1  ;;  %v17538_v49 = vld [vmem:[#allocation92_spill] sm:$0xff] }
 0x44b   : > { %v16427_v34 = vpop.f32.mrb[166].mxu1  ;;  %v10916_v55 = vpack.c.bf16 %v7573_v59, %v7570_v23  ;;  %7784 = vmatmul.mubr.bf16.gmra.mrb[156].mxu0 %v12649_v57  ;;  %v12652_v23 = vld [vmem:[%s17316_s2 + $0xc00] ss:$16 sps:$4 sm:$0xff]  }
 0x44c   : > { %v6581_v28 = vpop.f32.mrb[167].mxu1  ;;  %7791 = vmatprep.mubr.bf16.mxu0 %v12657_v45 }
 0x44d   : > { %11312 = vst [vmem:[%s14945_s22 + $0x1e0] sm:$0xff] %v10916_v55   ;;  %v6529_v55 = vadd.f32 %v16291_v62, %v17538_v49 }
 0x44e   : > { %6791 = vmatmul.mubr.bf16.gmra.mrb[164].mxu1 %v12646_v10  ;;  %v7577_v19 = vpop.f32.mrb[52].mxu0  ;;  %v12655_v10 = vld [vmem:[%s17316_s2 + $0xb08] ss:$16 sps:$4 sm:$0xff]  }
 0x44f   : > { %6798 = vmatprep.mubr.bf16.mxu1 %v12654_v29  ;;  %v7578_v15 = vadd.f32 %v7577_v19, %v6521_v56  ;;  %v7579_v27 = vpop.f32.mrb[53].mxu0  ;;  %v12663_v29 = vld [vmem:[%s17316_s2 + $0xb2c] ss:$16 sps:$4 sm:$0xff]  }
 0x450   : > { %v7580_v3 = vpop.f32.mrb[54].mxu0 }
 0x451   : > { %v16438_v36 = vpop.f32.mrb[168].mxu1  ;;  %v7581_v44 = vadd.f32 %v7580_v3, %v6524_v61  ;;  %v7582_v59 = vpop.f32.mrb[55].mxu0  ;;  %v6532_v61 = vadd.f32 %v16301_v50, %v17539_v14  ;;  %v12666_v3 = vld [vmem:[%s17316_s2 + $0xc44] ss:$16 sps:$4 sm:$0xff]  }
 0x452   : > { %v6586_v0 = vpop.f32.mrb[169].mxu1  ;;  %v17540_v59 = vld [vmem:[#allocation93_spill] sm:$0xff]  ;;  %v17541_v14 = vld [vmem:[#allocation94_spill] sm:$0xff] }
 0x453   : > { %v16448_v57 = vpop.f32.mrb[170].mxu1  ;;  %v10921_v28 = vpack.c.bf16 %v7581_v44, %v7578_v15  ;;  %7792 = vmatmul.mubr.bf16.gmra.mrb[160].mxu0 %v12655_v10  ;;  %v12658_v15 = vld [vmem:[%s17316_s2 + $0xc20] ss:$16 sps:$4 sm:$0xff]  }
 0x454   : > { %v6589_v45 = vpop.f32.mrb[171].mxu1  ;;  %7799 = vmatprep.mubr.bf16.mxu0 %v12663_v29 }
 0x455   : > { %11313 = vst [vmem:[%s14945_s22 + $0x1e8] sm:$0xff] %v10921_v28   ;;  %v6537_v28 = vadd.f32 %v16312_v32, %v17540_v59 }
 0x456   : > { %6799 = vmatmul.mubr.bf16.gmra.mrb[168].mxu1 %v12652_v23  ;;  %v7585_v56 = vpop.f32.mrb[56].mxu0  ;;  %v12661_v23 = vld [vmem:[%s17316_s2 + $0xb28] ss:$16 sps:$4 sm:$0xff]  }
 0x457   : > { %6806 = vmatprep.mubr.bf16.mxu1 %v12660_v58  ;;  %v7586_v19 = vadd.f32 %v7585_v56, %v6529_v55  ;;  %v7587_v27 = vpop.f32.mrb[57].mxu0  ;;  %v12669_v58 = vld [vmem:[%s17316_s2 + $0xb4c] ss:$16 sps:$4 sm:$0xff]  }
 0x458   : > { %v7588_v62 = vpop.f32.mrb[58].mxu0 }
 0x459   : > { %v16459_v33 = vpop.f32.mrb[172].mxu1  ;;  %v7589_v50 = vadd.f32 %v7588_v62, %v6532_v61  ;;  %v7590_v44 = vpop.f32.mrb[59].mxu0  ;;  %v6540_v61 = vadd.f32 %v16322_v20, %v17541_v14  ;;  %v12672_v62 = vld [vmem:[%s17316_s2 + $0xc64] ss:$16 sps:$4 sm:$0xff]   ;;  %v12673_v14 = vld [vmem:[%s17316_s2 + $0xb68] ss:$16 sps:$4 sm:$0xff]  }
 0x45a   : > { %v6594_v0 = vpop.f32.mrb[173].mxu1  ;;  %v6545_v44 = vadd.f32 %v16333_v4, %v14956_v8  ;;  %v12678_v4 = vld [vmem:[%s17316_s2 + $0xc84] ss:$16 sps:$4 sm:$0xff]  }
 0x45b   : > { %v16469_v10 = vpop.f32.mrb[174].mxu1  ;;  %v10926_v45 = vpack.c.bf16 %v7589_v50, %v7586_v19  ;;  %7800 = vmatmul.mubr.bf16.gmra.mrb[164].mxu0 %v12661_v23  ;;  %v12664_v19 = vld [vmem:[%s17316_s2 + $0xc40] ss:$16 sps:$4 sm:$0xff]  }
 0x45c   : > { %v6597_v29 = vpop.f32.mrb[175].mxu1  ;;  %7807 = vmatprep.mubr.bf16.mxu0 %v12669_v58 }
 0x45d   : > { %11314 = vst [vmem:[%s14945_s22 + $0x1f0] sm:$0xff] %v10926_v45  }
 0x45e   : > { %6807 = vmatmul.mubr.bf16.gmra.mrb[172].mxu1 %v12658_v15  ;;  %v7593_v55 = vpop.f32.mrb[60].mxu0  ;;  %v12667_v15 = vld [vmem:[%s17316_s2 + $0xb48] ss:$16 sps:$4 sm:$0xff]  }
 0x45f   : > { %6814 = vmatprep.mubr.bf16.mxu1 %v12666_v3  ;;  %v7594_v56 = vadd.f32 %v7593_v55, %v6537_v28  ;;  %v7595_v27 = vpop.f32.mrb[61].mxu0  ;;  %v12675_v3 = vld [vmem:[%s17316_s2 + $0xb6c] ss:$16 sps:$4 sm:$0xff]  }
 0x460   : > { %v7596_v32 = vpop.f32.mrb[62].mxu0  ;;  %v6548_v27 = vadd.f32 %v16343_v41, %v14958_v46 }
 0x461   : > { %v16480_v49 = vpop.f32.mrb[176].mxu1  ;;  %v7597_v20 = vadd.f32 %v7596_v32, %v6540_v61  ;;  %v7598_v50 = vpop.f32.mrb[63].mxu0 }
 0x462   : > { %v6602_v0 = vpop.f32.mrb[177].mxu1 }
 0x463   : > { %v16490_v23 = vpop.f32.mrb[178].mxu1  ;;  %v10931_v29 = vpack.c.bf16 %v7597_v20, %v7594_v56  ;;  %7808 = vmatmul.mubr.bf16.gmra.mrb[168].mxu0 %v12667_v15  ;;  %v12670_v56 = vld [vmem:[%s17316_s2 + $0xc60] ss:$16 sps:$4 sm:$0xff]  }
 0x464   : > { %v6605_v58 = vpop.f32.mrb[179].mxu1  ;;  %7815 = vmatprep.mubr.bf16.mxu0 %v12675_v3 }
 0x465   : > { %11315 = vst [vmem:[%s14945_s22 + $0x1f8] sm:$0xff] %v10931_v29  }
 0x466   : > { %6815 = vmatmul.mubr.bf16.gmra.mrb[176].mxu1 %v12664_v19  ;;  %v7601_v59 = vpop.f32.mrb[64].mxu0  ;;  %v12681_v19 = vld [vmem:[%s17316_s2 + $0xb8c] ss:$16 sps:$4 sm:$0xff]  }
 0x467   : > { %6822 = vmatprep.mubr.bf16.mxu1 %v12672_v62  ;;  %v7602_v28 = vadd.f32 %v7601_v59, %v6545_v44  ;;  %v7603_v0 = vpop.f32.mrb[65].mxu0  ;;  %v6553_v62 = vadd.f32 %v16354_v54, %v14993_v39  ;;  %v6556_v44 = vadd.f32 %v16364_v21, %v14995_v31  ;;  %v12676_v59 = vld [vmem:[%s17316_s2 + $0xc80] ss:$16 sps:$4 sm:$0xff]   ;;  %v12684_v54 = vld [vmem:[%s17316_s2 + $0xca4] ss:$16 sps:$4 sm:$0xff]  }
 0x468   : > { %v7604_v8 = vpop.f32.mrb[66].mxu0  ;;  %v12687_v0 = vld [vmem:[%s17316_s2 + $0xbac] ss:$16 sps:$4 sm:$0xff]  }
 0x469   : > { %v16501_v45 = vpop.f32.mrb[180].mxu1  ;;  %v7605_v46 = vadd.f32 %v7604_v8, %v6548_v27  ;;  %v7606_v15 = vpop.f32.mrb[67].mxu0 }
 0x46a   : > { %v6610_v55 = vpop.f32.mrb[181].mxu1  ;;  %v6564_v15 = vadd.f32 %v16385_v48, %v15032_v35 }
 0x46b   : > { %v16511_v61 = vpop.f32.mrb[182].mxu1  ;;  %v10936_v32 = vpack.c.bf16 %v7605_v46, %v7602_v28  ;;  %7816 = vmatmul.mubr.bf16.gmra.mrb[172].mxu0 %v12673_v14  ;;  %v12679_v28 = vld [vmem:[%s17316_s2 + $0xb88] ss:$16 sps:$4 sm:$0xff]   ;;  %v6561_v14 = vadd.f32 %v16375_v53, %v15030_v18  ;;  %v12690_v53 = vld [vmem:[%s17316_s2 + $0xcc4] ss:$16 sps:$4 sm:$0xff]  }
 0x46c   : > { %v6613_v41 = vpop.f32.mrb[183].mxu1  ;;  %7823 = vmatprep.mubr.bf16.mxu0 %v12681_v19 }
 0x46d   : > { %11316 = vst [vmem:[%s14945_s22 + $0x200] sm:$0xff] %v10936_v32   ;;  %v12682_v32 = vld [vmem:[%s17316_s2 + $0xca0] ss:$16 sps:$4 sm:$0xff]  }
 0x46e   : > { %6823 = vmatmul.mubr.bf16.gmra.mrb[180].mxu1 %v12670_v56  ;;  %v7609_v20 = vpop.f32.mrb[68].mxu0 }
 0x46f   : > { %6830 = vmatprep.mubr.bf16.mxu1 %v12678_v4  ;;  %v7610_v58 = vadd.f32 %v7609_v20, %v6553_v62  ;;  %v7611_v29 = vpop.f32.mrb[69].mxu0  ;;  %v12685_v62 = vld [vmem:[%s17316_s2 + $0xba8] ss:$16 sps:$4 sm:$0xff]  }
 0x470   : > { %v7612_v39 = vpop.f32.mrb[70].mxu0 }
 0x471   : > { %v16522_v3 = vpop.f32.mrb[184].mxu1  ;;  %v7613_v31 = vadd.f32 %v7612_v39, %v6556_v44  ;;  %v7614_v27 = vpop.f32.mrb[71].mxu0  ;;  %v6569_v44 = vadd.f32 %v16396_v12, %v15067_v43  ;;  %v12696_v12 = vld [vmem:[%s17316_s2 + $0xce4] ss:$16 sps:$4 sm:$0xff]  }
 0x472   : > { %v6618_v50 = vpop.f32.mrb[185].mxu1  ;;  %v12691_v27 = vld [vmem:[%s17316_s2 + $0xbc8] ss:$16 sps:$4 sm:$0xff]  }
 0x473   : > { %v16532_v55 = vpop.f32.mrb[186].mxu1  ;;  %v10941_v56 = vpack.c.bf16 %v7613_v31, %v7610_v58  ;;  %7824 = vmatmul.mubr.bf16.gmra.mrb[176].mxu0 %v12679_v28  ;;  %v12693_v58 = vld [vmem:[%s17316_s2 + $0xbcc] ss:$16 sps:$4 sm:$0xff]   ;;  %v6572_v31 = vadd.f32 %v16406_v24, %v15069_v2 }
 0x474   : > { %v6621_v21 = vpop.f32.mrb[187].mxu1  ;;  %7831 = vmatprep.mubr.bf16.mxu0 %v12687_v0 }
 0x475   : > { %11317 = vst [vmem:[%s14945_s22 + $0x208] sm:$0xff] %v10941_v56   ;;  %v12688_v21 = vld [vmem:[%s17316_s2 + $0xcc0] ss:$16 sps:$4 sm:$0xff]  }
 0x476   : > { %6831 = vmatmul.mubr.bf16.gmra.mrb[184].mxu1 %v12676_v59  ;;  %v7617_v4 = vpop.f32.mrb[72].mxu0 }
 0x477   : > { %6838 = vmatprep.mubr.bf16.mxu1 %v12684_v54  ;;  %v7618_v19 = vadd.f32 %v7617_v4, %v6561_v14  ;;  %v7619_v41 = vpop.f32.mrb[73].mxu0  ;;  %v12699_v14 = vld [vmem:[%s17316_s2 + $0xbec] ss:$16 sps:$4 sm:$0xff]  }
 0x478   : > { %v7620_v18 = vpop.f32.mrb[74].mxu0 }
 0x479   : > { %v16543_v8 = vpop.f32.mrb[188].mxu1  ;;  %v7621_v35 = vadd.f32 %v7620_v18, %v6564_v15  ;;  %v7622_v50 = vpop.f32.mrb[75].mxu0 }
 0x47a   : > { %v6626_v46 = vpop.f32.mrb[189].mxu1  ;;  %v12705_v50 = vld [vmem:[%s17316_s2 + $0xc0c] ss:$16 sps:$4 sm:$0xff]  }
 0x47b   : > { %v16553_v20 = vpop.f32.mrb[190].mxu1  ;;  %v10946_v29 = vpack.c.bf16 %v7621_v35, %v7618_v19  ;;  %7832 = vmatmul.mubr.bf16.gmra.mrb[180].mxu0 %v12685_v62  ;;  %v6577_v46 = vadd.f32 %v16417_v30, %v15104_v52  ;;  %v12697_v35 = vld [vmem:[%s17316_s2 + $0xbe8] ss:$16 sps:$4 sm:$0xff]   ;;  %v12702_v30 = vld [vmem:[%s17316_s2 + $0xd04] ss:$16 sps:$4 sm:$0xff]  }
 0x47c   : > { %v6629_v48 = vpop.f32.mrb[191].mxu1  ;;  %7839 = vmatprep.mubr.bf16.mxu0 %v12693_v58  ;;  %v12694_v58 = vld [vmem:[%s17316_s2 + $0xce0] ss:$16 sps:$4 sm:$0xff]  }
 0x47d   : > { %11318 = vst [vmem:[%s14945_s22 + $0x210] sm:$0xff] %v10946_v29  }
 0x47e   : > { %6839 = vmatmul.mubr.bf16.gmra.mrb[188].mxu1 %v12682_v32  ;;  %v7625_v28 = vpop.f32.mrb[76].mxu0 }
 0x47f   : > { %6846 = vmatprep.mubr.bf16.mxu1 %v12690_v53  ;;  %v7626_v39 = vadd.f32 %v7625_v28, %v6569_v44  ;;  %v7627_v0 = vpop.f32.mrb[77].mxu0  ;;  %v6580_v53 = vadd.f32 %v16427_v34, %v15106_v16  ;;  %v6585_v28 = vadd.f32 %v16438_v36, %v15141_v60  ;;  %v12708_v36 = vld [vmem:[%s17316_s2 + $0xd24] ss:$16 sps:$4 sm:$0xff]  }
 0x480   : > { %v7628_v43 = vpop.f32.mrb[78].mxu0 }
 0x481   : > { %v16564_v59 = vpop.f32.mrb[192].mxu1  ;;  %v7629_v2 = vadd.f32 %v7628_v43, %v6572_v31  ;;  %v7630_v4 = vpop.f32.mrb[79].mxu0  ;;  %v12700_v43 = vld [vmem:[%s17316_s2 + $0xd00] ss:$16 sps:$4 sm:$0xff]  }
 0x482   : > { %v6634_v54 = vpop.f32.mrb[193].mxu1 }
 0x483   : > { %v16574_v56 = vpop.f32.mrb[194].mxu1  ;;  %v10951_v19 = vpack.c.bf16 %v7629_v2, %v7626_v39  ;;  %7840 = vmatmul.mubr.bf16.gmra.mrb[184].mxu0 %v12691_v27  ;;  %v6588_v27 = vadd.f32 %v16448_v57, %v15143_v6  ;;  %v12711_v2 = vld [vmem:[%s17316_s2 + $0xc2c] ss:$16 sps:$4 sm:$0xff]  }
 0x484   : > { %v6637_v24 = vpop.f32.mrb[195].mxu1  ;;  %7847 = vmatprep.mubr.bf16.mxu0 %v12699_v14 }
 0x485   : > { %11319 = vst [vmem:[%s14945_s22 + $0x218] sm:$0xff] %v10951_v19   ;;  %v6593_v19 = vadd.f32 %v16459_v33, %v15178_v5  ;;  %v12714_v33 = vld [vmem:[%s17316_s2 + $0xd44] ss:$16 sps:$4 sm:$0xff]  }
 0x486   : > { %6847 = vmatmul.mubr.bf16.gmra.mrb[192].mxu1 %v12688_v21  ;;  %v7633_v15 = vpop.f32.mrb[80].mxu0 }
 0x487   : > { %6854 = vmatprep.mubr.bf16.mxu1 %v12696_v12  ;;  %v7634_v32 = vadd.f32 %v7633_v15, %v6577_v46  ;;  %v7635_v18 = vpop.f32.mrb[81].mxu0  ;;  %v12703_v12 = vld [vmem:[%s17316_s2 + $0xc08] ss:$16 sps:$4 sm:$0xff]  }
 0x488   : > { %v7636_v52 = vpop.f32.mrb[82].mxu0 }
 0x489   : > { %v16585_v41 = vpop.f32.mrb[196].mxu1  ;;  %v7637_v16 = vadd.f32 %v7636_v52, %v6580_v53  ;;  %v7638_v29 = vpop.f32.mrb[83].mxu0  ;;  %v6596_v53 = vadd.f32 %v16469_v10, %v15180_v37 }
 0x48a   : > { %v6642_v62 = vpop.f32.mrb[197].mxu1 }
 0x48b   : > { %v16595_v48 = vpop.f32.mrb[198].mxu1  ;;  %v10956_v44 = vpack.c.bf16 %v7637_v16, %v7634_v32  ;;  %7848 = vmatmul.mubr.bf16.gmra.mrb[188].mxu0 %v12697_v35  ;;  %v12709_v35 = vld [vmem:[%s17316_s2 + $0xc28] ss:$16 sps:$4 sm:$0xff]  }
 0x48c   : > { %v6645_v34 = vpop.f32.mrb[199].mxu1  ;;  %7855 = vmatprep.mubr.bf16.mxu0 %v12705_v50 }
 0x48d   : > { %11320 = vst [vmem:[%s14945_s22 + $0x220] sm:$0xff] %v10956_v44   ;;  %v6601_v34 = vadd.f32 %v16480_v49, %v15215_v9  ;;  %v12720_v49 = vld [vmem:[%s17316_s2 + $0xd64] ss:$16 sps:$4 sm:$0xff]  }
 0x48e   : > { %6855 = vmatmul.mubr.bf16.gmra.mrb[196].mxu1 %v12694_v58  ;;  %v7641_v54 = vpop.f32.mrb[84].mxu0  ;;  %v12706_v58 = vld [vmem:[%s17316_s2 + $0xd20] ss:$16 sps:$4 sm:$0xff]  }
 0x48f   : > { %6862 = vmatprep.mubr.bf16.mxu1 %v12702_v30  ;;  %v7642_v0 = vadd.f32 %v7641_v54, %v6585_v28  ;;  %v7643_v21 = vpop.f32.mrb[85].mxu0  ;;  %v12717_v30 = vld [vmem:[%s17316_s2 + $0xc4c] ss:$16 sps:$4 sm:$0xff]  }
 0x490   : > { %v7644_v60 = vpop.f32.mrb[86].mxu0  ;;  %v12712_v21 = vld [vmem:[%s17316_s2 + $0xd40] ss:$16 sps:$4 sm:$0xff]  }
 0x491   : > { %v16606_v39 = vpop.f32.mrb[200].mxu1  ;;  %v7645_v6 = vadd.f32 %v7644_v60, %v6588_v27  ;;  %v7646_v24 = vpop.f32.mrb[87].mxu0  ;;  %v12715_v27 = vld [vmem:[%s17316_s2 + $0xc48] ss:$16 sps:$4 sm:$0xff]  }
 0x492   : > { %v6650_v31 = vpop.f32.mrb[201].mxu1 }
 0x493   : > { %v16616_v14 = vpop.f32.mrb[202].mxu1  ;;  %v10961_v4 = vpack.c.bf16 %v7645_v6, %v7642_v0  ;;  %7856 = vmatmul.mubr.bf16.gmra.mrb[192].mxu0 %v12703_v12  ;;  %v6604_v31 = vadd.f32 %v16490_v23, %v15217_v1  ;;  %v12723_v12 = vld [vmem:[%s17316_s2 + $0xc6c] ss:$16 sps:$4 sm:$0xff]  }
 0x494   : > { %v6653_v57 = vpop.f32.mrb[203].mxu1  ;;  %7863 = vmatprep.mubr.bf16.mxu0 %v12711_v2  ;;  %v6609_v2 = vadd.f32 %v16501_v45, %v15252_v13  ;;  %v12726_v45 = vld [vmem:[%s17316_s2 + $0xd84] ss:$16 sps:$4 sm:$0xff]  }
 0x495   : > { %11321 = vst [vmem:[%s14945_s22 + $0x228] sm:$0xff] %v10961_v4  }
 0x496   : > { %6863 = vmatmul.mubr.bf16.gmra.mrb[200].mxu1 %v12700_v43  ;;  %v7649_v15 = vpop.f32.mrb[88].mxu0 }
 0x497   : > { %6870 = vmatprep.mubr.bf16.mxu1 %v12708_v36  ;;  %v7650_v32 = vadd.f32 %v7649_v15, %v6593_v19  ;;  %v7651_v18 = vpop.f32.mrb[89].mxu0  ;;  %v6612_v15 = vadd.f32 %v16511_v61, %v15254_v25 }
 0x498   : > { %v7652_v5 = vpop.f32.mrb[90].mxu0 }
 0x499   : > { %v16627_v46 = vpop.f32.mrb[204].mxu1  ;;  %v7653_v37 = vadd.f32 %v7652_v5, %v6596_v53  ;;  %v7654_v50 = vpop.f32.mrb[91].mxu0  ;;  %v12729_v53 = vld [vmem:[%s17316_s2 + $0xc8c] ss:$16 sps:$4 sm:$0xff]   ;;  %v6617_v5 = vadd.f32 %v16522_v3, %v15289_v17  ;;  %v12732_v3 = vld [vmem:[%s17316_s2 + $0xda4] ss:$16 sps:$4 sm:$0xff]  }
 0x49a   : > { %v6658_v62 = vpop.f32.mrb[205].mxu1 }
 0x49b   : > { %v16637_v52 = vpop.f32.mrb[206].mxu1  ;;  %v10966_v16 = vpack.c.bf16 %v7653_v37, %v7650_v32  ;;  %7864 = vmatmul.mubr.bf16.gmra.mrb[196].mxu0 %v12709_v35  ;;  %v12718_v32 = vld [vmem:[%s17316_s2 + $0xd60] ss:$16 sps:$4 sm:$0xff]   ;;  %v12721_v62 = vld [vmem:[%s17316_s2 + $0xc68] ss:$16 sps:$4 sm:$0xff]  }
 0x49c   : > { %v6661_v10 = vpop.f32.mrb[207].mxu1  ;;  %7871 = vmatprep.mubr.bf16.mxu0 %v12717_v30 }
 0x49d   : > { %11322 = vst [vmem:[%s14945_s22 + $0x230] sm:$0xff] %v10966_v16   ;;  %v6620_v16 = vadd.f32 %v16532_v55, %v15291_v47 }
 0x49e   : > { %6871 = vmatmul.mubr.bf16.gmra.mrb[204].mxu1 %v12706_v58  ;;  %v7657_v44 = vpop.f32.mrb[92].mxu0 }
 0x49f   : > { %6878 = vmatprep.mubr.bf16.mxu1 %v12714_v33  ;;  %v7658_v28 = vadd.f32 %v7657_v44, %v6601_v34  ;;  %v7659_v0 = vpop.f32.mrb[93].mxu0  ;;  %v12724_v34 = vld [vmem:[%s17316_s2 + $0xd80] ss:$16 sps:$4 sm:$0xff]   ;;  %v12727_v44 = vld [vmem:[%s17316_s2 + $0xc88] ss:$16 sps:$4 sm:$0xff]  }
 0x4a0   : > { %v7660_v9 = vpop.f32.mrb[94].mxu0 }
 0x4a1   : > { %v16648_v29 = vpop.f32.mrb[208].mxu1  ;;  %v7661_v1 = vadd.f32 %v7660_v9, %v6604_v31  ;;  %v7662_v60 = vpop.f32.mrb[95].mxu0 }
 0x4a2   : > { %v6666_v54 = vpop.f32.mrb[209].mxu1  ;;  %v12730_v60 = vld [vmem:[%s17316_s2 + $0xda0] ss:$16 sps:$4 sm:$0xff]  }
 0x4a3   : > { %v16658_v43 = vpop.f32.mrb[210].mxu1  ;;  %v10971_v36 = vpack.c.bf16 %v7661_v1, %v7658_v28  ;;  %7872 = vmatmul.mubr.bf16.gmra.mrb[200].mxu0 %v12715_v27  ;;  %v12735_v54 = vld [vmem:[%s17316_s2 + $0xcac] ss:$16 sps:$4 sm:$0xff]  }
 0x4a4   : > { %v6669_v23 = vpop.f32.mrb[211].mxu1  ;;  %7879 = vmatprep.mubr.bf16.mxu0 %v12723_v12 }
 0x4a5   : > { %11323 = vst [vmem:[%s14945_s22 + $0x238] sm:$0xff] %v10971_v36   ;;  %v6628_v23 = vadd.f32 %v16553_v20, %v15328_v51  ;;  %v12733_v36 = vld [vmem:[%s17316_s2 + $0xca8] ss:$16 sps:$4 sm:$0xff]  }
 0x4a6   : > { %6879 = vmatmul.mubr.bf16.gmra.mrb[208].mxu1 %v12712_v21  ;;  %v7665_v57 = vpop.f32.mrb[96].mxu0  ;;  %v6625_v21 = vadd.f32 %v16543_v8, %v15326_v22  ;;  %v12738_v8 = vld [vmem:[%s17316_s2 + $0xdc4] ss:$16 sps:$4 sm:$0xff]  }
 0x4a7   : > { %6886 = vmatprep.mubr.bf16.mxu1 %v12720_v49  ;;  %v7666_v24 = vadd.f32 %v7665_v57, %v6609_v2  ;;  %v7667_v19 = vpop.f32.mrb[97].mxu0  ;;  %v12741_v57 = vld [vmem:[%s17316_s2 + $0xccc] ss:$16 sps:$4 sm:$0xff]  }
 0x4a8   : > { %v7668_v13 = vpop.f32.mrb[98].mxu0  ;;  %v6633_v19 = vadd.f32 %v16564_v59, %v15363_v26  ;;  %v12744_v59 = vld [vmem:[%s17316_s2 + $0xde4] ss:$16 sps:$4 sm:$0xff]  }
 0x4a9   : > { %v16669_v6 = vpop.f32.mrb[212].mxu1  ;;  %v7669_v25 = vadd.f32 %v7668_v13, %v6612_v15  ;;  %v7670_v58 = vpop.f32.mrb[99].mxu0 }
 0x4aa   : > { %v6674_v4 = vpop.f32.mrb[213].mxu1 }
 0x4ab   : > { %v16679_v18 = vpop.f32.mrb[214].mxu1  ;;  %v10976_v35 = vpack.c.bf16 %v7669_v25, %v7666_v24  ;;  %7880 = vmatmul.mubr.bf16.gmra.mrb[204].mxu0 %v12721_v62  ;;  %v12736_v25 = vld [vmem:[%s17316_s2 + $0xdc0] ss:$16 sps:$4 sm:$0xff]  }
 0x4ac   : > { %v6677_v61 = vpop.f32.mrb[215].mxu1  ;;  %7887 = vmatprep.mubr.bf16.mxu0 %v12729_v53  ;;  %v6636_v53 = vadd.f32 %v16574_v56, %v15365_v42 }
 0x4ad   : > { %11324 = vst [vmem:[%s14945_s22 + $0x240] sm:$0xff] %v10976_v35   ;;  %v12739_v61 = vld [vmem:[%s17316_s2 + $0xcc8] ss:$16 sps:$4 sm:$0xff]   ;;  %v12747_v35 = vld [vmem:[%s17316_s2 + $0xcec] ss:$16 sps:$4 sm:$0xff]  }
 0x4ae   : > { %6887 = vmatmul.mubr.bf16.gmra.mrb[212].mxu1 %v12718_v32  ;;  %v7673_v30 = vpop.f32.mrb[100].mxu0 }
 0x4af   : > { %6894 = vmatprep.mubr.bf16.mxu1 %v12726_v45  ;;  %v7674_v37 = vadd.f32 %v7673_v30, %v6617_v5  ;;  %v7675_v50 = vpop.f32.mrb[101].mxu0 }
 0x4b0   : > { %v7676_v17 = vpop.f32.mrb[102].mxu0 }
 0x4b1   : > { %v16690_v33 = vpop.f32.mrb[216].mxu1  ;;  %v7677_v47 = vadd.f32 %v7676_v17, %v6620_v16  ;;  %v7678_v0 = vpop.f32.mrb[103].mxu0  ;;  %v6644_v17 = vadd.f32 %v16595_v48, %v15399_v40 }
 0x4b2   : > { %v6682_v10 = vpop.f32.mrb[217].mxu1 }
 0x4b3   : > { %v16700_v28 = vpop.f32.mrb[218].mxu1  ;;  %v10981_v31 = vpack.c.bf16 %v7677_v47, %v7674_v37  ;;  %7888 = vmatmul.mubr.bf16.gmra.mrb[208].mxu0 %v12727_v44  ;;  %v6641_v37 = vadd.f32 %v16585_v41, %v15397_v7  ;;  %v12750_v41 = vld [vmem:[%s17316_s2 + $0xe04] ss:$16 sps:$4 sm:$0xff]  }
 0x4b4   : > { %v6685_v55 = vpop.f32.mrb[219].mxu1  ;;  %7895 = vmatprep.mubr.bf16.mxu0 %v12735_v54  ;;  %v12745_v54 = vld [vmem:[%s17316_s2 + $0xce8] ss:$16 sps:$4 sm:$0xff]  }
 0x4b5   : > { %11325 = vst [vmem:[%s14945_s22 + $0x248] sm:$0xff] %v10981_v31   ;;  %v12753_v55 = vld [vmem:[%s17316_s2 + $0xd0c] ss:$16 sps:$4 sm:$0xff]  }
 0x4b6   : > { %6895 = vmatmul.mubr.bf16.gmra.mrb[216].mxu1 %v12724_v34  ;;  %v7681_v9 = vpop.f32.mrb[104].mxu0 }
 0x4b7   : > { %6902 = vmatprep.mubr.bf16.mxu1 %v12732_v3  ;;  %v7682_v49 = vadd.f32 %v7681_v9, %v6625_v21  ;;  %v7683_v1 = vpop.f32.mrb[105].mxu0  ;;  %v12742_v3 = vld [vmem:[%s17316_s2 + $0xde0] ss:$16 sps:$4 sm:$0xff]   ;;  %v6649_v21 = vadd.f32 %v16606_v39, %v15431_v63  ;;  %v12756_v39 = vld [vmem:[%s17316_s2 + $0xe24] ss:$16 sps:$4 sm:$0xff]  }
 0x4b8   : > { %v7684_v22 = vpop.f32.mrb[106].mxu0 }
 0x4b9   : > { %v16711_v27 = vpop.f32.mrb[220].mxu1  ;;  %v7685_v51 = vadd.f32 %v7684_v22, %v6628_v23  ;;  %v7686_v24 = vpop.f32.mrb[107].mxu0  ;;  %v12751_v22 = vld [vmem:[%s17316_s2 + $0xd08] ss:$16 sps:$4 sm:$0xff]  }
 0x4ba   : > { %v6690_v12 = vpop.f32.mrb[221].mxu1  ;;  %v2951_v24 = vpop.permute.xlu1 %2950 }
 0x4bb   : > { %v16721_v2 = vpop.f32.mrb[222].mxu1  ;;  %v10986_v4 = vpack.c.bf16 %v7685_v51, %v7682_v49  ;;  %7896 = vmatmul.mubr.bf16.gmra.mrb[212].mxu0 %v12733_v36  ;;  %v12748_v36 = vld [vmem:[%s17316_s2 + $0xe00] ss:$16 sps:$4 sm:$0xff]  }
 0x4bc   : > { %v6693_v20 = vpop.f32.mrb[223].mxu1  ;;  %7903 = vmatprep.mubr.bf16.mxu0 %v12741_v57 }
 0x4bd   : > { %11326 = vst [vmem:[%s14945_s22 + $0x250] sm:$0xff] %v10986_v4   ;;  %v2956_v4 = vpop.permute.xlu0 %2955 }
 0x4be   : > { %6903 = vmatmul.mubr.bf16.gmra.mrb[220].mxu1 %v12730_v60  ;;  %v7689_v32 = vpop.f32.mrb[108].mxu0  ;;  %v6652_v60 = vadd.f32 %v16616_v14, %v15433_v38  ;;  %v12759_v38 = vld [vmem:[%s17316_s2 + $0xd2c] ss:$16 sps:$4 sm:$0xff]  }
 0x4bf   : > { %6910 = vmatprep.mubr.bf16.mxu1 %v12738_v8  ;;  %v7690_v62 = vadd.f32 %v7689_v32, %v6633_v19  ;;  %v7691_v45 = vpop.f32.mrb[109].mxu0  ;;  %v6657_v19 = vadd.f32 %v16627_v46, %v15468_v11  ;;  %v12762_v46 = vld [vmem:[%s17316_s2 + $0xe44] ss:$16 sps:$4 sm:$0xff]  }
 0x4c0   : > { %v7692_v26 = vpop.f32.mrb[110].mxu0 }
 0x4c1   : > { %v16732_v15 = vpop.f32.mrb[224].mxu1  ;;  %v7693_v42 = vadd.f32 %v7692_v26, %v6636_v53  ;;  %v7694_v5 = vpop.f32.mrb[111].mxu0  ;;  %v12754_v26 = vld [vmem:[%s17316_s2 + $0xe20] ss:$16 sps:$4 sm:$0xff]  }
 0x4c2   : > { %v6698_v13 = vpop.f32.mrb[225].mxu1 }
 0x4c3   : > { %v16742_v58 = vpop.f32.mrb[226].mxu1  ;;  %v10991_v30 = vpack.c.bf16 %v7693_v42, %v7690_v62  ;;  %7904 = vmatmul.mubr.bf16.gmra.mrb[216].mxu0 %v12739_v61 }
 0x4c4   : > { %v6701_v56 = vpop.f32.mrb[227].mxu1  ;;  %7911 = vmatprep.mubr.bf16.mxu0 %v12747_v35 }
 0x4c5   : > { %11327 = vst [vmem:[%s14945_s22 + $0x258] sm:$0xff] %v10991_v30  }
 0x4c6   : > { %6911 = vmatmul.mubr.bf16.gmra.mrb[224].mxu1 %v12736_v25  ;;  %v7697_v50 = vpop.f32.mrb[112].mxu0  ;;  %v17542_v25 = vld [vmem:[#allocation95_spill] sm:$0xff] }
 0x4c7   : > { %6918 = vmatprep.mubr.bf16.mxu1 %v12744_v59  ;;  %v7698_v16 = vadd.f32 %v7697_v50, %v6641_v37  ;;  %v7699_v44 = vpop.f32.mrb[113].mxu0  ;;  %v6660_v61 = vadd.f32 %v16637_v52, %v17542_v25  ;;  %v12757_v59 = vld [vmem:[%s17316_s2 + $0xd28] ss:$16 sps:$4 sm:$0xff]   ;;  %v12765_v52 = vld [vmem:[%s17316_s2 + $0xd4c] ss:$16 sps:$4 sm:$0xff]   ;;  %v2961_v37 = vpop.permute.xlu1 %2960 }
 0x4c8   : > { %v7700_v7 = vpop.f32.mrb[114].mxu0  ;;  %v2966_v50 = vpop.permute.xlu0 %2965 }
 0x4c9   : > { %v16753_v10 = vpop.f32.mrb[228].mxu1  ;;  %v7701_v40 = vadd.f32 %v7700_v7, %v6644_v17  ;;  %v7702_v0 = vpop.f32.mrb[115].mxu0  ;;  %v6668_v7 = vadd.f32 %v16658_v43, %v2956_v4  ;;  %v12771_v43 = vld [vmem:[%s17316_s2 + $0xd6c] ss:$16 sps:$4 sm:$0xff]  }
 0x4ca   : > { %v6706_v34 = vpop.f32.mrb[229].mxu1 }
 0x4cb   : > { %v16763_v47 = vpop.f32.mrb[230].mxu1  ;;  %v10996_v31 = vpack.c.bf16 %v7701_v40, %v7698_v16  ;;  %7912 = vmatmul.mubr.bf16.gmra.mrb[220].mxu0 %v12745_v54  ;;  %v6665_v16 = vadd.f32 %v16648_v29, %v2951_v24 }
 0x4cc   : > { %v6709_v48 = vpop.f32.mrb[231].mxu1  ;;  %7919 = vmatprep.mubr.bf16.mxu0 %v12753_v55  ;;  %v12763_v55 = vld [vmem:[%s17316_s2 + $0xd48] ss:$16 sps:$4 sm:$0xff]  }
 0x4cd   : > { %11328 = vst [vmem:[%s14945_s22 + $0x260] sm:$0xff] %v10996_v31   ;;  %v12768_v48 = vld [vmem:[%s17316_s2 + $0xe64] ss:$16 sps:$4 sm:$0xff]  }
 0x4ce   : > { %6919 = vmatmul.mubr.bf16.gmra.mrb[228].mxu1 %v12742_v3  ;;  %v7705_v49 = vpop.f32.mrb[116].mxu0 }
 0x4cf   : > { %6926 = vmatprep.mubr.bf16.mxu1 %v12750_v41  ;;  %v7706_v12 = vadd.f32 %v7705_v49, %v6649_v21  ;;  %v7707_v23 = vpop.f32.mrb[117].mxu0  ;;  %v12760_v41 = vld [vmem:[%s17316_s2 + $0xe40] ss:$16 sps:$4 sm:$0xff]  }
 0x4d0   : > { %v7708_v63 = vpop.f32.mrb[118].mxu0  ;;  %v6673_v23 = vadd.f32 %v16669_v6, %v2961_v37 }
 0x4d1   : > { %v16774_v9 = vpop.f32.mrb[232].mxu1  ;;  %v7709_v14 = vadd.f32 %v7708_v63, %v6652_v60  ;;  %v7710_v51 = vpop.f32.mrb[119].mxu0 }
 0x4d2   : > { %v6714_v1 = vpop.f32.mrb[233].mxu1 }
 0x4d3   : > { %v16784_v8 = vpop.f32.mrb[234].mxu1  ;;  %v11001_v20 = vpack.c.bf16 %v7709_v14, %v7706_v12  ;;  %7920 = vmatmul.mubr.bf16.gmra.mrb[224].mxu0 %v12751_v22  ;;  %v2971_v12 = vpop.permute.xlu1 %2970  ;;  %v12766_v14 = vld [vmem:[%s17316_s2 + $0xe60] ss:$16 sps:$4 sm:$0xff]  }
 0x4d4   : > { %v6717_v57 = vpop.f32.mrb[235].mxu1  ;;  %7927 = vmatprep.mubr.bf16.mxu0 %v12759_v38  ;;  %v2976_v1 = vpop.permute.xlu0 %2975  ;;  %v6676_v38 = vadd.f32 %v16679_v18, %v2966_v50  ;;  %v12777_v18 = vld [vmem:[%s17316_s2 + $0xd8c] ss:$16 sps:$4 sm:$0xff]  }
 0x4d5   : > { %11329 = vst [vmem:[%s14945_s22 + $0x268] sm:$0xff] %v11001_v20   ;;  %v12769_v57 = vld [vmem:[%s17316_s2 + $0xd68] ss:$16 sps:$4 sm:$0xff]   ;;  %v12774_v20 = vld [vmem:[%s17316_s2 + $0xe84] ss:$16 sps:$4 sm:$0xff]  }
 0x4d6   : > { %6927 = vmatmul.mubr.bf16.gmra.mrb[232].mxu1 %v12748_v36  ;;  %v7713_v62 = vpop.f32.mrb[120].mxu0 }
 0x4d7   : > { %6934 = vmatprep.mubr.bf16.mxu1 %v12756_v39  ;;  %v7714_v13 = vadd.f32 %v7713_v62, %v6657_v19  ;;  %v7715_v53 = vpop.f32.mrb[121].mxu0 }
 0x4d8   : > { %v7716_v11 = vpop.f32.mrb[122].mxu0  ;;  %v6681_v53 = vadd.f32 %v16690_v33, %v2971_v12 }
 0x4d9   : > { %v16795_v32 = vpop.f32.mrb[236].mxu1  ;;  %v7717_v42 = vadd.f32 %v7716_v11, %v6660_v61  ;;  %v7718_v5 = vpop.f32.mrb[123].mxu0 }
 0x4da   : > { %v6722_v45 = vpop.f32.mrb[237].mxu1  ;;  %v12780_v5 = vld [vmem:[%s17316_s2 + $0xea4] ss:$16 sps:$4 sm:$0xff]  }
 0x4db   : > { %v16805_v35 = vpop.f32.mrb[238].mxu1  ;;  %v11006_v30 = vpack.c.bf16 %v7717_v42, %v7714_v13  ;;  %7928 = vmatmul.mubr.bf16.gmra.mrb[228].mxu0 %v12757_v59  ;;  %v2981_v13 = vpop.permute.xlu1 %2980  ;;  %v12775_v42 = vld [vmem:[%s17316_s2 + $0xd88] ss:$16 sps:$4 sm:$0xff]  }
 0x4dc   : > { %v6725_v56 = vpop.f32.mrb[239].mxu1  ;;  %7935 = vmatprep.mubr.bf16.mxu0 %v12765_v52  ;;  %v2986_v45 = vpop.permute.xlu0 %2985  ;;  %v12772_v52 = vld [vmem:[%s17316_s2 + $0xe80] ss:$16 sps:$4 sm:$0xff]  }
 0x4dd   : > { %11330 = vst [vmem:[%s14945_s22 + $0x270] sm:$0xff] %v11006_v30  }
 0x4de   : > { %6935 = vmatmul.mubr.bf16.gmra.mrb[236].mxu1 %v12754_v26  ;;  %v7721_v44 = vpop.f32.mrb[124].mxu0 }
 0x4df   : > { %6942 = vmatprep.mubr.bf16.mxu1 %v12762_v46  ;;  %v7722_v17 = vadd.f32 %v7721_v44, %v6665_v16  ;;  %v7723_v54 = vpop.f32.mrb[125].mxu0  ;;  %v6684_v46 = vadd.f32 %v16700_v28, %v2976_v1  ;;  %v12783_v28 = vld [vmem:[%s17316_s2 + $0xdac] ss:$16 sps:$4 sm:$0xff]   ;;  %v2991_v44 = vpop.permute.xlu1 %2990 }
 0x4e0   : > { %v7724_v29 = vpop.f32.mrb[126].mxu0 }
 0x4e1   : > { %v16815_v34 = vpop.f32.mrb[240].mxu1  ;;  %v7725_v0 = vadd.f32 %v7724_v29, %v6668_v7  ;;  %v7726_v21 = vpop.f32.mrb[127].mxu0 }
 0x4e2   : > { %v6730_v3 = vpop.f32.mrb[241].mxu1  ;;  %v12786_v21 = vld [vmem:[%s17316_s2 + $0xec4] ss:$16 sps:$4 sm:$0xff]  }
 0x4e3   : > { %v16824_v40 = vpop.f32.mrb[242].mxu1  ;;  %v11011_v49 = vpack.c.bf16 %v7725_v0, %v7722_v17  ;;  %7936 = vmatmul.mubr.bf16.gmra.mrb[232].mxu0 %v12763_v55  ;;  %v2996_v17 = vpop.permute.xlu0 %2995  ;;  %v6689_v3 = vadd.f32 %v16711_v27, %v2981_v13  ;;  %v12781_v0 = vld [vmem:[%s17316_s2 + $0xda8] ss:$16 sps:$4 sm:$0xff]  }
 0x4e4   : > { %v6733_v31 = vpop.f32.mrb[243].mxu1  ;;  %7943 = vmatprep.mubr.bf16.mxu0 %v12771_v43  ;;  %v12778_v43 = vld [vmem:[%s17316_s2 + $0xea0] ss:$16 sps:$4 sm:$0xff]  }
 0x4e5   : > { %11331 = vst [vmem:[%s14945_s22 + $0x278] sm:$0xff] %v11011_v49  }
 0x4e6   : > { %6943 = vmatmul.mubr.bf16.gmra.mrb[240].mxu1 %v12760_v41  ;;  %v7729_v36 = vpop.f32.mrb[128].mxu0 }
 0x4e7   : > { %6950 = vmatprep.mubr.bf16.mxu1 %v12768_v48  ;;  %v7730_v22 = vadd.f32 %v7729_v36, %v6673_v23  ;;  %v7731_v39 = vpop.f32.mrb[129].mxu0  ;;  %v6692_v48 = vadd.f32 %v16721_v2, %v2986_v45  ;;  %v12789_v2 = vld [vmem:[%s17316_s2 + $0xdcc] ss:$16 sps:$4 sm:$0xff]   ;;  %v3001_v36 = vpop.permute.xlu1 %3000 }
 0x4e8   : > { %v7732_v6 = vpop.f32.mrb[130].mxu0 }
 0x4e9   : > { %v16834_v60 = vpop.f32.mrb[244].mxu1  ;;  %v7733_v24 = vadd.f32 %v7732_v6, %v6676_v38  ;;  %v7734_v19 = vpop.f32.mrb[131].mxu0 }
 0x4ea   : > { %v6738_v63 = vpop.f32.mrb[245].mxu1  ;;  %v12792_v19 = vld [vmem:[%s17316_s2 + $0xee4] ss:$16 sps:$4 sm:$0xff]  }
 0x4eb   : > { %v16843_v51 = vpop.f32.mrb[246].mxu1  ;;  %v11016_v62 = vpack.c.bf16 %v7733_v24, %v7730_v22  ;;  %7944 = vmatmul.mubr.bf16.gmra.mrb[236].mxu0 %v12769_v57  ;;  %v3006_v22 = vpop.permute.xlu0 %3005  ;;  %v6697_v63 = vadd.f32 %v16732_v15, %v2991_v44  ;;  %v12787_v24 = vld [vmem:[%s17316_s2 + $0xdc8] ss:$16 sps:$4 sm:$0xff]  }
 0x4ec   : > { %v6741_v4 = vpop.f32.mrb[247].mxu1  ;;  %7951 = vmatprep.mubr.bf16.mxu0 %v12777_v18  ;;  %v12784_v18 = vld [vmem:[%s17316_s2 + $0xec0] ss:$16 sps:$4 sm:$0xff]  }
 0x4ed   : > { %11332 = vst [vmem:[%s14945_s22 + $0x280] sm:$0xff] %v11016_v62  }
 0x4ee   : > { %6951 = vmatmul.mubr.bf16.gmra.mrb[244].mxu1 %v12766_v14  ;;  %v7737_v61 = vpop.f32.mrb[132].mxu0 }
 0x4ef   : > { %6958 = vmatprep.mubr.bf16.mxu1 %v12774_v20  ;;  %v7738_v26 = vadd.f32 %v7737_v61, %v6681_v53  ;;  %v7739_v11 = vpop.f32.mrb[133].mxu0  ;;  %v6700_v20 = vadd.f32 %v16742_v58, %v2996_v17  ;;  %v12795_v58 = vld [vmem:[%s17316_s2 + $0xdec] ss:$16 sps:$4 sm:$0xff]   ;;  %v3011_v61 = vpop.permute.xlu1 %3010 }
 0x4f0   : > { %v7740_v33 = vpop.f32.mrb[134].mxu0 }
 0x4f1   : > { %v16853_v25 = vpop.f32.mrb[248].mxu1  ;;  %v7741_v30 = vadd.f32 %v7740_v33, %v6684_v46  ;;  %v7742_v50 = vpop.f32.mrb[135].mxu0 }
 0x4f2   : > { %v6746_v59 = vpop.f32.mrb[249].mxu1  ;;  %v12798_v50 = vld [vmem:[%s17316_s2 + $0xf04] ss:$16 sps:$4 sm:$0xff]  }
 0x4f3   : > { %v16862_v56 = vpop.f32.mrb[250].mxu1  ;;  %v11021_v16 = vpack.c.bf16 %v7741_v30, %v7738_v26  ;;  %7952 = vmatmul.mubr.bf16.gmra.mrb[240].mxu0 %v12775_v42  ;;  %v3016_v26 = vpop.permute.xlu0 %3015  ;;  %v6705_v59 = vadd.f32 %v16753_v10, %v3001_v36  ;;  %v12793_v30 = vld [vmem:[%s17316_s2 + $0xde8] ss:$16 sps:$4 sm:$0xff]  }
 0x4f4   : > { %v6749_v37 = vpop.f32.mrb[251].mxu1  ;;  %7959 = vmatprep.mubr.bf16.mxu0 %v12783_v28  ;;  %v12790_v28 = vld [vmem:[%s17316_s2 + $0xee0] ss:$16 sps:$4 sm:$0xff]  }
 0x4f5   : > { %11333 = vst [vmem:[%s14945_s22 + $0x288] sm:$0xff] %v11021_v16  }
 0x4f6   : > { %6959 = vmatmul.mubr.bf16.gmra.mrb[248].mxu1 %v12772_v52  ;;  %v7745_v7 = vpop.f32.mrb[136].mxu0 }
 0x4f7   : > { %6966 = vmatprep.mubr.bf16.mxu1 %v12780_v5  ;;  %v7746_v41 = vadd.f32 %v7745_v7, %v6689_v3  ;;  %v7747_v29 = vpop.f32.mrb[137].mxu0  ;;  %v6708_v5 = vadd.f32 %v16763_v47, %v3006_v22  ;;  %v12801_v47 = vld [vmem:[%s17316_s2 + $0xe0c] ss:$16 sps:$4 sm:$0xff]   ;;  %v3021_v7 = vpop.permute.xlu1 %3020 }
 0x4f8   : > { %v7748_v27 = vpop.f32.mrb[138].mxu0 }
 0x4f9   : > { %v16872_v54 = vpop.f32.mrb[252].mxu1  ;;  %v7749_v49 = vadd.f32 %v7748_v27, %v6692_v48  ;;  %v7750_v1 = vpop.f32.mrb[139].mxu0 }
 0x4fa   : > { %v6754_v55 = vpop.f32.mrb[253].mxu1  ;;  %v12804_v1 = vld [vmem:[%s17316_s2 + $0xf24] ss:$16 sps:$4 sm:$0xff]  }
 0x4fb   : > { %v16881_v31 = vpop.f32.mrb[254].mxu1  ;;  %v11026_v23 = vpack.c.bf16 %v7749_v49, %v7746_v41  ;;  %7960 = vmatmul.mubr.bf16.gmra.mrb[244].mxu0 %v12781_v0  ;;  %v3026_v41 = vpop.permute.xlu0 %3025  ;;  %v6713_v55 = vadd.f32 %v16774_v9, %v3011_v61  ;;  %v12799_v49 = vld [vmem:[%s17316_s2 + $0xe08] ss:$16 sps:$4 sm:$0xff]  }
 0x4fc   : > { %v6757_v12 = vpop.f32.mrb[255].mxu1  ;;  %7967 = vmatprep.mubr.bf16.mxu0 %v12789_v2  ;;  %v12796_v2 = vld [vmem:[%s17316_s2 + $0xf00] ss:$16 sps:$4 sm:$0xff]  }
 0x4fd   : > { %11334 = vst [vmem:[%s14945_s22 + $0x290] sm:$0xff] %v11026_v23  }
 0x4fe   : > { %6967 = vmatmul.mubr.bf16.gmra.mrb[252].mxu1 %v12778_v43  ;;  %v7753_v38 = vpop.f32.mrb[140].mxu0 }
 0x4ff   : > { %6974 = vmatprep.mubr.bf16.mxu1 %v12786_v21  ;;  %v7754_v14 = vadd.f32 %v7753_v38, %v6697_v63  ;;  %v7755_v6 = vpop.f32.mrb[141].mxu0  ;;  %v6716_v21 = vadd.f32 %v16784_v8, %v3016_v26  ;;  %v12807_v8 = vld [vmem:[%s17316_s2 + $0xe2c] ss:$16 sps:$4 sm:$0xff]   ;;  %v3031_v38 = vpop.permute.xlu1 %3030 }
 0x500   : > { %v7756_v15 = vpop.f32.mrb[142].mxu0 }
 0x501   : > { %v16891_v39 = vpop.f32.mrb[148].mxu1  ;;  %v7757_v62 = vadd.f32 %v7756_v15, %v6700_v20  ;;  %v7758_v45 = vpop.f32.mrb[143].mxu0 }
 0x502   : > { %v6762_v57 = vpop.f32.mrb[149].mxu1  ;;  %v12810_v45 = vld [vmem:[%s17316_s2 + $0xf44] ss:$16 sps:$4 sm:$0xff]  }
 0x503   : > { %v16900_v4 = vpop.f32.mrb[150].mxu1  ;;  %v11031_v53 = vpack.c.bf16 %v7757_v62, %v7754_v14  ;;  %7968 = vmatmul.mubr.bf16.gmra.mrb[248].mxu0 %v12787_v24  ;;  %v3036_v14 = vpop.permute.xlu0 %3035  ;;  %v6721_v57 = vadd.f32 %v16795_v32, %v3021_v7  ;;  %v12805_v62 = vld [vmem:[%s17316_s2 + $0xe28] ss:$16 sps:$4 sm:$0xff]  }
 0x504   : > { %v6765_v13 = vpop.f32.mrb[151].mxu1  ;;  %7975 = vmatprep.mubr.bf16.mxu0 %v12795_v58  ;;  %v12802_v58 = vld [vmem:[%s17316_s2 + $0xf20] ss:$16 sps:$4 sm:$0xff]  }
 0x505   : > { %11335 = vst [vmem:[%s14945_s22 + $0x298] sm:$0xff] %v11031_v53  }
 0x506   : > { %6975 = vmatmul.mubr.bf16.gmra.mrb[148].mxu1 %v12784_v18  ;;  %v7761_v46 = vpop.f32.mrb[144].mxu0 }
 0x507   : > { %6982 = vmatprep.mubr.bf16.mxu1 %v12792_v19  ;;  %v7762_v52 = vadd.f32 %v7761_v46, %v6705_v59  ;;  %v7763_v33 = vpop.f32.mrb[145].mxu0  ;;  %v6724_v19 = vadd.f32 %v16805_v35, %v3026_v41  ;;  %v12813_v35 = vld [vmem:[%s17316_s2 + $0xe4c] ss:$16 sps:$4 sm:$0xff]   ;;  %v3041_v46 = vpop.permute.xlu1 %3040 }
 0x508   : > { %v7764_v10 = vpop.f32.mrb[146].mxu0 }
 0x509   : > { %v16910_v11 = vpop.f32.mrb[152].mxu1  ;;  %v7765_v16 = vadd.f32 %v7764_v10, %v6708_v5  ;;  %v7766_v17 = vpop.f32.mrb[147].mxu0 }
 0x50a   : > { %v6770_v42 = vpop.f32.mrb[153].mxu1  ;;  %v12816_v17 = vld [vmem:[%s17316_s2 + $0xf64] ss:$16 sps:$4 sm:$0xff]  }
 0x50b   : > { %v16919_v37 = vpop.f32.mrb[154].mxu1  ;;  %v11036_v3 = vpack.c.bf16 %v7765_v16, %v7762_v52  ;;  %7976 = vmatmul.mubr.bf16.gmra.mrb[252].mxu0 %v12793_v30  ;;  %v3046_v52 = vpop.permute.xlu0 %3045  ;;  %v6729_v42 = vadd.f32 %v16815_v34, %v3031_v38  ;;  %v12811_v16 = vld [vmem:[%s17316_s2 + $0xe48] ss:$16 sps:$4 sm:$0xff]  }
 0x50c   : > { %v6773_v44 = vpop.f32.mrb[155].mxu1  ;;  %7983 = vmatprep.mubr.bf16.mxu0 %v12801_v47  ;;  %v12808_v47 = vld [vmem:[%s17316_s2 + $0xf40] ss:$16 sps:$4 sm:$0xff]  }
 0x50d   : > { %11336 = vst [vmem:[%s14945_s22 + $0x2a0] sm:$0xff] %v11036_v3  }
 0x50e   : > { %6983 = vmatmul.mubr.bf16.gmra.mrb[152].mxu1 %v12790_v28  ;;  %v7769_v48 = vpop.f32.mrb[148].mxu0 }
 0x50f   : > { %6990 = vmatprep.mubr.bf16.mxu1 %v12798_v50  ;;  %v7770_v43 = vadd.f32 %v7769_v48, %v6713_v55  ;;  %v7771_v27 = vpop.f32.mrb[149].mxu0  ;;  %v6732_v50 = vadd.f32 %v16824_v40, %v3036_v14  ;;  %v12819_v40 = vld [vmem:[%s17316_s2 + $0xe6c] ss:$16 sps:$4 sm:$0xff]   ;;  %v3051_v48 = vpop.permute.xlu1 %3050 }
 0x510   : > { %v7772_v9 = vpop.f32.mrb[150].mxu0 }
 0x511   : > { %v16929_v29 = vpop.f32.mrb[156].mxu1  ;;  %v7773_v23 = vadd.f32 %v7772_v9, %v6716_v21  ;;  %v7774_v22 = vpop.f32.mrb[151].mxu0 }
 0x512   : > { %v6778_v0 = vpop.f32.mrb[157].mxu1  ;;  %v12822_v22 = vld [vmem:[%s17316_s2 + $0xf84] ss:$16 sps:$4 sm:$0xff]  }
 0x513   : > { %v16938_v12 = vpop.f32.mrb[158].mxu1  ;;  %v11041_v63 = vpack.c.bf16 %v7773_v23, %v7770_v43  ;;  %7984 = vmatmul.mubr.bf16.gmra.mrb[0].mxu0 %v12799_v49  ;;  %v3056_v43 = vpop.permute.xlu0 %3055  ;;  %v6737_v0 = vadd.f32 %v16834_v60, %v3041_v46  ;;  %v12817_v23 = vld [vmem:[%s17316_s2 + $0xe68] ss:$16 sps:$4 sm:$0xff]  }
 0x514   : > { %v6781_v36 = vpop.f32.mrb[159].mxu1  ;;  %7991 = vmatprep.mubr.bf16.mxu0 %v12807_v8  ;;  %v12814_v8 = vld [vmem:[%s17316_s2 + $0xf60] ss:$16 sps:$4 sm:$0xff]  }
 0x515   : > { %11337 = vst [vmem:[%s14945_s22 + $0x2a8] sm:$0xff] %v11041_v63  }
 0x516   : > { %6991 = vmatmul.mubr.bf16.gmra.mrb[156].mxu1 %v12796_v2  ;;  %v7777_v20 = vpop.f32.mrb[152].mxu0 }
 0x517   : > { %6998 = vmatprep.mubr.bf16.mxu1 %v12804_v1  ;;  %v7778_v18 = vadd.f32 %v7777_v20, %v6721_v57  ;;  %v7779_v15 = vpop.f32.mrb[153].mxu0  ;;  %v6740_v1 = vadd.f32 %v16843_v51, %v3046_v52  ;;  %v12825_v51 = vld [vmem:[%s17316_s2 + $0xe8c] ss:$16 sps:$4 sm:$0xff]   ;;  %v3061_v20 = vpop.permute.xlu1 %3060 }
 0x518   : > { %v7780_v32 = vpop.f32.mrb[154].mxu0 }
 0x519   : > { %v16948_v6 = vpop.f32.mrb[160].mxu1  ;;  %v7781_v53 = vadd.f32 %v7780_v32, %v6724_v19  ;;  %v7782_v26 = vpop.f32.mrb[155].mxu0 }
 0x51a   : > { %v6786_v24 = vpop.f32.mrb[161].mxu1  ;;  %v12828_v26 = vld [vmem:[%s17316_s2 + $0xfa4] ss:$16 sps:$4 sm:$0xff]  }
 0x51b   : > { %v16957_v13 = vpop.f32.mrb[162].mxu1  ;;  %v11046_v59 = vpack.c.bf16 %v7781_v53, %v7778_v18  ;;  %7992 = vmatmul.mubr.bf16.gmra.mrb[4].mxu0 %v12805_v62  ;;  %v3066_v18 = vpop.permute.xlu0 %3065  ;;  %v6745_v24 = vadd.f32 %v16853_v25, %v3051_v48  ;;  %v12823_v53 = vld [vmem:[%s17316_s2 + $0xe88] ss:$16 sps:$4 sm:$0xff]  }
 0x51c   : > { %v6789_v61 = vpop.f32.mrb[163].mxu1  ;;  %7999 = vmatprep.mubr.bf16.mxu0 %v12813_v35  ;;  %v12820_v35 = vld [vmem:[%s17316_s2 + $0xf80] ss:$16 sps:$4 sm:$0xff]  }
 0x51d   : > { %11338 = vst [vmem:[%s14945_s22 + $0x2b0] sm:$0xff] %v11046_v59  }
 0x51e   : > { %6999 = vmatmul.mubr.bf16.gmra.mrb[160].mxu1 %v12802_v58  ;;  %v7785_v5 = vpop.f32.mrb[156].mxu0 }
 0x51f   : > { %7006 = vmatprep.mubr.bf16.mxu1 %v12810_v45  ;;  %v7786_v28 = vadd.f32 %v7785_v5, %v6729_v42  ;;  %v7787_v10 = vpop.f32.mrb[157].mxu0  ;;  %v6748_v45 = vadd.f32 %v16862_v56, %v3056_v43  ;;  %v12831_v56 = vld [vmem:[%s17316_s2 + $0xeac] ss:$16 sps:$4 sm:$0xff]   ;;  %v3071_v5 = vpop.permute.xlu1 %3070 }
 0x520   : > { %v7788_v34 = vpop.f32.mrb[158].mxu0 }
 0x521   : > { %v16967_v33 = vpop.f32.mrb[164].mxu1  ;;  %v7789_v3 = vadd.f32 %v7788_v34, %v6732_v50  ;;  %v7790_v41 = vpop.f32.mrb[159].mxu0 }
 0x522   : > { %v6794_v30 = vpop.f32.mrb[165].mxu1  ;;  %v12834_v41 = vld [vmem:[%s17316_s2 + $0xfc4] ss:$16 sps:$4 sm:$0xff]  }
 0x523   : > { %v16976_v44 = vpop.f32.mrb[166].mxu1  ;;  %v11051_v55 = vpack.c.bf16 %v7789_v3, %v7786_v28  ;;  %8000 = vmatmul.mubr.bf16.gmra.mrb[8].mxu0 %v12811_v16  ;;  %v3076_v28 = vpop.permute.xlu0 %3075  ;;  %v6753_v30 = vadd.f32 %v16872_v54, %v3061_v20  ;;  %v12829_v3 = vld [vmem:[%s17316_s2 + $0xea8] ss:$16 sps:$4 sm:$0xff]  }
 0x524   : > { %v6797_v7 = vpop.f32.mrb[167].mxu1  ;;  %8007 = vmatprep.mubr.bf16.mxu0 %v12819_v40  ;;  %v12826_v40 = vld [vmem:[%s17316_s2 + $0xfa0] ss:$16 sps:$4 sm:$0xff]  }
 0x525   : > { %11339 = vst [vmem:[%s14945_s22 + $0x2b8] sm:$0xff] %v11051_v55  }
 0x526   : > { %7007 = vmatmul.mubr.bf16.gmra.mrb[164].mxu1 %v12808_v47  ;;  %v7793_v21 = vpop.f32.mrb[160].mxu0 }
 0x527   : > { %7014 = vmatprep.mubr.bf16.mxu1 %v12816_v17  ;;  %v7794_v2 = vadd.f32 %v7793_v21, %v6737_v0  ;;  %v7795_v9 = vpop.f32.mrb[161].mxu0  ;;  %v6756_v17 = vadd.f32 %v16881_v31, %v3066_v18  ;;  %v12837_v31 = vld [vmem:[%s17316_s2 + $0xecc] ss:$16 sps:$4 sm:$0xff]   ;;  %v3081_v21 = vpop.permute.xlu1 %3080 }
 0x528   : > { %v7796_v60 = vpop.f32.mrb[162].mxu0 }
 0x529   : > { %v16986_v27 = vpop.f32.mrb[168].mxu1  ;;  %v7797_v63 = vadd.f32 %v7796_v60, %v6740_v1  ;;  %v7798_v14 = vpop.f32.mrb[163].mxu0 }
 0x52a   : > { %v6802_v49 = vpop.f32.mrb[169].mxu1  ;;  %v12840_v14 = vld [vmem:[%s17316_s2 + $0xfe4] ss:$16 sps:$4 sm:$0xff]  }
 0x52b   : > { %v16995_v36 = vpop.f32.mrb[170].mxu1  ;;  %v11056_v57 = vpack.c.bf16 %v7797_v63, %v7794_v2  ;;  %8008 = vmatmul.mubr.bf16.gmra.mrb[12].mxu0 %v12817_v23  ;;  %v3086_v2 = vpop.permute.xlu0 %3085  ;;  %v6761_v49 = vadd.f32 %v16891_v39, %v3071_v5  ;;  %v12835_v63 = vld [vmem:[%s17316_s2 + $0xec8] ss:$16 sps:$4 sm:$0xff]  }
 0x52c   : > { %v6805_v38 = vpop.f32.mrb[171].mxu1  ;;  %8015 = vmatprep.mubr.bf16.mxu0 %v12825_v51  ;;  %v12832_v51 = vld [vmem:[%s17316_s2 + $0xfc0] ss:$16 sps:$4 sm:$0xff]  }
 0x52d   : > { %11340 = vst [vmem:[%s14945_s22 + $0x2c0] sm:$0xff] %v11056_v57  }
 0x52e   : > { %7015 = vmatmul.mubr.bf16.gmra.mrb[168].mxu1 %v12814_v8  ;;  %v7801_v19 = vpop.f32.mrb[164].mxu0 }
 0x52f   : > { %7022 = vmatprep.mubr.bf16.mxu1 %v12822_v22  ;;  %v7802_v58 = vadd.f32 %v7801_v19, %v6745_v24  ;;  %v7803_v32 = vpop.f32.mrb[165].mxu0  ;;  %v6764_v22 = vadd.f32 %v16900_v4, %v3076_v28  ;;  %v12843_v4 = vld [vmem:[%s17316_s2 + $0xeec] ss:$16 sps:$4 sm:$0xff]   ;;  %v3091_v19 = vpop.permute.xlu1 %3090 }
 0x530   : > { %v7804_v25 = vpop.f32.mrb[166].mxu0 }
 0x531   : > { %v17005_v15 = vpop.f32.mrb[172].mxu1  ;;  %v7805_v59 = vadd.f32 %v7804_v25, %v6748_v45  ;;  %v7806_v52 = vpop.f32.mrb[167].mxu0 }
 0x532   : > { %v6810_v62 = vpop.f32.mrb[173].mxu1  ;;  %v12846_v52 = vld [vmem:[%s17316_s2 + $0xf0c] ss:$16 sps:$4 sm:$0xff]  }
 0x533   : > { %v17014_v61 = vpop.f32.mrb[174].mxu1  ;;  %v11061_v42 = vpack.c.bf16 %v7805_v59, %v7802_v58  ;;  %8016 = vmatmul.mubr.bf16.gmra.mrb[16].mxu0 %v12823_v53  ;;  %v3096_v58 = vpop.permute.xlu0 %3095  ;;  %v6769_v62 = vadd.f32 %v16910_v11, %v3081_v21  ;;  %v12841_v59 = vld [vmem:[%s17316_s2 + $0xee8] ss:$16 sps:$4 sm:$0xff]  }
 0x534   : > { %v6813_v46 = vpop.f32.mrb[175].mxu1  ;;  %8023 = vmatprep.mubr.bf16.mxu0 %v12831_v56  ;;  %v12838_v56 = vld [vmem:[%s17316_s2 + $0xfe0] ss:$16 sps:$4 sm:$0xff]  }
 0x535   : > { %11341 = vst [vmem:[%s14945_s22 + $0x2c8] sm:$0xff] %v11061_v42  }
 0x536   : > { %7023 = vmatmul.mubr.bf16.gmra.mrb[172].mxu1 %v12820_v35  ;;  %v7809_v50 = vpop.f32.mrb[168].mxu0 }
 0x537   : > { %7030 = vmatprep.mubr.bf16.mxu1 %v12828_v26  ;;  %v7810_v47 = vadd.f32 %v7809_v50, %v6753_v30  ;;  %v7811_v34 = vpop.f32.mrb[169].mxu0  ;;  %v6772_v26 = vadd.f32 %v16919_v37, %v3086_v2  ;;  %v12849_v37 = vld [vmem:[%s17316_s2 + $0xf6c] ss:$16 sps:$4 sm:$0xff]   ;;  %v3101_v50 = vpop.permute.xlu1 %3100 }
 0x538   : > { %v7812_v54 = vpop.f32.mrb[170].mxu0 }
 0x539   : > { %v17024_v10 = vpop.f32.mrb[176].mxu1  ;;  %v7813_v55 = vadd.f32 %v7812_v54, %v6756_v17  ;;  %v7814_v43 = vpop.f32.mrb[171].mxu0 }
 0x53a   : > { %v6818_v16 = vpop.f32.mrb[177].mxu1  ;;  %v12852_v43 = vld [vmem:[%s17316_s2 + $0xf2c] ss:$16 sps:$4 sm:$0xff]  }
 0x53b   : > { %v17033_v7 = vpop.f32.mrb[178].mxu1  ;;  %v11066_v0 = vpack.c.bf16 %v7813_v55, %v7810_v47  ;;  %8024 = vmatmul.mubr.bf16.gmra.mrb[20].mxu0 %v12829_v3  ;;  %v3106_v47 = vpop.permute.xlu0 %3105  ;;  %v6777_v16 = vadd.f32 %v16929_v29, %v3091_v19  ;;  %v12847_v55 = vld [vmem:[%s17316_s2 + $0xf68] ss:$16 sps:$4 sm:$0xff]  }
 0x53c   : > { %v6821_v48 = vpop.f32.mrb[179].mxu1  ;;  %8031 = vmatprep.mubr.bf16.mxu0 %v12837_v31  ;;  %v12844_v31 = vld [vmem:[%s17316_s2 + $0xf08] ss:$16 sps:$4 sm:$0xff]  }
 0x53d   : > { %11342 = vst [vmem:[%s14945_s22 + $0x2d0] sm:$0xff] %v11066_v0  }
 0x53e   : > { %7031 = vmatmul.mubr.bf16.gmra.mrb[176].mxu1 %v12826_v40  ;;  %v7817_v1 = vpop.f32.mrb[172].mxu0 }
 0x53f   : > { %7038 = vmatprep.mubr.bf16.mxu1 %v12834_v41  ;;  %v7818_v8 = vadd.f32 %v7817_v1, %v6761_v49  ;;  %v7819_v60 = vpop.f32.mrb[173].mxu0  ;;  %v6780_v41 = vadd.f32 %v16938_v12, %v3096_v58  ;;  %v12855_v12 = vld [vmem:[%s17316_s2 + $0xf8c] ss:$16 sps:$4 sm:$0xff]   ;;  %v3111_v1 = vpop.permute.xlu1 %3110 }
 0x540   : > { %v7820_v39 = vpop.f32.mrb[174].mxu0 }
 0x541   : > { %v17043_v9 = vpop.f32.mrb[180].mxu1  ;;  %v7821_v57 = vadd.f32 %v7820_v39, %v6764_v22  ;;  %v7822_v18 = vpop.f32.mrb[175].mxu0 }
 0x542   : > { %v6826_v23 = vpop.f32.mrb[181].mxu1  ;;  %v12858_v18 = vld [vmem:[%s17316_s2 + $0xf4c] ss:$16 sps:$4 sm:$0xff]  }
 0x543   : > { %v17052_v38 = vpop.f32.mrb[182].mxu1  ;;  %v11071_v24 = vpack.c.bf16 %v7821_v57, %v7818_v8  ;;  %8032 = vmatmul.mubr.bf16.gmra.mrb[24].mxu0 %v12835_v63  ;;  %v3116_v8 = vpop.permute.xlu0 %3115  ;;  %v6785_v23 = vadd.f32 %v16948_v6, %v3101_v50  ;;  %v12853_v57 = vld [vmem:[%s17316_s2 + $0xf88] ss:$16 sps:$4 sm:$0xff]  }
 0x544   : > { %v6829_v20 = vpop.f32.mrb[183].mxu1  ;;  %8039 = vmatprep.mubr.bf16.mxu0 %v12843_v4  ;;  %v12850_v4 = vld [vmem:[%s17316_s2 + $0xf28] ss:$16 sps:$4 sm:$0xff]  }
 0x545   : > { %11343 = vst [vmem:[%s14945_s22 + $0x2d8] sm:$0xff] %v11071_v24  }
 0x546   : > { %7039 = vmatmul.mubr.bf16.gmra.mrb[180].mxu1 %v12832_v51  ;;  %v7825_v45 = vpop.f32.mrb[176].mxu0 }
 0x547   : > { %7046 = vmatprep.mubr.bf16.mxu1 %v12840_v14  ;;  %v7826_v35 = vadd.f32 %v7825_v45, %v6769_v62  ;;  %v7827_v25 = vpop.f32.mrb[177].mxu0  ;;  %v6788_v14 = vadd.f32 %v16957_v13, %v3106_v47  ;;  %v12861_v13 = vld [vmem:[%s17316_s2 + $0xfac] ss:$16 sps:$4 sm:$0xff]   ;;  %v3121_v45 = vpop.permute.xlu1 %3120 }
 0x548   : > { %v7828_v11 = vpop.f32.mrb[178].mxu0 }
 0x549   : > { %v17062_v32 = vpop.f32.mrb[184].mxu1  ;;  %v7829_v42 = vadd.f32 %v7828_v11, %v6772_v26  ;;  %v7830_v28 = vpop.f32.mrb[179].mxu0 }
 0x54a   : > { %v6834_v53 = vpop.f32.mrb[185].mxu1  ;;  %v12864_v28 = vld [vmem:[%s17316_s2 + $0xfcc] ss:$16 sps:$4 sm:$0xff]  }
 0x54b   : > { %v17071_v46 = vpop.f32.mrb[186].mxu1  ;;  %v11076_v30 = vpack.c.bf16 %v7829_v42, %v7826_v35  ;;  %8040 = vmatmul.mubr.bf16.gmra.mrb[28].mxu0 %v12841_v59  ;;  %v3126_v35 = vpop.permute.xlu0 %3125  ;;  %v6793_v53 = vadd.f32 %v16967_v33, %v3111_v1  ;;  %v12859_v42 = vld [vmem:[%s17316_s2 + $0xfa8] ss:$16 sps:$4 sm:$0xff]  }
 0x54c   : > { %v6837_v5 = vpop.f32.mrb[187].mxu1  ;;  %8047 = vmatprep.mubr.bf16.mxu0 %v12846_v52  ;;  %v6796_v52 = vadd.f32 %v16976_v44, %v3116_v8  ;;  %v3131_v44 = vpop.permute.xlu1 %3130 }
 0x54d   : > { %11344 = vst [vmem:[%s14945_s22 + $0x2e0] sm:$0xff] %v11076_v30  }
 0x54e   : > { %7047 = vmatmul.mubr.bf16.gmra.mrb[184].mxu1 %v12838_v56  ;;  %v7833_v17 = vpop.f32.mrb[180].mxu0 }
 0x54f   : > { %8071 = vmatprep.mubr.bf16.mxu1 %v12849_v37  ;;  %v7834_v40 = vadd.f32 %v7833_v17, %v6777_v16  ;;  %v7835_v54 = vpop.f32.mrb[181].mxu0  ;;  %v12856_v37 = vld [vmem:[%s17316_s2 + $0xf48] ss:$16 sps:$4 sm:$0xff]   ;;  %v3136_v17 = vpop.permute.xlu0 %3135 }
 0x550   : > { %v7836_v29 = vpop.f32.mrb[182].mxu0  ;;  %v3141_v8 = vpop.permute.xlu1 %3140 }
 0x551   : > { %v17081_v34 = vpop.f32.mrb[188].mxu1  ;;  %v7837_v0 = vadd.f32 %v7836_v29, %v6780_v41  ;;  %v7838_v2 = vpop.f32.mrb[183].mxu0  ;;  %v6804_v29 = vadd.f32 %v16995_v36, %v3126_v35  ;;  %v6809_v36 = vadd.f32 %v17005_v15, %v3131_v44 }
 0x552   : > { %v6842_v3 = vpop.f32.mrb[189].mxu1 }
 0x553   : > { %v17090_v48 = vpop.f32.mrb[190].mxu1  ;;  %v11081_v49 = vpack.c.bf16 %v7837_v0, %v7834_v40  ;;  %8048 = vmatmul.mubr.bf16.gmra.mrb[32].mxu0 %v12844_v31  ;;  %v6801_v40 = vadd.f32 %v16986_v27, %v3121_v45  ;;  %v12867_v27 = vld [vmem:[%s17316_s2 + $0xfec] ss:$16 sps:$4 sm:$0xff]   ;;  %v6817_v45 = vadd.f32 %v17024_v10, %v3141_v8 }
 0x554   : > { %v6845_v21 = vpop.f32.mrb[191].mxu1  ;;  %8055 = vmatprep.mubr.bf16.mxu0 %v12852_v43  ;;  %v12862_v43 = vld [vmem:[%s17316_s2 + $0xfc8] ss:$16 sps:$4 sm:$0xff]  }
 0x555   : > { %11345 = vst [vmem:[%s14945_s22 + $0x2e8] sm:$0xff] %v11081_v49  }
 0x556   : > { %8072 = vmatmul.mubr.bf16.vlgmr.msra.gmra.mrb[168].mxu1 %v12847_v55  ;;  %v7841_v22 = vpop.f32.mrb[184].mxu0 }
 0x557   : > { %8079 = vmatprep.mubr.bf16.mxu1 %v12855_v12  ;;  %v7842_v51 = vadd.f32 %v7841_v22, %v6785_v23  ;;  %v7843_v39 = vpop.f32.mrb[185].mxu0  ;;  %v3146_v23 = vpop.permute.xlu0 %3145 }
 0x558   : > { %v7844_v6 = vpop.f32.mrb[186].mxu0 }
 0x559   : > { %v17100_v60 = vpop.f32.mrb[192].mxu1  ;;  %v7845_v24 = vadd.f32 %v7844_v6, %v6788_v14  ;;  %v7846_v58 = vpop.f32.mrb[187].mxu0 }
 0x55a   : > { %v6850_v63 = vpop.f32.mrb[193].mxu1  ;;  %v3151_v58 = vpop.permute.xlu1 %3150 }
 0x55b   : > { %v17109_v20 = vpop.f32.mrb[194].mxu1  ;;  %v11086_v62 = vpack.c.bf16 %v7845_v24, %v7842_v51  ;;  %8056 = vmatmul.mubr.bf16.gmra.mrb[36].mxu0 %v12850_v4  ;;  %v6812_v4 = vadd.f32 %v17014_v61, %v3136_v17  ;;  %v6825_v10 = vadd.f32 %v17043_v9, %v3151_v58 }
 0x55c   : > { %v6853_v19 = vpop.f32.mrb[195].mxu1  ;;  %8063 = vmatprep.mubr.bf16.mxu0 %v12858_v18 }
 0x55d   : > { %11346 = vst [vmem:[%s14945_s22 + $0x2f0] sm:$0xff] %v11086_v62   ;;  %v3156_v62 = vpop.permute.xlu0 %3155 }
 0x55e   : > { %8080 = vmatmul.mubr.bf16.gmra.mrb[172].mxu1 %v12853_v57  ;;  %v7849_v26 = vpop.f32.mrb[188].mxu0  ;;  %v12865_v57 = vld [vmem:[%s17316_s2 + $0xfe8] ss:$16 sps:$4 sm:$0xff]  }
 0x55f   : > { %8087 = vmatprep.mubr.bf16.mxu1 %v12861_v13  ;;  %v7850_v56 = vadd.f32 %v7849_v26, %v6793_v53  ;;  %v7851_v11 = vpop.f32.mrb[189].mxu0 }
 0x560   : > { %v7852_v33 = vpop.f32.mrb[190].mxu0 }
 0x561   : > { %v17119_v25 = vpop.f32.mrb[196].mxu1  ;;  %v7853_v30 = vadd.f32 %v7852_v33, %v6796_v52  ;;  %v7854_v47 = vpop.f32.mrb[191].mxu0 }
 0x562   : > { %v6858_v59 = vpop.f32.mrb[197].mxu1 }
 0x563   : > { %v17128_v5 = vpop.f32.mrb[198].mxu1  ;;  %v11091_v16 = vpack.c.bf16 %v7853_v30, %v7850_v56  ;;  %8064 = vmatmul.mubr.bf16.gmra.mrb[40].mxu0 %v12856_v37  ;;  %v6820_v59 = vadd.f32 %v17033_v7, %v3146_v23  ;;  %v3161_v30 = vpop.permute.xlu1 %3160  ;;  %v6828_v7 = vadd.f32 %v17052_v38, %v3156_v62 }
 0x564   : > { %v6861_v50 = vpop.f32.mrb[199].mxu1  ;;  %v6833_v9 = vadd.f32 %v17062_v32, %v3161_v30 }
 0x565   : > { %11347 = vst [vmem:[%s14945_s22 + $0x2f8] sm:$0xff] %v11091_v16   ;;  %v3166_v50 = vpop.permute.xlu0 %3165 }
 0x566   : > { %8088 = vmatmul.mubr.bf16.gmra.mrb[176].mxu1 %v12859_v42  ;;  %v7857_v54 = vpop.f32.mrb[192].mxu0  ;;  %v6836_v38 = vadd.f32 %v17071_v46, %v3166_v50 }
 0x567   : > { %8095 = vmatprep.mubr.bf16.mxu1 %v12864_v28  ;;  %v7858_v41 = vadd.f32 %v7857_v54, %v6801_v40  ;;  %v7859_v55 = vpop.f32.mrb[193].mxu0 }
 0x568   : > { %v7860_v0 = vpop.f32.mrb[194].mxu0 }
 0x569   : > { %v17135_v3 = vpop.f32.mrb[200].mxu1  ;;  %v7861_v21 = vadd.f32 %v7860_v0, %v6804_v29  ;;  %v7862_v49 = vpop.f32.mrb[195].mxu0 }
 0x56a   : > { %v6866_v31 = vpop.f32.mrb[201].mxu1  ;;  %v3171_v0 = vpop.permute.xlu1 %3170 }
 0x56b   : > { %v17141_v12 = vpop.f32.mrb[202].mxu1  ;;  %v11096_v1 = vpack.c.bf16 %v7861_v21, %v7858_v41  ;;  %v6841_v32 = vadd.f32 %v17081_v34, %v3171_v0 }
 0x56c   : > { %v6869_v2 = vpop.f32.mrb[203].mxu1 }
 0x56d   : > { %11348 = vst [vmem:[%s14945_s22 + $0x300] sm:$0xff] %v11096_v1  }
 0x56e   : > { %8096 = vmatmul.mubr.bf16.gmra.mrb[180].mxu1 %v12862_v43  ;;  %v7865_v51 = vpop.f32.mrb[196].mxu0 }
 0x56f   : > { %8103 = vmatprep.mubr.bf16.mxu1 %v12867_v27  ;;  %v7866_v63 = vadd.f32 %v7865_v51, %v6809_v36  ;;  %v7867_v14 = vpop.f32.mrb[197].mxu0  ;;  %v3176_v27 = vpop.permute.xlu0 %3175 }
 0x570   : > { %v7868_v18 = vpop.f32.mrb[198].mxu0 }
 0x571   : > { %v17148_v22 = vpop.f32.mrb[204].mxu1  ;;  %v7869_v13 = vadd.f32 %v7868_v18, %v6812_v4  ;;  %v7870_v19 = vpop.f32.mrb[199].mxu0 }
 0x572   : > { %v6874_v39 = vpop.f32.mrb[205].mxu1  ;;  %v3181_v4 = vpop.permute.xlu1 %3180 }
 0x573   : > { %v17154_v6 = vpop.f32.mrb[206].mxu1  ;;  %v11101_v15 = vpack.c.bf16 %v7869_v13, %v7866_v63  ;;  %v6849_v34 = vadd.f32 %v17100_v60, %v3181_v4 }
 0x574   : > { %v6877_v24 = vpop.f32.mrb[207].mxu1 }
 0x575   : > { %11349 = vst [vmem:[%s14945_s22 + $0x308] sm:$0xff] %v11101_v15   ;;  %v6844_v24 = vadd.f32 %v17090_v48, %v3176_v27 }
 0x576   : > { %8104 = vmatmul.mubr.bf16.gmra.mrb[184].mxu1 %v12865_v57  ;;  %v7873_v61 = vpop.f32.mrb[200].mxu0  ;;  %v3186_v57 = vpop.permute.xlu0 %3185 }
 0x577   : > { %v7874_v53 = vadd.f32 %v7873_v61, %v6817_v45  ;;  %v7875_v56 = vpop.f32.mrb[201].mxu0  ;;  %v6852_v48 = vadd.f32 %v17109_v20, %v3186_v57 }
 0x578   : > { %v7876_v52 = vpop.f32.mrb[202].mxu0  ;;  %v3191_v56 = vpop.permute.xlu1 %3190 }
 0x579   : > { %v17158_v35 = vpop.f32.mrb[208].mxu1  ;;  %v7877_v37 = vadd.f32 %v7876_v52, %v6820_v59  ;;  %v7878_v33 = vpop.f32.mrb[203].mxu0  ;;  %v6857_v60 = vadd.f32 %v17119_v25, %v3191_v56 }
 0x57a   : > { %v6882_v26 = vpop.f32.mrb[209].mxu1  ;;  %v3196_v59 = vpop.permute.xlu0 %3195 }
 0x57b   : > { %v17161_v11 = vpop.f32.mrb[210].mxu1  ;;  %v11106_v28 = vpack.c.bf16 %v7877_v37, %v7874_v53  ;;  %v6860_v20 = vadd.f32 %v17128_v5, %v3196_v59 }
 0x57c   : > { %v6885_v42 = vpop.f32.mrb[211].mxu1 }
 0x57d   : > { %11350 = vst [vmem:[%s14945_s22 + $0x310] sm:$0xff] %v11106_v28  }
 0x57e   : > { %v7881_v16 = vpop.f32.mrb[204].mxu0 }
 0x57f   : > { %v7882_v44 = vadd.f32 %v7881_v16, %v6825_v10  ;;  %v7883_v40 = vpop.f32.mrb[205].mxu0 }
 0x580   : > { %v7884_v41 = vpop.f32.mrb[206].mxu0  ;;  %v3201_v40 = vpop.permute.xlu1 %3200 }
 0x581   : > { %v17165_v47 = vpop.f32.mrb[212].mxu1  ;;  %v7885_v31 = vadd.f32 %v7884_v41, %v6828_v7  ;;  %v7886_v29 = vpop.f32.mrb[207].mxu0  ;;  %v6865_v25 = vadd.f32 %v17135_v3, %v3201_v40 }
 0x582   : > { %v6890_v17 = vpop.f32.mrb[213].mxu1  ;;  %v3206_v7 = vpop.permute.xlu0 %3205 }
 0x583   : > { %v17168_v54 = vpop.f32.mrb[214].mxu1  ;;  %v11111_v43 = vpack.c.bf16 %v7885_v31, %v7882_v44  ;;  %v6868_v5 = vadd.f32 %v17141_v12, %v3206_v7 }
 0x584   : > { %v6893_v55 = vpop.f32.mrb[215].mxu1 }
 0x585   : > { %11351 = vst [vmem:[%s14945_s22 + $0x318] sm:$0xff] %v11111_v43  }
 0x586   : > { %v7889_v2 = vpop.f32.mrb[208].mxu0 }
 0x587   : > { %v7890_v49 = vadd.f32 %v7889_v2, %v6833_v9  ;;  %v7891_v8 = vpop.f32.mrb[209].mxu0 }
 0x588   : > { %v7892_v36 = vpop.f32.mrb[210].mxu0  ;;  %v3211_v8 = vpop.permute.xlu1 %3210 }
 0x589   : > { %v17172_v21 = vpop.f32.mrb[216].mxu1  ;;  %v7893_v51 = vadd.f32 %v7892_v36, %v6836_v38  ;;  %v7894_v39 = vpop.f32.mrb[211].mxu0  ;;  %v6873_v3 = vadd.f32 %v17148_v22, %v3211_v8 }
 0x58a   : > { %v6898_v1 = vpop.f32.mrb[217].mxu1  ;;  %v3216_v38 = vpop.permute.xlu0 %3215 }
 0x58b   : > { %v17175_v23 = vpop.f32.mrb[218].mxu1  ;;  %v11116_v14 = vpack.c.bf16 %v7893_v51, %v7890_v49  ;;  %v6876_v12 = vadd.f32 %v17154_v6, %v3216_v38 }
 0x58c   : > { %v6901_v63 = vpop.f32.mrb[219].mxu1 }
 0x58d   : > { %11352 = vst [vmem:[%s14945_s22 + $0x320] sm:$0xff] %v11116_v14  }
 0x58e   : > { %v7897_v13 = vpop.f32.mrb[212].mxu0 }
 0x58f   : > { %v7898_v19 = vadd.f32 %v7897_v13, %v6841_v32  ;;  %v7899_v15 = vpop.f32.mrb[213].mxu0 }
 0x590   : > { %v7900_v62 = vpop.f32.mrb[214].mxu0  ;;  %v3226_v15 = vpop.permute.xlu0 %3225 }
 0x591   : > { %v17179_v18 = vpop.f32.mrb[220].mxu1  ;;  %v7901_v45 = vadd.f32 %v7900_v62, %v6844_v24  ;;  %v7902_v53 = vpop.f32.mrb[215].mxu0  ;;  %v6884_v6 = vadd.f32 %v17161_v11, %v3226_v15 }
 0x592   : > { %v6906_v46 = vpop.f32.mrb[221].mxu1 }
 0x593   : > { %v17182_v58 = vpop.f32.mrb[222].mxu1  ;;  %v11121_v26 = vpack.c.bf16 %v7901_v45, %v7898_v19  ;;  %v3221_v46 = vpop.permute.xlu1 %3220 }
 0x594   : > { %v6909_v61 = vpop.f32.mrb[223].mxu1  ;;  %v6881_v22 = vadd.f32 %v17158_v35, %v3221_v46 }
 0x595   : > { %11353 = vst [vmem:[%s14945_s22 + $0x328] sm:$0xff] %v11121_v26  }
 0x596   : > { %v7905_v37 = vpop.f32.mrb[216].mxu0 }
 0x597   : > { %v7906_v42 = vadd.f32 %v7905_v37, %v6849_v34  ;;  %v7907_v28 = vpop.f32.mrb[217].mxu0 }
 0x598   : > { %v7908_v50 = vpop.f32.mrb[218].mxu0  ;;  %v3236_v28 = vpop.permute.xlu0 %3235 }
 0x599   : > { %v17186_v52 = vpop.f32.mrb[224].mxu1  ;;  %v7909_v10 = vadd.f32 %v7908_v50, %v6852_v48  ;;  %v7910_v44 = vpop.f32.mrb[219].mxu0  ;;  %v6892_v11 = vadd.f32 %v17168_v54, %v3236_v28 }
 0x59a   : > { %v6914_v33 = vpop.f32.mrb[225].mxu1 }
 0x59b   : > { %v17189_v30 = vpop.f32.mrb[226].mxu1  ;;  %v11126_v17 = vpack.c.bf16 %v7909_v10, %v7906_v42  ;;  %v3231_v33 = vpop.permute.xlu1 %3230 }
 0x59c   : > { %v6917_v16 = vpop.f32.mrb[227].mxu1  ;;  %v6889_v35 = vadd.f32 %v17165_v47, %v3231_v33 }
 0x59d   : > { %11354 = vst [vmem:[%s14945_s22 + $0x330] sm:$0xff] %v11126_v17  }
 0x59e   : > { %v7913_v31 = vpop.f32.mrb[220].mxu0 }
 0x59f   : > { %v7914_v55 = vadd.f32 %v7913_v31, %v6857_v60  ;;  %v7915_v43 = vpop.f32.mrb[221].mxu0 }
 0x5a0   : > { %v7916_v27 = vpop.f32.mrb[222].mxu0  ;;  %v3246_v43 = vpop.permute.xlu0 %3245 }
 0x5a1   : > { %v17193_v41 = vpop.f32.mrb[228].mxu1  ;;  %v7917_v9 = vadd.f32 %v7916_v27, %v6860_v20  ;;  %v7918_v49 = vpop.f32.mrb[223].mxu0  ;;  %v6900_v54 = vadd.f32 %v17175_v23, %v3246_v43 }
 0x5a2   : > { %v6922_v29 = vpop.f32.mrb[229].mxu1 }
 0x5a3   : > { %v17196_v0 = vpop.f32.mrb[230].mxu1  ;;  %v11131_v1 = vpack.c.bf16 %v7917_v9, %v7914_v55  ;;  %v3241_v29 = vpop.permute.xlu1 %3240 }
 0x5a4   : > { %v6925_v2 = vpop.f32.mrb[231].mxu1  ;;  %v6897_v47 = vadd.f32 %v17172_v21, %v3241_v29 }
 0x5a5   : > { %11355 = vst [vmem:[%s14945_s22 + $0x338] sm:$0xff] %v11131_v1  }
 0x5a6   : > { %v7921_v51 = vpop.f32.mrb[224].mxu0 }
 0x5a7   : > { %v7922_v63 = vadd.f32 %v7921_v51, %v6865_v25  ;;  %v7923_v14 = vpop.f32.mrb[225].mxu0 }
 0x5a8   : > { %v7924_v57 = vpop.f32.mrb[226].mxu0  ;;  %v3256_v14 = vpop.permute.xlu0 %3255 }
 0x5a9   : > { %v17200_v36 = vpop.f32.mrb[232].mxu1  ;;  %v7925_v32 = vadd.f32 %v7924_v57, %v6868_v5  ;;  %v7926_v24 = vpop.f32.mrb[227].mxu0  ;;  %v6908_v23 = vadd.f32 %v17182_v58, %v3256_v14 }
 0x5aa   : > { %v6930_v39 = vpop.f32.mrb[233].mxu1 }
 0x5ab   : > { %v17203_v4 = vpop.f32.mrb[234].mxu1  ;;  %v11136_v19 = vpack.c.bf16 %v7925_v32, %v7922_v63  ;;  %v3251_v39 = vpop.permute.xlu1 %3250 }
 0x5ac   : > { %v6933_v13 = vpop.f32.mrb[235].mxu1  ;;  %v6905_v21 = vadd.f32 %v17179_v18, %v3251_v39 }
 0x5ad   : > { %11356 = vst [vmem:[%s14945_s22 + $0x340] sm:$0xff] %v11136_v19  }
 0x5ae   : > { %v7929_v45 = vpop.f32.mrb[228].mxu0 }
 0x5af   : > { %v7930_v61 = vadd.f32 %v7929_v45, %v6873_v3  ;;  %v7931_v26 = vpop.f32.mrb[229].mxu0 }
 0x5b0   : > { %v7932_v59 = vpop.f32.mrb[230].mxu0  ;;  %v3266_v26 = vpop.permute.xlu0 %3265 }
 0x5b1   : > { %v17207_v62 = vpop.f32.mrb[236].mxu1  ;;  %v7933_v34 = vadd.f32 %v7932_v59, %v6876_v12  ;;  %v7934_v48 = vpop.f32.mrb[231].mxu0  ;;  %v6916_v58 = vadd.f32 %v17189_v30, %v3266_v26 }
 0x5b2   : > { %v6938_v53 = vpop.f32.mrb[237].mxu1 }
 0x5b3   : > { %v17210_v56 = vpop.f32.mrb[238].mxu1  ;;  %v11141_v42 = vpack.c.bf16 %v7933_v34, %v7930_v61  ;;  %v3261_v53 = vpop.permute.xlu1 %3260 }
 0x5b4   : > { %v6941_v37 = vpop.f32.mrb[239].mxu1  ;;  %v6913_v18 = vadd.f32 %v17186_v52, %v3261_v53 }
 0x5b5   : > { %11357 = vst [vmem:[%s14945_s22 + $0x348] sm:$0xff] %v11141_v42  }
 0x5b6   : > { %v7937_v10 = vpop.f32.mrb[232].mxu0 }
 0x5b7   : > { %v7938_v16 = vadd.f32 %v7937_v10, %v6881_v22  ;;  %v7939_v17 = vpop.f32.mrb[233].mxu0 }
 0x5b8   : > { %v7940_v7 = vpop.f32.mrb[234].mxu0  ;;  %v3276_v17 = vpop.permute.xlu0 %3275 }
 0x5b9   : > { %v17214_v50 = vpop.f32.mrb[240].mxu1  ;;  %v7941_v60 = vadd.f32 %v7940_v7, %v6884_v6  ;;  %v7942_v20 = vpop.f32.mrb[235].mxu0  ;;  %v6924_v30 = vadd.f32 %v17196_v0, %v3276_v17 }
 0x5ba   : > { %v6946_v44 = vpop.f32.mrb[241].mxu1 }
 0x5bb   : > { %v17217_v40 = vpop.f32.mrb[242].mxu1  ;;  %v11146_v55 = vpack.c.bf16 %v7941_v60, %v7938_v16  ;;  %v3271_v44 = vpop.permute.xlu1 %3270 }
 0x5bc   : > { %v6949_v31 = vpop.f32.mrb[243].mxu1  ;;  %v6921_v52 = vadd.f32 %v17193_v41, %v3271_v44 }
 0x5bd   : > { %11358 = vst [vmem:[%s14945_s22 + $0x350] sm:$0xff] %v11146_v55  }
 0x5be   : > { %v7945_v9 = vpop.f32.mrb[236].mxu0 }
 0x5bf   : > { %v7946_v2 = vadd.f32 %v7945_v9, %v6889_v35  ;;  %v7947_v1 = vpop.f32.mrb[237].mxu0 }
 0x5c0   : > { %v7948_v38 = vpop.f32.mrb[238].mxu0  ;;  %v3286_v1 = vpop.permute.xlu0 %3285 }
 0x5c1   : > { %v17221_v27 = vpop.f32.mrb[244].mxu1  ;;  %v7949_v25 = vadd.f32 %v7948_v38, %v6892_v11  ;;  %v7950_v5 = vpop.f32.mrb[239].mxu0  ;;  %v6932_v0 = vadd.f32 %v17203_v4, %v3286_v1 }
 0x5c2   : > { %v6954_v49 = vpop.f32.mrb[245].mxu1 }
 0x5c3   : > { %v17224_v8 = vpop.f32.mrb[246].mxu1  ;;  %v11151_v63 = vpack.c.bf16 %v7949_v25, %v7946_v2  ;;  %v3281_v49 = vpop.permute.xlu1 %3280 }
 0x5c4   : > { %v6957_v51 = vpop.f32.mrb[247].mxu1  ;;  %v6929_v41 = vadd.f32 %v17200_v36, %v3281_v49 }
 0x5c5   : > { %11359 = vst [vmem:[%s14945_s22 + $0x358] sm:$0xff] %v11151_v63  }
 0x5c6   : > { %v7953_v32 = vpop.f32.mrb[240].mxu0 }
 0x5c7   : > { %v7954_v13 = vadd.f32 %v7953_v32, %v6897_v47  ;;  %v7955_v19 = vpop.f32.mrb[241].mxu0 }
 0x5c8   : > { %v7956_v15 = vpop.f32.mrb[242].mxu0  ;;  %v3296_v19 = vpop.permute.xlu0 %3295 }
 0x5c9   : > { %v17228_v57 = vpop.f32.mrb[248].mxu1  ;;  %v7957_v3 = vadd.f32 %v7956_v15, %v6900_v54  ;;  %v7958_v12 = vpop.f32.mrb[243].mxu0  ;;  %v6940_v4 = vadd.f32 %v17210_v56, %v3296_v19 }
 0x5ca   : > { %v6962_v24 = vpop.f32.mrb[249].mxu1 }
 0x5cb   : > { %v17231_v46 = vpop.f32.mrb[250].mxu1  ;;  %v11156_v61 = vpack.c.bf16 %v7957_v3, %v7954_v13  ;;  %v3291_v24 = vpop.permute.xlu1 %3290 }
 0x5cc   : > { %v6965_v45 = vpop.f32.mrb[251].mxu1  ;;  %v6937_v36 = vadd.f32 %v17207_v62, %v3291_v24 }
 0x5cd   : > { %11360 = vst [vmem:[%s14945_s22 + $0x360] sm:$0xff] %v11156_v61  }
 0x5ce   : > { %v7961_v34 = vpop.f32.mrb[244].mxu0 }
 0x5cf   : > { %v7962_v37 = vadd.f32 %v7961_v34, %v6905_v21  ;;  %v7963_v42 = vpop.f32.mrb[245].mxu0 }
 0x5d0   : > { %v7964_v28 = vpop.f32.mrb[246].mxu0  ;;  %v3306_v42 = vpop.permute.xlu0 %3305 }
 0x5d1   : > { %v17235_v59 = vpop.f32.mrb[252].mxu1  ;;  %v7965_v22 = vadd.f32 %v7964_v28, %v6908_v23  ;;  %v7966_v6 = vpop.f32.mrb[247].mxu0  ;;  %v6948_v56 = vadd.f32 %v17217_v40, %v3306_v42 }
 0x5d2   : > { %v6970_v48 = vpop.f32.mrb[253].mxu1 }
 0x5d3   : > { %v17238_v33 = vpop.f32.mrb[254].mxu1  ;;  %v11161_v16 = vpack.c.bf16 %v7965_v22, %v7962_v37  ;;  %v3301_v48 = vpop.permute.xlu1 %3300 }
 0x5d4   : > { %v6973_v10 = vpop.f32.mrb[255].mxu1  ;;  %v6945_v62 = vadd.f32 %v17214_v50, %v3301_v48 }
 0x5d5   : > { %11361 = vst [vmem:[%s14945_s22 + $0x368] sm:$0xff] %v11161_v16  }
 0x5d6   : > { %v7969_v60 = vpop.f32.mrb[248].mxu0 }
 0x5d7   : > { %v7970_v31 = vadd.f32 %v7969_v60, %v6913_v18  ;;  %v7971_v55 = vpop.f32.mrb[249].mxu0 }
 0x5d8   : > { %v7972_v43 = vpop.f32.mrb[250].mxu0  ;;  %v3316_v55 = vpop.permute.xlu0 %3315 }
 0x5d9   : > { %v17242_v7 = vpop.f32.mrb[148].mxu1  ;;  %v7973_v35 = vadd.f32 %v7972_v43, %v6916_v58  ;;  %v7974_v11 = vpop.f32.mrb[251].mxu0 }
 0x5da   : > { %v6978_v20 = vpop.f32.mrb[149].mxu1 }
 0x5db   : > { %v17245_v29 = vpop.f32.mrb[150].mxu1  ;;  %v11166_v2 = vpack.c.bf16 %v7973_v35, %v7970_v31  ;;  %v3311_v20 = vpop.permute.xlu1 %3310 }
 0x5dc   : > { %v6981_v9 = vpop.f32.mrb[151].mxu1 }
 0x5dd   : > { %11362 = vst [vmem:[%s14945_s22 + $0x370] sm:$0xff] %v11166_v2  }
 0x5de   : > { %v7977_v25 = vpop.f32.mrb[252].mxu0 }
 0x5df   : > { %v7978_v51 = vadd.f32 %v7977_v25, %v6921_v52  ;;  %v7979_v63 = vpop.f32.mrb[253].mxu0 }
 0x5e0   : > { %v7980_v14 = vpop.f32.mrb[254].mxu0  ;;  %v6953_v63 = vadd.f32 %v17221_v27, %v3311_v20 }
 0x5e1   : > { %v17249_v38 = vpop.f32.mrb[152].mxu1  ;;  %v7981_v47 = vadd.f32 %v7980_v14, %v6924_v30  ;;  %v7982_v54 = vpop.f32.mrb[255].mxu0 }
 0x5e2   : > { %v6986_v5 = vpop.f32.mrb[153].mxu1 }
 0x5e3   : > { %v17252_v39 = vpop.f32.mrb[154].mxu1  ;;  %v11171_v13 = vpack.c.bf16 %v7981_v47, %v7978_v51  ;;  %v3321_v51 = vpop.permute.xlu1 %3320  ;;  %v6956_v47 = vadd.f32 %v17224_v8, %v3316_v55 }
 0x5e4   : > { %v6989_v32 = vpop.f32.mrb[155].mxu1  ;;  %v3326_v5 = vpop.permute.xlu0 %3325 }
 0x5e5   : > { %11363 = vst [vmem:[%s14945_s22 + $0x378] sm:$0xff] %v11171_v13   ;;  %v6964_v27 = vadd.f32 %v17231_v46, %v3326_v5 }
 0x5e6   : > { %v7985_v3 = vpop.f32.mrb[0].mxu0 }
 0x5e7   : > { %v7986_v45 = vadd.f32 %v7985_v3, %v6929_v41  ;;  %v7987_v61 = vpop.f32.mrb[1].mxu0  ;;  %v3331_v54 = vpop.permute.xlu1 %3330 }
 0x5e8   : > { %v7988_v26 = vpop.f32.mrb[2].mxu0  ;;  %v3336_v24 = vpop.permute.xlu0 %3335 }
 0x5e9   : > { %v17256_v15 = vpop.f32.mrb[156].mxu1  ;;  %v7989_v21 = vadd.f32 %v7988_v26, %v6932_v0  ;;  %v7990_v23 = vpop.f32.mrb[3].mxu0  ;;  %v6961_v0 = vadd.f32 %v17228_v57, %v3321_v51  ;;  %v6972_v57 = vadd.f32 %v17238_v33, %v3336_v24 }
 0x5ea   : > { %v6994_v12 = vpop.f32.mrb[157].mxu1 }
 0x5eb   : > { %v17259_v53 = vpop.f32.mrb[158].mxu1  ;;  %v11176_v37 = vpack.c.bf16 %v7989_v21, %v7986_v45  ;;  %v3341_v45 = vpop.permute.xlu1 %3340 }
 0x5ec   : > { %v6997_v34 = vpop.f32.mrb[159].mxu1  ;;  %v3346_v61 = vpop.permute.xlu0 %3345 }
 0x5ed   : > { %11364 = vst [vmem:[%s14945_s22 + $0x380] sm:$0xff] %v11176_v37   ;;  %v6980_v20 = vadd.f32 %v17245_v29, %v3346_v61 }
 0x5ee   : > { %v7993_v22 = vpop.f32.mrb[4].mxu0 }
 0x5ef   : > { %v7994_v10 = vadd.f32 %v7993_v22, %v6937_v36  ;;  %v7995_v16 = vpop.f32.mrb[5].mxu0  ;;  %v3351_v48 = vpop.permute.xlu1 %3350  ;;  %v6969_v36 = vadd.f32 %v17235_v59, %v3331_v54 }
 0x5f0   : > { %v7996_v17 = vpop.f32.mrb[6].mxu0  ;;  %v3356_v42 = vpop.permute.xlu0 %3355 }
 0x5f1   : > { %v17263_v28 = vpop.f32.mrb[160].mxu1  ;;  %v7997_v18 = vadd.f32 %v7996_v17, %v6940_v4  ;;  %v7998_v58 = vpop.f32.mrb[7].mxu0 }
 0x5f2   : > { %v7002_v6 = vpop.f32.mrb[161].mxu1  ;;  %v6977_v58 = vadd.f32 %v17242_v7, %v3341_v45  ;;  %v6988_v7 = vadd.f32 %v17252_v39, %v3356_v42 }
 0x5f3   : > { %v17266_v44 = vpop.f32.mrb[162].mxu1  ;;  %v11181_v31 = vpack.c.bf16 %v7997_v18, %v7994_v10  ;;  %v3361_v17 = vpop.permute.xlu1 %3360 }
 0x5f4   : > { %v7005_v60 = vpop.f32.mrb[163].mxu1  ;;  %v3366_v18 = vpop.permute.xlu0 %3365 }
 0x5f5   : > { %11365 = vst [vmem:[%s14945_s22 + $0x388] sm:$0xff] %v11181_v31  }
 0x5f6   : > { %v8001_v35 = vpop.f32.mrb[8].mxu0 }
 0x5f7   : > { %v8002_v9 = vadd.f32 %v8001_v35, %v6945_v62  ;;  %v8003_v2 = vpop.f32.mrb[9].mxu0  ;;  %v3371_v62 = vpop.permute.xlu1 %3370 }
 0x5f8   : > { %v8004_v1 = vpop.f32.mrb[10].mxu0  ;;  %v3376_v33 = vpop.permute.xlu0 %3375  ;;  %v6985_v2 = vadd.f32 %v17249_v38, %v3351_v48  ;;  %v6996_v38 = vadd.f32 %v17259_v53, %v3366_v18 }
 0x5f9   : > { %v17270_v43 = vpop.f32.mrb[164].mxu1  ;;  %v8005_v52 = vadd.f32 %v8004_v1, %v6948_v56  ;;  %v8006_v25 = vpop.f32.mrb[11].mxu0 }
 0x5fa   : > { %v7010_v11 = vpop.f32.mrb[165].mxu1 }
 0x5fb   : > { %v17273_v49 = vpop.f32.mrb[166].mxu1  ;;  %v11186_v50 = vpack.c.bf16 %v8005_v52, %v8002_v9  ;;  %v3381_v1 = vpop.permute.xlu1 %3380 }
 0x5fc   : > { %v7013_v30 = vpop.f32.mrb[167].mxu1  ;;  %v3386_v25 = vpop.permute.xlu0 %3385 }
 0x5fd   : > { %11366 = vst [vmem:[%s14945_s22 + $0x390] sm:$0xff] %v11186_v50  }
 0x5fe   : > { %v8009_v14 = vpop.f32.mrb[12].mxu0 }
 0x5ff   : > { %v8010_v40 = vadd.f32 %v8009_v14, %v6953_v63  ;;  %v8011_v32 = vpop.f32.mrb[13].mxu0  ;;  %v3391_v14 = vpop.permute.xlu1 %3390 }
 0x600   : > { %v8012_v13 = vpop.f32.mrb[14].mxu0 }
 0x601   : > { %v8013_v19 = vadd.f32 %v8012_v13, %v6956_v47  ;;  %v8014_v41 = vpop.f32.mrb[15].mxu0  ;;  %v3396_v47 = vpop.permute.xlu0 %3395 }
 0x603   : > { %v11191_v3 = vpack.c.bf16 %v8013_v19, %v8010_v40  ;;  %v6993_v40 = vadd.f32 %v17256_v15, %v3361_v17  ;;  %v3401_v15 = vpop.permute.xlu1 %3400 }
 0x605   : > { %11367 = vst [vmem:[%s14945_s22 + $0x398] sm:$0xff] %v11191_v3  }
 0x606   : > { %v8017_v12 = vpop.f32.mrb[16].mxu0 }
 0x607   : > { %v8018_v26 = vadd.f32 %v8017_v12, %v6961_v0  ;;  %v8019_v21 = vpop.f32.mrb[17].mxu0  ;;  %v3411_v17 = vpop.permute.xlu1 %3410 }
 0x608   : > { %v8020_v8 = vpop.f32.mrb[18].mxu0  ;;  %v3406_v21 = vpop.permute.xlu0 %3405 }
 0x609   : > { %v8021_v34 = vadd.f32 %v8020_v8, %v6964_v27  ;;  %v8022_v23 = vpop.f32.mrb[19].mxu0  ;;  %v7001_v8 = vadd.f32 %v17263_v28, %v3371_v62 }
 0x60a   : > { %v7004_v23 = vadd.f32 %v17266_v44, %v3376_v33 }
 0x60b   : > { %v11196_v37 = vpack.c.bf16 %v8021_v34, %v8018_v26 }
 0x60c   : > { %v3416_v18 = vpop.permute.xlu0 %3415 }
 0x60d   : > { %11368 = vst [vmem:[%s14945_s22 + $0x3a0] sm:$0xff] %v11196_v37  }
 0x60e   : > { %v8025_v22 = vpop.f32.mrb[20].mxu0 }
 0x60f   : > { %v8026_v4 = vadd.f32 %v8025_v22, %v6969_v36  ;;  %v8027_v10 = vpop.f32.mrb[21].mxu0 }
 0x610   : > { %v8028_v6 = vpop.f32.mrb[22].mxu0 }
 0x611   : > { %v8029_v16 = vadd.f32 %v8028_v6, %v6972_v57  ;;  %v8030_v46 = vpop.f32.mrb[23].mxu0 }
 0x613   : > { %v11201_v60 = vpack.c.bf16 %v8029_v16, %v8026_v4 }
 0x615   : > { %11369 = vst [vmem:[%s14945_s22 + $0x3a8] sm:$0xff] %v11201_v60   ;;  %v7009_v60 = vadd.f32 %v17270_v43, %v3381_v1 }
 0x616   : > { %v8033_v31 = vpop.f32.mrb[24].mxu0 }
 0x617   : > { %v8034_v59 = vadd.f32 %v8033_v31, %v6977_v58  ;;  %v8035_v55 = vpop.f32.mrb[25].mxu0  ;;  %v7012_v31 = vadd.f32 %v17273_v49, %v3386_v25 }
 0x618   : > { %v8036_v35 = vpop.f32.mrb[26].mxu0 }
 0x619   : > { %v8037_v56 = vadd.f32 %v8036_v35, %v6980_v20  ;;  %v8038_v9 = vpop.f32.mrb[27].mxu0 }
 0x61b   : > { %v11206_v11 = vpack.c.bf16 %v8037_v56, %v8034_v59 }
 0x61d   : > { %11370 = vst [vmem:[%s14945_s22 + $0x3b0] sm:$0xff] %v11206_v11  }
 0x61e   : > { %v8041_v52 = vpop.f32.mrb[28].mxu0 }
 0x61f   : > { %v8042_v30 = vadd.f32 %v8041_v52, %v6985_v2  ;;  %v8043_v51 = vpop.f32.mrb[29].mxu0 }
 0x620   : > { %v8044_v29 = vpop.f32.mrb[30].mxu0  ;;  %v3426_v51 = vpop.permute.xlu0 %3425 }
 0x621   : > { %v8045_v5 = vadd.f32 %v8044_v29, %v6988_v7  ;;  %v8046_v50 = vpop.f32.mrb[31].mxu0  ;;  %v3421_v7 = vpop.permute.xlu1 %3420 }
 0x623   : > { %v11211_v63 = vpack.c.bf16 %v8045_v5, %v8042_v30 }
 0x625   : > { %11371 = vst [vmem:[%s14945_s22 + $0x3b8] sm:$0xff] %v11211_v63  }
 0x626   : > { %v8049_v32 = vpop.f32.mrb[32].mxu0 }
 0x627   : > { %v8050_v13 = vadd.f32 %v8049_v32, %v6993_v40  ;;  %v8051_v24 = vpop.f32.mrb[33].mxu0  ;;  %v3436_v40 = vpop.permute.xlu0 %3435 }
 0x628   : > { %v8052_v19 = vpop.f32.mrb[34].mxu0 }
 0x629   : > { %v8073_v54 = vpop.f32.mrb[168].mxu1  ;;  %v8053_v0 = vadd.f32 %v8052_v19, %v6996_v38  ;;  %v8054_v12 = vpop.f32.mrb[35].mxu0 }
 0x62a   : > { %v8075_v39 = vpop.f32.mrb[169].mxu1  ;;  %v12009_v3 = vadd.f32 %v8073_v54, %v3391_v14  ;;  %v3431_v14 = vpop.permute.xlu1 %3430 }
 0x62b   : > { %v8076_v41 = vpop.f32.mrb[170].mxu1  ;;  %v11216_v27 = vpack.c.bf16 %v8053_v0, %v8050_v13 }
 0x62c   : > { %v12010_v45 = vadd.f32 %v8076_v41, %v3396_v47  ;;  %v8078_v61 = vpop.f32.mrb[171].mxu1 }
 0x62d   : > { %11372 = vst [vmem:[%s14945_s22 + $0x3c0] sm:$0xff] %v11216_v27  }
 0x62e   : > { %v11231_v26 = vpack.c.bf16 %v12010_v45, %v12009_v3  ;;  %v8057_v53 = vpop.f32.mrb[36].mxu0 }
 0x62f   : > { %v8058_v37 = vadd.f32 %v8057_v53, %v7001_v8  ;;  %v8059_v48 = vpop.f32.mrb[37].mxu0 }
 0x630   : > { %11375 = vst [vmem:[%s14945_s22 + $0x3d8] sm:$0xff] %v11231_v26   ;;  %v8060_v36 = vpop.f32.mrb[38].mxu0 }
 0x631   : > { %v8081_v34 = vpop.f32.mrb[172].mxu1  ;;  %v8061_v4 = vadd.f32 %v8060_v36, %v7004_v23  ;;  %v8062_v6 = vpop.f32.mrb[39].mxu0 }
 0x632   : > { %v8083_v42 = vpop.f32.mrb[173].mxu1  ;;  %v12011_v57 = vadd.f32 %v8081_v34, %v3401_v15 }
 0x633   : > { %v8084_v22 = vpop.f32.mrb[174].mxu1  ;;  %v11221_v46 = vpack.c.bf16 %v8061_v4, %v8058_v37 }
 0x634   : > { %v12012_v10 = vadd.f32 %v8084_v22, %v3406_v21  ;;  %v8086_v16 = vpop.f32.mrb[175].mxu1 }
 0x635   : > { %11373 = vst [vmem:[%s14945_s22 + $0x3c8] sm:$0xff] %v11221_v46  }
 0x636   : > { %v11236_v28 = vpack.c.bf16 %v12012_v10, %v12011_v57  ;;  %v8065_v44 = vpop.f32.mrb[40].mxu0 }
 0x637   : > { %v8066_v20 = vadd.f32 %v8065_v44, %v7009_v60  ;;  %v8067_v59 = vpop.f32.mrb[41].mxu0 }
 0x638   : > { %11376 = vst [vmem:[%s14945_s22 + $0x3e0] sm:$0xff] %v11236_v28   ;;  %v8068_v62 = vpop.f32.mrb[42].mxu0 }
 0x639   : > { %v8089_v58 = vpop.f32.mrb[176].mxu1  ;;  %v8069_v56 = vadd.f32 %v8068_v62, %v7012_v31  ;;  %v8070_v2 = vpop.f32.mrb[43].mxu0 }
 0x63a   : > { %v8091_v55 = vpop.f32.mrb[177].mxu1  ;;  %v12013_v33 = vadd.f32 %v8089_v58, %v3411_v17 }
 0x63b   : > { %v8092_v35 = vpop.f32.mrb[178].mxu1  ;;  %v11226_v43 = vpack.c.bf16 %v8069_v56, %v8066_v20 }
 0x63c   : > { %v12014_v9 = vadd.f32 %v8092_v35, %v3416_v18  ;;  %v8094_v11 = vpop.f32.mrb[179].mxu1 }
 0x63d   : > { %11374 = vst [vmem:[%s14945_s22 + $0x3d0] sm:$0xff] %v11226_v43  }
 0x63e   : > { %v11241_v1 = vpack.c.bf16 %v12014_v9, %v12013_v33 }
 0x640   : > { %11377 = vst [vmem:[%s14945_s22 + $0x3e8] sm:$0xff] %v11241_v1  }
 0x641   : > { %v8097_v52 = vpop.f32.mrb[180].mxu1 }
 0x642   : > { %v8099_v30 = vpop.f32.mrb[181].mxu1  ;;  %v12015_v25 = vadd.f32 %v8097_v52, %v3421_v7 }
 0x643   : > { %v8100_v49 = vpop.f32.mrb[182].mxu1 }
 0x644   : > { %v12016_v29 = vadd.f32 %v8100_v49, %v3426_v51  ;;  %v8102_v5 = vpop.f32.mrb[183].mxu1 }
 0x646   : > { %v11246_v50 = vpack.c.bf16 %v12016_v29, %v12015_v25 }
 0x648   : > { %11378 = vst [vmem:[%s14945_s22 + $0x3f0] sm:$0xff] %v11246_v50  }
 0x649   : > { %v8105_v63 = vpop.f32.mrb[184].mxu1 }
 0x64a   : > { %v8107_v47 = vpop.f32.mrb[185].mxu1  ;;  %v12017_v54 = vadd.f32 %v8105_v63, %v3431_v14 }
 0x64b   : > { %v8108_v32 = vpop.f32.mrb[186].mxu1 }
 0x64c   : > { %v12018_v38 = vadd.f32 %v8108_v32, %v3436_v40  ;;  %v8110_v13 = vpop.f32.mrb[187].mxu1 }
 0x64e   : > { %v11251_v24 = vpack.c.bf16 %v12018_v38, %v12017_v54 }
 0x650   : > { %11379 = vst [vmem:[%s14945_s22 + $0x3f8] sm:$0xff] %v11251_v24  }
 0x651 PF: > { %s16_s20 = sadd.s32 1, %s12890_s20   ;;  %s17543_s18 = smov %s12886_s19 }
 0x652   : > { %p13_p5 = scmp.ge.s32.totalorder %s16_s20, 4   ;;  %s17544_s19 = smov %s17546_s21 }
 0x654   :  { %15 = sbr.rel (!%p13_p5) target bundleno = 2 (0x2), region = 82 }

</bundles_post_ra>
